<compile_context>
chip_gen: v7x
topology: tpu7x:2x2x1
jax: 0.10.0
libtpu: 0.0.40
codegen_flags: <defaults>
</compile_context>

<pallas_src>
import math

import numpy as np
import jax
import jax.numpy as jnp
from jax.experimental import pallas as pl
from jax.experimental.pallas import tpu as pltpu

# Keep both the in-kernel MXU matmuls and the pure-JAX reference at full f32 precision
# so the correctness check below is meaningful.
jax.config.update("jax_default_matmul_precision", "highest")


# ----------------------------------------------------------------------------------
# Fused encoder kernel: transformer layers + ln_final + EOT pooling + text projection
# ----------------------------------------------------------------------------------
def make_encoder_kernel(B, L, D, H, n_layers):
    Dh = D // H
    scale = 1.0 / math.sqrt(Dh)

    def layer_norm(z, g, b):
        mu = jnp.mean(z, axis=-1, keepdims=True)
        var = jnp.mean(jnp.square(z - mu), axis=-1, keepdims=True)
        return (z - mu) * jax.lax.rsqrt(var + 1e-5) * g + b

    def kernel(x_ref, wqkv_ref, bqkv_ref, wo_ref, bo_ref,
               ln1g_ref, ln1b_ref, ln2g_ref, ln2b_ref,
               wfc_ref, bfc_ref, wpr_ref, bpr_ref,
               lnfg_ref, lnfb_ref, proj_ref, sel_ref, out_ref):
        f32 = jnp.float32
        x = x_ref[...]                                           # (B*L, D)

        # causal mask, shared by every batch / head / layer
        row = jax.lax.broadcasted_iota(jnp.int32, (L, L), 0)
        col = jax.lax.broadcasted_iota(jnp.int32, (L, L), 1)
        causal = col <= row

        for l in range(n_layers):                                # static unroll (small)
            # ---- LN1 + fused QKV projection: one MXU matmul over all B*L tokens ----
            xn = layer_norm(x, ln1g_ref[l], ln1b_ref[l])
            qkv = jnp.dot(xn, wqkv_ref[l], preferred_element_type=f32) + bqkv_ref[l]

            # ---- multi-head causal self-attention (per (batch, head), unrolled) ----
            batch_rows = []
            for b in range(B):
                r0 = b * L
                heads = []
                for h in range(H):
                    c0 = h * Dh
                    qh = qkv[r0:r0 + L, c0:c0 + Dh]
                    kh = qkv[r0:r0 + L, D + c0:D + c0 + Dh]
                    vh = qkv[r0:r0 + L, 2 * D + c0:2 * D + c0 + Dh]
                    s = jnp.dot(qh, kh.T, preferred_element_type=f32) * scale
                    s = jnp.where(causal, s, -jnp.inf)
                    m = jnp.max(s, axis=-1, keepdims=True)
                    e = jnp.exp(s - m)
                    p = e * pl.reciprocal(jnp.sum(e, axis=-1, keepdims=True), approx=True)
                    heads.append(jnp.dot(p, vh, preferred_element_type=f32))
                batch_rows.append(jnp.concatenate(heads, axis=-1))
            attn = jnp.concatenate(batch_rows, axis=0)           # (B*L, D)

            x = x + jnp.dot(attn, wo_ref[l], preferred_element_type=f32) + bo_ref[l]

            # ---- LN2 + MLP (Linear -> QuickGELU -> Linear), big MXU matmuls ----
            xn2 = layer_norm(x, ln2g_ref[l], ln2b_ref[l])
            hdn = jnp.dot(xn2, wfc_ref[l], preferred_element_type=f32) + bfc_ref[l]
            hdn = hdn * (1.0 / (1.0 + jnp.exp(-1.702 * hdn)))    # QuickGELU
            x = x + jnp.dot(hdn, wpr_ref[l], preferred_element_type=f32) + bpr_ref[l]

        # ---- EOT pooling (one-hot matmul gather) + ln_final + text projection ----
        pooled = jnp.dot(sel_ref[...], x, preferred_element_type=f32)     # (B, D)
        pooled = layer_norm(pooled, lnfg_ref[...], lnfb_ref[...])
        out_ref[...] = jnp.dot(pooled, proj_ref[...], preferred_element_type=f32)

    return kernel


# ----------------------------------------------------------------------------------
# Host wrapper: embedding lookup (glue), weight layout prep, single pallas_call.
# ----------------------------------------------------------------------------------
def clip_text_encoder_forward(text, p, *, heads, n_layers):
    B, L = text.shape
    D = p["tok_emb"].shape[1]
    E = p["proj"].shape[1]

    # token embedding lookup + positional embedding
    # TODO(synk): move the embedding gather in-kernel (scalar-prefetch DMA) for real vocab sizes.
    x = jnp.take(p["tok_emb"], text, axis=0) + p["pos_emb"][None]        # (B, L, D)
    x2 = x.reshape(B * L, D).astype(jnp.float32)

    # one-hot selection matrix for the EOT tokens (argmax itself is scalar host glue)
    eot = jnp.argmax(text, axis=-1)
    sel = jax.nn.one_hot(jnp.arange(B) * L + eot, B * L, dtype=jnp.float32)   # (B, B*L)

    # pre-transposed weights so every in-kernel matmul is a plain row-major jnp.dot
    wqkvT = jnp.swapaxes(p["Wqkv"], 1, 2)            # (layers, D, 3D)
    woT = jnp.swapaxes(p["Wo"], 1, 2)                # (layers, D, D)
    wfcT = jnp.swapaxes(p["Wfc"], 1, 2)              # (layers, D, 4D)
    wprT = jnp.swapaxes(p["Wpr"], 1, 2)              # (layers, 4D, D)

    nl = n_layers
    args = (
        x2,
        wqkvT, p["bqkv"].reshape(nl, 1, 3 * D),
        woT, p["bo"].reshape(nl, 1, D),
        p["ln1_g"].reshape(nl, 1, D), p["ln1_b"].reshape(nl, 1, D),
        p["ln2_g"].reshape(nl, 1, D), p["ln2_b"].reshape(nl, 1, D),
        wfcT, p["bfc"].reshape(nl, 1, 4 * D),
        wprT, p["bpr"].reshape(nl, 1, D),
        p["lnf_g"].reshape(1, D), p["lnf_b"].reshape(1, D),
        p["proj"],
        sel,
    )

    def full(shape):
        return pl.BlockSpec(shape, lambda *_: (0,) * len(shape))

    kernel = make_encoder_kernel(B, L, D, heads, n_layers)
    return pl.pallas_call(
        kernel,
        out_shape=jax.ShapeDtypeStruct((B, E), jnp.float32),
        grid=(1,),
        in_specs=[full(a.shape) for a in args],
        out_specs=full((B, E)),
        compiler_params=pltpu.CompilerParams(dimension_semantics=("arbitrary",)),
    )(*args)


# ----------------------------------------------------------------------------------
# Pure-JAX reference mirroring the PyTorch forward (for verification).
# ----------------------------------------------------------------------------------
def ref_forward(text, p, *, heads, n_layers):
    B, L = text.shape
    D = p["tok_emb"].shape[1]
    Dh = D // heads

    def ln(z, g, b):
        mu = z.mean(-1, keepdims=True)
        var = ((z - mu) ** 2).mean(-1, keepdims=True)
        return (z - mu) * jax.lax.rsqrt(var + 1e-5) * g + b

    x = p["tok_emb"][text] + p["pos_emb"][None]                          # (B, L, D)
    mask = jnp.where(jnp.tril(jnp.ones((L, L), bool)), 0.0, -jnp.inf)    # causal
    for l in range(n_layers):
        xn = ln(x, p["ln1_g"][l], p["ln1_b"][l])
        qkv = xn @ p["Wqkv"][l].T + p["bqkv"][l]
        q, k, v = jnp.split(qkv, 3, axis=-1)
        q = q.reshape(B, L, heads, Dh).transpose(0, 2, 1, 3)
        k = k.reshape(B, L, heads, Dh).transpose(0, 2, 1, 3)
        v = v.reshape(B, L, heads, Dh).transpose(0, 2, 1, 3)
        s = jnp.einsum("bhqd,bhkd->bhqk", q, k) / np.sqrt(Dh) + mask
        a = jax.nn.softmax(s, axis=-1)
        o = jnp.einsum("bhqk,bhkd->bhqd", a, v).transpose(0, 2, 1, 3).reshape(B, L, D)
        x = x + o @ p["Wo"][l].T + p["bo"][l]
        xn2 = ln(x, p["ln2_g"][l], p["ln2_b"][l])
        h1 = xn2 @ p["Wfc"][l].T + p["bfc"][l]
        h1 = h1 * jax.nn.sigmoid(1.702 * h1)
        x = x + h1 @ p["Wpr"][l].T + p["bpr"][l]
    xf = ln(x, p["lnf_g"], p["lnf_b"])
    eot = jnp.argmax(text, axis=-1)
    return xf[jnp.arange(B), eot] @ p["proj"]


if __name__ == "__main__":
    # small config consistent with the module (context_length, width, heads, layers, embed_dim)
    B, L = 2, 16          # batch, context_length
    V = 64                # vocab_size (small for the test)
    D = 64                # transformer_width
    heads = 4
    n_layers = 2
    E = 128               # embed_dim (lane-dense output)

    key = jax.random.PRNGKey(0)
    keys = jax.random.split(key, 18)
    s = 0.05
    p = {
        "tok_emb": jax.random.normal(keys[0], (V, D), jnp.float32) * 0.1,
        "pos_emb": jax.random.normal(keys[1], (L, D), jnp.float32) * 0.02,
        "Wqkv": jax.random.normal(keys[2], (n_layers, 3 * D, D), jnp.float32) * s,
        "bqkv": jax.random.normal(keys[3], (n_layers, 3 * D), jnp.float32) * s,
        "Wo": jax.random.normal(keys[4], (n_layers, D, D), jnp.float32) * s,
        "bo": jax.random.normal(keys[5], (n_layers, D), jnp.float32) * s,
        "ln1_g": 1.0 + jax.random.normal(keys[6], (n_layers, D), jnp.float32) * s,
        "ln1_b": jax.random.normal(keys[7], (n_layers, D), jnp.float32) * s,
        "ln2_g": 1.0 + jax.random.normal(keys[8], (n_layers, D), jnp.float32) * s,
        "ln2_b": jax.random.normal(keys[9], (n_layers, D), jnp.float32) * s,
        "Wfc": jax.random.normal(keys[10], (n_layers, 4 * D, D), jnp.float32) * s,
        "bfc": jax.random.normal(keys[11], (n_layers, 4 * D), jnp.float32) * s,
        "Wpr": jax.random.normal(keys[12], (n_layers, D, 4 * D), jnp.float32) * s,
        "bpr": jax.random.normal(keys[13], (n_layers, D), jnp.float32) * s,
        "lnf_g": 1.0 + jax.random.normal(keys[14], (D,), jnp.float32) * s,
        "lnf_b": jax.random.normal(keys[15], (D,), jnp.float32) * s,
        "proj": jax.random.normal(keys[16], (D, E), jnp.float32) * (D ** -0.5),
    }
    text = jax.random.randint(keys[17], (B, L), 1, V, dtype=jnp.int32)

    out = jax.block_until_ready(
        clip_text_encoder_forward(text, p, heads=heads, n_layers=n_layers))
    ref = jax.block_until_ready(ref_forward(text, p, heads=heads, n_layers=n_layers))

    # tolerance accounts for the approx (EUP) reciprocal in the softmax; everything else is f32
    np.testing.assert_allclose(np.asarray(out), np.asarray(ref), rtol=5e-3, atol=5e-3)

    print("KERNEL_OK")
</pallas_src>

<mosaic_0001>
module attributes {stable_mosaic.version = 11 : i64} {
  func.func @kernel(%arg0: i32, %arg1: memref<32x64xf32, #tpu.memory_space<vmem>>, %arg2: memref<2x64x192xf32, #tpu.memory_space<vmem>>, %arg3: memref<2x1x192xf32, #tpu.memory_space<vmem>>, %arg4: memref<2x64x64xf32, #tpu.memory_space<vmem>>, %arg5: memref<2x1x64xf32, #tpu.memory_space<vmem>>, %arg6: memref<2x1x64xf32, #tpu.memory_space<vmem>>, %arg7: memref<2x1x64xf32, #tpu.memory_space<vmem>>, %arg8: memref<2x1x64xf32, #tpu.memory_space<vmem>>, %arg9: memref<2x1x64xf32, #tpu.memory_space<vmem>>, %arg10: memref<2x64x256xf32, #tpu.memory_space<vmem>>, %arg11: memref<2x1x256xf32, #tpu.memory_space<vmem>>, %arg12: memref<2x256x64xf32, #tpu.memory_space<vmem>>, %arg13: memref<2x1x64xf32, #tpu.memory_space<vmem>>, %arg14: memref<1x64xf32, #tpu.memory_space<vmem>>, %arg15: memref<1x64xf32, #tpu.memory_space<vmem>>, %arg16: memref<64x128xf32, #tpu.memory_space<vmem>>, %arg17: memref<2x32xf32, #tpu.memory_space<vmem>>, %arg18: memref<2x128xf32, #tpu.memory_space<vmem>>) attributes {dimension_semantics = [#tpu.dimension_semantics<arbitrary>], iteration_bounds = array<i64: 1>, scalar_prefetch = 0 : i64, scratch_operands = 0 : i64, tpu.core_type = #tpu.core_type<tc>, window_params = [{pipeline_mode = #tpu.pipeline_mode<synchronous>, transform_indices = @transform_0, window_bounds = array<i64: 32, 64>}, {pipeline_mode = #tpu.pipeline_mode<synchronous>, transform_indices = @transform_1, window_bounds = array<i64: 2, 64, 192>}, {pipeline_mode = #tpu.pipeline_mode<synchronous>, transform_indices = @transform_2, window_bounds = array<i64: 2, 1, 192>}, {pipeline_mode = #tpu.pipeline_mode<synchronous>, transform_indices = @transform_3, window_bounds = array<i64: 2, 64, 64>}, {pipeline_mode = #tpu.pipeline_mode<synchronous>, transform_indices = @transform_4, window_bounds = array<i64: 2, 1, 64>}, {pipeline_mode = #tpu.pipeline_mode<synchronous>, transform_indices = @transform_5, window_bounds = array<i64: 2, 1, 64>}, {pipeline_mode = #tpu.pipeline_mode<synchronous>, transform_indices = @transform_6, window_bounds = array<i64: 2, 1, 64>}, {pipeline_mode = #tpu.pipeline_mode<synchronous>, transform_indices = @transform_7, window_bounds = array<i64: 2, 1, 64>}, {pipeline_mode = #tpu.pipeline_mode<synchronous>, transform_indices = @transform_8, window_bounds = array<i64: 2, 1, 64>}, {pipeline_mode = #tpu.pipeline_mode<synchronous>, transform_indices = @transform_9, window_bounds = array<i64: 2, 64, 256>}, {pipeline_mode = #tpu.pipeline_mode<synchronous>, transform_indices = @transform_10, window_bounds = array<i64: 2, 1, 256>}, {pipeline_mode = #tpu.pipeline_mode<synchronous>, transform_indices = @transform_11, window_bounds = array<i64: 2, 256, 64>}, {pipeline_mode = #tpu.pipeline_mode<synchronous>, transform_indices = @transform_12, window_bounds = array<i64: 2, 1, 64>}, {pipeline_mode = #tpu.pipeline_mode<synchronous>, transform_indices = @transform_13, window_bounds = array<i64: 1, 64>}, {pipeline_mode = #tpu.pipeline_mode<synchronous>, transform_indices = @transform_14, window_bounds = array<i64: 1, 64>}, {pipeline_mode = #tpu.pipeline_mode<synchronous>, transform_indices = @transform_15, window_bounds = array<i64: 64, 128>}, {pipeline_mode = #tpu.pipeline_mode<synchronous>, transform_indices = @transform_16, window_bounds = array<i64: 2, 32>}, {pipeline_mode = #tpu.pipeline_mode<synchronous>, transform_indices = @transform_17, window_bounds = array<i64: 2, 128>}]} {
    %c0 = arith.constant 0 : index
    %c0_0 = arith.constant 0 : index
    %0 = vector.load %arg1[%c0, %c0_0] : memref<32x64xf32, #tpu.memory_space<vmem>>, vector<32x64xf32>
    %1 = tpu.iota {dimensions = array<i32: 0>} : vector<16x16xi32>
    %2 = tpu.iota {dimensions = array<i32: 1>} : vector<16x16xi32>
    %3 = arith.cmpi sle, %2, %1 : vector<16x16xi32>
    %c0_1 = arith.constant 0 : index
    %c0_2 = arith.constant 0 : index
    %c0_3 = arith.constant 0 : index
    %4 = vector.load %arg6[%c0_1, %c0_2, %c0_3] : memref<2x1x64xf32, #tpu.memory_space<vmem>>, vector<1x1x64xf32>
    %5 = vector.shape_cast %4 : vector<1x1x64xf32> to vector<1x64xf32>
    %c0_4 = arith.constant 0 : index
    %c0_5 = arith.constant 0 : index
    %c0_6 = arith.constant 0 : index
    %6 = vector.load %arg7[%c0_4, %c0_5, %c0_6] : memref<2x1x64xf32, #tpu.memory_space<vmem>>, vector<1x1x64xf32>
    %7 = vector.shape_cast %6 : vector<1x1x64xf32> to vector<1x64xf32>
    %cst = arith.constant dense<0.000000e+00> : vector<32xf32>
    %8 = vector.multi_reduction <add>, %0, %cst [1] : vector<32x64xf32> to vector<32xf32>
    %9 = vector.shape_cast %8 : vector<32xf32> to vector<32x1xf32>
    %cst_7 = arith.constant 6.400000e+01 : f32
    %10 = vector.broadcast %cst_7 : f32 to vector<32x1xf32>
    %11 = arith.divf %9, %10 : vector<32x1xf32>
    %12 = vector.broadcast %11 : vector<32x1xf32> to vector<32x64xf32>
    %13 = arith.subf %0, %12 : vector<32x64xf32>
    %14 = arith.mulf %13, %13 : vector<32x64xf32>
    %cst_8 = arith.constant dense<0.000000e+00> : vector<32xf32>
    %15 = vector.multi_reduction <add>, %14, %cst_8 [1] : vector<32x64xf32> to vector<32xf32>
    %16 = vector.shape_cast %15 : vector<32xf32> to vector<32x1xf32>
    %cst_9 = arith.constant 6.400000e+01 : f32
    %17 = vector.broadcast %cst_9 : f32 to vector<32x1xf32>
    %18 = arith.divf %16, %17 : vector<32x1xf32>
    %19 = vector.broadcast %11 : vector<32x1xf32> to vector<32x64xf32>
    %20 = arith.subf %0, %19 : vector<32x64xf32>
    %cst_10 = arith.constant 9.99999974E-6 : f32
    %21 = vector.broadcast %cst_10 : f32 to vector<32x1xf32>
    %22 = arith.addf %18, %21 : vector<32x1xf32>
    %23 = math.rsqrt %22 : vector<32x1xf32>
    %24 = vector.broadcast %23 : vector<32x1xf32> to vector<32x64xf32>
    %25 = arith.mulf %20, %24 : vector<32x64xf32>
    %26 = vector.broadcast %5 : vector<1x64xf32> to vector<32x64xf32>
    %27 = arith.mulf %25, %26 : vector<32x64xf32>
    %28 = vector.broadcast %7 : vector<1x64xf32> to vector<32x64xf32>
    %29 = arith.addf %27, %28 : vector<32x64xf32>
    %c0_11 = arith.constant 0 : index
    %c0_12 = arith.constant 0 : index
    %c0_13 = arith.constant 0 : index
    %30 = vector.load %arg2[%c0_11, %c0_12, %c0_13] : memref<2x64x192xf32, #tpu.memory_space<vmem>>, vector<1x64x192xf32>
    %31 = vector.shape_cast %30 : vector<1x64x192xf32> to vector<64x192xf32>
    %cst_14 = arith.constant dense<0.000000e+00> : vector<32x192xf32>
    %32 = tpu.matmul %29, %31, %cst_14 {dimension_numbers = #tpu.dot_dimension_numbers<[1], [0], [0], [1], [0, 0, 1, 1], [], []>, precision = #tpu.contract_precision<fp32>} : vector<32x64xf32>, vector<64x192xf32>, vector<32x192xf32> -> vector<32x192xf32>
    %c0_15 = arith.constant 0 : index
    %c0_16 = arith.constant 0 : index
    %c0_17 = arith.constant 0 : index
    %33 = vector.load %arg3[%c0_15, %c0_16, %c0_17] : memref<2x1x192xf32, #tpu.memory_space<vmem>>, vector<1x1x192xf32>
    %34 = vector.shape_cast %33 : vector<1x1x192xf32> to vector<1x192xf32>
    %35 = vector.broadcast %34 : vector<1x192xf32> to vector<32x192xf32>
    %36 = arith.addf %32, %35 : vector<32x192xf32>
    %37 = vector.extract_strided_slice %36 {offsets = [0, 0], sizes = [16, 16], strides = [1, 1]} : vector<32x192xf32> to vector<16x16xf32>
    %38 = vector.extract_strided_slice %36 {offsets = [0, 64], sizes = [16, 16], strides = [1, 1]} : vector<32x192xf32> to vector<16x16xf32>
    %39 = vector.extract_strided_slice %36 {offsets = [0, 128], sizes = [16, 16], strides = [1, 1]} : vector<32x192xf32> to vector<16x16xf32>
    %40 = tpu.transpose %38, [1, 0] : vector<16x16xf32> -> vector<16x16xf32>
    %cst_18 = arith.constant dense<0.000000e+00> : vector<16x16xf32>
    %41 = tpu.matmul %37, %40, %cst_18 {dimension_numbers = #tpu.dot_dimension_numbers<[1], [0], [0], [1], [0, 0, 1, 1], [], []>, precision = #tpu.contract_precision<fp32>} : vector<16x16xf32>, vector<16x16xf32>, vector<16x16xf32> -> vector<16x16xf32>
    %cst_19 = arith.constant 2.500000e-01 : f32
    %42 = vector.broadcast %cst_19 : f32 to vector<16x16xf32>
    %43 = arith.mulf %41, %42 : vector<16x16xf32>
    %cst_20 = arith.constant 0xFF800000 : f32
    %44 = vector.broadcast %cst_20 : f32 to vector<16x16xf32>
    %45 = arith.select %3, %43, %44 : vector<16x16xi1>, vector<16x16xf32>
    %cst_21 = arith.constant dense<0xFF800000> : vector<16xf32>
    %46 = vector.multi_reduction <maximumf>, %45, %cst_21 [1] : vector<16x16xf32> to vector<16xf32>
    %47 = vector.shape_cast %46 : vector<16xf32> to vector<16x1xf32>
    %48 = vector.broadcast %47 : vector<16x1xf32> to vector<16x16xf32>
    %49 = arith.subf %45, %48 : vector<16x16xf32>
    %50 = math.exp %49 : vector<16x16xf32>
    %cst_22 = arith.constant dense<0.000000e+00> : vector<16xf32>
    %51 = vector.multi_reduction <add>, %50, %cst_22 [1] : vector<16x16xf32> to vector<16xf32>
    %52 = vector.shape_cast %51 : vector<16xf32> to vector<16x1xf32>
    %53 = tpu.reciprocal %52 {approx = true} : vector<16x1xf32> -> vector<16x1xf32>
    %54 = vector.broadcast %53 : vector<16x1xf32> to vector<16x16xf32>
    %55 = arith.mulf %50, %54 : vector<16x16xf32>
    %cst_23 = arith.constant dense<0.000000e+00> : vector<16x16xf32>
    %56 = tpu.matmul %55, %39, %cst_23 {dimension_numbers = #tpu.dot_dimension_numbers<[1], [0], [0], [1], [0, 0, 1, 1], [], []>, precision = #tpu.contract_precision<fp32>} : vector<16x16xf32>, vector<16x16xf32>, vector<16x16xf32> -> vector<16x16xf32>
    %57 = vector.extract_strided_slice %36 {offsets = [0, 16], sizes = [16, 16], strides = [1, 1]} : vector<32x192xf32> to vector<16x16xf32>
    %58 = vector.extract_strided_slice %36 {offsets = [0, 80], sizes = [16, 16], strides = [1, 1]} : vector<32x192xf32> to vector<16x16xf32>
    %59 = vector.extract_strided_slice %36 {offsets = [0, 144], sizes = [16, 16], strides = [1, 1]} : vector<32x192xf32> to vector<16x16xf32>
    %60 = tpu.transpose %58, [1, 0] : vector<16x16xf32> -> vector<16x16xf32>
    %cst_24 = arith.constant dense<0.000000e+00> : vector<16x16xf32>
    %61 = tpu.matmul %57, %60, %cst_24 {dimension_numbers = #tpu.dot_dimension_numbers<[1], [0], [0], [1], [0, 0, 1, 1], [], []>, precision = #tpu.contract_precision<fp32>} : vector<16x16xf32>, vector<16x16xf32>, vector<16x16xf32> -> vector<16x16xf32>
    %cst_25 = arith.constant 2.500000e-01 : f32
    %62 = vector.broadcast %cst_25 : f32 to vector<16x16xf32>
    %63 = arith.mulf %61, %62 : vector<16x16xf32>
    %cst_26 = arith.constant 0xFF800000 : f32
    %64 = vector.broadcast %cst_26 : f32 to vector<16x16xf32>
    %65 = arith.select %3, %63, %64 : vector<16x16xi1>, vector<16x16xf32>
    %cst_27 = arith.constant dense<0xFF800000> : vector<16xf32>
    %66 = vector.multi_reduction <maximumf>, %65, %cst_27 [1] : vector<16x16xf32> to vector<16xf32>
    %67 = vector.shape_cast %66 : vector<16xf32> to vector<16x1xf32>
    %68 = vector.broadcast %67 : vector<16x1xf32> to vector<16x16xf32>
    %69 = arith.subf %65, %68 : vector<16x16xf32>
    %70 = math.exp %69 : vector<16x16xf32>
    %cst_28 = arith.constant dense<0.000000e+00> : vector<16xf32>
    %71 = vector.multi_reduction <add>, %70, %cst_28 [1] : vector<16x16xf32> to vector<16xf32>
    %72 = vector.shape_cast %71 : vector<16xf32> to vector<16x1xf32>
    %73 = tpu.reciprocal %72 {approx = true} : vector<16x1xf32> -> vector<16x1xf32>
    %74 = vector.broadcast %73 : vector<16x1xf32> to vector<16x16xf32>
    %75 = arith.mulf %70, %74 : vector<16x16xf32>
    %cst_29 = arith.constant dense<0.000000e+00> : vector<16x16xf32>
    %76 = tpu.matmul %75, %59, %cst_29 {dimension_numbers = #tpu.dot_dimension_numbers<[1], [0], [0], [1], [0, 0, 1, 1], [], []>, precision = #tpu.contract_precision<fp32>} : vector<16x16xf32>, vector<16x16xf32>, vector<16x16xf32> -> vector<16x16xf32>
    %77 = vector.extract_strided_slice %36 {offsets = [0, 32], sizes = [16, 16], strides = [1, 1]} : vector<32x192xf32> to vector<16x16xf32>
    %78 = vector.extract_strided_slice %36 {offsets = [0, 96], sizes = [16, 16], strides = [1, 1]} : vector<32x192xf32> to vector<16x16xf32>
    %79 = vector.extract_strided_slice %36 {offsets = [0, 160], sizes = [16, 16], strides = [1, 1]} : vector<32x192xf32> to vector<16x16xf32>
    %80 = tpu.transpose %78, [1, 0] : vector<16x16xf32> -> vector<16x16xf32>
    %cst_30 = arith.constant dense<0.000000e+00> : vector<16x16xf32>
    %81 = tpu.matmul %77, %80, %cst_30 {dimension_numbers = #tpu.dot_dimension_numbers<[1], [0], [0], [1], [0, 0, 1, 1], [], []>, precision = #tpu.contract_precision<fp32>} : vector<16x16xf32>, vector<16x16xf32>, vector<16x16xf32> -> vector<16x16xf32>
    %cst_31 = arith.constant 2.500000e-01 : f32
    %82 = vector.broadcast %cst_31 : f32 to vector<16x16xf32>
    %83 = arith.mulf %81, %82 : vector<16x16xf32>
    %cst_32 = arith.constant 0xFF800000 : f32
    %84 = vector.broadcast %cst_32 : f32 to vector<16x16xf32>
    %85 = arith.select %3, %83, %84 : vector<16x16xi1>, vector<16x16xf32>
    %cst_33 = arith.constant dense<0xFF800000> : vector<16xf32>
    %86 = vector.multi_reduction <maximumf>, %85, %cst_33 [1] : vector<16x16xf32> to vector<16xf32>
    %87 = vector.shape_cast %86 : vector<16xf32> to vector<16x1xf32>
    %88 = vector.broadcast %87 : vector<16x1xf32> to vector<16x16xf32>
    %89 = arith.subf %85, %88 : vector<16x16xf32>
    %90 = math.exp %89 : vector<16x16xf32>
    %cst_34 = arith.constant dense<0.000000e+00> : vector<16xf32>
    %91 = vector.multi_reduction <add>, %90, %cst_34 [1] : vector<16x16xf32> to vector<16xf32>
    %92 = vector.shape_cast %91 : vector<16xf32> to vector<16x1xf32>
    %93 = tpu.reciprocal %92 {approx = true} : vector<16x1xf32> -> vector<16x1xf32>
    %94 = vector.broadcast %93 : vector<16x1xf32> to vector<16x16xf32>
    %95 = arith.mulf %90, %94 : vector<16x16xf32>
    %cst_35 = arith.constant dense<0.000000e+00> : vector<16x16xf32>
    %96 = tpu.matmul %95, %79, %cst_35 {dimension_numbers = #tpu.dot_dimension_numbers<[1], [0], [0], [1], [0, 0, 1, 1], [], []>, precision = #tpu.contract_precision<fp32>} : vector<16x16xf32>, vector<16x16xf32>, vector<16x16xf32> -> vector<16x16xf32>
    %97 = vector.extract_strided_slice %36 {offsets = [0, 48], sizes = [16, 16], strides = [1, 1]} : vector<32x192xf32> to vector<16x16xf32>
    %98 = vector.extract_strided_slice %36 {offsets = [0, 112], sizes = [16, 16], strides = [1, 1]} : vector<32x192xf32> to vector<16x16xf32>
    %99 = vector.extract_strided_slice %36 {offsets = [0, 176], sizes = [16, 16], strides = [1, 1]} : vector<32x192xf32> to vector<16x16xf32>
    %100 = tpu.transpose %98, [1, 0] : vector<16x16xf32> -> vector<16x16xf32>
    %cst_36 = arith.constant dense<0.000000e+00> : vector<16x16xf32>
    %101 = tpu.matmul %97, %100, %cst_36 {dimension_numbers = #tpu.dot_dimension_numbers<[1], [0], [0], [1], [0, 0, 1, 1], [], []>, precision = #tpu.contract_precision<fp32>} : vector<16x16xf32>, vector<16x16xf32>, vector<16x16xf32> -> vector<16x16xf32>
    %cst_37 = arith.constant 2.500000e-01 : f32
    %102 = vector.broadcast %cst_37 : f32 to vector<16x16xf32>
    %103 = arith.mulf %101, %102 : vector<16x16xf32>
    %cst_38 = arith.constant 0xFF800000 : f32
    %104 = vector.broadcast %cst_38 : f32 to vector<16x16xf32>
    %105 = arith.select %3, %103, %104 : vector<16x16xi1>, vector<16x16xf32>
    %cst_39 = arith.constant dense<0xFF800000> : vector<16xf32>
    %106 = vector.multi_reduction <maximumf>, %105, %cst_39 [1] : vector<16x16xf32> to vector<16xf32>
    %107 = vector.shape_cast %106 : vector<16xf32> to vector<16x1xf32>
    %108 = vector.broadcast %107 : vector<16x1xf32> to vector<16x16xf32>
    %109 = arith.subf %105, %108 : vector<16x16xf32>
    %110 = math.exp %109 : vector<16x16xf32>
    %cst_40 = arith.constant dense<0.000000e+00> : vector<16xf32>
    %111 = vector.multi_reduction <add>, %110, %cst_40 [1] : vector<16x16xf32> to vector<16xf32>
    %112 = vector.shape_cast %111 : vector<16xf32> to vector<16x1xf32>
    %113 = tpu.reciprocal %112 {approx = true} : vector<16x1xf32> -> vector<16x1xf32>
    %114 = vector.broadcast %113 : vector<16x1xf32> to vector<16x16xf32>
    %115 = arith.mulf %110, %114 : vector<16x16xf32>
    %cst_41 = arith.constant dense<0.000000e+00> : vector<16x16xf32>
    %116 = tpu.matmul %115, %99, %cst_41 {dimension_numbers = #tpu.dot_dimension_numbers<[1], [0], [0], [1], [0, 0, 1, 1], [], []>, precision = #tpu.contract_precision<fp32>} : vector<16x16xf32>, vector<16x16xf32>, vector<16x16xf32> -> vector<16x16xf32>
    %117 = tpu.concatenate %56, %76, %96, %116 in 1 : vector<16x16xf32>, vector<16x16xf32>, vector<16x16xf32>, vector<16x16xf32> -> vector<16x64xf32>
    %118 = vector.extract_strided_slice %36 {offsets = [16, 0], sizes = [16, 16], strides = [1, 1]} : vector<32x192xf32> to vector<16x16xf32>
    %119 = vector.extract_strided_slice %36 {offsets = [16, 64], sizes = [16, 16], strides = [1, 1]} : vector<32x192xf32> to vector<16x16xf32>
    %120 = vector.extract_strided_slice %36 {offsets = [16, 128], sizes = [16, 16], strides = [1, 1]} : vector<32x192xf32> to vector<16x16xf32>
    %121 = tpu.transpose %119, [1, 0] : vector<16x16xf32> -> vector<16x16xf32>
    %cst_42 = arith.constant dense<0.000000e+00> : vector<16x16xf32>
    %122 = tpu.matmul %118, %121, %cst_42 {dimension_numbers = #tpu.dot_dimension_numbers<[1], [0], [0], [1], [0, 0, 1, 1], [], []>, precision = #tpu.contract_precision<fp32>} : vector<16x16xf32>, vector<16x16xf32>, vector<16x16xf32> -> vector<16x16xf32>
    %cst_43 = arith.constant 2.500000e-01 : f32
    %123 = vector.broadcast %cst_43 : f32 to vector<16x16xf32>
    %124 = arith.mulf %122, %123 : vector<16x16xf32>
    %cst_44 = arith.constant 0xFF800000 : f32
    %125 = vector.broadcast %cst_44 : f32 to vector<16x16xf32>
    %126 = arith.select %3, %124, %125 : vector<16x16xi1>, vector<16x16xf32>
    %cst_45 = arith.constant dense<0xFF800000> : vector<16xf32>
    %127 = vector.multi_reduction <maximumf>, %126, %cst_45 [1] : vector<16x16xf32> to vector<16xf32>
    %128 = vector.shape_cast %127 : vector<16xf32> to vector<16x1xf32>
    %129 = vector.broadcast %128 : vector<16x1xf32> to vector<16x16xf32>
    %130 = arith.subf %126, %129 : vector<16x16xf32>
    %131 = math.exp %130 : vector<16x16xf32>
    %cst_46 = arith.constant dense<0.000000e+00> : vector<16xf32>
    %132 = vector.multi_reduction <add>, %131, %cst_46 [1] : vector<16x16xf32> to vector<16xf32>
    %133 = vector.shape_cast %132 : vector<16xf32> to vector<16x1xf32>
    %134 = tpu.reciprocal %133 {approx = true} : vector<16x1xf32> -> vector<16x1xf32>
    %135 = vector.broadcast %134 : vector<16x1xf32> to vector<16x16xf32>
    %136 = arith.mulf %131, %135 : vector<16x16xf32>
    %cst_47 = arith.constant dense<0.000000e+00> : vector<16x16xf32>
    %137 = tpu.matmul %136, %120, %cst_47 {dimension_numbers = #tpu.dot_dimension_numbers<[1], [0], [0], [1], [0, 0, 1, 1], [], []>, precision = #tpu.contract_precision<fp32>} : vector<16x16xf32>, vector<16x16xf32>, vector<16x16xf32> -> vector<16x16xf32>
    %138 = vector.extract_strided_slice %36 {offsets = [16, 16], sizes = [16, 16], strides = [1, 1]} : vector<32x192xf32> to vector<16x16xf32>
    %139 = vector.extract_strided_slice %36 {offsets = [16, 80], sizes = [16, 16], strides = [1, 1]} : vector<32x192xf32> to vector<16x16xf32>
    %140 = vector.extract_strided_slice %36 {offsets = [16, 144], sizes = [16, 16], strides = [1, 1]} : vector<32x192xf32> to vector<16x16xf32>
    %141 = tpu.transpose %139, [1, 0] : vector<16x16xf32> -> vector<16x16xf32>
    %cst_48 = arith.constant dense<0.000000e+00> : vector<16x16xf32>
    %142 = tpu.matmul %138, %141, %cst_48 {dimension_numbers = #tpu.dot_dimension_numbers<[1], [0], [0], [1], [0, 0, 1, 1], [], []>, precision = #tpu.contract_precision<fp32>} : vector<16x16xf32>, vector<16x16xf32>, vector<16x16xf32> -> vector<16x16xf32>
    %cst_49 = arith.constant 2.500000e-01 : f32
    %143 = vector.broadcast %cst_49 : f32 to vector<16x16xf32>
    %144 = arith.mulf %142, %143 : vector<16x16xf32>
    %cst_50 = arith.constant 0xFF800000 : f32
    %145 = vector.broadcast %cst_50 : f32 to vector<16x16xf32>
    %146 = arith.select %3, %144, %145 : vector<16x16xi1>, vector<16x16xf32>
    %cst_51 = arith.constant dense<0xFF800000> : vector<16xf32>
    %147 = vector.multi_reduction <maximumf>, %146, %cst_51 [1] : vector<16x16xf32> to vector<16xf32>
    %148 = vector.shape_cast %147 : vector<16xf32> to vector<16x1xf32>
    %149 = vector.broadcast %148 : vector<16x1xf32> to vector<16x16xf32>
    %150 = arith.subf %146, %149 : vector<16x16xf32>
    %151 = math.exp %150 : vector<16x16xf32>
    %cst_52 = arith.constant dense<0.000000e+00> : vector<16xf32>
    %152 = vector.multi_reduction <add>, %151, %cst_52 [1] : vector<16x16xf32> to vector<16xf32>
    %153 = vector.shape_cast %152 : vector<16xf32> to vector<16x1xf32>
    %154 = tpu.reciprocal %153 {approx = true} : vector<16x1xf32> -> vector<16x1xf32>
    %155 = vector.broadcast %154 : vector<16x1xf32> to vector<16x16xf32>
    %156 = arith.mulf %151, %155 : vector<16x16xf32>
    %cst_53 = arith.constant dense<0.000000e+00> : vector<16x16xf32>
    %157 = tpu.matmul %156, %140, %cst_53 {dimension_numbers = #tpu.dot_dimension_numbers<[1], [0], [0], [1], [0, 0, 1, 1], [], []>, precision = #tpu.contract_precision<fp32>} : vector<16x16xf32>, vector<16x16xf32>, vector<16x16xf32> -> vector<16x16xf32>
    %158 = vector.extract_strided_slice %36 {offsets = [16, 32], sizes = [16, 16], strides = [1, 1]} : vector<32x192xf32> to vector<16x16xf32>
    %159 = vector.extract_strided_slice %36 {offsets = [16, 96], sizes = [16, 16], strides = [1, 1]} : vector<32x192xf32> to vector<16x16xf32>
    %160 = vector.extract_strided_slice %36 {offsets = [16, 160], sizes = [16, 16], strides = [1, 1]} : vector<32x192xf32> to vector<16x16xf32>
    %161 = tpu.transpose %159, [1, 0] : vector<16x16xf32> -> vector<16x16xf32>
    %cst_54 = arith.constant dense<0.000000e+00> : vector<16x16xf32>
    %162 = tpu.matmul %158, %161, %cst_54 {dimension_numbers = #tpu.dot_dimension_numbers<[1], [0], [0], [1], [0, 0, 1, 1], [], []>, precision = #tpu.contract_precision<fp32>} : vector<16x16xf32>, vector<16x16xf32>, vector<16x16xf32> -> vector<16x16xf32>
    %cst_55 = arith.constant 2.500000e-01 : f32
    %163 = vector.broadcast %cst_55 : f32 to vector<16x16xf32>
    %164 = arith.mulf %162, %163 : vector<16x16xf32>
    %cst_56 = arith.constant 0xFF800000 : f32
    %165 = vector.broadcast %cst_56 : f32 to vector<16x16xf32>
    %166 = arith.select %3, %164, %165 : vector<16x16xi1>, vector<16x16xf32>
    %cst_57 = arith.constant dense<0xFF800000> : vector<16xf32>
    %167 = vector.multi_reduction <maximumf>, %166, %cst_57 [1] : vector<16x16xf32> to vector<16xf32>
    %168 = vector.shape_cast %167 : vector<16xf32> to vector<16x1xf32>
    %169 = vector.broadcast %168 : vector<16x1xf32> to vector<16x16xf32>
    %170 = arith.subf %166, %169 : vector<16x16xf32>
    %171 = math.exp %170 : vector<16x16xf32>
    %cst_58 = arith.constant dense<0.000000e+00> : vector<16xf32>
    %172 = vector.multi_reduction <add>, %171, %cst_58 [1] : vector<16x16xf32> to vector<16xf32>
    %173 = vector.shape_cast %172 : vector<16xf32> to vector<16x1xf32>
    %174 = tpu.reciprocal %173 {approx = true} : vector<16x1xf32> -> vector<16x1xf32>
    %175 = vector.broadcast %174 : vector<16x1xf32> to vector<16x16xf32>
    %176 = arith.mulf %171, %175 : vector<16x16xf32>
    %cst_59 = arith.constant dense<0.000000e+00> : vector<16x16xf32>
    %177 = tpu.matmul %176, %160, %cst_59 {dimension_numbers = #tpu.dot_dimension_numbers<[1], [0], [0], [1], [0, 0, 1, 1], [], []>, precision = #tpu.contract_precision<fp32>} : vector<16x16xf32>, vector<16x16xf32>, vector<16x16xf32> -> vector<16x16xf32>
    %178 = vector.extract_strided_slice %36 {offsets = [16, 48], sizes = [16, 16], strides = [1, 1]} : vector<32x192xf32> to vector<16x16xf32>
    %179 = vector.extract_strided_slice %36 {offsets = [16, 112], sizes = [16, 16], strides = [1, 1]} : vector<32x192xf32> to vector<16x16xf32>
    %180 = vector.extract_strided_slice %36 {offsets = [16, 176], sizes = [16, 16], strides = [1, 1]} : vector<32x192xf32> to vector<16x16xf32>
    %181 = tpu.transpose %179, [1, 0] : vector<16x16xf32> -> vector<16x16xf32>
    %cst_60 = arith.constant dense<0.000000e+00> : vector<16x16xf32>
    %182 = tpu.matmul %178, %181, %cst_60 {dimension_numbers = #tpu.dot_dimension_numbers<[1], [0], [0], [1], [0, 0, 1, 1], [], []>, precision = #tpu.contract_precision<fp32>} : vector<16x16xf32>, vector<16x16xf32>, vector<16x16xf32> -> vector<16x16xf32>
    %cst_61 = arith.constant 2.500000e-01 : f32
    %183 = vector.broadcast %cst_61 : f32 to vector<16x16xf32>
    %184 = arith.mulf %182, %183 : vector<16x16xf32>
    %cst_62 = arith.constant 0xFF800000 : f32
    %185 = vector.broadcast %cst_62 : f32 to vector<16x16xf32>
    %186 = arith.select %3, %184, %185 : vector<16x16xi1>, vector<16x16xf32>
    %cst_63 = arith.constant dense<0xFF800000> : vector<16xf32>
    %187 = vector.multi_reduction <maximumf>, %186, %cst_63 [1] : vector<16x16xf32> to vector<16xf32>
    %188 = vector.shape_cast %187 : vector<16xf32> to vector<16x1xf32>
    %189 = vector.broadcast %188 : vector<16x1xf32> to vector<16x16xf32>
    %190 = arith.subf %186, %189 : vector<16x16xf32>
    %191 = math.exp %190 : vector<16x16xf32>
    %cst_64 = arith.constant dense<0.000000e+00> : vector<16xf32>
    %192 = vector.multi_reduction <add>, %191, %cst_64 [1] : vector<16x16xf32> to vector<16xf32>
    %193 = vector.shape_cast %192 : vector<16xf32> to vector<16x1xf32>
    %194 = tpu.reciprocal %193 {approx = true} : vector<16x1xf32> -> vector<16x1xf32>
    %195 = vector.broadcast %194 : vector<16x1xf32> to vector<16x16xf32>
    %196 = arith.mulf %191, %195 : vector<16x16xf32>
    %cst_65 = arith.constant dense<0.000000e+00> : vector<16x16xf32>
    %197 = tpu.matmul %196, %180, %cst_65 {dimension_numbers = #tpu.dot_dimension_numbers<[1], [0], [0], [1], [0, 0, 1, 1], [], []>, precision = #tpu.contract_precision<fp32>} : vector<16x16xf32>, vector<16x16xf32>, vector<16x16xf32> -> vector<16x16xf32>
    %198 = tpu.concatenate %137, %157, %177, %197 in 1 : vector<16x16xf32>, vector<16x16xf32>, vector<16x16xf32>, vector<16x16xf32> -> vector<16x64xf32>
    %199 = tpu.concatenate %117, %198 in 0 : vector<16x64xf32>, vector<16x64xf32> -> vector<32x64xf32>
    %c0_66 = arith.constant 0 : index
    %c0_67 = arith.constant 0 : index
    %c0_68 = arith.constant 0 : index
    %200 = vector.load %arg4[%c0_66, %c0_67, %c0_68] : memref<2x64x64xf32, #tpu.memory_space<vmem>>, vector<1x64x64xf32>
    %201 = vector.shape_cast %200 : vector<1x64x64xf32> to vector<64x64xf32>
    %cst_69 = arith.constant dense<0.000000e+00> : vector<32x64xf32>
    %202 = tpu.matmul %199, %201, %cst_69 {dimension_numbers = #tpu.dot_dimension_numbers<[1], [0], [0], [1], [0, 0, 1, 1], [], []>, precision = #tpu.contract_precision<fp32>} : vector<32x64xf32>, vector<64x64xf32>, vector<32x64xf32> -> vector<32x64xf32>
    %203 = arith.addf %0, %202 : vector<32x64xf32>
    %c0_70 = arith.constant 0 : index
    %c0_71 = arith.constant 0 : index
    %c0_72 = arith.constant 0 : index
    %204 = vector.load %arg5[%c0_70, %c0_71, %c0_72] : memref<2x1x64xf32, #tpu.memory_space<vmem>>, vector<1x1x64xf32>
    %205 = vector.shape_cast %204 : vector<1x1x64xf32> to vector<1x64xf32>
    %206 = vector.broadcast %205 : vector<1x64xf32> to vector<32x64xf32>
    %207 = arith.addf %203, %206 : vector<32x64xf32>
    %c0_73 = arith.constant 0 : index
    %c0_74 = arith.constant 0 : index
    %c0_75 = arith.constant 0 : index
    %208 = vector.load %arg8[%c0_73, %c0_74, %c0_75] : memref<2x1x64xf32, #tpu.memory_space<vmem>>, vector<1x1x64xf32>
    %209 = vector.shape_cast %208 : vector<1x1x64xf32> to vector<1x64xf32>
    %c0_76 = arith.constant 0 : index
    %c0_77 = arith.constant 0 : index
    %c0_78 = arith.constant 0 : index
    %210 = vector.load %arg9[%c0_76, %c0_77, %c0_78] : memref<2x1x64xf32, #tpu.memory_space<vmem>>, vector<1x1x64xf32>
    %211 = vector.shape_cast %210 : vector<1x1x64xf32> to vector<1x64xf32>
    %cst_79 = arith.constant dense<0.000000e+00> : vector<32xf32>
    %212 = vector.multi_reduction <add>, %207, %cst_79 [1] : vector<32x64xf32> to vector<32xf32>
    %213 = vector.shape_cast %212 : vector<32xf32> to vector<32x1xf32>
    %cst_80 = arith.constant 6.400000e+01 : f32
    %214 = vector.broadcast %cst_80 : f32 to vector<32x1xf32>
    %215 = arith.divf %213, %214 : vector<32x1xf32>
    %216 = vector.broadcast %215 : vector<32x1xf32> to vector<32x64xf32>
    %217 = arith.subf %207, %216 : vector<32x64xf32>
    %218 = arith.mulf %217, %217 : vector<32x64xf32>
    %cst_81 = arith.constant dense<0.000000e+00> : vector<32xf32>
    %219 = vector.multi_reduction <add>, %218, %cst_81 [1] : vector<32x64xf32> to vector<32xf32>
    %220 = vector.shape_cast %219 : vector<32xf32> to vector<32x1xf32>
    %cst_82 = arith.constant 6.400000e+01 : f32
    %221 = vector.broadcast %cst_82 : f32 to vector<32x1xf32>
    %222 = arith.divf %220, %221 : vector<32x1xf32>
    %223 = vector.broadcast %215 : vector<32x1xf32> to vector<32x64xf32>
    %224 = arith.subf %207, %223 : vector<32x64xf32>
    %cst_83 = arith.constant 9.99999974E-6 : f32
    %225 = vector.broadcast %cst_83 : f32 to vector<32x1xf32>
    %226 = arith.addf %222, %225 : vector<32x1xf32>
    %227 = math.rsqrt %226 : vector<32x1xf32>
    %228 = vector.broadcast %227 : vector<32x1xf32> to vector<32x64xf32>
    %229 = arith.mulf %224, %228 : vector<32x64xf32>
    %230 = vector.broadcast %209 : vector<1x64xf32> to vector<32x64xf32>
    %231 = arith.mulf %229, %230 : vector<32x64xf32>
    %232 = vector.broadcast %211 : vector<1x64xf32> to vector<32x64xf32>
    %233 = arith.addf %231, %232 : vector<32x64xf32>
    %c0_84 = arith.constant 0 : index
    %c0_85 = arith.constant 0 : index
    %c0_86 = arith.constant 0 : index
    %234 = vector.load %arg10[%c0_84, %c0_85, %c0_86] : memref<2x64x256xf32, #tpu.memory_space<vmem>>, vector<1x64x256xf32>
    %235 = vector.shape_cast %234 : vector<1x64x256xf32> to vector<64x256xf32>
    %cst_87 = arith.constant dense<0.000000e+00> : vector<32x256xf32>
    %236 = tpu.matmul %233, %235, %cst_87 {dimension_numbers = #tpu.dot_dimension_numbers<[1], [0], [0], [1], [0, 0, 1, 1], [], []>, precision = #tpu.contract_precision<fp32>} : vector<32x64xf32>, vector<64x256xf32>, vector<32x256xf32> -> vector<32x256xf32>
    %c0_88 = arith.constant 0 : index
    %c0_89 = arith.constant 0 : index
    %c0_90 = arith.constant 0 : index
    %237 = vector.load %arg11[%c0_88, %c0_89, %c0_90] : memref<2x1x256xf32, #tpu.memory_space<vmem>>, vector<1x1x256xf32>
    %238 = vector.shape_cast %237 : vector<1x1x256xf32> to vector<1x256xf32>
    %239 = vector.broadcast %238 : vector<1x256xf32> to vector<32x256xf32>
    %240 = arith.addf %236, %239 : vector<32x256xf32>
    %cst_91 = arith.constant -1.702000e+00 : f32
    %241 = vector.broadcast %cst_91 : f32 to vector<32x256xf32>
    %242 = arith.mulf %241, %240 : vector<32x256xf32>
    %243 = math.exp %242 : vector<32x256xf32>
    %cst_92 = arith.constant 1.000000e+00 : f32
    %244 = vector.broadcast %cst_92 : f32 to vector<32x256xf32>
    %245 = arith.addf %244, %243 : vector<32x256xf32>
    %cst_93 = arith.constant 1.000000e+00 : f32
    %246 = vector.broadcast %cst_93 : f32 to vector<32x256xf32>
    %247 = arith.divf %246, %245 : vector<32x256xf32>
    %248 = arith.mulf %240, %247 : vector<32x256xf32>
    %c0_94 = arith.constant 0 : index
    %c0_95 = arith.constant 0 : index
    %c0_96 = arith.constant 0 : index
    %249 = vector.load %arg12[%c0_94, %c0_95, %c0_96] : memref<2x256x64xf32, #tpu.memory_space<vmem>>, vector<1x256x64xf32>
    %250 = vector.shape_cast %249 : vector<1x256x64xf32> to vector<256x64xf32>
    %cst_97 = arith.constant dense<0.000000e+00> : vector<32x64xf32>
    %251 = tpu.matmul %248, %250, %cst_97 {dimension_numbers = #tpu.dot_dimension_numbers<[1], [0], [0], [1], [0, 0, 1, 1], [], []>, precision = #tpu.contract_precision<fp32>} : vector<32x256xf32>, vector<256x64xf32>, vector<32x64xf32> -> vector<32x64xf32>
    %252 = arith.addf %207, %251 : vector<32x64xf32>
    %c0_98 = arith.constant 0 : index
    %c0_99 = arith.constant 0 : index
    %c0_100 = arith.constant 0 : index
    %253 = vector.load %arg13[%c0_98, %c0_99, %c0_100] : memref<2x1x64xf32, #tpu.memory_space<vmem>>, vector<1x1x64xf32>
    %254 = vector.shape_cast %253 : vector<1x1x64xf32> to vector<1x64xf32>
    %255 = vector.broadcast %254 : vector<1x64xf32> to vector<32x64xf32>
    %256 = arith.addf %252, %255 : vector<32x64xf32>
    %c1 = arith.constant 1 : index
    %c0_101 = arith.constant 0 : index
    %c0_102 = arith.constant 0 : index
    %257 = vector.load %arg6[%c1, %c0_101, %c0_102] : memref<2x1x64xf32, #tpu.memory_space<vmem>>, vector<1x1x64xf32>
    %258 = vector.shape_cast %257 : vector<1x1x64xf32> to vector<1x64xf32>
    %c1_103 = arith.constant 1 : index
    %c0_104 = arith.constant 0 : index
    %c0_105 = arith.constant 0 : index
    %259 = vector.load %arg7[%c1_103, %c0_104, %c0_105] : memref<2x1x64xf32, #tpu.memory_space<vmem>>, vector<1x1x64xf32>
    %260 = vector.shape_cast %259 : vector<1x1x64xf32> to vector<1x64xf32>
    %cst_106 = arith.constant dense<0.000000e+00> : vector<32xf32>
    %261 = vector.multi_reduction <add>, %256, %cst_106 [1] : vector<32x64xf32> to vector<32xf32>
    %262 = vector.shape_cast %261 : vector<32xf32> to vector<32x1xf32>
    %cst_107 = arith.constant 6.400000e+01 : f32
    %263 = vector.broadcast %cst_107 : f32 to vector<32x1xf32>
    %264 = arith.divf %262, %263 : vector<32x1xf32>
    %265 = vector.broadcast %264 : vector<32x1xf32> to vector<32x64xf32>
    %266 = arith.subf %256, %265 : vector<32x64xf32>
    %267 = arith.mulf %266, %266 : vector<32x64xf32>
    %cst_108 = arith.constant dense<0.000000e+00> : vector<32xf32>
    %268 = vector.multi_reduction <add>, %267, %cst_108 [1] : vector<32x64xf32> to vector<32xf32>
    %269 = vector.shape_cast %268 : vector<32xf32> to vector<32x1xf32>
    %cst_109 = arith.constant 6.400000e+01 : f32
    %270 = vector.broadcast %cst_109 : f32 to vector<32x1xf32>
    %271 = arith.divf %269, %270 : vector<32x1xf32>
    %272 = vector.broadcast %264 : vector<32x1xf32> to vector<32x64xf32>
    %273 = arith.subf %256, %272 : vector<32x64xf32>
    %cst_110 = arith.constant 9.99999974E-6 : f32
    %274 = vector.broadcast %cst_110 : f32 to vector<32x1xf32>
    %275 = arith.addf %271, %274 : vector<32x1xf32>
    %276 = math.rsqrt %275 : vector<32x1xf32>
    %277 = vector.broadcast %276 : vector<32x1xf32> to vector<32x64xf32>
    %278 = arith.mulf %273, %277 : vector<32x64xf32>
    %279 = vector.broadcast %258 : vector<1x64xf32> to vector<32x64xf32>
    %280 = arith.mulf %278, %279 : vector<32x64xf32>
    %281 = vector.broadcast %260 : vector<1x64xf32> to vector<32x64xf32>
    %282 = arith.addf %280, %281 : vector<32x64xf32>
    %c1_111 = arith.constant 1 : index
    %c0_112 = arith.constant 0 : index
    %c0_113 = arith.constant 0 : index
    %283 = vector.load %arg2[%c1_111, %c0_112, %c0_113] : memref<2x64x192xf32, #tpu.memory_space<vmem>>, vector<1x64x192xf32>
    %284 = vector.shape_cast %283 : vector<1x64x192xf32> to vector<64x192xf32>
    %cst_114 = arith.constant dense<0.000000e+00> : vector<32x192xf32>
    %285 = tpu.matmul %282, %284, %cst_114 {dimension_numbers = #tpu.dot_dimension_numbers<[1], [0], [0], [1], [0, 0, 1, 1], [], []>, precision = #tpu.contract_precision<fp32>} : vector<32x64xf32>, vector<64x192xf32>, vector<32x192xf32> -> vector<32x192xf32>
    %c1_115 = arith.constant 1 : index
    %c0_116 = arith.constant 0 : index
    %c0_117 = arith.constant 0 : index
    %286 = vector.load %arg3[%c1_115, %c0_116, %c0_117] : memref<2x1x192xf32, #tpu.memory_space<vmem>>, vector<1x1x192xf32>
    %287 = vector.shape_cast %286 : vector<1x1x192xf32> to vector<1x192xf32>
    %288 = vector.broadcast %287 : vector<1x192xf32> to vector<32x192xf32>
    %289 = arith.addf %285, %288 : vector<32x192xf32>
    %290 = vector.extract_strided_slice %289 {offsets = [0, 0], sizes = [16, 16], strides = [1, 1]} : vector<32x192xf32> to vector<16x16xf32>
    %291 = vector.extract_strided_slice %289 {offsets = [0, 64], sizes = [16, 16], strides = [1, 1]} : vector<32x192xf32> to vector<16x16xf32>
    %292 = vector.extract_strided_slice %289 {offsets = [0, 128], sizes = [16, 16], strides = [1, 1]} : vector<32x192xf32> to vector<16x16xf32>
    %293 = tpu.transpose %291, [1, 0] : vector<16x16xf32> -> vector<16x16xf32>
    %cst_118 = arith.constant dense<0.000000e+00> : vector<16x16xf32>
    %294 = tpu.matmul %290, %293, %cst_118 {dimension_numbers = #tpu.dot_dimension_numbers<[1], [0], [0], [1], [0, 0, 1, 1], [], []>, precision = #tpu.contract_precision<fp32>} : vector<16x16xf32>, vector<16x16xf32>, vector<16x16xf32> -> vector<16x16xf32>
    %cst_119 = arith.constant 2.500000e-01 : f32
    %295 = vector.broadcast %cst_119 : f32 to vector<16x16xf32>
    %296 = arith.mulf %294, %295 : vector<16x16xf32>
    %cst_120 = arith.constant 0xFF800000 : f32
    %297 = vector.broadcast %cst_120 : f32 to vector<16x16xf32>
    %298 = arith.select %3, %296, %297 : vector<16x16xi1>, vector<16x16xf32>
    %cst_121 = arith.constant dense<0xFF800000> : vector<16xf32>
    %299 = vector.multi_reduction <maximumf>, %298, %cst_121 [1] : vector<16x16xf32> to vector<16xf32>
    %300 = vector.shape_cast %299 : vector<16xf32> to vector<16x1xf32>
    %301 = vector.broadcast %300 : vector<16x1xf32> to vector<16x16xf32>
    %302 = arith.subf %298, %301 : vector<16x16xf32>
    %303 = math.exp %302 : vector<16x16xf32>
    %cst_122 = arith.constant dense<0.000000e+00> : vector<16xf32>
    %304 = vector.multi_reduction <add>, %303, %cst_122 [1] : vector<16x16xf32> to vector<16xf32>
    %305 = vector.shape_cast %304 : vector<16xf32> to vector<16x1xf32>
    %306 = tpu.reciprocal %305 {approx = true} : vector<16x1xf32> -> vector<16x1xf32>
    %307 = vector.broadcast %306 : vector<16x1xf32> to vector<16x16xf32>
    %308 = arith.mulf %303, %307 : vector<16x16xf32>
    %cst_123 = arith.constant dense<0.000000e+00> : vector<16x16xf32>
    %309 = tpu.matmul %308, %292, %cst_123 {dimension_numbers = #tpu.dot_dimension_numbers<[1], [0], [0], [1], [0, 0, 1, 1], [], []>, precision = #tpu.contract_precision<fp32>} : vector<16x16xf32>, vector<16x16xf32>, vector<16x16xf32> -> vector<16x16xf32>
    %310 = vector.extract_strided_slice %289 {offsets = [0, 16], sizes = [16, 16], strides = [1, 1]} : vector<32x192xf32> to vector<16x16xf32>
    %311 = vector.extract_strided_slice %289 {offsets = [0, 80], sizes = [16, 16], strides = [1, 1]} : vector<32x192xf32> to vector<16x16xf32>
    %312 = vector.extract_strided_slice %289 {offsets = [0, 144], sizes = [16, 16], strides = [1, 1]} : vector<32x192xf32> to vector<16x16xf32>
    %313 = tpu.transpose %311, [1, 0] : vector<16x16xf32> -> vector<16x16xf32>
    %cst_124 = arith.constant dense<0.000000e+00> : vector<16x16xf32>
    %314 = tpu.matmul %310, %313, %cst_124 {dimension_numbers = #tpu.dot_dimension_numbers<[1], [0], [0], [1], [0, 0, 1, 1], [], []>, precision = #tpu.contract_precision<fp32>} : vector<16x16xf32>, vector<16x16xf32>, vector<16x16xf32> -> vector<16x16xf32>
    %cst_125 = arith.constant 2.500000e-01 : f32
    %315 = vector.broadcast %cst_125 : f32 to vector<16x16xf32>
    %316 = arith.mulf %314, %315 : vector<16x16xf32>
    %cst_126 = arith.constant 0xFF800000 : f32
    %317 = vector.broadcast %cst_126 : f32 to vector<16x16xf32>
    %318 = arith.select %3, %316, %317 : vector<16x16xi1>, vector<16x16xf32>
    %cst_127 = arith.constant dense<0xFF800000> : vector<16xf32>
    %319 = vector.multi_reduction <maximumf>, %318, %cst_127 [1] : vector<16x16xf32> to vector<16xf32>
    %320 = vector.shape_cast %319 : vector<16xf32> to vector<16x1xf32>
    %321 = vector.broadcast %320 : vector<16x1xf32> to vector<16x16xf32>
    %322 = arith.subf %318, %321 : vector<16x16xf32>
    %323 = math.exp %322 : vector<16x16xf32>
    %cst_128 = arith.constant dense<0.000000e+00> : vector<16xf32>
    %324 = vector.multi_reduction <add>, %323, %cst_128 [1] : vector<16x16xf32> to vector<16xf32>
    %325 = vector.shape_cast %324 : vector<16xf32> to vector<16x1xf32>
    %326 = tpu.reciprocal %325 {approx = true} : vector<16x1xf32> -> vector<16x1xf32>
    %327 = vector.broadcast %326 : vector<16x1xf32> to vector<16x16xf32>
    %328 = arith.mulf %323, %327 : vector<16x16xf32>
    %cst_129 = arith.constant dense<0.000000e+00> : vector<16x16xf32>
    %329 = tpu.matmul %328, %312, %cst_129 {dimension_numbers = #tpu.dot_dimension_numbers<[1], [0], [0], [1], [0, 0, 1, 1], [], []>, precision = #tpu.contract_precision<fp32>} : vector<16x16xf32>, vector<16x16xf32>, vector<16x16xf32> -> vector<16x16xf32>
    %330 = vector.extract_strided_slice %289 {offsets = [0, 32], sizes = [16, 16], strides = [1, 1]} : vector<32x192xf32> to vector<16x16xf32>
    %331 = vector.extract_strided_slice %289 {offsets = [0, 96], sizes = [16, 16], strides = [1, 1]} : vector<32x192xf32> to vector<16x16xf32>
    %332 = vector.extract_strided_slice %289 {offsets = [0, 160], sizes = [16, 16], strides = [1, 1]} : vector<32x192xf32> to vector<16x16xf32>
    %333 = tpu.transpose %331, [1, 0] : vector<16x16xf32> -> vector<16x16xf32>
    %cst_130 = arith.constant dense<0.000000e+00> : vector<16x16xf32>
    %334 = tpu.matmul %330, %333, %cst_130 {dimension_numbers = #tpu.dot_dimension_numbers<[1], [0], [0], [1], [0, 0, 1, 1], [], []>, precision = #tpu.contract_precision<fp32>} : vector<16x16xf32>, vector<16x16xf32>, vector<16x16xf32> -> vector<16x16xf32>
    %cst_131 = arith.constant 2.500000e-01 : f32
    %335 = vector.broadcast %cst_131 : f32 to vector<16x16xf32>
    %336 = arith.mulf %334, %335 : vector<16x16xf32>
    %cst_132 = arith.constant 0xFF800000 : f32
    %337 = vector.broadcast %cst_132 : f32 to vector<16x16xf32>
    %338 = arith.select %3, %336, %337 : vector<16x16xi1>, vector<16x16xf32>
    %cst_133 = arith.constant dense<0xFF800000> : vector<16xf32>
    %339 = vector.multi_reduction <maximumf>, %338, %cst_133 [1] : vector<16x16xf32> to vector<16xf32>
    %340 = vector.shape_cast %339 : vector<16xf32> to vector<16x1xf32>
    %341 = vector.broadcast %340 : vector<16x1xf32> to vector<16x16xf32>
    %342 = arith.subf %338, %341 : vector<16x16xf32>
    %343 = math.exp %342 : vector<16x16xf32>
    %cst_134 = arith.constant dense<0.000000e+00> : vector<16xf32>
    %344 = vector.multi_reduction <add>, %343, %cst_134 [1] : vector<16x16xf32> to vector<16xf32>
    %345 = vector.shape_cast %344 : vector<16xf32> to vector<16x1xf32>
    %346 = tpu.reciprocal %345 {approx = true} : vector<16x1xf32> -> vector<16x1xf32>
    %347 = vector.broadcast %346 : vector<16x1xf32> to vector<16x16xf32>
    %348 = arith.mulf %343, %347 : vector<16x16xf32>
    %cst_135 = arith.constant dense<0.000000e+00> : vector<16x16xf32>
    %349 = tpu.matmul %348, %332, %cst_135 {dimension_numbers = #tpu.dot_dimension_numbers<[1], [0], [0], [1], [0, 0, 1, 1], [], []>, precision = #tpu.contract_precision<fp32>} : vector<16x16xf32>, vector<16x16xf32>, vector<16x16xf32> -> vector<16x16xf32>
    %350 = vector.extract_strided_slice %289 {offsets = [0, 48], sizes = [16, 16], strides = [1, 1]} : vector<32x192xf32> to vector<16x16xf32>
    %351 = vector.extract_strided_slice %289 {offsets = [0, 112], sizes = [16, 16], strides = [1, 1]} : vector<32x192xf32> to vector<16x16xf32>
    %352 = vector.extract_strided_slice %289 {offsets = [0, 176], sizes = [16, 16], strides = [1, 1]} : vector<32x192xf32> to vector<16x16xf32>
    %353 = tpu.transpose %351, [1, 0] : vector<16x16xf32> -> vector<16x16xf32>
    %cst_136 = arith.constant dense<0.000000e+00> : vector<16x16xf32>
    %354 = tpu.matmul %350, %353, %cst_136 {dimension_numbers = #tpu.dot_dimension_numbers<[1], [0], [0], [1], [0, 0, 1, 1], [], []>, precision = #tpu.contract_precision<fp32>} : vector<16x16xf32>, vector<16x16xf32>, vector<16x16xf32> -> vector<16x16xf32>
    %cst_137 = arith.constant 2.500000e-01 : f32
    %355 = vector.broadcast %cst_137 : f32 to vector<16x16xf32>
    %356 = arith.mulf %354, %355 : vector<16x16xf32>
    %cst_138 = arith.constant 0xFF800000 : f32
    %357 = vector.broadcast %cst_138 : f32 to vector<16x16xf32>
    %358 = arith.select %3, %356, %357 : vector<16x16xi1>, vector<16x16xf32>
    %cst_139 = arith.constant dense<0xFF800000> : vector<16xf32>
    %359 = vector.multi_reduction <maximumf>, %358, %cst_139 [1] : vector<16x16xf32> to vector<16xf32>
    %360 = vector.shape_cast %359 : vector<16xf32> to vector<16x1xf32>
    %361 = vector.broadcast %360 : vector<16x1xf32> to vector<16x16xf32>
    %362 = arith.subf %358, %361 : vector<16x16xf32>
    %363 = math.exp %362 : vector<16x16xf32>
    %cst_140 = arith.constant dense<0.000000e+00> : vector<16xf32>
    %364 = vector.multi_reduction <add>, %363, %cst_140 [1] : vector<16x16xf32> to vector<16xf32>
    %365 = vector.shape_cast %364 : vector<16xf32> to vector<16x1xf32>
    %366 = tpu.reciprocal %365 {approx = true} : vector<16x1xf32> -> vector<16x1xf32>
    %367 = vector.broadcast %366 : vector<16x1xf32> to vector<16x16xf32>
    %368 = arith.mulf %363, %367 : vector<16x16xf32>
    %cst_141 = arith.constant dense<0.000000e+00> : vector<16x16xf32>
    %369 = tpu.matmul %368, %352, %cst_141 {dimension_numbers = #tpu.dot_dimension_numbers<[1], [0], [0], [1], [0, 0, 1, 1], [], []>, precision = #tpu.contract_precision<fp32>} : vector<16x16xf32>, vector<16x16xf32>, vector<16x16xf32> -> vector<16x16xf32>
    %370 = tpu.concatenate %309, %329, %349, %369 in 1 : vector<16x16xf32>, vector<16x16xf32>, vector<16x16xf32>, vector<16x16xf32> -> vector<16x64xf32>
    %371 = vector.extract_strided_slice %289 {offsets = [16, 0], sizes = [16, 16], strides = [1, 1]} : vector<32x192xf32> to vector<16x16xf32>
    %372 = vector.extract_strided_slice %289 {offsets = [16, 64], sizes = [16, 16], strides = [1, 1]} : vector<32x192xf32> to vector<16x16xf32>
    %373 = vector.extract_strided_slice %289 {offsets = [16, 128], sizes = [16, 16], strides = [1, 1]} : vector<32x192xf32> to vector<16x16xf32>
    %374 = tpu.transpose %372, [1, 0] : vector<16x16xf32> -> vector<16x16xf32>
    %cst_142 = arith.constant dense<0.000000e+00> : vector<16x16xf32>
    %375 = tpu.matmul %371, %374, %cst_142 {dimension_numbers = #tpu.dot_dimension_numbers<[1], [0], [0], [1], [0, 0, 1, 1], [], []>, precision = #tpu.contract_precision<fp32>} : vector<16x16xf32>, vector<16x16xf32>, vector<16x16xf32> -> vector<16x16xf32>
    %cst_143 = arith.constant 2.500000e-01 : f32
    %376 = vector.broadcast %cst_143 : f32 to vector<16x16xf32>
    %377 = arith.mulf %375, %376 : vector<16x16xf32>
    %cst_144 = arith.constant 0xFF800000 : f32
    %378 = vector.broadcast %cst_144 : f32 to vector<16x16xf32>
    %379 = arith.select %3, %377, %378 : vector<16x16xi1>, vector<16x16xf32>
    %cst_145 = arith.constant dense<0xFF800000> : vector<16xf32>
    %380 = vector.multi_reduction <maximumf>, %379, %cst_145 [1] : vector<16x16xf32> to vector<16xf32>
    %381 = vector.shape_cast %380 : vector<16xf32> to vector<16x1xf32>
    %382 = vector.broadcast %381 : vector<16x1xf32> to vector<16x16xf32>
    %383 = arith.subf %379, %382 : vector<16x16xf32>
    %384 = math.exp %383 : vector<16x16xf32>
    %cst_146 = arith.constant dense<0.000000e+00> : vector<16xf32>
    %385 = vector.multi_reduction <add>, %384, %cst_146 [1] : vector<16x16xf32> to vector<16xf32>
    %386 = vector.shape_cast %385 : vector<16xf32> to vector<16x1xf32>
    %387 = tpu.reciprocal %386 {approx = true} : vector<16x1xf32> -> vector<16x1xf32>
    %388 = vector.broadcast %387 : vector<16x1xf32> to vector<16x16xf32>
    %389 = arith.mulf %384, %388 : vector<16x16xf32>
    %cst_147 = arith.constant dense<0.000000e+00> : vector<16x16xf32>
    %390 = tpu.matmul %389, %373, %cst_147 {dimension_numbers = #tpu.dot_dimension_numbers<[1], [0], [0], [1], [0, 0, 1, 1], [], []>, precision = #tpu.contract_precision<fp32>} : vector<16x16xf32>, vector<16x16xf32>, vector<16x16xf32> -> vector<16x16xf32>
    %391 = vector.extract_strided_slice %289 {offsets = [16, 16], sizes = [16, 16], strides = [1, 1]} : vector<32x192xf32> to vector<16x16xf32>
    %392 = vector.extract_strided_slice %289 {offsets = [16, 80], sizes = [16, 16], strides = [1, 1]} : vector<32x192xf32> to vector<16x16xf32>
    %393 = vector.extract_strided_slice %289 {offsets = [16, 144], sizes = [16, 16], strides = [1, 1]} : vector<32x192xf32> to vector<16x16xf32>
    %394 = tpu.transpose %392, [1, 0] : vector<16x16xf32> -> vector<16x16xf32>
    %cst_148 = arith.constant dense<0.000000e+00> : vector<16x16xf32>
    %395 = tpu.matmul %391, %394, %cst_148 {dimension_numbers = #tpu.dot_dimension_numbers<[1], [0], [0], [1], [0, 0, 1, 1], [], []>, precision = #tpu.contract_precision<fp32>} : vector<16x16xf32>, vector<16x16xf32>, vector<16x16xf32> -> vector<16x16xf32>
    %cst_149 = arith.constant 2.500000e-01 : f32
    %396 = vector.broadcast %cst_149 : f32 to vector<16x16xf32>
    %397 = arith.mulf %395, %396 : vector<16x16xf32>
    %cst_150 = arith.constant 0xFF800000 : f32
    %398 = vector.broadcast %cst_150 : f32 to vector<16x16xf32>
    %399 = arith.select %3, %397, %398 : vector<16x16xi1>, vector<16x16xf32>
    %cst_151 = arith.constant dense<0xFF800000> : vector<16xf32>
    %400 = vector.multi_reduction <maximumf>, %399, %cst_151 [1] : vector<16x16xf32> to vector<16xf32>
    %401 = vector.shape_cast %400 : vector<16xf32> to vector<16x1xf32>
    %402 = vector.broadcast %401 : vector<16x1xf32> to vector<16x16xf32>
    %403 = arith.subf %399, %402 : vector<16x16xf32>
    %404 = math.exp %403 : vector<16x16xf32>
    %cst_152 = arith.constant dense<0.000000e+00> : vector<16xf32>
    %405 = vector.multi_reduction <add>, %404, %cst_152 [1] : vector<16x16xf32> to vector<16xf32>
    %406 = vector.shape_cast %405 : vector<16xf32> to vector<16x1xf32>
    %407 = tpu.reciprocal %406 {approx = true} : vector<16x1xf32> -> vector<16x1xf32>
    %408 = vector.broadcast %407 : vector<16x1xf32> to vector<16x16xf32>
    %409 = arith.mulf %404, %408 : vector<16x16xf32>
    %cst_153 = arith.constant dense<0.000000e+00> : vector<16x16xf32>
    %410 = tpu.matmul %409, %393, %cst_153 {dimension_numbers = #tpu.dot_dimension_numbers<[1], [0], [0], [1], [0, 0, 1, 1], [], []>, precision = #tpu.contract_precision<fp32>} : vector<16x16xf32>, vector<16x16xf32>, vector<16x16xf32> -> vector<16x16xf32>
    %411 = vector.extract_strided_slice %289 {offsets = [16, 32], sizes = [16, 16], strides = [1, 1]} : vector<32x192xf32> to vector<16x16xf32>
    %412 = vector.extract_strided_slice %289 {offsets = [16, 96], sizes = [16, 16], strides = [1, 1]} : vector<32x192xf32> to vector<16x16xf32>
    %413 = vector.extract_strided_slice %289 {offsets = [16, 160], sizes = [16, 16], strides = [1, 1]} : vector<32x192xf32> to vector<16x16xf32>
    %414 = tpu.transpose %412, [1, 0] : vector<16x16xf32> -> vector<16x16xf32>
    %cst_154 = arith.constant dense<0.000000e+00> : vector<16x16xf32>
    %415 = tpu.matmul %411, %414, %cst_154 {dimension_numbers = #tpu.dot_dimension_numbers<[1], [0], [0], [1], [0, 0, 1, 1], [], []>, precision = #tpu.contract_precision<fp32>} : vector<16x16xf32>, vector<16x16xf32>, vector<16x16xf32> -> vector<16x16xf32>
    %cst_155 = arith.constant 2.500000e-01 : f32
    %416 = vector.broadcast %cst_155 : f32 to vector<16x16xf32>
    %417 = arith.mulf %415, %416 : vector<16x16xf32>
    %cst_156 = arith.constant 0xFF800000 : f32
    %418 = vector.broadcast %cst_156 : f32 to vector<16x16xf32>
    %419 = arith.select %3, %417, %418 : vector<16x16xi1>, vector<16x16xf32>
    %cst_157 = arith.constant dense<0xFF800000> : vector<16xf32>
    %420 = vector.multi_reduction <maximumf>, %419, %cst_157 [1] : vector<16x16xf32> to vector<16xf32>
    %421 = vector.shape_cast %420 : vector<16xf32> to vector<16x1xf32>
    %422 = vector.broadcast %421 : vector<16x1xf32> to vector<16x16xf32>
    %423 = arith.subf %419, %422 : vector<16x16xf32>
    %424 = math.exp %423 : vector<16x16xf32>
    %cst_158 = arith.constant dense<0.000000e+00> : vector<16xf32>
    %425 = vector.multi_reduction <add>, %424, %cst_158 [1] : vector<16x16xf32> to vector<16xf32>
    %426 = vector.shape_cast %425 : vector<16xf32> to vector<16x1xf32>
    %427 = tpu.reciprocal %426 {approx = true} : vector<16x1xf32> -> vector<16x1xf32>
    %428 = vector.broadcast %427 : vector<16x1xf32> to vector<16x16xf32>
    %429 = arith.mulf %424, %428 : vector<16x16xf32>
    %cst_159 = arith.constant dense<0.000000e+00> : vector<16x16xf32>
    %430 = tpu.matmul %429, %413, %cst_159 {dimension_numbers = #tpu.dot_dimension_numbers<[1], [0], [0], [1], [0, 0, 1, 1], [], []>, precision = #tpu.contract_precision<fp32>} : vector<16x16xf32>, vector<16x16xf32>, vector<16x16xf32> -> vector<16x16xf32>
    %431 = vector.extract_strided_slice %289 {offsets = [16, 48], sizes = [16, 16], strides = [1, 1]} : vector<32x192xf32> to vector<16x16xf32>
    %432 = vector.extract_strided_slice %289 {offsets = [16, 112], sizes = [16, 16], strides = [1, 1]} : vector<32x192xf32> to vector<16x16xf32>
    %433 = vector.extract_strided_slice %289 {offsets = [16, 176], sizes = [16, 16], strides = [1, 1]} : vector<32x192xf32> to vector<16x16xf32>
    %434 = tpu.transpose %432, [1, 0] : vector<16x16xf32> -> vector<16x16xf32>
    %cst_160 = arith.constant dense<0.000000e+00> : vector<16x16xf32>
    %435 = tpu.matmul %431, %434, %cst_160 {dimension_numbers = #tpu.dot_dimension_numbers<[1], [0], [0], [1], [0, 0, 1, 1], [], []>, precision = #tpu.contract_precision<fp32>} : vector<16x16xf32>, vector<16x16xf32>, vector<16x16xf32> -> vector<16x16xf32>
    %cst_161 = arith.constant 2.500000e-01 : f32
    %436 = vector.broadcast %cst_161 : f32 to vector<16x16xf32>
    %437 = arith.mulf %435, %436 : vector<16x16xf32>
    %cst_162 = arith.constant 0xFF800000 : f32
    %438 = vector.broadcast %cst_162 : f32 to vector<16x16xf32>
    %439 = arith.select %3, %437, %438 : vector<16x16xi1>, vector<16x16xf32>
    %cst_163 = arith.constant dense<0xFF800000> : vector<16xf32>
    %440 = vector.multi_reduction <maximumf>, %439, %cst_163 [1] : vector<16x16xf32> to vector<16xf32>
    %441 = vector.shape_cast %440 : vector<16xf32> to vector<16x1xf32>
    %442 = vector.broadcast %441 : vector<16x1xf32> to vector<16x16xf32>
    %443 = arith.subf %439, %442 : vector<16x16xf32>
    %444 = math.exp %443 : vector<16x16xf32>
    %cst_164 = arith.constant dense<0.000000e+00> : vector<16xf32>
    %445 = vector.multi_reduction <add>, %444, %cst_164 [1] : vector<16x16xf32> to vector<16xf32>
    %446 = vector.shape_cast %445 : vector<16xf32> to vector<16x1xf32>
    %447 = tpu.reciprocal %446 {approx = true} : vector<16x1xf32> -> vector<16x1xf32>
    %448 = vector.broadcast %447 : vector<16x1xf32> to vector<16x16xf32>
    %449 = arith.mulf %444, %448 : vector<16x16xf32>
    %cst_165 = arith.constant dense<0.000000e+00> : vector<16x16xf32>
    %450 = tpu.matmul %449, %433, %cst_165 {dimension_numbers = #tpu.dot_dimension_numbers<[1], [0], [0], [1], [0, 0, 1, 1], [], []>, precision = #tpu.contract_precision<fp32>} : vector<16x16xf32>, vector<16x16xf32>, vector<16x16xf32> -> vector<16x16xf32>
    %451 = tpu.concatenate %390, %410, %430, %450 in 1 : vector<16x16xf32>, vector<16x16xf32>, vector<16x16xf32>, vector<16x16xf32> -> vector<16x64xf32>
    %452 = tpu.concatenate %370, %451 in 0 : vector<16x64xf32>, vector<16x64xf32> -> vector<32x64xf32>
    %c1_166 = arith.constant 1 : index
    %c0_167 = arith.constant 0 : index
    %c0_168 = arith.constant 0 : index
    %453 = vector.load %arg4[%c1_166, %c0_167, %c0_168] : memref<2x64x64xf32, #tpu.memory_space<vmem>>, vector<1x64x64xf32>
    %454 = vector.shape_cast %453 : vector<1x64x64xf32> to vector<64x64xf32>
    %cst_169 = arith.constant dense<0.000000e+00> : vector<32x64xf32>
    %455 = tpu.matmul %452, %454, %cst_169 {dimension_numbers = #tpu.dot_dimension_numbers<[1], [0], [0], [1], [0, 0, 1, 1], [], []>, precision = #tpu.contract_precision<fp32>} : vector<32x64xf32>, vector<64x64xf32>, vector<32x64xf32> -> vector<32x64xf32>
    %456 = arith.addf %256, %455 : vector<32x64xf32>
    %c1_170 = arith.constant 1 : index
    %c0_171 = arith.constant 0 : index
    %c0_172 = arith.constant 0 : index
    %457 = vector.load %arg5[%c1_170, %c0_171, %c0_172] : memref<2x1x64xf32, #tpu.memory_space<vmem>>, vector<1x1x64xf32>
    %458 = vector.shape_cast %457 : vector<1x1x64xf32> to vector<1x64xf32>
    %459 = vector.broadcast %458 : vector<1x64xf32> to vector<32x64xf32>
    %460 = arith.addf %456, %459 : vector<32x64xf32>
    %c1_173 = arith.constant 1 : index
    %c0_174 = arith.constant 0 : index
    %c0_175 = arith.constant 0 : index
    %461 = vector.load %arg8[%c1_173, %c0_174, %c0_175] : memref<2x1x64xf32, #tpu.memory_space<vmem>>, vector<1x1x64xf32>
    %462 = vector.shape_cast %461 : vector<1x1x64xf32> to vector<1x64xf32>
    %c1_176 = arith.constant 1 : index
    %c0_177 = arith.constant 0 : index
    %c0_178 = arith.constant 0 : index
    %463 = vector.load %arg9[%c1_176, %c0_177, %c0_178] : memref<2x1x64xf32, #tpu.memory_space<vmem>>, vector<1x1x64xf32>
    %464 = vector.shape_cast %463 : vector<1x1x64xf32> to vector<1x64xf32>
    %cst_179 = arith.constant dense<0.000000e+00> : vector<32xf32>
    %465 = vector.multi_reduction <add>, %460, %cst_179 [1] : vector<32x64xf32> to vector<32xf32>
    %466 = vector.shape_cast %465 : vector<32xf32> to vector<32x1xf32>
    %cst_180 = arith.constant 6.400000e+01 : f32
    %467 = vector.broadcast %cst_180 : f32 to vector<32x1xf32>
    %468 = arith.divf %466, %467 : vector<32x1xf32>
    %469 = vector.broadcast %468 : vector<32x1xf32> to vector<32x64xf32>
    %470 = arith.subf %460, %469 : vector<32x64xf32>
    %471 = arith.mulf %470, %470 : vector<32x64xf32>
    %cst_181 = arith.constant dense<0.000000e+00> : vector<32xf32>
    %472 = vector.multi_reduction <add>, %471, %cst_181 [1] : vector<32x64xf32> to vector<32xf32>
    %473 = vector.shape_cast %472 : vector<32xf32> to vector<32x1xf32>
    %cst_182 = arith.constant 6.400000e+01 : f32
    %474 = vector.broadcast %cst_182 : f32 to vector<32x1xf32>
    %475 = arith.divf %473, %474 : vector<32x1xf32>
    %476 = vector.broadcast %468 : vector<32x1xf32> to vector<32x64xf32>
    %477 = arith.subf %460, %476 : vector<32x64xf32>
    %cst_183 = arith.constant 9.99999974E-6 : f32
    %478 = vector.broadcast %cst_183 : f32 to vector<32x1xf32>
    %479 = arith.addf %475, %478 : vector<32x1xf32>
    %480 = math.rsqrt %479 : vector<32x1xf32>
    %481 = vector.broadcast %480 : vector<32x1xf32> to vector<32x64xf32>
    %482 = arith.mulf %477, %481 : vector<32x64xf32>
    %483 = vector.broadcast %462 : vector<1x64xf32> to vector<32x64xf32>
    %484 = arith.mulf %482, %483 : vector<32x64xf32>
    %485 = vector.broadcast %464 : vector<1x64xf32> to vector<32x64xf32>
    %486 = arith.addf %484, %485 : vector<32x64xf32>
    %c1_184 = arith.constant 1 : index
    %c0_185 = arith.constant 0 : index
    %c0_186 = arith.constant 0 : index
    %487 = vector.load %arg10[%c1_184, %c0_185, %c0_186] : memref<2x64x256xf32, #tpu.memory_space<vmem>>, vector<1x64x256xf32>
    %488 = vector.shape_cast %487 : vector<1x64x256xf32> to vector<64x256xf32>
    %cst_187 = arith.constant dense<0.000000e+00> : vector<32x256xf32>
    %489 = tpu.matmul %486, %488, %cst_187 {dimension_numbers = #tpu.dot_dimension_numbers<[1], [0], [0], [1], [0, 0, 1, 1], [], []>, precision = #tpu.contract_precision<fp32>} : vector<32x64xf32>, vector<64x256xf32>, vector<32x256xf32> -> vector<32x256xf32>
    %c1_188 = arith.constant 1 : index
    %c0_189 = arith.constant 0 : index
    %c0_190 = arith.constant 0 : index
    %490 = vector.load %arg11[%c1_188, %c0_189, %c0_190] : memref<2x1x256xf32, #tpu.memory_space<vmem>>, vector<1x1x256xf32>
    %491 = vector.shape_cast %490 : vector<1x1x256xf32> to vector<1x256xf32>
    %492 = vector.broadcast %491 : vector<1x256xf32> to vector<32x256xf32>
    %493 = arith.addf %489, %492 : vector<32x256xf32>
    %cst_191 = arith.constant -1.702000e+00 : f32
    %494 = vector.broadcast %cst_191 : f32 to vector<32x256xf32>
    %495 = arith.mulf %494, %493 : vector<32x256xf32>
    %496 = math.exp %495 : vector<32x256xf32>
    %cst_192 = arith.constant 1.000000e+00 : f32
    %497 = vector.broadcast %cst_192 : f32 to vector<32x256xf32>
    %498 = arith.addf %497, %496 : vector<32x256xf32>
    %cst_193 = arith.constant 1.000000e+00 : f32
    %499 = vector.broadcast %cst_193 : f32 to vector<32x256xf32>
    %500 = arith.divf %499, %498 : vector<32x256xf32>
    %501 = arith.mulf %493, %500 : vector<32x256xf32>
    %c1_194 = arith.constant 1 : index
    %c0_195 = arith.constant 0 : index
    %c0_196 = arith.constant 0 : index
    %502 = vector.load %arg12[%c1_194, %c0_195, %c0_196] : memref<2x256x64xf32, #tpu.memory_space<vmem>>, vector<1x256x64xf32>
    %503 = vector.shape_cast %502 : vector<1x256x64xf32> to vector<256x64xf32>
    %cst_197 = arith.constant dense<0.000000e+00> : vector<32x64xf32>
    %504 = tpu.matmul %501, %503, %cst_197 {dimension_numbers = #tpu.dot_dimension_numbers<[1], [0], [0], [1], [0, 0, 1, 1], [], []>, precision = #tpu.contract_precision<fp32>} : vector<32x256xf32>, vector<256x64xf32>, vector<32x64xf32> -> vector<32x64xf32>
    %505 = arith.addf %460, %504 : vector<32x64xf32>
    %c1_198 = arith.constant 1 : index
    %c0_199 = arith.constant 0 : index
    %c0_200 = arith.constant 0 : index
    %506 = vector.load %arg13[%c1_198, %c0_199, %c0_200] : memref<2x1x64xf32, #tpu.memory_space<vmem>>, vector<1x1x64xf32>
    %507 = vector.shape_cast %506 : vector<1x1x64xf32> to vector<1x64xf32>
    %508 = vector.broadcast %507 : vector<1x64xf32> to vector<32x64xf32>
    %509 = arith.addf %505, %508 : vector<32x64xf32>
    %c0_201 = arith.constant 0 : index
    %c0_202 = arith.constant 0 : index
    %510 = vector.load %arg17[%c0_201, %c0_202] : memref<2x32xf32, #tpu.memory_space<vmem>>, vector<2x32xf32>
    %cst_203 = arith.constant dense<0.000000e+00> : vector<2x64xf32>
    %511 = tpu.matmul %510, %509, %cst_203 {dimension_numbers = #tpu.dot_dimension_numbers<[1], [0], [0], [1], [0, 0, 1, 1], [], []>, precision = #tpu.contract_precision<fp32>} : vector<2x32xf32>, vector<32x64xf32>, vector<2x64xf32> -> vector<2x64xf32>
    %c0_204 = arith.constant 0 : index
    %c0_205 = arith.constant 0 : index
    %512 = vector.load %arg14[%c0_204, %c0_205] : memref<1x64xf32, #tpu.memory_space<vmem>>, vector<1x64xf32>
    %c0_206 = arith.constant 0 : index
    %c0_207 = arith.constant 0 : index
    %513 = vector.load %arg15[%c0_206, %c0_207] : memref<1x64xf32, #tpu.memory_space<vmem>>, vector<1x64xf32>
    %cst_208 = arith.constant dense<0.000000e+00> : vector<2xf32>
    %514 = vector.multi_reduction <add>, %511, %cst_208 [1] : vector<2x64xf32> to vector<2xf32>
    %515 = vector.shape_cast %514 : vector<2xf32> to vector<2x1xf32>
    %cst_209 = arith.constant 6.400000e+01 : f32
    %516 = vector.broadcast %cst_209 : f32 to vector<2x1xf32>
    %517 = arith.divf %515, %516 : vector<2x1xf32>
    %518 = vector.broadcast %517 : vector<2x1xf32> to vector<2x64xf32>
    %519 = arith.subf %511, %518 : vector<2x64xf32>
    %520 = arith.mulf %519, %519 : vector<2x64xf32>
    %cst_210 = arith.constant dense<0.000000e+00> : vector<2xf32>
    %521 = vector.multi_reduction <add>, %520, %cst_210 [1] : vector<2x64xf32> to vector<2xf32>
    %522 = vector.shape_cast %521 : vector<2xf32> to vector<2x1xf32>
    %cst_211 = arith.constant 6.400000e+01 : f32
    %523 = vector.broadcast %cst_211 : f32 to vector<2x1xf32>
    %524 = arith.divf %522, %523 : vector<2x1xf32>
    %525 = vector.broadcast %517 : vector<2x1xf32> to vector<2x64xf32>
    %526 = arith.subf %511, %525 : vector<2x64xf32>
    %cst_212 = arith.constant 9.99999974E-6 : f32
    %527 = vector.broadcast %cst_212 : f32 to vector<2x1xf32>
    %528 = arith.addf %524, %527 : vector<2x1xf32>
    %529 = math.rsqrt %528 : vector<2x1xf32>
    %530 = vector.broadcast %529 : vector<2x1xf32> to vector<2x64xf32>
    %531 = arith.mulf %526, %530 : vector<2x64xf32>
    %532 = vector.broadcast %512 : vector<1x64xf32> to vector<2x64xf32>
    %533 = arith.mulf %531, %532 : vector<2x64xf32>
    %534 = vector.broadcast %513 : vector<1x64xf32> to vector<2x64xf32>
    %535 = arith.addf %533, %534 : vector<2x64xf32>
    %c0_213 = arith.constant 0 : index
    %c0_214 = arith.constant 0 : index
    %536 = vector.load %arg16[%c0_213, %c0_214] : memref<64x128xf32, #tpu.memory_space<vmem>>, vector<64x128xf32>
    %cst_215 = arith.constant dense<0.000000e+00> : vector<2x128xf32>
    %537 = tpu.matmul %535, %536, %cst_215 {dimension_numbers = #tpu.dot_dimension_numbers<[1], [0], [0], [1], [0, 0, 1, 1], [], []>, precision = #tpu.contract_precision<fp32>} : vector<2x64xf32>, vector<64x128xf32>, vector<2x128xf32> -> vector<2x128xf32>
    %c0_216 = arith.constant 0 : index
    %c0_217 = arith.constant 0 : index
    %538 = vector.load %arg18[%c0_216, %c0_217] : memref<2x128xf32, #tpu.memory_space<vmem>>, vector<2x128xf32>
    tpu.vector_store %arg18[%c0_216, %c0_217], %537 {strides = array<i32>} : memref<2x128xf32, #tpu.memory_space<vmem>>, vector<2x128xf32>,
    return
  }
  func.func @transform_0(%arg0: i32) -> (i32, i32) {
    %c0_i32 = arith.constant 0 : i32
    %c0_i32_0 = arith.constant 0 : i32
    %c0_i32_1 = arith.constant 0 : i32
    return %c0_i32, %c0_i32_0 : i32, i32
  }
  func.func @transform_1(%arg0: i32) -> (i32, i32, i32) {
    %c0_i32 = arith.constant 0 : i32
    %c0_i32_0 = arith.constant 0 : i32
    %c0_i32_1 = arith.constant 0 : i32
    %c0_i32_2 = arith.constant 0 : i32
    return %c0_i32, %c0_i32_0, %c0_i32_1 : i32, i32, i32
  }
  func.func @transform_2(%arg0: i32) -> (i32, i32, i32) {
    %c0_i32 = arith.constant 0 : i32
    %c0_i32_0 = arith.constant 0 : i32
    %c0_i32_1 = arith.constant 0 : i32
    %c0_i32_2 = arith.constant 0 : i32
    return %c0_i32, %c0_i32_0, %c0_i32_1 : i32, i32, i32
  }
  func.func @transform_3(%arg0: i32) -> (i32, i32, i32) {
    %c0_i32 = arith.constant 0 : i32
    %c0_i32_0 = arith.constant 0 : i32
    %c0_i32_1 = arith.constant 0 : i32
    %c0_i32_2 = arith.constant 0 : i32
    return %c0_i32, %c0_i32_0, %c0_i32_1 : i32, i32, i32
  }
  func.func @transform_4(%arg0: i32) -> (i32, i32, i32) {
    %c0_i32 = arith.constant 0 : i32
    %c0_i32_0 = arith.constant 0 : i32
    %c0_i32_1 = arith.constant 0 : i32
    %c0_i32_2 = arith.constant 0 : i32
    return %c0_i32, %c0_i32_0, %c0_i32_1 : i32, i32, i32
  }
  func.func @transform_5(%arg0: i32) -> (i32, i32, i32) {
    %c0_i32 = arith.constant 0 : i32
    %c0_i32_0 = arith.constant 0 : i32
    %c0_i32_1 = arith.constant 0 : i32
    %c0_i32_2 = arith.constant 0 : i32
    return %c0_i32, %c0_i32_0, %c0_i32_1 : i32, i32, i32
  }
  func.func @transform_6(%arg0: i32) -> (i32, i32, i32) {
    %c0_i32 = arith.constant 0 : i32
    %c0_i32_0 = arith.constant 0 : i32
    %c0_i32_1 = arith.constant 0 : i32
    %c0_i32_2 = arith.constant 0 : i32
    return %c0_i32, %c0_i32_0, %c0_i32_1 : i32, i32, i32
  }
  func.func @transform_7(%arg0: i32) -> (i32, i32, i32) {
    %c0_i32 = arith.constant 0 : i32
    %c0_i32_0 = arith.constant 0 : i32
    %c0_i32_1 = arith.constant 0 : i32
    %c0_i32_2 = arith.constant 0 : i32
    return %c0_i32, %c0_i32_0, %c0_i32_1 : i32, i32, i32
  }
  func.func @transform_8(%arg0: i32) -> (i32, i32, i32) {
    %c0_i32 = arith.constant 0 : i32
    %c0_i32_0 = arith.constant 0 : i32
    %c0_i32_1 = arith.constant 0 : i32
    %c0_i32_2 = arith.constant 0 : i32
    return %c0_i32, %c0_i32_0, %c0_i32_1 : i32, i32, i32
  }
  func.func @transform_9(%arg0: i32) -> (i32, i32, i32) {
    %c0_i32 = arith.constant 0 : i32
    %c0_i32_0 = arith.constant 0 : i32
    %c0_i32_1 = arith.constant 0 : i32
    %c0_i32_2 = arith.constant 0 : i32
    return %c0_i32, %c0_i32_0, %c0_i32_1 : i32, i32, i32
  }
  func.func @transform_10(%arg0: i32) -> (i32, i32, i32) {
    %c0_i32 = arith.constant 0 : i32
    %c0_i32_0 = arith.constant 0 : i32
    %c0_i32_1 = arith.constant 0 : i32
    %c0_i32_2 = arith.constant 0 : i32
    return %c0_i32, %c0_i32_0, %c0_i32_1 : i32, i32, i32
  }
  func.func @transform_11(%arg0: i32) -> (i32, i32, i32) {
    %c0_i32 = arith.constant 0 : i32
    %c0_i32_0 = arith.constant 0 : i32
    %c0_i32_1 = arith.constant 0 : i32
    %c0_i32_2 = arith.constant 0 : i32
    return %c0_i32, %c0_i32_0, %c0_i32_1 : i32, i32, i32
  }
  func.func @transform_12(%arg0: i32) -> (i32, i32, i32) {
    %c0_i32 = arith.constant 0 : i32
    %c0_i32_0 = arith.constant 0 : i32
    %c0_i32_1 = arith.constant 0 : i32
    %c0_i32_2 = arith.constant 0 : i32
    return %c0_i32, %c0_i32_0, %c0_i32_1 : i32, i32, i32
  }
  func.func @transform_13(%arg0: i32) -> (i32, i32) {
    %c0_i32 = arith.constant 0 : i32
    %c0_i32_0 = arith.constant 0 : i32
    %c0_i32_1 = arith.constant 0 : i32
    return %c0_i32, %c0_i32_0 : i32, i32
  }
  func.func @transform_14(%arg0: i32) -> (i32, i32) {
    %c0_i32 = arith.constant 0 : i32
    %c0_i32_0 = arith.constant 0 : i32
    %c0_i32_1 = arith.constant 0 : i32
    return %c0_i32, %c0_i32_0 : i32, i32
  }
  func.func @transform_15(%arg0: i32) -> (i32, i32) {
    %c0_i32 = arith.constant 0 : i32
    %c0_i32_0 = arith.constant 0 : i32
    %c0_i32_1 = arith.constant 0 : i32
    return %c0_i32, %c0_i32_0 : i32, i32
  }
  func.func @transform_16(%arg0: i32) -> (i32, i32) {
    %c0_i32 = arith.constant 0 : i32
    %c0_i32_0 = arith.constant 0 : i32
    %c0_i32_1 = arith.constant 0 : i32
    return %c0_i32, %c0_i32_0 : i32, i32
  }
  func.func @transform_17(%arg0: i32) -> (i32, i32) {
    %c0_i32 = arith.constant 0 : i32
    %c0_i32_0 = arith.constant 0 : i32
    %c0_i32_1 = arith.constant 0 : i32
    return %c0_i32, %c0_i32_0 : i32, i32
  }
}

</mosaic_0001>

<bundles_post_ra>
// kernel: tpu_custom_call.1
= control target key start
LH: loop header
LB: loop body
LE: loop exit
PB: predicated region body
PF: predicated region fallthrough
CT: control target
= control target key end

     0   :  { %s36340_s0 = inlined_call_operand.vmem [shape: f32[32,64], index: 0, kind: input, shape index: {}]   ;;  %s36341_s1 = inlined_call_operand.vmem [shape: f32[2,64,192], index: 1, kind: input, shape index: {}]   ;;  %s36342_s2 = inlined_call_operand.vmem [shape: f32[2,1,192], index: 2, kind: input, shape index: {}]   ;;  %s36343_s3 = inlined_call_operand.vmem [shape: f32[2,64,64], index: 3, kind: input, shape index: {}]   ;;  %s36344_s4 = inlined_call_operand.vmem [shape: f32[2,1,64], index: 4, kind: input, shape index: {}]   ;;  %s36345_s5 = inlined_call_operand.vmem [shape: f32[2,1,64], index: 5, kind: input, shape index: {}]   ;;  %s36346_s6 = inlined_call_operand.vmem [shape: f32[2,1,64], index: 6, kind: input, shape index: {}]   ;;  %s36347_s7 = inlined_call_operand.vmem [shape: f32[2,1,64], index: 7, kind: input, shape index: {}]   ;;  %s36348_s8 = inlined_call_operand.vmem [shape: f32[2,1,64], index: 8, kind: input, shape index: {}]   ;;  %s36349_s9 = inlined_call_operand.vmem [shape: f32[2,64,256], index: 9, kind: input, shape index: {}]   ;;  %s36350_s10 = inlined_call_operand.vmem [shape: f32[2,1,256], index: 10, kind: input, shape index: {}]   ;;  %s36351_s11 = inlined_call_operand.vmem [shape: f32[2,256,64], index: 11, kind: input, shape index: {}]   ;;  %s36352_s12 = inlined_call_operand.vmem [shape: f32[2,1,64], index: 12, kind: input, shape index: {}]   ;;  %s36353_s13 = inlined_call_operand.vmem [shape: f32[1,64], index: 13, kind: input, shape index: {}]   ;;  %s36354_s14 = inlined_call_operand.vmem [shape: f32[1,64], index: 14, kind: input, shape index: {}]   ;;  %s36355_s15 = inlined_call_operand.vmem [shape: f32[64,128], index: 15, kind: input, shape index: {}]   ;;  %s36356_s16 = inlined_call_operand.vmem [shape: f32[2,32], index: 16, kind: input, shape index: {}]   ;;  %s36357_s17 = inlined_call_operand.hbm [shape: f32[2,128], index: 17, kind: output, shape index: {}]  }
   0x1   :  { %36543 = sst [smem:[#allocation30_spill]] %s36340_s0 }
   0x2   :  { %36544 = sst [smem:[#allocation31_spill]] %s36341_s1 }
   0x3   :  { %s36545_s26 = sld [smem:[#allocation30_spill]]  ;;  %vm70_vm0 = vcmask 523264  }
   0x9   :  { %v57_v0 = vld [vmem:[%s36545_s26] sm:$0xff]  ;;  %v59_v1 = vld [vmem:[%s36545_s26 + $0x10] sm:$0xff]  ;;  %v58_v2 = vld [vmem:[%s36545_s26 + $0x8] sm:$0xff] }
   0xa   :  { %v71_v3 = vsel %vm70_vm0, %v57_v0, 0.0  ;;  %v77_v4 = vsel %vm70_vm0, %v59_v1, 0.0  ;;  %v60_v5 = vld [vmem:[%s36545_s26 + $0x18] sm:$0xff] }
   0xb   :  { %22 = vsyncpa [#allocation3], 0  ;;  %72 = vadd.xlane.f32.xlu0 %v71_v3  ;;  %78 = vadd.xlane.f32.xlu1 %v77_v4  ;;  %v74_v6 = vsel %vm70_vm0, %v58_v2, 0.0  ;;  %v80_v7 = vsel %vm70_vm0, %v60_v5, 0.0  ;;  %s36546_s20 = sld [smem:[#allocation31_spill]]  ;;  %vm984_vm1 = vcmask 130048  }
   0xc   :  { %s31571_s18 = smov 64   ;;  %s31572_s19 = smov 48   ;;  %vm5231_vm4 = vcmask 261120   ;;  %vm5234_vm5 = vcmask 392192   ;;  %vm31579_vm6 = vmmov 0   ;;  %vm24900_vm7 = vcmask 517120  }
   0xd   :  { %s31573_s1 = smov 112   ;;  %s31574_s21 = smov 32  }
   0xe   :  { %s31575_s22 = smov 96   ;;  %s36367_s23 = smov 16  }
   0xf   :  { %75 = vadd.xlane.f32.xlu0 %v74_v6  ;;  %81 = vadd.xlane.f32.xlu1 %v80_v7  ;;  %s36365_s24 = smov 80   ;;  %s36693_s30 = smov 80  }
  0x11   :  { %v31710_v28 = vld [vmem:[%s36546_s20 + $0x8] sm:$0xff]  ;;  %v31715_v29 = vld [vmem:[%s36546_s20 + $0x18] sm:$0xff]  ;;  %v31722_v32 = vld [vmem:[%s36546_s20] sm:$0xff] }
  0x12   :  { %v184_v30 = vand.u32 4294901760, %v31710_v28  ;;  %v188_v31 = vand.u32 4294901760, %v31715_v29  ;;  %v31727_v33 = vld [vmem:[%s36546_s20 + $0x10] sm:$0xff]  ;;  %v186_v34 = vand.u32 4294901760, %v31722_v32  ;;  %v31754_v40 = vld [vmem:[%s36546_s20 + $0x28] sm:$0xff]  ;;  %v31759_v41 = vld [vmem:[%s36546_s20 + $0x38] sm:$0xff] }
  0x13   :  { %v190_v35 = vand.u32 4294901760, %v31727_v33  ;;  %v192_v44 = vand.u32 4294901760, %v31754_v40  ;;  %v196_v45 = vand.u32 4294901760, %v31759_v41  ;;  %v31768_v46 = vld [vmem:[%s36546_s20 + $0x20] sm:$0xff]  ;;  %v31773_v47 = vld [vmem:[%s36546_s20 + $0x30] sm:$0xff]  ;;  %v31814_v60 = vld [vmem:[%s36546_s20 + $0x48] sm:$0xff] }
  0x14   :  { %v31734_v36 = vsub.f32 %v31710_v28, %v184_v30  ;;  %v31739_v37 = vsub.f32 %v31715_v29, %v188_v31  ;;  %v31744_v38 = vsub.f32 %v31722_v32, %v186_v34  ;;  %v194_v50 = vand.u32 4294901760, %v31768_v46  ;;  %v31828_v6 = vld [vmem:[%s36546_s20 + $0x40] sm:$0xff] }
  0x15   :  { %v31749_v39 = vsub.f32 %v31727_v33, %v190_v35  ;;  %v198_v51 = vand.u32 4294901760, %v31773_v47  ;;  %v31788_v54 = vsub.f32 %v31754_v40, %v192_v44  ;;  %v31793_v55 = vsub.f32 %v31759_v41, %v196_v45 }
  0x16   :  { %v311_v42 = vand.u32 4294901760, %v31734_v36  ;;  %v323_v43 = vand.u32 4294901760, %v31739_v37  ;;  %v317_v48 = vand.u32 4294901760, %v31744_v38  ;;  %v31804_v58 = vsub.f32 %v31768_v46, %v194_v50 }
  0x17   :  { %v329_v49 = vand.u32 4294901760, %v31749_v39  ;;  %v31809_v59 = vsub.f32 %v31773_v47, %v198_v51  ;;  %v335_v63 = vand.u32 4294901760, %v31788_v54  ;;  %v36369_v47 = vmov 0.0  }
  0x18   :  { %v312_v52 = vsub.f32 %v31734_v36, %v311_v42  ;;  %v324_v53 = vsub.f32 %v31739_v37, %v323_v43  ;;  %v318_v56 = vsub.f32 %v31744_v38, %v317_v48  ;;  %v341_v4 = vand.u32 4294901760, %v31804_v58  ;;  %453 = vmatprep.mubr.f32.mxu0 %v36369_v47  ;;  %264 = vmatprep.mubr.f32.mxu1 %v36369_v47 }
  0x19   :  { %v330_v57 = vsub.f32 %v31749_v39, %v329_v49 }
  0x1a   :  { %v313_v61 = vand.u32 4294901760, %v312_v52  ;;  %v325_v62 = vand.u32 4294901760, %v324_v53 }
  0x1b   :  { %v331_v3 = vand.u32 4294901760, %v330_v57 }
  0x1c   :  { %v28913_v7 = vpack.c.bf16 %v325_v62, %v313_v61 }
  0x1e   :  { %28914 = vmatprep.subr.bf16.mxu0 %v28913_v7 }
  0x98   :  { %v73_v8 = vpop.xlane.xlu0 %72  ;;  %v79_v9 = vpop.xlane.xlu1 %78 }
  0x99   :  { %v84_v10 = vmul.f32 0.015625, %v73_v8  ;;  %v86_v11 = vmul.f32 0.015625, %v79_v9  ;;  %v336_v8 = vsub.f32 %v31788_v54, %v335_v63 }
  0x9b   :  { %v31687_v12 = vsub.f32 %v57_v0, %v84_v10  ;;  %v31689_v13 = vsub.f32 %v59_v1, %v86_v11  ;;  %v347_v0 = vand.u32 4294901760, %v31793_v55  ;;  %v31821_v1 = vld [vmem:[%s36546_s20 + $0x58] sm:$0xff]  ;;  %v200_v10 = vand.u32 4294901760, %v31814_v60  ;;  %v31840_v11 = vld [vmem:[%s36546_s20 + $0x50] sm:$0xff] }
  0x9c   :  { %v76_v14 = vpop.xlane.xlu0 %75  ;;  %v82_v15 = vpop.xlane.xlu1 %81  ;;  %v206_v53 = vand.u32 4294901760, %v31840_v11 }
  0x9d   :  { %v85_v16 = vmul.f32 0.015625, %v76_v14  ;;  %v87_v17 = vmul.f32 0.015625, %v82_v15  ;;  %v92_v18 = vmul.f32 %v31687_v12, %v31687_v12  ;;  %v94_v19 = vmul.f32 %v31689_v13, %v31689_v13 }
  0x9e   :  { %v348_v9 = vsub.f32 %v31793_v55, %v347_v0  ;;  %v342_v15 = vsub.f32 %v31804_v58, %v341_v4 }
  0x9f   :  { %v31695_v20 = vsub.f32 %v58_v2, %v85_v16  ;;  %v31697_v21 = vsub.f32 %v60_v5, %v87_v17  ;;  %v96_v22 = vsel %vm70_vm0, %v92_v18, 0.0  ;;  %v102_v23 = vsel %vm70_vm0, %v94_v19, 0.0  ;;  %v31852_v18 = vld [vmem:[%s36546_s20 + $0x68] sm:$0xff] }
  0xa0   :  { %97 = vadd.xlane.f32.xlu0 %v96_v22  ;;  %v319_v2 = vand.u32 4294901760, %v318_v56  ;;  %v36362_v5 = vand.u32 4294901760, %v31809_v59  ;;  %v204_v17 = vand.u32 4294901760, %v31821_v1  ;;  %v337_v19 = vand.u32 4294901760, %v336_v8  ;;  %v31874_v56 = vld [vmem:[%s36546_s20 + $0x60] sm:$0xff] }
  0xa1   :  { %v93_v24 = vmul.f32 %v31695_v20, %v31695_v20  ;;  %v95_v25 = vmul.f32 %v31697_v21, %v31697_v21  ;;  %v349_v22 = vand.u32 4294901760, %v348_v9  ;;  %v31890_v9 = vsub.f32 %v31840_v11, %v206_v53 }
  0xa2   :  { %v28915_v14 = vpack.c.bf16 %v331_v3, %v319_v2  ;;  %v354_v16 = vsub.f32 %v31809_v59, %v36362_v5  ;;  %v31868_v52 = vsub.f32 %v31821_v1, %v204_v17  ;;  %v208_v2 = vand.u32 4294901760, %v31852_v18  ;;  %v31886_v3 = vld [vmem:[%s36546_s20 + $0x70] sm:$0xff] }
  0xa3   :  { %v99_v26 = vsel %vm70_vm0, %v93_v24, 0.0  ;;  %v105_v27 = vsel %vm70_vm0, %v95_v25, 0.0  ;;  %v202_v24 = vand.u32 4294901760, %v31828_v6  ;;  %v31863_v25 = vld [vmem:[%s36546_s20 + $0x78] sm:$0xff]  ;;  %v28917_v57 = vpack.c.bf16 %v349_v22, %v337_v19 }
  0xa4   :  { %103 = vadd.xlane.f32.xlu0 %v102_v23  ;;  %100 = vadd.xlane.f32.xlu1 %v99_v26  ;;  %v31857_v23 = vsub.f32 %v31814_v60, %v200_v10  ;;  %v343_v26 = vand.u32 4294901760, %v342_v15  ;;  %v36361_v8 = vand.u32 4294901760, %v31868_v52  ;;  %v31898_v19 = vsub.f32 %v31852_v18, %v208_v2 }
  0xa5   :  { %28916 = vmatpush1.bf16.msra.mxu0 %v28915_v14  ;;  %v31880_v62 = vsub.f32 %v31828_v6, %v202_v24  ;;  %v212_v14 = vand.u32 4294901760, %v31863_v25  ;;  %v210_v22 = vand.u32 4294901760, %v31874_v56  ;;  %v31913_v18 = vpack.c.bf16 %v188_v31, %v184_v30 }
  0xa6   :  { %v36360_v61 = vand.u32 4294901760, %v31857_v23  ;;  %28918 = vmatprep.subr.bf16.mxu0 %v28917_v57  ;;  %v372_v11 = vsub.f32 %v31868_v52, %v36361_v8  ;;  %v214_v57 = vand.u32 4294901760, %v31886_v3  ;;  %v383_v8 = vand.u32 4294901760, %v31898_v19 }
  0xa7   :  { %28898 = vmatprep.subr.bf16.mxu1 %v31913_v18  ;;  %v31961_v46 = vpack.c.bf16 %v204_v17, %v200_v10  ;;  %v31973_v60 = vpack.c.bf16 %v212_v14, %v208_v2  ;;  %v28933_v1 = vpack.c.bf16 %v31793_v55, %v31788_v54  ;;  %v28935_v10 = vpack.c.bf16 %v31809_v59, %v31804_v58 }
  0xa8   :  { %106 = vadd.xlane.f32.xlu1 %v105_v27  ;;  %v355_v27 = vand.u32 4294901760, %v354_v16  ;;  %v360_v15 = vsub.f32 %v31857_v23, %v36360_v61  ;;  %v36364_v16 = vand.u32 4294901760, %v31880_v62  ;;  %v373_v5 = vand.u32 4294901760, %v372_v11 }
  0xa9   :  { %v384_v31 = vsub.f32 %v31898_v19, %v383_v8  ;;  %v31935_v32 = vsub.f32 %v31886_v3, %v214_v57  ;;  %v31943_v11 = vpack.c.bf16 %v196_v45, %v192_v44  ;;  %v31980_v6 = vpack.c.bf16 %v214_v57, %v210_v22 }
  0xaa   :  { %v28919_v7 = vpack.c.bf16 %v355_v27, %v343_v26  ;;  %v36363_v26 = vand.u32 4294901760, %v31890_v9  ;;  %v31906_v27 = vsub.f32 %v31863_v25, %v212_v14  ;;  %v361_v61 = vand.u32 4294901760, %v360_v15 }
  0xab   :  { %v31923_v25 = vpack.c.bf16 %v190_v35, %v186_v34  ;;  %v31932_v15 = vsub.f32 %v31874_v56, %v210_v22  ;;  %v401_v56 = vand.u32 4294901760, %v31935_v32  ;;  %v28937_v17 = vpack.c.bf16 %v31868_v52, %v31857_v23 }
  0xac   :  { %28920 = vmatpush1.bf16.msra.mxu0 %v28919_v7  ;;  %v366_v7 = vsub.f32 %v31880_v62, %v36364_v16  ;;  %v378_v28 = vsub.f32 %v31890_v9, %v36363_v26  ;;  %v395_v29 = vand.u32 4294901760, %v31906_v27  ;;  %v28921_v33 = vpack.c.bf16 %v373_v5, %v361_v61 }
  0xad   :  { %28900 = vmatpush1.bf16.msra.mxu1 %v31923_v25  ;;  %v389_v26 = vand.u32 4294901760, %v31932_v15  ;;  %v31951_v5 = vpack.c.bf16 %v198_v51, %v194_v50  ;;  %v402_v41 = vsub.f32 %v31935_v32, %v401_v56  ;;  %v28929_v50 = vpack.c.bf16 %v31739_v37, %v31734_v36 }
  0xae   :  { %v367_v30 = vand.u32 4294901760, %v366_v7  ;;  %v379_v34 = vand.u32 4294901760, %v378_v28  ;;  %v396_v35 = vsub.f32 %v31906_v27, %v395_v29  ;;  %v385_v7 = vand.u32 4294901760, %v384_v31  ;;  %28922 = vmatprep.subr.bf16.mxu0 %v28921_v33  ;;  %28902 = vmatprep.subr.bf16.mxu1 %v31943_v11 }
  0xaf   :  { %v390_v40 = vsub.f32 %v31932_v15, %v389_v26  ;;  %v403_v61 = vand.u32 4294901760, %v402_v41  ;;  %v31968_v51 = vpack.c.bf16 %v206_v53, %v202_v24  ;;  %v28939_v24 = vpack.c.bf16 %v31890_v9, %v31880_v62 }
  0xb0   :  { %v28923_v3 = vpack.c.bf16 %v379_v34, %v367_v30  ;;  %v397_v16 = vand.u32 4294901760, %v396_v35  ;;  %v28941_v53 = vpack.c.bf16 %v31906_v27, %v31898_v19  ;;  %v28943_v2 = vpack.c.bf16 %v31935_v32, %v31932_v15 }
  0xb1   :  { %28904 = vmatpush1.bf16.msra.mxu1 %v31951_v5  ;;  %v391_v45 = vand.u32 4294901760, %v390_v40  ;;  %v31997_v14 = vpack.c.bf16 %v323_v43, %v311_v42  ;;  %v32003_v22 = vpack.c.bf16 %v329_v49, %v317_v48  ;;  %v32009_v57 = vpack.c.bf16 %v347_v0, %v335_v63 }
  0xb2   :  { %28924 = vmatpush1.bf16.msra.mxu0 %v28923_v3  ;;  %v28925_v44 = vpack.c.bf16 %v397_v16, %v385_v7  ;;  %v28931_v16 = vpack.c.bf16 %v31749_v39, %v31744_v38  ;;  %28906 = vmatprep.subr.bf16.mxu1 %v31961_v46  ;;  %v36547_v36 = vand.u32 4294901760, %v31809_v59  ;;  %v36548_v37 = vand.u32 4294901760, %v31857_v23 }
  0xb3   :  { %v28927_v28 = vpack.c.bf16 %v403_v61, %v391_v45  ;;  %v36549_v38 = vand.u32 4294901760, %v31868_v52  ;;  %v36550_v39 = vand.u32 4294901760, %v31880_v62  ;;  %v36551_v43 = vand.u32 4294901760, %v31890_v9 }
  0xb4   :  { %28926 = vmatprep.subr.bf16.mxu0 %v28925_v44  ;;  %v32015_v30 = vpack.c.bf16 %v36547_v36, %v341_v4  ;;  %v32029_v49 = vpack.c.bf16 %v395_v29, %v383_v8  ;;  %v32031_v54 = vpack.c.bf16 %v401_v56, %v389_v26  ;;  %v25491_v26 = vld [vmem:[%s36345_s5] ss:$0 sm:$0xff]  ;;  %v61_v27 = vlaneseq }
  0xb5   :  { %28908 = vmatpush1.bf16.msra.mxu1 %v31968_v51  ;;  %v32021_v42 = vpack.c.bf16 %v36549_v38, %v36548_v37  ;;  %v32027_v48 = vpack.c.bf16 %v36551_v43, %v36550_v39  ;;  %v25492_v56 = vld [vmem:[%s36346_s6] ss:$0 sm:$0xff] }
  0xb6   :  { %28928 = vmatpush1.bf16.msra.mxu0 %v28927_v28  ;;  %28910 = vmatprep.subr.bf16.mxu1 %v31973_v60 }
  0xb7   :  { %28930 = vmatprep.subr.bf16.mxu0 %v28929_v50 }
  0xb9   :  { %28912 = vmatpush1.bf16.msra.mxu1 %v31980_v6 }
 0x12d   :  { %v98_v55 = vpop.xlane.xlu0 %97 }
 0x12e   :  { %v108_v63 = vmul.f32 0.015625, %v98_v55 }
 0x130   :  { %v112_v0 = vadd.f32 1e-05, %v108_v63 }
 0x131   :  { %v101_v4 = vpop.xlane.xlu1 %100  ;;  %v104_v31 = vpop.xlane.xlu0 %103 }
 0x132   :  { %31316 = vrsqrt.f32 %v112_v0  ;;  %v109_v33 = vmul.f32 0.015625, %v101_v4  ;;  %v110_v34 = vmul.f32 0.015625, %v104_v31 }
 0x134   :  { %v113_v35 = vadd.f32 1e-05, %v109_v33  ;;  %v114_v7 = vadd.f32 1e-05, %v110_v34 }
 0x135   :  { %v107_v3 = vpop.xlane.xlu1 %106 }
 0x136   :  { %31318 = vrsqrt.f32 %v113_v35  ;;  %v111_v40 = vmul.f32 0.015625, %v107_v3 }
 0x137   :  { %31320 = vrsqrt.f32 %v114_v7 }
 0x138   :  { %v115_v41 = vadd.f32 1e-05, %v111_v40 }
 0x13a   :  { %31322 = vrsqrt.f32 %v115_v41 }
 0x13c   :  { %v31317_v8 = vpop.eup %31316 }
 0x13d   :  { %v120_v29 = vmul.f32 %v31317_v8, %v31687_v12 }
 0x13f   :  { %v130_v44 = vmul.f32 %v25491_v26, %v120_v29 }
 0x140   :  { %v31319_v45 = vpop.eup %31318 }
 0x141   :  { %v31321_v61 = vpop.eup %31320  ;;  %v121_v50 = vmul.f32 %v31319_v45, %v31695_v20  ;;  %v140_v28 = vadd.f32 %v25492_v56, %v130_v44 }
 0x142   :  { %v122_v36 = vmul.f32 %v31321_v61, %v31689_v13 }
 0x143   :  { %v173_v37 = vsel %vm70_vm0, %v140_v28, 0  ;;  %v131_v38 = vmul.f32 %v25491_v26, %v121_v50 }
 0x144   :  { %v31323_v39 = vpop.eup %31322  ;;  %v32043_v43 = vand.u32 4294901760, %v173_v37  ;;  %v132_v55 = vmul.f32 %v25491_v26, %v122_v36 }
 0x145   :  { %v123_v12 = vmul.f32 %v31323_v39, %v31697_v21  ;;  %v141_v63 = vadd.f32 %v25492_v56, %v131_v38 }
 0x146   :  { %455 = vmatmul.mubr.f32.vlgmr.msra.gmra.mrb[0].mxu0 %v32043_v43  ;;  %v32048_v0 = vsub.f32 %v173_v37, %v32043_v43  ;;  %v142_v4 = vadd.f32 %v25492_v56, %v132_v55 }
 0x147   :  { %28932 = vmatpush1.bf16.msra.mxu0 %v28931_v16  ;;  %460 = vmatprep.mubr.f32.mxu0 %v36369_v47  ;;  %v176_v13 = vsel %vm70_vm0, %v141_v63, 0  ;;  %v133_v20 = vmul.f32 %v25491_v26, %v123_v12 }
 0x148   :  { %v32052_v31 = vand.u32 4294901760, %v176_v13  ;;  %28934 = vmatprep.subr.bf16.mxu0 %v28933_v1  ;;  %v267_v33 = vand.u32 4294901760, %v32048_v0  ;;  %v179_v21 = vsel %vm70_vm0, %v142_v4, 0 }
 0x149   :  { %v32056_v34 = vand.u32 4294901760, %v179_v21  ;;  %v143_v35 = vadd.f32 %v25492_v56, %v133_v20 }
 0x14a   :  { %462 = vmatmul.mubr.f32.gmra.mrb[2].mxu0 %v32052_v31  ;;  %v268_v7 = vsub.f32 %v32048_v0, %v267_v33  ;;  %v277_v16 = vsub.f32 %v176_v13, %v32052_v31 }
 0x14b   :  { %28936 = vmatpush1.bf16.msra.mxu0 %v28935_v10  ;;  %467 = vmatprep.mubr.f32.mxu0 %v36369_v47  ;;  %v182_v1 = vsel %vm70_vm0, %v143_v35, 0  ;;  %v288_v3 = vsub.f32 %v179_v21, %v32056_v34 }
 0x14c   :  { %v269_v40 = vand.u32 4294901760, %v268_v7  ;;  %28938 = vmatprep.subr.bf16.mxu0 %v28937_v17  ;;  %v278_v41 = vand.u32 4294901760, %v277_v16  ;;  %v32070_v8 = vand.u32 4294901760, %v182_v1 }
 0x14d   :  { %v289_v26 = vand.u32 4294901760, %v288_v3 }
 0x14e   :  { %270 = vmatmul.mubr.f32.vlgmr.msra.gmra.mrb[0].mxu1 %v269_v40  ;;  %469 = vmatmul.mubr.f32.gmra.mrb[4].mxu0 %v32056_v34  ;;  %v279_v58 = vsub.f32 %v277_v16, %v278_v41  ;;  %v299_v59 = vsub.f32 %v182_v1, %v32070_v8 }
 0x14f   :  { %28940 = vmatpush1.bf16.msra.mxu0 %v28939_v24  ;;  %275 = vmatprep.mubr.f32.mxu1 %v36369_v47  ;;  %v290_v52 = vsub.f32 %v288_v3, %v289_v26 }
 0x150   :  { %474 = vmatprep.mubr.f32.mxu0 %v36369_v47  ;;  %v280_v23 = vand.u32 4294901760, %v279_v58  ;;  %28942 = vmatprep.subr.bf16.mxu0 %v28941_v53  ;;  %v300_v10 = vand.u32 4294901760, %v299_v59 }
 0x151   :  { %v291_v62 = vand.u32 4294901760, %v290_v52 }
 0x152   :  { %281 = vmatmul.mubr.f32.gmra.mrb[2].mxu1 %v280_v23  ;;  %476 = vmatmul.mubr.f32.gmra.mrb[6].mxu0 %v32070_v8  ;;  %v301_v9 = vsub.f32 %v299_v59, %v300_v10 }
 0x153   :  { %28944 = vmatpush1.bf16.msra.mxu0 %v28943_v2  ;;  %286 = vmatprep.mubr.f32.mxu1 %v36369_v47 }
 0x154   :  { %578 = vmatprep.mubr.f32.mxu0 %v36369_v47  ;;  %28946 = vmatprep.subr.bf16.mxu0 %v31913_v18  ;;  %v302_v19 = vand.u32 4294901760, %v301_v9 }
 0x156   :  { %292 = vmatmul.mubr.f32.gmra.mrb[4].mxu1 %v291_v62  ;;  %581 = vmatmul.mubr.f32.vlgmr.msra.gmra.mrb[0].mxu0 %v32048_v0 }
 0x157   :  { %28948 = vmatpush1.bf16.msra.mxu0 %v31923_v25  ;;  %297 = vmatprep.mubr.f32.mxu1 %v36369_v47 }
 0x158   :  { %586 = vmatprep.mubr.f32.mxu0 %v36369_v47  ;;  %28950 = vmatprep.subr.bf16.mxu0 %v31943_v11 }
 0x15a   :  { %303 = vmatmul.mubr.f32.gmra.mrb[6].mxu1 %v302_v19  ;;  %589 = vmatmul.mubr.f32.gmra.mrb[2].mxu0 %v277_v16 }
 0x15b   :  { %28952 = vmatpush1.bf16.msra.mxu0 %v31951_v5  ;;  %594 = vmatprep.mubr.f32.mxu0 %v36369_v47 }
 0x15c   :  { %28954 = vmatprep.subr.bf16.mxu0 %v31961_v46 }
 0x15e   :  { %597 = vmatmul.mubr.f32.gmra.mrb[4].mxu0 %v288_v3 }
 0x15f   :  { %28956 = vmatpush1.bf16.msra.mxu0 %v31968_v51  ;;  %602 = vmatprep.mubr.f32.mxu0 %v36369_v47 }
 0x160   :  { %28958 = vmatprep.subr.bf16.mxu0 %v31973_v60 }
 0x162   :  { %605 = vmatmul.mubr.f32.gmra.mrb[6].mxu0 %v299_v59 }
 0x163   :  { %28960 = vmatpush1.bf16.msra.mxu0 %v31980_v6  ;;  %691 = vmatprep.mubr.f32.mxu0 %v36369_v47 }
 0x164   :  { %28962 = vmatprep.subr.bf16.mxu0 %v31997_v14 }
 0x166   :  { %695 = vmatmul.mubr.f32.vlgmr.msra.gmra.mrb[0].mxu0 %v267_v33 }
 0x167   :  { %28964 = vmatpush1.bf16.msra.mxu0 %v32003_v22  ;;  %700 = vmatprep.mubr.f32.mxu0 %v36369_v47 }
 0x168   :  { %28966 = vmatprep.subr.bf16.mxu0 %v32009_v57 }
 0x16a   :  { %704 = vmatmul.mubr.f32.gmra.mrb[2].mxu0 %v278_v41 }
 0x16b   :  { %28968 = vmatpush1.bf16.msra.mxu0 %v32015_v30  ;;  %709 = vmatprep.mubr.f32.mxu0 %v36369_v47 }
 0x16c   :  { %28970 = vmatprep.subr.bf16.mxu0 %v32021_v42 }
 0x16e   :  { %713 = vmatmul.mubr.f32.gmra.mrb[4].mxu0 %v289_v26 }
 0x16f   :  { %28972 = vmatpush1.bf16.msra.mxu0 %v32027_v48  ;;  %718 = vmatprep.mubr.f32.mxu0 %v36369_v47 }
 0x170   :  { %28974 = vmatprep.subr.bf16.mxu0 %v32029_v49 }
 0x172   :  { %722 = vmatmul.mubr.f32.gmra.mrb[6].mxu0 %v300_v10 }
 0x173   :  { %28976 = vmatpush1.bf16.msra.mxu0 %v32031_v54  ;;  %840 = vmatprep.mubr.f32.mxu0 %v36369_v47 }
 0x174   :  { %28978 = vmatprep.subr.bf16.mxu0 %v31913_v18  ;;  %v32138_v18 = vshrl.u32 %v61_v27, 7 }
 0x176   :  { %842 = vmatmul.mubr.f32.vlgmr.msra.gmra.mrb[0].mxu0 %v32043_v43  ;;  %v32141_v32 = vsub.s32 0, %v32138_v18 }
 0x177   :  { %28980 = vmatpush1.bf16.msra.mxu0 %v31923_v25  ;;  %847 = vmatprep.mubr.f32.mxu0 %v36369_v47 }
 0x178   :  { %28982 = vmatprep.subr.bf16.mxu0 %v31943_v11  ;;  %36552 = vst [vmem:[#allocation5_spill] sm:$0xff] %v32141_v32  ;;  %v160_v11 = vld [vmem:[%s36342_s2] sm:$0x3] }
 0x17a   :  { %849 = vmatmul.mubr.f32.gmra.mrb[2].mxu0 %v32052_v31 }
 0x17b   :  { %28984 = vmatpush1.bf16.msra.mxu0 %v31951_v5  ;;  %854 = vmatprep.mubr.f32.mxu0 %v36369_v47  ;;  %v32147_v5 = vsub.s32 1, %v32138_v18 }
 0x17c   :  { %28986 = vmatprep.subr.bf16.mxu0 %v31961_v46 }
 0x17d   :  { %36553 = vst [vmem:[#allocation6_spill] sm:$0xff] %v32147_v5 }
 0x17e   :  { %856 = vmatmul.mubr.f32.gmra.mrb[4].mxu0 %v32056_v34 }
 0x17f   :  { %28988 = vmatpush1.bf16.msra.mxu0 %v31968_v51  ;;  %861 = vmatprep.mubr.f32.mxu0 %v36369_v47 }
 0x180   :  { %28990 = vmatprep.subr.bf16.mxu0 %v31973_v60  ;;  %v165_v60 = vrot.slane %v160_v11, %v32141_v32 }
 0x182   :  { %863 = vmatmul.mubr.f32.gmra.mrb[6].mxu0 %v32070_v8 }
 0x183   :  { %28992 = vmatpush1.bf16.msra.mxu0 %v31980_v6  ;;  %949 = vmatprep.mubr.f32.mxu0 %v36369_v47  ;;  %v169_v6 = vrot.slane %v160_v11, %v32147_v5 }
 0x186   :  { %951 = vmatmul.mubr.f32.vlgmr.msra.gmra.mrb[0].mxu0 %v32043_v43 }
 0x187   :  { %956 = vmatprep.mubr.f32.mxu0 %v36369_v47 }
 0x18a   :  { %958 = vmatmul.mubr.f32.gmra.mrb[2].mxu0 %v32052_v31 }
 0x18b   :  { %963 = vmatprep.mubr.f32.mxu0 %v36369_v47 }
 0x18e   :  { %965 = vmatmul.mubr.f32.gmra.mrb[4].mxu0 %v32056_v34 }
 0x18f   :  { %970 = vmatprep.mubr.f32.mxu0 %v36369_v47 }
 0x192   :  { %972 = vmatmul.mubr.f32.gmra.mrb[6].mxu0 %v32070_v8 }
 0x221   :  { %v271_v25 = vpop.f32.mrb[0].mxu1 }
 0x222   :  { %v273_v15 = vpop.f32.mrb[1].mxu1  ;;  %v272_v42 = vadd.f32 %v271_v25, %v165_v60 }
 0x223   :  { %v274_v48 = vadd.f32 %v273_v15, %v169_v6 }
 0x225   :  { %v282_v46 = vpop.f32.mrb[2].mxu1 }
 0x226   :  { %v284_v51 = vpop.f32.mrb[3].mxu1  ;;  %v283_v44 = vadd.f32 %v282_v46, %v165_v60 }
 0x227   :  { %v285_v61 = vadd.f32 %v284_v51, %v169_v6 }
 0x229   :  { %v293_v17 = vpop.f32.mrb[4].mxu1 }
 0x22a   :  { %v294_v24 = vadd.f32 %v293_v17, %v165_v60  ;;  %v295_v53 = vpop.f32.mrb[5].mxu1 }
 0x22b   :  { %v296_v2 = vadd.f32 %v295_v53, %v169_v6 }
 0x22d   :  { %v304_v14 = vpop.f32.mrb[6].mxu1 }
 0x22e   :  { %v305_v22 = vadd.f32 %v304_v14, %v165_v60  ;;  %v306_v57 = vpop.f32.mrb[7].mxu1 }
 0x22f   :  { %v307_v30 = vadd.f32 %v306_v57, %v169_v6 }
 0x259   :  { %v952_v49 = vpop.f32.mrb[0].mxu0 }
 0x25a   :  { %v32151_v54 = vadd.f32 %v952_v49, %v272_v42  ;;  %v954_v29 = vpop.f32.mrb[1].mxu0 }
 0x25b   :  { %v32153_v56 = vadd.f32 %v954_v29, %v274_v48 }
 0x25c   :  { %980 = vrot.lane.b32.xlu0 %v32151_v54, %s31571_s18  ;;  %v985_v45 = vsel %vm984_vm1, %v32151_v54, 0 }
 0x25d   :  { %v959_v50 = vpop.f32.mrb[2].mxu0  ;;  %v32159_v28 = vand.u32 4294901760, %v985_v45  ;;  %v1528_v36 = vand.u32 4294901760, %v32153_v56 }
 0x25e   :  { %v32162_v37 = vadd.f32 %v959_v50, %v283_v44  ;;  %v961_v38 = vpop.f32.mrb[3].mxu0 }
 0x25f   :  { %v32164_v39 = vadd.f32 %v961_v38, %v285_v61  ;;  %v32167_v43 = vsub.f32 %v985_v45, %v32159_v28  ;;  %v32178_v13 = vsub.f32 %v32153_v56, %v1528_v36 }
 0x260   :  { %982 = vrot.lane.b32.xlu1 %v32162_v37, %s31571_s18  ;;  %v987_v9 = vsel %vm984_vm1, %v32162_v37, 0 }
 0x261   :  { %v1531_v55 = vand.u32 4294901760, %v32164_v39  ;;  %v966_v12 = vpop.f32.mrb[4].mxu0  ;;  %v1062_v63 = vand.u32 4294901760, %v32167_v43  ;;  %v1617_v1 = vand.u32 4294901760, %v32178_v13  ;;  %v1070_v25 = vand.u32 4294901760, %v987_v9 }
 0x262   :  { %v32173_v0 = vadd.f32 %v966_v12, %v294_v24  ;;  %v968_v4 = vpop.f32.mrb[5].mxu0 }
 0x263   :  { %v32180_v20 = vadd.f32 %v968_v4, %v296_v2  ;;  %v1063_v31 = vsub.f32 %v32167_v43, %v1062_v63  ;;  %v32186_v33 = vsub.f32 %v32164_v39, %v1531_v55  ;;  %v1071_v60 = vsub.f32 %v987_v9, %v1070_v25 }
 0x264   :  { %v32235_v50 = vpack.c.bf16 %v1531_v55, %v1528_v36  ;;  %v63_v36 = vadd.s32 8, %v32138_v18  ;;  %v65_v55 = vand.u32 127, %v61_v27 }
 0x265   :  { %v5786_v21 = vand.u32 4294901760, %v32180_v20  ;;  %v973_v34 = vpop.f32.mrb[6].mxu0  ;;  %v1064_v35 = vand.u32 4294901760, %v1063_v31  ;;  %v1624_v3 = vand.u32 4294901760, %v32186_v33  ;;  %v32195_v40 = vpack.c.bf16 %v32186_v33, %v32178_v13 }
 0x266   :  { %v32189_v7 = vadd.f32 %v973_v34, %v305_v22  ;;  %v975_v16 = vpop.f32.mrb[7].mxu0  ;;  %v1072_v14 = vand.u32 4294901760, %v1071_v60  ;;  %vm32244_vm2 = vcmp.le.s32.totalorder %v65_v55, %v63_v36  ;;  %v36554_v31 = vmov 0 }
 0x267   :  { %v32197_v41 = vadd.f32 %v975_v16, %v307_v30  ;;  %27113 = vmatprep.mubr.f32.mxu1 %v1064_v35  ;;  %v32199_v8 = vpack.c.bf16 %v1624_v3, %v1617_v1  ;;  %v32205_v58 = vsub.f32 %v32180_v20, %v5786_v21  ;;  %v1625_v38 = vsub.f32 %v32186_v33, %v1624_v3 }
 0x268   :  { %v1073_v30 = vsub.f32 %v1071_v60, %v1072_v14  ;;  %v36555_v31 = vsel %vm32244_vm2, 4294967295, %v36554_v31  ;;  %vm32249_vm3 = vcmp.le.s32.totalorder %v65_v55, %v32138_v18  ;;  %v36557_v33 = vmov 0 }
 0x269   :  { %v5789_v26 = vand.u32 4294901760, %v32197_v41  ;;  %v5875_v23 = vand.u32 4294901760, %v32205_v58  ;;  %v1626_v12 = vand.u32 4294901760, %v1625_v38  ;;  %36556 = vst [vmem:[#allocation7_spill] sm:$0xff] %v36555_v31  ;;  %v36558_v33 = vsel %vm32249_vm3, 4294967295, %v36557_v33 }
 0x26a   :  { %v1074_v29 = vand.u32 4294901760, %v1073_v30  ;;  %36559 = vst [vmem:[#allocation8_spill] sm:$0xff] %v36558_v33 }
 0x26b   :  { %v32210_v59 = vsub.f32 %v32197_v41, %v5789_v26 }
 0x26d   :  { %v5882_v52 = vand.u32 4294901760, %v32210_v59  ;;  %v32216_v10 = vpack.c.bf16 %v32210_v59, %v32205_v58 }
 0x26f   :  { %v32222_v62 = vpack.c.bf16 %v5882_v52, %v5875_v23 }
 0x2ce   :  { %v981_v19 = vpop.permute.xlu0 %980 }
 0x2cf   :  { %v989_v15 = vsel %vm984_vm1, %v981_v19, 0 }
 0x2d0   :  { %v994_v11 = vand.u32 4294901760, %v989_v15 }
 0x2d2   :  { %v1082_v46 = vsub.f32 %v989_v15, %v994_v11  ;;  %v983_v51 = vpop.permute.xlu1 %982 }
 0x2d3   :  { %v991_v6 = vsel %vm984_vm1, %v983_v51, 0 }
 0x2d4   :  { %v1083_v17 = vand.u32 4294901760, %v1082_v46  ;;  %v997_v24 = vand.u32 4294901760, %v991_v6 }
 0x2d6   :  { %v28993_v53 = vpack.c.bf16 %v997_v24, %v994_v11  ;;  %v1089_v2 = vsub.f32 %v991_v6, %v997_v24  ;;  %v1084_v57 = vsub.f32 %v1082_v46, %v1083_v17 }
 0x2d8   :  { %v1090_v22 = vand.u32 4294901760, %v1089_v2  ;;  %28994 = vmatprep.subr.bf16.mxu1 %v28993_v53  ;;  %v1085_v48 = vand.u32 4294901760, %v1084_v57  ;;  %v29001_v45 = vpack.c.bf16 %v1089_v2, %v1082_v46 }
 0x2d9   :  { %28996 = vmatpush3.bf16.xpose.msra.mxu1 %v28993_v53 }
 0x2da   :  { %v1091_v42 = vsub.f32 %v1089_v2, %v1090_v22  ;;  %v29009_v61 = vpack.c.bf16 %v1090_v22, %v1083_v17 }
 0x2dc   :  { %v1092_v49 = vand.u32 4294901760, %v1091_v42 }
 0x2de   :  { %v28997_v44 = vpack.c.bf16 %v1092_v49, %v1085_v48 }
 0x2e0   :  { %27114 = vmatmul.mubr.f32.vlgmr.msra.gmra.mrb[8].mxu1 %v1074_v29  ;;  %28998 = vmatprep.subr.bf16.mxu1 %v28997_v44 }
 0x2e1   :  { %29000 = vmatpush3.bf16.xpose.msra.mxu1 %v28997_v44  ;;  %27120 = vmatprep.mubr.f32.mxu1 %v32159_v28 }
 0x2e2   :  { %29002 = vmatprep.subr.bf16.mxu1 %v29001_v45 }
 0x2e8   :  { %27121 = vmatmul.mubr.f32.vlgmr.msra.gmra.mrb[8].mxu1 %v1070_v25 }
 0x2e9   :  { %29004 = vmatpush3.bf16.xpose.msra.mxu1 %v29001_v45  ;;  %27127 = vmatprep.mubr.f32.mxu1 %v32167_v43  ;;  %v1618_v43 = vsub.f32 %v32178_v13, %v1617_v1 }
 0x2ea   :  { %29006 = vmatprep.subr.bf16.mxu1 %v28993_v53 }
 0x2f0   :  { %27128 = vmatmul.mubr.f32.vlgmr.msra.gmra.mrb[8].mxu1 %v1071_v60 }
 0x2f1   :  { %29008 = vmatpush3.bf16.xpose.msra.mxu1 %v28993_v53  ;;  %27134 = vmatprep.mubr.f32.mxu1 %v1062_v63  ;;  %v1619_v63 = vand.u32 4294901760, %v1618_v43 }
 0x2f2   :  { %29010 = vmatprep.subr.bf16.mxu1 %v29009_v61 }
 0x2f3   :  { %v29021_v4 = vpack.c.bf16 %v1626_v12, %v1619_v63 }
 0x2f8   :  { %27135 = vmatmul.mubr.f32.vlgmr.msra.gmra.mrb[8].mxu1 %v1072_v14 }
 0x2f9   :  { %29012 = vmatpush3.bf16.xpose.msra.mxu1 %v29009_v61  ;;  %27141 = vmatprep.mubr.f32.mxu1 %v32159_v28 }
 0x2fa   :  { %29014 = vmatprep.subr.bf16.mxu1 %v28993_v53 }
 0x300   :  { %27142 = vmatmul.mubr.f32.vlgmr.msra.gmra.mrb[8].mxu1 %v1070_v25 }
 0x301   :  { %29016 = vmatpush3.bf16.xpose.msra.mxu1 %v28993_v53  ;;  %27148 = vmatprep.mubr.f32.mxu1 %v32159_v28 }
 0x302   :  { %29018 = vmatprep.subr.bf16.mxu1 %v32235_v50 }
 0x308   :  { %27149 = vmatmul.mubr.f32.vlgmr.msra.gmra.mrb[8].mxu1 %v1070_v25 }
 0x309   :  { %29020 = vmatpush3.bf16.msra.mxu1 %v32235_v50 }
 0x30a   :  { %29022 = vmatprep.subr.bf16.mxu1 %v29021_v4 }
 0x3db   :  { %v27150_v28 = vpop.f32.mrb[8].mxu1 }
 0x3dc   :  { %v1496_v13 = vmul.f32 0.25, %v27150_v28  ;;  %v1485_v34 = vpop.f32.mrb[9].mxu1 }
 0x3dd   :  { %v1495_v35 = vmul.f32 0.25, %v1485_v34 }
 0x3de   :  { %v1498_v16 = vsel %vm32244_vm2, %v1496_v13, -inf }
 0x3df   :  { %v1502_v1 = vsel %vm984_vm1, %v1498_v16, -inf  ;;  %v1497_v27 = vsel %vm32249_vm3, %v1495_v35, -inf }
 0x3e0   :  { %1503 = vmax.xlane.f32.xlu0 %v1502_v1  ;;  %v1499_v3 = vsel %vm984_vm1, %v1497_v27, -inf }
 0x3e1   :  { %1500 = vmax.xlane.f32.xlu1 %v1499_v3 }
 0x46d   :  { %v1504_v9 = vpop.xlane.xlu0 %1503 }
 0x46e   :  { %v1506_v18 = vsub.f32 %v1498_v16, %v1504_v9  ;;  %v1501_v19 = vpop.xlane.xlu1 %1500 }
 0x46f   :  { %v1505_v25 = vsub.f32 %v1497_v27, %v1501_v19 }
 0x470   :  { %v1509_v15 = vmul.f32 1.442695, %v1506_v18 }
 0x471   :  { %v1507_v11 = vmul.f32 1.442695, %v1505_v25 }
 0x472   :  { %31324 = vpow2.f32 %v1509_v15 }
 0x473   :  { %31326 = vpow2.f32 %v1507_v11 }
 0x47c   :  { %v31325_v46 = vpop.eup %31324 }
 0x47d   :  { %v31327_v51 = vpop.eup %31326  ;;  %v1514_v60 = vsel %vm984_vm1, %v31325_v46, 0.0 }
 0x47e   :  { %1515 = vadd.xlane.f32.xlu1 %v1514_v60  ;;  %v1511_v6 = vsel %vm984_vm1, %v31327_v51, 0.0 }
 0x47f   :  { %1512 = vadd.xlane.f32.xlu0 %v1511_v6 }
 0x48f   :  { %2035 = vrot.lane.b32.xlu1 %v32162_v37, %s31572_s19 }
 0x493   :  { %2029 = vrot.lane.b32.xlu1 %v32151_v54, %s31573_s1 }
 0x495   :  { %2033 = vrot.lane.b32.xlu0 %v32151_v54, %s31572_s19 }
 0x497   :  { %2031 = vrot.lane.b32.xlu1 %v32162_v37, %s31573_s1 }
 0x50b   :  { %v1516_v17 = vpop.xlane.xlu1 %1515 }
 0x50c   :  { %31328 = vrcp.f32 %v1516_v17  ;;  %v1513_v24 = vpop.xlane.xlu0 %1512 }
 0x50d   :  { %31330 = vrcp.f32 %v1513_v24 }
 0x50f   :  { %v2036_v63 = vpop.permute.xlu1 %2035 }
 0x510   :  { %v2034_v36 = vpop.permute.xlu0 %2033  ;;  %v2043_v28 = vsel %vm984_vm1, %v2036_v63, 0 }
 0x511   :  { %v2049_v34 = vand.u32 4294901760, %v2043_v28 }
 0x513   :  { %v2030_v55 = vpop.permute.xlu1 %2029  ;;  %v2141_v16 = vsub.f32 %v2043_v28, %v2049_v34 }
 0x514   :  { %v2037_v13 = vsel %vm984_vm1, %v2030_v55, 0 }
 0x515   :  { %v2112_v35 = vand.u32 4294901760, %v2037_v13  ;;  %v2142_v18 = vand.u32 4294901760, %v2141_v16 }
 0x516   :  { %v31329_v53 = vpop.eup %31328 }
 0x517   :  { %v31331_v2 = vpop.eup %31330  ;;  %v1520_v14 = vmul.f32 %v31329_v53, %v31325_v46  ;;  %v2032_v27 = vpop.permute.xlu1 %2031  ;;  %v2113_v3 = vsub.f32 %v2037_v13, %v2112_v35 }
 0x518   :  { %v1519_v22 = vmul.f32 %v31331_v2, %v31327_v51  ;;  %v2039_v9 = vsel %vm984_vm1, %v2032_v27, 0  ;;  %v2143_v51 = vsub.f32 %v2141_v16, %v2142_v18 }
 0x519   :  { %v1525_v57 = vsel %vm984_vm1, %v1520_v14, 0  ;;  %v2122_v25 = vand.u32 4294901760, %v2039_v9  ;;  %v2114_v15 = vand.u32 4294901760, %v2113_v3 }
 0x51a   :  { %v1522_v30 = vsel %vm984_vm1, %v1519_v22, 0  ;;  %v1604_v42 = vand.u32 4294901760, %v1525_v57  ;;  %v2144_v17 = vand.u32 4294901760, %v2143_v51 }
 0x51b   :  { %v1594_v48 = vand.u32 4294901760, %v1522_v30  ;;  %v2123_v60 = vsub.f32 %v2039_v9, %v2122_v25 }
 0x51c   :  { %v1605_v49 = vsub.f32 %v1525_v57, %v1604_v42 }
 0x51d   :  { %v1595_v29 = vsub.f32 %v1522_v30, %v1594_v48  ;;  %v2124_v24 = vand.u32 4294901760, %v2123_v60 }
 0x51e   :  { %v1606_v44 = vand.u32 4294901760, %v1605_v49 }
 0x51f   :  { %v1596_v45 = vand.u32 4294901760, %v1595_v29  ;;  %v2125_v14 = vsub.f32 %v2123_v60, %v2124_v24 }
 0x520   :  { %v1607_v61 = vsub.f32 %v1605_v49, %v1606_v44 }
 0x521   :  { %v1597_v38 = vsub.f32 %v1595_v29, %v1596_v45  ;;  %v2126_v22 = vand.u32 4294901760, %v2125_v14 }
 0x522   :  { %v1608_v12 = vand.u32 4294901760, %v1607_v61 }
 0x523   :  { %v1598_v43 = vand.u32 4294901760, %v1597_v38 }
 0x525   :  { %27155 = vmatprep.mubr.f32.mxu1 %v1598_v43 }
 0x526   :  { %27156 = vmatmul.mubr.f32.vlgmr.msra.gmra.mrb[10].mxu1 %v1608_v12 }
 0x527   :  { %29024 = vmatpush3.bf16.msra.mxu1 %v29021_v4  ;;  %27162 = vmatprep.mubr.f32.mxu1 %v1594_v48  ;;  %v2041_v4 = vsel %vm984_vm1, %v2034_v36, 0 }
 0x528   :  { %29026 = vmatprep.subr.bf16.mxu1 %v32195_v40 }
 0x52e   :  { %27163 = vmatmul.mubr.f32.vlgmr.msra.gmra.mrb[10].mxu1 %v1604_v42 }
 0x52f   :  { %29028 = vmatpush3.bf16.msra.mxu1 %v32195_v40  ;;  %27169 = vmatprep.mubr.f32.mxu1 %v1595_v29  ;;  %v2046_v40 = vand.u32 4294901760, %v2041_v4 }
 0x530   :  { %29030 = vmatprep.subr.bf16.mxu1 %v32235_v50 }
 0x531   :  { %v2134_v1 = vsub.f32 %v2041_v4, %v2046_v40  ;;  %v29041_v11 = vpack.c.bf16 %v2049_v34, %v2046_v40 }
 0x533   :  { %v2135_v19 = vand.u32 4294901760, %v2134_v1  ;;  %v29049_v57 = vpack.c.bf16 %v2141_v16, %v2134_v1 }
 0x535   :  { %v2136_v46 = vsub.f32 %v2134_v1, %v2135_v19 }
 0x536   :  { %27170 = vmatmul.mubr.f32.vlgmr.msra.gmra.mrb[10].mxu1 %v1605_v49 }
 0x537   :  { %29032 = vmatpush3.bf16.msra.mxu1 %v32235_v50  ;;  %27176 = vmatprep.mubr.f32.mxu1 %v1596_v45  ;;  %v2137_v6 = vand.u32 4294901760, %v2136_v46 }
 0x538   :  { %29034 = vmatprep.subr.bf16.mxu1 %v32199_v8 }
 0x539   :  { %v29045_v2 = vpack.c.bf16 %v2144_v17, %v2137_v6 }
 0x53e   :  { %27177 = vmatmul.mubr.f32.vlgmr.msra.gmra.mrb[10].mxu1 %v1606_v44 }
 0x53f   :  { %29036 = vmatpush3.bf16.msra.mxu1 %v32199_v8  ;;  %27183 = vmatprep.mubr.f32.mxu1 %v1594_v48  ;;  %v2115_v8 = vsub.f32 %v2113_v3, %v2114_v15 }
 0x540   :  { %29038 = vmatprep.subr.bf16.mxu1 %v32235_v50 }
 0x541   :  { %v2116_v53 = vand.u32 4294901760, %v2115_v8 }
 0x546   :  { %27184 = vmatmul.mubr.f32.vlgmr.msra.gmra.mrb[10].mxu1 %v1604_v42 }
 0x547   :  { %29040 = vmatpush3.bf16.msra.mxu1 %v32235_v50  ;;  %27190 = vmatprep.mubr.f32.mxu1 %v1594_v48  ;;  %v29057_v50 = vpack.c.bf16 %v2142_v18, %v2135_v19 }
 0x548   :  { %29042 = vmatprep.subr.bf16.mxu1 %v29041_v11 }
 0x54e   :  { %27191 = vmatmul.mubr.f32.vlgmr.msra.gmra.mrb[10].mxu1 %v1604_v42 }
 0x54f   :  { %27197 = vmatprep.mubr.f32.mxu1 %v2116_v53 }
 0x550   :  { %29044 = vmatpush3.bf16.xpose.msra.mxu1 %v29041_v11 }
 0x551   :  { %29046 = vmatprep.subr.bf16.mxu1 %v29045_v2 }
 0x557   :  { %27198 = vmatmul.mubr.f32.vlgmr.msra.gmra.mrb[12].mxu1 %v2126_v22 }
 0x558   :  { %29048 = vmatpush3.bf16.xpose.msra.mxu1 %v29045_v2  ;;  %27204 = vmatprep.mubr.f32.mxu1 %v2112_v35 }
 0x559   :  { %29050 = vmatprep.subr.bf16.mxu1 %v29049_v57 }
 0x55f   :  { %27205 = vmatmul.mubr.f32.vlgmr.msra.gmra.mrb[12].mxu1 %v2122_v25 }
 0x560   :  { %29052 = vmatpush3.bf16.xpose.msra.mxu1 %v29049_v57  ;;  %27211 = vmatprep.mubr.f32.mxu1 %v2113_v3 }
 0x561   :  { %29054 = vmatprep.subr.bf16.mxu1 %v29041_v11 }
 0x567   :  { %27212 = vmatmul.mubr.f32.vlgmr.msra.gmra.mrb[12].mxu1 %v2123_v60 }
 0x568   :  { %29056 = vmatpush3.bf16.xpose.msra.mxu1 %v29041_v11  ;;  %27218 = vmatprep.mubr.f32.mxu1 %v2114_v15 }
 0x569   :  { %29058 = vmatprep.subr.bf16.mxu1 %v29057_v50 }
 0x56f   :  { %27219 = vmatmul.mubr.f32.vlgmr.msra.gmra.mrb[12].mxu1 %v2124_v24 }
 0x570   :  { %29060 = vmatpush3.bf16.xpose.msra.mxu1 %v29057_v50  ;;  %27225 = vmatprep.mubr.f32.mxu1 %v2112_v35 }
 0x571   :  { %29062 = vmatprep.subr.bf16.mxu1 %v29041_v11 }
 0x577   :  { %27226 = vmatmul.mubr.f32.vlgmr.msra.gmra.mrb[12].mxu1 %v2122_v25 }
 0x578   :  { %29064 = vmatpush3.bf16.xpose.msra.mxu1 %v29041_v11  ;;  %27232 = vmatprep.mubr.f32.mxu1 %v2112_v35 }
 0x57f   :  { %27233 = vmatmul.mubr.f32.vlgmr.msra.gmra.mrb[12].mxu1 %v2122_v25 }
 0x621   :  { %v32283_v30 = vpop.f32.mrb[10].mxu1 }
 0x622   :  { %v32285_v42 = vpop.f32.mrb[11].mxu1 }
 0x652   :  { %v27234_v48 = vpop.f32.mrb[12].mxu1 }
 0x653   :  { %v2548_v49 = vmul.f32 0.25, %v27234_v48  ;;  %v2537_v29 = vpop.f32.mrb[13].mxu1 }
 0x654   :  { %v2547_v44 = vmul.f32 0.25, %v2537_v29 }
 0x655   :  { %v2550_v45 = vsel %vm32244_vm2, %v2548_v49, -inf }
 0x656   :  { %v2554_v61 = vsel %vm984_vm1, %v2550_v45, -inf  ;;  %v2549_v38 = vsel %vm32249_vm3, %v2547_v44, -inf }
 0x657   :  { %2555 = vmax.xlane.f32.xlu1 %v2554_v61  ;;  %v2551_v43 = vsel %vm984_vm1, %v2549_v38, -inf }
 0x658   :  { %2552 = vmax.xlane.f32.xlu0 %v2551_v43 }
 0x668   :  { %2577 = vrot.lane.b32.xlu1 %v32164_v39, %s31573_s1 }
 0x66c   :  { %3093 = vrot.lane.b32.xlu1 %v32151_v54, %s31574_s21 }
 0x670   :  { %3095 = vrot.lane.b32.xlu1 %v32162_v37, %s31574_s21 }
 0x674   :  { %3091 = vrot.lane.b32.xlu1 %v32162_v37, %s31575_s22 }
 0x6e4   :  { %v2556_v12 = vpop.xlane.xlu1 %2555 }
 0x6e5   :  { %v2558_v63 = vsub.f32 %v2550_v45, %v2556_v12  ;;  %v2553_v36 = vpop.xlane.xlu0 %2552 }
 0x6e6   :  { %v2557_v55 = vsub.f32 %v2549_v38, %v2553_v36 }
 0x6e7   :  { %v2561_v28 = vmul.f32 1.442695, %v2558_v63 }
 0x6e8   :  { %v2559_v4 = vmul.f32 1.442695, %v2557_v55  ;;  %v2578_v16 = vpop.permute.xlu1 %2577 }
 0x6e9   :  { %31332 = vpow2.f32 %v2561_v28  ;;  %v2591_v27 = vand.u32 4294901760, %v2578_v16 }
 0x6ea   :  { %31334 = vpow2.f32 %v2559_v4 }
 0x6eb   :  { %v32307_v18 = vsub.f32 %v2578_v16, %v2591_v27 }
 0x6ec   :  { %v3094_v1 = vpop.permute.xlu1 %3093 }
 0x6ed   :  { %v2684_v15 = vand.u32 4294901760, %v32307_v18  ;;  %v3101_v11 = vsel %vm984_vm1, %v3094_v1, 0 }
 0x6ee   :  { %v3106_v6 = vand.u32 4294901760, %v3101_v11 }
 0x6ef   :  { %v2685_v14 = vsub.f32 %v32307_v18, %v2684_v15 }
 0x6f0   :  { %v3096_v9 = vpop.permute.xlu1 %3095  ;;  %v32334_v43 = vsub.f32 %v3101_v11, %v3106_v6 }
 0x6f1   :  { %v3103_v25 = vsel %vm984_vm1, %v3096_v9, 0  ;;  %v2686_v12 = vand.u32 4294901760, %v2685_v14 }
 0x6f2   :  { %v3109_v51 = vand.u32 4294901760, %v3103_v25  ;;  %v3195_v1 = vand.u32 4294901760, %v32334_v43 }
 0x6f3   :  { %v31333_v13 = vpop.eup %31332 }
 0x6f4   :  { %v2566_v34 = vsel %vm984_vm1, %v31333_v13, 0.0  ;;  %v31335_v40 = vpop.eup %31334  ;;  %v32319_v22 = vpack.c.bf16 %v3109_v51, %v3106_v6  ;;  %v32324_v48 = vsub.f32 %v3103_v25, %v3109_v51  ;;  %v3092_v49 = vpop.permute.xlu1 %3091 }
 0x6f5   :  { %2567 = vadd.xlane.f32.xlu0 %v2566_v34  ;;  %v2563_v35 = vsel %vm984_vm1, %v31335_v40, 0.0  ;;  %v3099_v36 = vsel %vm984_vm1, %v3092_v49, 0 }
 0x6f9   :  { %2564 = vadd.xlane.f32.xlu0 %v2563_v35 }
 0x70f   :  { %2575 = vrot.lane.b32.xlu0 %v32153_v56, %s31573_s1 }
 0x713   :  { %3089 = vrot.lane.b32.xlu0 %v32151_v54, %s31575_s22 }
 0x782   :  { %v2568_v3 = vpop.xlane.xlu0 %2567 }
 0x783   :  { %31336 = vrcp.f32 %v2568_v3 }
 0x786   :  { %v2565_v19 = vpop.xlane.xlu0 %2564 }
 0x787   :  { %31338 = vrcp.f32 %v2565_v19 }
 0x78a   :  { %v2576_v46 = vpop.permute.xlu0 %2575 }
 0x78b   :  { %v2588_v60 = vand.u32 4294901760, %v2576_v46 }
 0x78d   :  { %v31337_v8 = vpop.eup %31336  ;;  %v32312_v17 = vpack.c.bf16 %v2591_v27, %v2588_v60  ;;  %v32314_v24 = vsub.f32 %v2576_v46, %v2588_v60  ;;  %v32344_v27 = vand.u32 4294901760, %v3099_v36  ;;  %v3196_v60 = vsub.f32 %v32334_v43, %v3195_v1 }
 0x78e   :  { %v2572_v53 = vmul.f32 %v31337_v8, %v31333_v13  ;;  %v3090_v2 = vpop.permute.xlu0 %3089  ;;  %v3202_v13 = vand.u32 4294901760, %v32324_v48 }
 0x78f   :  { %v2677_v57 = vand.u32 4294901760, %v32314_v24  ;;  %v3097_v50 = vsel %vm984_vm1, %v3090_v2, 0  ;;  %29066 = vmatprep.subr.bf16.mxu1 %v32312_v17  ;;  %v3183_v46 = vsub.f32 %v3099_v36, %v32344_v27 }
 0x790   :  { %v32326_v29 = vand.u32 4294901760, %v3097_v50  ;;  %29068 = vmatpush3.bf16.msra.mxu1 %v32312_v17  ;;  %v2585_v44 = vsel %vm984_vm1, %v2572_v53, 0  ;;  %v3203_v25 = vsub.f32 %v32324_v48, %v3202_v13 }
 0x791   :  { %v31339_v45 = vpop.eup %31338  ;;  %29090 = vmatprep.subr.bf16.mxu1 %v32319_v22  ;;  %v2678_v61 = vsub.f32 %v32314_v24, %v2677_v57  ;;  %v32332_v38 = vand.u32 4294901760, %v2585_v44  ;;  %v3184_v2 = vand.u32 4294901760, %v3183_v46 }
 0x792   :  { %v2571_v63 = vmul.f32 %v31339_v45, %v31335_v40  ;;  %v32338_v55 = vsub.f32 %v3097_v50, %v32326_v29  ;;  %v29073_v40 = vpack.c.bf16 %v32307_v18, %v32314_v24  ;;  %v3204_v24 = vand.u32 4294901760, %v3203_v25 }
 0x793   :  { %v2679_v28 = vand.u32 4294901760, %v2678_v61  ;;  %v2665_v4 = vsub.f32 %v2585_v44, %v32332_v38  ;;  %v3197_v50 = vand.u32 4294901760, %v3196_v60  ;;  %v3185_v45 = vsub.f32 %v3183_v46, %v3184_v2 }
 0x794   :  { %v2582_v34 = vsel %vm984_vm1, %v2571_v63, 0  ;;  %v3174_v19 = vand.u32 4294901760, %v32338_v55  ;;  %v29081_v61 = vpack.c.bf16 %v2684_v15, %v2677_v57  ;;  %v29097_v63 = vpack.c.bf16 %v32324_v48, %v32334_v43 }
 0x795   :  { %v29069_v35 = vpack.c.bf16 %v2686_v12, %v2679_v28  ;;  %v2654_v16 = vand.u32 4294901760, %v2582_v34  ;;  %v2666_v3 = vand.u32 4294901760, %v2665_v4  ;;  %v29093_v44 = vpack.c.bf16 %v3204_v24, %v3197_v50 }
 0x796   :  { %v3175_v6 = vsub.f32 %v32338_v55, %v3174_v19  ;;  %v3186_v12 = vand.u32 4294901760, %v3185_v45  ;;  %v29105_v18 = vpack.c.bf16 %v3202_v13, %v3195_v1 }
 0x797   :  { %29070 = vmatprep.subr.bf16.mxu0 %v29069_v35  ;;  %27246 = vmatprep.mubr.f32.mxu0 %v2654_v16  ;;  %v2655_v9 = vsub.f32 %v2582_v34, %v2654_v16  ;;  %v2667_v51 = vsub.f32 %v2665_v4, %v2666_v3 }
 0x798   :  { %29072 = vmatpush3.bf16.msra.mxu0 %v29069_v35  ;;  %v3176_v49 = vand.u32 4294901760, %v3175_v6 }
 0x799   :  { %29074 = vmatprep.subr.bf16.mxu0 %v29073_v40  ;;  %v2656_v11 = vand.u32 4294901760, %v2655_v9  ;;  %v2668_v14 = vand.u32 4294901760, %v2667_v51 }
 0x79b   :  { %27247 = vmatmul.mubr.f32.vlgmr.msra.gmra.mrb[8].mxu0 %v32332_v38  ;;  %v2657_v8 = vsub.f32 %v2655_v9, %v2656_v11 }
 0x79c   :  { %29076 = vmatpush3.bf16.msra.mxu0 %v29073_v40  ;;  %27253 = vmatprep.mubr.f32.mxu0 %v2655_v9 }
 0x79d   :  { %29078 = vmatprep.subr.bf16.mxu0 %v32312_v17  ;;  %v2658_v53 = vand.u32 4294901760, %v2657_v8 }
 0x79f   :  { %27239 = vmatprep.mubr.f32.mxu1 %v2658_v53 }
 0x7a0   :  { %27240 = vmatmul.mubr.f32.vlgmr.msra.gmra.mrb[14].mxu1 %v2668_v14 }
 0x7a1   :  { %29092 = vmatpush3.bf16.xpose.msra.mxu1 %v32319_v22  ;;  %27281 = vmatprep.mubr.f32.mxu1 %v3176_v49 }
 0x7a2   :  { %29094 = vmatprep.subr.bf16.mxu1 %v29093_v44 }
 0x7a3   :  { %27254 = vmatmul.mubr.f32.vlgmr.msra.gmra.mrb[8].mxu0 %v2665_v4 }
 0x7a4   :  { %29080 = vmatpush3.bf16.msra.mxu0 %v32312_v17  ;;  %27260 = vmatprep.mubr.f32.mxu0 %v2656_v11 }
 0x7a5   :  { %29082 = vmatprep.subr.bf16.mxu0 %v29081_v61 }
 0x7a8   :  { %27282 = vmatmul.mubr.f32.vlgmr.msra.gmra.mrb[16].mxu1 %v3186_v12 }
 0x7a9   :  { %29096 = vmatpush3.bf16.xpose.msra.mxu1 %v29093_v44  ;;  %27288 = vmatprep.mubr.f32.mxu1 %v32326_v29 }
 0x7aa   :  { %29098 = vmatprep.subr.bf16.mxu1 %v29097_v63 }
 0x7ab   :  { %27261 = vmatmul.mubr.f32.vlgmr.msra.gmra.mrb[8].mxu0 %v2666_v3 }
 0x7ac   :  { %29084 = vmatpush3.bf16.msra.mxu0 %v29081_v61  ;;  %27267 = vmatprep.mubr.f32.mxu0 %v2654_v16 }
 0x7ad   :  { %29086 = vmatprep.subr.bf16.mxu0 %v32312_v17 }
 0x7b0   :  { %27289 = vmatmul.mubr.f32.vlgmr.msra.gmra.mrb[16].mxu1 %v32344_v27 }
 0x7b1   :  { %29100 = vmatpush3.bf16.xpose.msra.mxu1 %v29097_v63  ;;  %27295 = vmatprep.mubr.f32.mxu1 %v32338_v55 }
 0x7b2   :  { %29102 = vmatprep.subr.bf16.mxu1 %v32319_v22 }
 0x7b3   :  { %27268 = vmatmul.mubr.f32.vlgmr.msra.gmra.mrb[8].mxu0 %v32332_v38 }
 0x7b4   :  { %29088 = vmatpush3.bf16.msra.mxu0 %v32312_v17  ;;  %27274 = vmatprep.mubr.f32.mxu0 %v2654_v16 }
 0x7b8   :  { %27296 = vmatmul.mubr.f32.vlgmr.msra.gmra.mrb[16].mxu1 %v3183_v46 }
 0x7b9   :  { %29104 = vmatpush3.bf16.xpose.msra.mxu1 %v32319_v22  ;;  %27302 = vmatprep.mubr.f32.mxu1 %v3174_v19 }
 0x7ba   :  { %29106 = vmatprep.subr.bf16.mxu1 %v29105_v18 }
 0x7bb   :  { %27275 = vmatmul.mubr.f32.vlgmr.msra.gmra.mrb[8].mxu0 %v32332_v38 }
 0x7c0   :  { %27303 = vmatmul.mubr.f32.vlgmr.msra.gmra.mrb[16].mxu1 %v3184_v2 }
 0x7c1   :  { %29108 = vmatpush3.bf16.xpose.msra.mxu1 %v29105_v18  ;;  %27309 = vmatprep.mubr.f32.mxu1 %v32326_v29 }
 0x7c2   :  { %29110 = vmatprep.subr.bf16.mxu1 %v32319_v22 }
 0x7c8   :  { %27310 = vmatmul.mubr.f32.vlgmr.msra.gmra.mrb[16].mxu1 %v32344_v27 }
 0x7c9   :  { %29112 = vmatpush3.bf16.xpose.msra.mxu1 %v32319_v22  ;;  %27316 = vmatprep.mubr.f32.mxu1 %v32326_v29 }
 0x7d0   :  { %27317 = vmatmul.mubr.f32.vlgmr.msra.gmra.mrb[16].mxu1 %v32344_v27 }
 0x873   :  { %v27241_v15 = vpop.f32.mrb[14].mxu1 }
 0x874   :  { %v2660_v17 = vpop.f32.mrb[15].mxu1 }
 0x88e   :  { %v27276_v57 = vpop.f32.mrb[8].mxu0 }
 0x88f   :  { %v32376_v48 = vadd.f32 %v27276_v57, %v27241_v15  ;;  %v3079_v38 = vpop.f32.mrb[9].mxu0 }
 0x890   :  { %v32378_v43 = vadd.f32 %v3079_v38, %v2660_v17 }
 0x8a3   :  { %v27318_v36 = vpop.f32.mrb[16].mxu1 }
 0x8a4   :  { %v3608_v55 = vmul.f32 0.25, %v27318_v36  ;;  %v3597_v28 = vpop.f32.mrb[17].mxu1 }
 0x8a5   :  { %v3607_v4 = vmul.f32 0.25, %v3597_v28 }
 0x8a6   :  { %v3610_v13 = vsel %vm32244_vm2, %v3608_v55, -inf }
 0x8a7   :  { %v3614_v22 = vsel %vm984_vm1, %v3610_v13, -inf  ;;  %v3609_v29 = vsel %vm32249_vm3, %v3607_v4, -inf }
 0x8a8   :  { %3615 = vmax.xlane.f32.xlu1 %v3614_v22  ;;  %v3611_v34 = vsel %vm984_vm1, %v3609_v29, -inf }
 0x8a9   :  { %3612 = vmax.xlane.f32.xlu0 %v3611_v34 }
 0x8b9   :  { %3635 = vrot.lane.b32.xlu1 %v32164_v39, %s31575_s22 }
 0x8bd   :  { %4151 = vrot.lane.b32.xlu1 %v32151_v54, %s36367_s23 }
 0x8c1   :  { %4153 = vrot.lane.b32.xlu1 %v32162_v37, %s36367_s23 }
 0x8c5   :  { %4149 = vrot.lane.b32.xlu1 %v32162_v37, %s36365_s24 }
 0x935   :  { %v3616_v35 = vpop.xlane.xlu1 %3615 }
 0x936   :  { %v3618_v16 = vsub.f32 %v3610_v13, %v3616_v35  ;;  %v3613_v1 = vpop.xlane.xlu0 %3612 }
 0x937   :  { %v3617_v27 = vsub.f32 %v3609_v29, %v3613_v1 }
 0x938   :  { %v3621_v3 = vmul.f32 1.442695, %v3618_v16 }
 0x939   :  { %v3619_v40 = vmul.f32 1.442695, %v3617_v27  ;;  %v3636_v37 = vpop.permute.xlu1 %3635 }
 0x93a   :  { %31340 = vpow2.f32 %v3621_v3  ;;  %v3649_v51 = vand.u32 4294901760, %v3636_v37 }
 0x93b   :  { %31342 = vpow2.f32 %v3619_v40 }
 0x93c   :  { %v3741_v8 = vsub.f32 %v3636_v37, %v3649_v51 }
 0x93d   :  { %v4152_v1 = vpop.permute.xlu1 %4151 }
 0x93e   :  { %v3742_v24 = vand.u32 4294901760, %v3741_v8 }
 0x940   :  { %v3743_v45 = vsub.f32 %v3741_v8, %v3742_v24 }
 0x941   :  { %v4154_v27 = vpop.permute.xlu1 %4153 }
 0x942   :  { %v3744_v17 = vand.u32 4294901760, %v3743_v45 }
 0x944   :  { %v31341_v9 = vpop.eup %31340 }
 0x945   :  { %v3626_v19 = vsel %vm984_vm1, %v31341_v9, 0.0  ;;  %v31343_v25 = vpop.eup %31342 }
 0x946   :  { %3627 = vadd.xlane.f32.xlu0 %v3626_v19  ;;  %v3623_v11 = vsel %vm984_vm1, %v31343_v25, 0.0  ;;  %v4159_v19 = vsel %vm984_vm1, %v4152_v1, 0 }
 0x947   :  { %v4164_v37 = vand.u32 4294901760, %v4159_v19 }
 0x94a   :  { %3624 = vadd.xlane.f32.xlu0 %v3623_v11 }
 0x960   :  { %3633 = vrot.lane.b32.xlu0 %v32153_v56, %s31575_s22 }
 0x964   :  { %4147 = vrot.lane.b32.xlu0 %v32151_v54, %s36365_s24 }
 0x9d3   :  { %v3628_v46 = vpop.xlane.xlu0 %3627 }
 0x9d4   :  { %31344 = vrcp.f32 %v3628_v46 }
 0x9d7   :  { %v3625_v60 = vpop.xlane.xlu0 %3624 }
 0x9d8   :  { %31346 = vrcp.f32 %v3625_v60  ;;  %v4150_v60 = vpop.permute.xlu1 %4149 }
 0x9db   :  { %v3634_v6 = vpop.permute.xlu0 %3633 }
 0x9dc   :  { %v3646_v53 = vand.u32 4294901760, %v3634_v6 }
 0x9de   :  { %v31345_v2 = vpop.eup %31344  ;;  %v32400_v14 = vpack.c.bf16 %v3649_v51, %v3646_v53  ;;  %v3734_v50 = vsub.f32 %v3634_v6, %v3646_v53 }
 0x9df   :  { %v3632_v49 = vmul.f32 %v31345_v2, %v31341_v9  ;;  %v4148_v40 = vpop.permute.xlu0 %4147  ;;  %v4161_v9 = vsel %vm984_vm1, %v4154_v27, 0 }
 0x9e0   :  { %v3735_v44 = vand.u32 4294901760, %v3734_v50  ;;  %29114 = vmatprep.subr.bf16.mxu0 %v32400_v14  ;;  %v29121_v16 = vpack.c.bf16 %v3741_v8, %v3734_v50  ;;  %v4167_v11 = vand.u32 4294901760, %v4161_v9  ;;  %v4252_v8 = vsub.f32 %v4159_v19, %v4164_v37 }
 0x9e1   :  { %29116 = vmatpush3.bf16.msra.mxu0 %v32400_v14  ;;  %v3643_v54 = vsel %vm984_vm1, %v3632_v49, 0 }
 0x9e2   :  { %v31347_v61 = vpop.eup %31346  ;;  %v3736_v12 = vsub.f32 %v3734_v50, %v3735_v44  ;;  %v32405_v63 = vand.u32 4294901760, %v3643_v54  ;;  %v29129_v3 = vpack.c.bf16 %v3742_v24, %v3735_v44  ;;  %v4259_v51 = vsub.f32 %v4161_v9, %v4167_v11 }
 0x9e3   :  { %v3631_v18 = vmul.f32 %v31347_v61, %v31343_v25  ;;  %v4155_v25 = vsel %vm984_vm1, %v4148_v40, 0  ;;  %v4157_v24 = vsel %vm984_vm1, %v4150_v60, 0  ;;  %v4253_v2 = vand.u32 4294901760, %v4252_v8 }
 0x9e4   :  { %v3737_v15 = vand.u32 4294901760, %v3736_v12  ;;  %v3723_v57 = vsub.f32 %v3643_v54, %v32405_v63  ;;  %v4230_v46 = vand.u32 4294901760, %v4155_v25  ;;  %v4260_v53 = vand.u32 4294901760, %v4259_v51 }
 0x9e5   :  { %v3640_v38 = vsel %vm984_vm1, %v3631_v18, 0  ;;  %v4240_v50 = vand.u32 4294901760, %v4157_v24  ;;  %v29137_v44 = vpack.c.bf16 %v4167_v11, %v4164_v37  ;;  %v4254_v12 = vsub.f32 %v4252_v8, %v4253_v2 }
 0x9e6   :  { %v29117_v36 = vpack.c.bf16 %v3744_v17, %v3737_v15  ;;  %v3712_v55 = vand.u32 4294901760, %v3640_v38  ;;  %v3724_v28 = vand.u32 4294901760, %v3723_v57  ;;  %v4231_v6 = vsub.f32 %v4155_v25, %v4230_v46 }
 0x9e7   :  { %v4261_v45 = vsub.f32 %v4259_v51, %v4260_v53  ;;  %v4241_v54 = vsub.f32 %v4157_v24, %v4240_v50 }
 0x9e8   :  { %29118 = vmatprep.subr.bf16.mxu0 %v29117_v36  ;;  %v3713_v4 = vsub.f32 %v3640_v38, %v3712_v55  ;;  %v3725_v22 = vsub.f32 %v3723_v57, %v3724_v28  ;;  %v4232_v49 = vand.u32 4294901760, %v4231_v6 }
 0x9e9   :  { %v4262_v18 = vand.u32 4294901760, %v4261_v45  ;;  %v4242_v15 = vand.u32 4294901760, %v4241_v54 }
 0x9ea   :  { %v3714_v13 = vand.u32 4294901760, %v3713_v4  ;;  %v3726_v35 = vand.u32 4294901760, %v3725_v22  ;;  %v4233_v61 = vsub.f32 %v4231_v6, %v4232_v49 }
 0x9ec   :  { %v3715_v29 = vsub.f32 %v3713_v4, %v3714_v13  ;;  %v4234_v17 = vand.u32 4294901760, %v4233_v61 }
 0x9ee   :  { %v3716_v34 = vand.u32 4294901760, %v3715_v29 }
 0x9f0   :  { %27323 = vmatprep.mubr.f32.mxu0 %v3716_v34 }
 0x9f1   :  { %27324 = vmatmul.mubr.f32.vlgmr.msra.gmra.mrb[10].mxu0 %v3726_v35 }
 0x9f2   :  { %29120 = vmatpush3.bf16.msra.mxu0 %v29117_v36  ;;  %27330 = vmatprep.mubr.f32.mxu0 %v3712_v55  ;;  %v4243_v36 = vsub.f32 %v4241_v54, %v4242_v15 }
 0x9f3   :  { %29122 = vmatprep.subr.bf16.mxu0 %v29121_v16 }
 0x9f9   :  { %27331 = vmatmul.mubr.f32.vlgmr.msra.gmra.mrb[10].mxu0 %v32405_v63 }
 0x9fa   :  { %29124 = vmatpush3.bf16.msra.mxu0 %v29121_v16  ;;  %27337 = vmatprep.mubr.f32.mxu0 %v3713_v4  ;;  %v5883_v4 = vsub.f32 %v32210_v59, %v5882_v52 }
 0x9fb   :  { %29126 = vmatprep.subr.bf16.mxu0 %v32400_v14 }
 0x9fc   :  { %v5884_v22 = vand.u32 4294901760, %v5883_v4 }
 0xa01   :  { %27338 = vmatmul.mubr.f32.vlgmr.msra.gmra.mrb[10].mxu0 %v3723_v57  ;;  %v4255_v57 = vand.u32 4294901760, %v4254_v12 }
 0xa02   :  { %29128 = vmatpush3.bf16.msra.mxu0 %v32400_v14  ;;  %27344 = vmatprep.mubr.f32.mxu0 %v3714_v13  ;;  %v5876_v13 = vsub.f32 %v32205_v58, %v5875_v23 }
 0xa03   :  { %29130 = vmatprep.subr.bf16.mxu0 %v29129_v3  ;;  %v29141_v38 = vpack.c.bf16 %v4262_v18, %v4255_v57 }
 0xa04   :  { %v5877_v29 = vand.u32 4294901760, %v5876_v13 }
 0xa06   :  { %v32433_v34 = vpack.c.bf16 %v5884_v22, %v5877_v29 }
 0xa09   :  { %27345 = vmatmul.mubr.f32.vlgmr.msra.gmra.mrb[10].mxu0 %v3724_v28  ;;  %v4244_v28 = vand.u32 4294901760, %v4243_v36 }
 0xa0a   :  { %29132 = vmatpush3.bf16.msra.mxu0 %v29129_v3  ;;  %27351 = vmatprep.mubr.f32.mxu0 %v3712_v55 }
 0xa0b   :  { %29134 = vmatprep.subr.bf16.mxu0 %v32400_v14 }
 0xa11   :  { %27352 = vmatmul.mubr.f32.vlgmr.msra.gmra.mrb[10].mxu0 %v32405_v63 }
 0xa12   :  { %29136 = vmatpush3.bf16.msra.mxu0 %v32400_v14  ;;  %27358 = vmatprep.mubr.f32.mxu0 %v3712_v55  ;;  %v29145_v14 = vpack.c.bf16 %v4259_v51, %v4252_v8  ;;  %v29153_v55 = vpack.c.bf16 %v4260_v53, %v4253_v2 }
 0xa13   :  { %29138 = vmatprep.subr.bf16.mxu0 %v29137_v44 }
 0xa19   :  { %27359 = vmatmul.mubr.f32.vlgmr.msra.gmra.mrb[10].mxu0 %v32405_v63  ;;  %v32424_v63 = vpack.c.bf16 %v5789_v26, %v5786_v21 }
 0xa1a   :  { %27365 = vmatprep.mubr.f32.mxu0 %v4234_v17 }
 0xa1b   :  { %29140 = vmatpush3.bf16.xpose.msra.mxu0 %v29137_v44 }
 0xa1c   :  { %29142 = vmatprep.subr.bf16.mxu0 %v29141_v38 }
 0xa22   :  { %27366 = vmatmul.mubr.f32.vlgmr.msra.gmra.mrb[12].mxu0 %v4244_v28 }
 0xa23   :  { %29144 = vmatpush3.bf16.xpose.msra.mxu0 %v29141_v38  ;;  %27372 = vmatprep.mubr.f32.mxu0 %v4230_v46 }
 0xa24   :  { %29146 = vmatprep.subr.bf16.mxu0 %v29145_v14 }
 0xa2a   :  { %27373 = vmatmul.mubr.f32.vlgmr.msra.gmra.mrb[12].mxu0 %v4240_v50 }
 0xa2b   :  { %29148 = vmatpush3.bf16.xpose.msra.mxu0 %v29145_v14  ;;  %27379 = vmatprep.mubr.f32.mxu0 %v4231_v6 }
 0xa2c   :  { %29150 = vmatprep.subr.bf16.mxu0 %v29137_v44 }
 0xa32   :  { %27380 = vmatmul.mubr.f32.vlgmr.msra.gmra.mrb[12].mxu0 %v4241_v54 }
 0xa33   :  { %29152 = vmatpush3.bf16.xpose.msra.mxu0 %v29137_v44  ;;  %27386 = vmatprep.mubr.f32.mxu0 %v4232_v49 }
 0xa34   :  { %29154 = vmatprep.subr.bf16.mxu0 %v29153_v55 }
 0xa3a   :  { %27387 = vmatmul.mubr.f32.vlgmr.msra.gmra.mrb[12].mxu0 %v4242_v15 }
 0xa3b   :  { %29156 = vmatpush3.bf16.xpose.msra.mxu0 %v29153_v55  ;;  %27393 = vmatprep.mubr.f32.mxu0 %v4230_v46 }
 0xa3c   :  { %29158 = vmatprep.subr.bf16.mxu0 %v29137_v44 }
 0xa42   :  { %27394 = vmatmul.mubr.f32.vlgmr.msra.gmra.mrb[12].mxu0 %v4240_v50 }
 0xa43   :  { %29160 = vmatpush3.bf16.xpose.msra.mxu0 %v29137_v44  ;;  %27400 = vmatprep.mubr.f32.mxu0 %v4230_v46 }
 0xa44   :  { %29210 = vmatprep.subr.bf16.mxu0 %v32424_v63 }
 0xa4a   :  { %27401 = vmatmul.mubr.f32.vlgmr.msra.gmra.mrb[12].mxu0 %v4240_v50 }
 0xa4b   :  { %29212 = vmatpush3.bf16.msra.mxu0 %v32424_v63 }
 0xa4c   :  { %29214 = vmatprep.subr.bf16.mxu0 %v32433_v34 }
 0xaec   :  { %v32437_v21 = vpop.f32.mrb[10].mxu0 }
 0xaed   :  { %v32439_v26 = vpop.f32.mrb[11].mxu0 }
 0xb1d   :  { %v27402_v59 = vpop.f32.mrb[12].mxu0 }
 0xb1e   :  { %v4666_v52 = vmul.f32 0.25, %v27402_v59  ;;  %v4655_v35 = vpop.f32.mrb[13].mxu0 }
 0xb1f   :  { %v4665_v16 = vmul.f32 0.25, %v4655_v35 }
 0xb20   :  { %v4668_v58 = vsel %vm32244_vm2, %v4666_v52, -inf }
 0xb21   :  { %v4672_v23 = vsel %vm984_vm1, %v4668_v58, -inf  ;;  %v4667_v1 = vsel %vm32249_vm3, %v4665_v16, -inf }
 0xb22   :  { %4673 = vmax.xlane.f32.xlu1 %v4672_v23  ;;  %v4669_v27 = vsel %vm984_vm1, %v4667_v1, -inf }
 0xb23   :  { %4670 = vmax.xlane.f32.xlu0 %v4669_v27 }
 0xb33   :  { %4693 = vrot.lane.b32.xlu1 %v32164_v39, %s36365_s24 }
 0xb37   :  { %5239 = vrot.lane.b32.xlu1 %v32173_v0, %s31571_s18 }
 0xb3b   :  { %5241 = vrot.lane.b32.xlu1 %v32189_v7, %s31571_s18 }
 0xbaf   :  { %v4674_v3 = vpop.xlane.xlu1 %4673 }
 0xbb0   :  { %v4676_v40 = vsub.f32 %v4668_v58, %v4674_v3  ;;  %v4671_v9 = vpop.xlane.xlu0 %4670 }
 0xbb1   :  { %v4675_v19 = vsub.f32 %v4667_v1, %v4671_v9 }
 0xbb2   :  { %v4679_v25 = vmul.f32 1.442695, %v4676_v40 }
 0xbb3   :  { %v4677_v11 = vmul.f32 1.442695, %v4675_v19  ;;  %v4694_v60 = vpop.permute.xlu1 %4693  ;;  %v5243_v19 = vsel %vm984_vm1, %v32173_v0, 0 }
 0xbb4   :  { %31348 = vpow2.f32 %v4679_v25  ;;  %v4707_v6 = vand.u32 4294901760, %v4694_v60 }
 0xbb5   :  { %31350 = vpow2.f32 %v4677_v11 }
 0xbb6   :  { %v4799_v53 = vsub.f32 %v4694_v60, %v4707_v6  ;;  %v5245_v60 = vsel %vm984_vm1, %v32189_v7, 0 }
 0xbb7   :  { %v5240_v1 = vpop.permute.xlu1 %5239 }
 0xbb8   :  { %v4800_v50 = vand.u32 4294901760, %v4799_v53  ;;  %v5247_v9 = vsel %vm984_vm1, %v5240_v1, 0 }
 0xbb9   :  { %v5252_v11 = vand.u32 4294901760, %v5247_v9 }
 0xbba   :  { %v4801_v18 = vsub.f32 %v4799_v53, %v4800_v50 }
 0xbbb   :  { %v5242_v27 = vpop.permute.xlu1 %5241 }
 0xbbc   :  { %v4802_v28 = vand.u32 4294901760, %v4801_v18  ;;  %v5249_v40 = vsel %vm984_vm1, %v5242_v27, 0 }
 0xbbd   :  { %v5255_v25 = vand.u32 4294901760, %v5249_v40 }
 0xbbe   :  { %v31349_v37 = vpop.eup %31348 }
 0xbbf   :  { %v4684_v46 = vsel %vm984_vm1, %v31349_v37, 0.0  ;;  %v31351_v51 = vpop.eup %31350 }
 0xbc0   :  { %4685 = vadd.xlane.f32.xlu0 %v4684_v46  ;;  %v4681_v39 = vsel %vm984_vm1, %v31351_v51, 0.0  ;;  %v5347_v46 = vsub.f32 %v5249_v40, %v5255_v25 }
 0xbc4   :  { %4682 = vadd.xlane.f32.xlu0 %v4681_v39 }
 0xbda   :  { %4691 = vrot.lane.b32.xlu0 %v32153_v56, %s36365_s24 }
 0xc4d   :  { %v4686_v8 = vpop.xlane.xlu0 %4685 }
 0xc4e   :  { %31352 = vrcp.f32 %v4686_v8  ;;  %v5348_v8 = vand.u32 4294901760, %v5347_v46 }
 0xc51   :  { %v4683_v24 = vpop.xlane.xlu0 %4682 }
 0xc52   :  { %31354 = vrcp.f32 %v4683_v24 }
 0xc55   :  { %v4692_v2 = vpop.permute.xlu0 %4691 }
 0xc56   :  { %v4704_v49 = vand.u32 4294901760, %v4692_v2 }
 0xc58   :  { %v31353_v44 = vpop.eup %31352  ;;  %v29161_v45 = vpack.c.bf16 %v4707_v6, %v4704_v49  ;;  %v4792_v54 = vsub.f32 %v4692_v2, %v4704_v49  ;;  %v29185_v2 = vpack.c.bf16 %v5255_v25, %v5252_v11 }
 0xc59   :  { %v4690_v61 = vmul.f32 %v31353_v44, %v31349_v37  ;;  %v5318_v37 = vand.u32 4294901760, %v5243_v19 }
 0xc5a   :  { %v4793_v12 = vand.u32 4294901760, %v4792_v54  ;;  %29162 = vmatprep.subr.bf16.mxu1 %v29161_v45  ;;  %v29169_v23 = vpack.c.bf16 %v4799_v53, %v4792_v54  ;;  %v5328_v53 = vand.u32 4294901760, %v5245_v60 }
 0xc5b   :  { %29164 = vmatpush3.bf16.msra.mxu1 %v29161_v45  ;;  %v4701_v56 = vsel %vm984_vm1, %v4690_v61, 0  ;;  %v5319_v39 = vsub.f32 %v5243_v19, %v5318_v37 }
 0xc5c   :  { %v31355_v15 = vpop.eup %31354  ;;  %v4794_v17 = vsub.f32 %v4792_v54, %v4793_v12  ;;  %v32458_v57 = vand.u32 4294901760, %v4701_v56  ;;  %v29177_v3 = vpack.c.bf16 %v4800_v50, %v4793_v12  ;;  %v5349_v50 = vsub.f32 %v5347_v46, %v5348_v8 }
 0xc5d   :  { %v4689_v38 = vmul.f32 %v31355_v15, %v31351_v51  ;;  %v5340_v51 = vsub.f32 %v5247_v9, %v5252_v11  ;;  %v5320_v24 = vand.u32 4294901760, %v5319_v39  ;;  %v5329_v54 = vsub.f32 %v5245_v60, %v5328_v53 }
 0xc5e   :  { %v4795_v36 = vand.u32 4294901760, %v4794_v17  ;;  %v4781_v14 = vsub.f32 %v4701_v56, %v32458_v57  ;;  %v5350_v61 = vand.u32 4294901760, %v5349_v50 }
 0xc5f   :  { %v4698_v55 = vsel %vm984_vm1, %v4689_v38, 0  ;;  %v5341_v6 = vand.u32 4294901760, %v5340_v51  ;;  %v5321_v49 = vsub.f32 %v5319_v39, %v5320_v24  ;;  %v5330_v56 = vand.u32 4294901760, %v5329_v54 }
 0xc60   :  { %v29165_v4 = vpack.c.bf16 %v4802_v28, %v4795_v36  ;;  %v4770_v13 = vand.u32 4294901760, %v4698_v55  ;;  %v4782_v22 = vand.u32 4294901760, %v4781_v14 }
 0xc61   :  { %v5342_v44 = vsub.f32 %v5340_v51, %v5341_v6  ;;  %v5322_v12 = vand.u32 4294901760, %v5321_v49  ;;  %v5331_v17 = vsub.f32 %v5329_v54, %v5330_v56  ;;  %v29201_v36 = vpack.c.bf16 %v5348_v8, %v5341_v6 }
 0xc62   :  { %29166 = vmatprep.subr.bf16.mxu1 %v29165_v4  ;;  %v4771_v29 = vsub.f32 %v4698_v55, %v4770_v13  ;;  %v4783_v52 = vsub.f32 %v4781_v14, %v4782_v22 }
 0xc63   :  { %v5343_v18 = vand.u32 4294901760, %v5342_v44  ;;  %v5332_v38 = vand.u32 4294901760, %v5331_v17 }
 0xc64   :  { %v4772_v59 = vand.u32 4294901760, %v4771_v29  ;;  %v4784_v58 = vand.u32 4294901760, %v4783_v52 }
 0xc65   :  { %v29189_v15 = vpack.c.bf16 %v5350_v61, %v5343_v18 }
 0xc66   :  { %v4773_v35 = vsub.f32 %v4771_v29, %v4772_v59 }
 0xc68   :  { %v4774_v16 = vand.u32 4294901760, %v4773_v35 }
 0xc6a   :  { %27407 = vmatprep.mubr.f32.mxu1 %v4774_v16 }
 0xc6b   :  { %27408 = vmatmul.mubr.f32.vlgmr.msra.gmra.mrb[18].mxu1 %v4784_v58 }
 0xc6c   :  { %29168 = vmatpush3.bf16.msra.mxu1 %v29165_v4  ;;  %27414 = vmatprep.mubr.f32.mxu1 %v4770_v13 }
 0xc6d   :  { %29170 = vmatprep.subr.bf16.mxu1 %v29169_v23 }
 0xc73   :  { %27415 = vmatmul.mubr.f32.vlgmr.msra.gmra.mrb[18].mxu1 %v32458_v57 }
 0xc74   :  { %29172 = vmatpush3.bf16.msra.mxu1 %v29169_v23  ;;  %27421 = vmatprep.mubr.f32.mxu1 %v4771_v29 }
 0xc75   :  { %29174 = vmatprep.subr.bf16.mxu1 %v29161_v45 }
 0xc7b   :  { %27422 = vmatmul.mubr.f32.vlgmr.msra.gmra.mrb[18].mxu1 %v4781_v14 }
 0xc7c   :  { %29176 = vmatpush3.bf16.msra.mxu1 %v29161_v45  ;;  %27428 = vmatprep.mubr.f32.mxu1 %v4772_v59 }
 0xc7d   :  { %29178 = vmatprep.subr.bf16.mxu1 %v29177_v3 }
 0xc83   :  { %27429 = vmatmul.mubr.f32.vlgmr.msra.gmra.mrb[18].mxu1 %v4782_v22 }
 0xc84   :  { %29180 = vmatpush3.bf16.msra.mxu1 %v29177_v3  ;;  %27435 = vmatprep.mubr.f32.mxu1 %v4770_v13 }
 0xc85   :  { %29182 = vmatprep.subr.bf16.mxu1 %v29161_v45 }
 0xc8b   :  { %27436 = vmatmul.mubr.f32.vlgmr.msra.gmra.mrb[18].mxu1 %v32458_v57 }
 0xc8c   :  { %29184 = vmatpush3.bf16.msra.mxu1 %v29161_v45  ;;  %27442 = vmatprep.mubr.f32.mxu1 %v4770_v13  ;;  %v29193_v45 = vpack.c.bf16 %v5347_v46, %v5340_v51 }
 0xc8d   :  { %29186 = vmatprep.subr.bf16.mxu1 %v29185_v2 }
 0xc93   :  { %27443 = vmatmul.mubr.f32.vlgmr.msra.gmra.mrb[18].mxu1 %v32458_v57 }
 0xc94   :  { %27449 = vmatprep.mubr.f32.mxu1 %v5322_v12 }
 0xc95   :  { %29188 = vmatpush3.bf16.xpose.msra.mxu1 %v29185_v2 }
 0xc96   :  { %29190 = vmatprep.subr.bf16.mxu1 %v29189_v15 }
 0xc9c   :  { %27450 = vmatmul.mubr.f32.vlgmr.msra.gmra.mrb[20].mxu1 %v5332_v38 }
 0xc9d   :  { %29192 = vmatpush3.bf16.xpose.msra.mxu1 %v29189_v15  ;;  %27456 = vmatprep.mubr.f32.mxu1 %v5318_v37 }
 0xc9e   :  { %29194 = vmatprep.subr.bf16.mxu1 %v29193_v45 }
 0xca4   :  { %27457 = vmatmul.mubr.f32.vlgmr.msra.gmra.mrb[20].mxu1 %v5328_v53 }
 0xca5   :  { %29196 = vmatpush3.bf16.xpose.msra.mxu1 %v29193_v45  ;;  %27463 = vmatprep.mubr.f32.mxu1 %v5319_v39 }
 0xca6   :  { %29198 = vmatprep.subr.bf16.mxu1 %v29185_v2 }
 0xcac   :  { %27464 = vmatmul.mubr.f32.vlgmr.msra.gmra.mrb[20].mxu1 %v5329_v54 }
 0xcad   :  { %29200 = vmatpush3.bf16.xpose.msra.mxu1 %v29185_v2  ;;  %27470 = vmatprep.mubr.f32.mxu1 %v5320_v24 }
 0xcae   :  { %29202 = vmatprep.subr.bf16.mxu1 %v29201_v36 }
 0xcb4   :  { %27471 = vmatmul.mubr.f32.vlgmr.msra.gmra.mrb[20].mxu1 %v5330_v56 }
 0xcb5   :  { %29204 = vmatpush3.bf16.xpose.msra.mxu1 %v29201_v36  ;;  %27477 = vmatprep.mubr.f32.mxu1 %v5318_v37 }
 0xcb6   :  { %29206 = vmatprep.subr.bf16.mxu1 %v29185_v2 }
 0xcbc   :  { %27478 = vmatmul.mubr.f32.vlgmr.msra.gmra.mrb[20].mxu1 %v5328_v53 }
 0xcbd   :  { %29208 = vmatpush3.bf16.xpose.msra.mxu1 %v29185_v2  ;;  %27484 = vmatprep.mubr.f32.mxu1 %v5318_v37 }
 0xcc4   :  { %27485 = vmatmul.mubr.f32.vlgmr.msra.gmra.mrb[20].mxu1 %v5328_v53 }
 0xd66   :  { %v32471_v57 = vpop.f32.mrb[18].mxu1 }
 0xd67   :  { %v32473_v28 = vpop.f32.mrb[19].mxu1 }
 0xd97   :  { %v27486_v14 = vpop.f32.mrb[20].mxu1 }
 0xd98   :  { %v5754_v55 = vmul.f32 0.25, %v27486_v14  ;;  %v5743_v4 = vpop.f32.mrb[21].mxu1 }
 0xd99   :  { %v5753_v13 = vmul.f32 0.25, %v5743_v4 }
 0xd9a   :  { %v5756_v22 = vsel %vm32244_vm2, %v5754_v55, -inf }
 0xd9b   :  { %v5760_v29 = vsel %vm984_vm1, %v5756_v22, -inf  ;;  %v5755_v59 = vsel %vm32249_vm3, %v5753_v13, -inf }
 0xd9c   :  { %5761 = vmax.xlane.f32.xlu1 %v5760_v29  ;;  %v5757_v52 = vsel %vm984_vm1, %v5755_v59, -inf }
 0xd9d   :  { %5758 = vmax.xlane.f32.xlu0 %v5757_v52 }
 0xdad   :  { %6293 = vrot.lane.b32.xlu1 %v32189_v7, %s31572_s19 }
 0xdb1   :  { %6287 = vrot.lane.b32.xlu1 %v32173_v0, %s31573_s1 }
 0xdb5   :  { %6289 = vrot.lane.b32.xlu1 %v32189_v7, %s31573_s1 }
 0xe29   :  { %v5762_v35 = vpop.xlane.xlu1 %5761 }
 0xe2a   :  { %v5764_v16 = vsub.f32 %v5756_v22, %v5762_v35  ;;  %v5759_v58 = vpop.xlane.xlu0 %5758 }
 0xe2b   :  { %v5763_v23 = vsub.f32 %v5755_v59, %v5759_v58 }
 0xe2c   :  { %v5767_v1 = vmul.f32 1.442695, %v5764_v16 }
 0xe2d   :  { %v5765_v27 = vmul.f32 1.442695, %v5763_v23  ;;  %v6294_v18 = vpop.permute.xlu1 %6293 }
 0xe2f   :  { %31356 = vpow2.f32 %v5765_v27 }
 0xe30   :  { %31358 = vpow2.f32 %v5767_v1 }
 0xe31   :  { %v6288_v15 = vpop.permute.xlu1 %6287 }
 0xe32   :  { %v6295_v38 = vsel %vm984_vm1, %v6288_v15, 0 }
 0xe33   :  { %v6370_v36 = vand.u32 4294901760, %v6295_v38 }
 0xe35   :  { %v6290_v14 = vpop.permute.xlu1 %6289  ;;  %v6371_v13 = vsub.f32 %v6295_v38, %v6370_v36 }
 0xe36   :  { %v6297_v22 = vsel %vm984_vm1, %v6290_v14, 0 }
 0xe37   :  { %v6380_v52 = vand.u32 4294901760, %v6297_v22  ;;  %v6372_v35 = vand.u32 4294901760, %v6371_v13 }
 0xe39   :  { %v31357_v3 = vpop.eup %31356  ;;  %v6381_v23 = vsub.f32 %v6297_v22, %v6380_v52 }
 0xe3a   :  { %v5769_v40 = vsel %vm984_vm1, %v31357_v3, 0.0  ;;  %v31359_v9 = vpop.eup %31358 }
 0xe3b   :  { %5770 = vadd.xlane.f32.xlu0 %v5769_v40  ;;  %v5772_v19 = vsel %vm984_vm1, %v31359_v9, 0.0 }
 0xe3f   :  { %5773 = vadd.xlane.f32.xlu0 %v5772_v19 }
 0xe55   :  { %6291 = vrot.lane.b32.xlu0 %v32173_v0, %s31572_s19 }
 0xec8   :  { %v5771_v25 = vpop.xlane.xlu0 %5770 }
 0xec9   :  { %31360 = vrcp.f32 %v5771_v25 }
 0xecc   :  { %v5774_v11 = vpop.xlane.xlu0 %5773 }
 0xecd   :  { %31362 = vrcp.f32 %v5774_v11 }
 0xed0   :  { %v6292_v56 = vpop.permute.xlu0 %6291 }
 0xed1   :  { %v6299_v17 = vsel %vm984_vm1, %v6292_v56, 0 }
 0xed2   :  { %v6304_v45 = vand.u32 4294901760, %v6299_v17 }
 0xed3   :  { %v31361_v37 = vpop.eup %31360 }
 0xed4   :  { %v5777_v46 = vmul.f32 %v31361_v37, %v31357_v3  ;;  %v6392_v55 = vsub.f32 %v6299_v17, %v6304_v45  ;;  %v6382_v3 = vand.u32 4294901760, %v6381_v23 }
 0xed6   :  { %v5780_v51 = vsel %vm984_vm1, %v5777_v46, 0  ;;  %v6393_v29 = vand.u32 4294901760, %v6392_v55  ;;  %v6383_v25 = vsub.f32 %v6381_v23, %v6382_v3 }
 0xed7   :  { %v31363_v39 = vpop.eup %31362  ;;  %v5852_v60 = vand.u32 4294901760, %v5780_v51 }
 0xed8   :  { %v5778_v8 = vmul.f32 %v31363_v39, %v31359_v9  ;;  %v6394_v58 = vsub.f32 %v6392_v55, %v6393_v29  ;;  %v6384_v11 = vand.u32 4294901760, %v6383_v25 }
 0xed9   :  { %v5853_v6 = vsub.f32 %v5780_v51, %v5852_v60 }
 0xeda   :  { %v5783_v24 = vsel %vm984_vm1, %v5778_v8, 0  ;;  %v6395_v27 = vand.u32 4294901760, %v6394_v58 }
 0xedb   :  { %v5854_v53 = vand.u32 4294901760, %v5853_v6  ;;  %v5862_v2 = vand.u32 4294901760, %v5783_v24 }
 0xedd   :  { %v5855_v50 = vsub.f32 %v5853_v6, %v5854_v53  ;;  %v5863_v49 = vsub.f32 %v5783_v24, %v5862_v2 }
 0xedf   :  { %v5856_v44 = vand.u32 4294901760, %v5855_v50  ;;  %v5864_v54 = vand.u32 4294901760, %v5863_v49 }
 0xee1   :  { %27491 = vmatprep.mubr.f32.mxu0 %v5856_v44  ;;  %v5865_v61 = vsub.f32 %v5863_v49, %v5864_v54 }
 0xee3   :  { %v5866_v12 = vand.u32 4294901760, %v5865_v61 }
 0xee5   :  { %27492 = vmatmul.mubr.f32.vlgmr.msra.gmra.mrb[14].mxu0 %v5866_v12 }
 0xee6   :  { %29216 = vmatpush3.bf16.msra.mxu0 %v32433_v34  ;;  %27498 = vmatprep.mubr.f32.mxu0 %v5852_v60  ;;  %v6301_v34 = vsel %vm984_vm1, %v6294_v18, 0 }
 0xee7   :  { %29218 = vmatprep.subr.bf16.mxu0 %v32216_v10 }
 0xeed   :  { %27499 = vmatmul.mubr.f32.vlgmr.msra.gmra.mrb[14].mxu0 %v5862_v2 }
 0xeee   :  { %29220 = vmatpush3.bf16.msra.mxu0 %v32216_v10  ;;  %27505 = vmatprep.mubr.f32.mxu0 %v5853_v6  ;;  %v6307_v10 = vand.u32 4294901760, %v6301_v34 }
 0xeef   :  { %29222 = vmatprep.subr.bf16.mxu0 %v32424_v63 }
 0xef0   :  { %v6399_v4 = vsub.f32 %v6301_v34, %v6307_v10  ;;  %v29233_v16 = vpack.c.bf16 %v6307_v10, %v6304_v45 }
 0xef2   :  { %v6400_v59 = vand.u32 4294901760, %v6399_v4  ;;  %v29241_v37 = vpack.c.bf16 %v6399_v4, %v6392_v55 }
 0xef4   :  { %v6401_v1 = vsub.f32 %v6399_v4, %v6400_v59 }
 0xef5   :  { %27506 = vmatmul.mubr.f32.vlgmr.msra.gmra.mrb[14].mxu0 %v5863_v49 }
 0xef6   :  { %29224 = vmatpush3.bf16.msra.mxu0 %v32424_v63  ;;  %27512 = vmatprep.mubr.f32.mxu0 %v5854_v53  ;;  %v6402_v9 = vand.u32 4294901760, %v6401_v1 }
 0xef7   :  { %29226 = vmatprep.subr.bf16.mxu0 %v32222_v62 }
 0xef8   :  { %v29237_v19 = vpack.c.bf16 %v6402_v9, %v6395_v27 }
 0xefd   :  { %27513 = vmatmul.mubr.f32.vlgmr.msra.gmra.mrb[14].mxu0 %v5864_v54 }
 0xefe   :  { %29228 = vmatpush3.bf16.msra.mxu0 %v32222_v62  ;;  %27519 = vmatprep.mubr.f32.mxu0 %v5852_v60  ;;  %v6373_v62 = vsub.f32 %v6371_v13, %v6372_v35 }
 0xeff   :  { %29230 = vmatprep.subr.bf16.mxu0 %v32424_v63 }
 0xf00   :  { %v6374_v40 = vand.u32 4294901760, %v6373_v62 }
 0xf05   :  { %27520 = vmatmul.mubr.f32.vlgmr.msra.gmra.mrb[14].mxu0 %v5862_v2 }
 0xf06   :  { %29232 = vmatpush3.bf16.msra.mxu0 %v32424_v63  ;;  %27526 = vmatprep.mubr.f32.mxu0 %v5852_v60  ;;  %v29249_v63 = vpack.c.bf16 %v6400_v59, %v6393_v29 }
 0xf07   :  { %29234 = vmatprep.subr.bf16.mxu0 %v29233_v16 }
 0xf0d   :  { %27527 = vmatmul.mubr.f32.vlgmr.msra.gmra.mrb[14].mxu0 %v5862_v2 }
 0xf0e   :  { %27533 = vmatprep.mubr.f32.mxu0 %v6374_v40 }
 0xf0f   :  { %29236 = vmatpush3.bf16.xpose.msra.mxu0 %v29233_v16 }
 0xf10   :  { %29238 = vmatprep.subr.bf16.mxu0 %v29237_v19 }
 0xf16   :  { %27534 = vmatmul.mubr.f32.vlgmr.msra.gmra.mrb[16].mxu0 %v6384_v11 }
 0xf17   :  { %29240 = vmatpush3.bf16.xpose.msra.mxu0 %v29237_v19  ;;  %27540 = vmatprep.mubr.f32.mxu0 %v6370_v36 }
 0xf18   :  { %29242 = vmatprep.subr.bf16.mxu0 %v29241_v37 }
 0xf1e   :  { %27541 = vmatmul.mubr.f32.vlgmr.msra.gmra.mrb[16].mxu0 %v6380_v52 }
 0xf1f   :  { %29244 = vmatpush3.bf16.xpose.msra.mxu0 %v29241_v37  ;;  %27547 = vmatprep.mubr.f32.mxu0 %v6371_v13 }
 0xf20   :  { %29246 = vmatprep.subr.bf16.mxu0 %v29233_v16 }
 0xf26   :  { %27548 = vmatmul.mubr.f32.vlgmr.msra.gmra.mrb[16].mxu0 %v6381_v23 }
 0xf27   :  { %29248 = vmatpush3.bf16.xpose.msra.mxu0 %v29233_v16  ;;  %27554 = vmatprep.mubr.f32.mxu0 %v6372_v35 }
 0xf28   :  { %29250 = vmatprep.subr.bf16.mxu0 %v29249_v63 }
 0xf2e   :  { %27555 = vmatmul.mubr.f32.vlgmr.msra.gmra.mrb[16].mxu0 %v6382_v3 }
 0xf2f   :  { %29252 = vmatpush3.bf16.xpose.msra.mxu0 %v29249_v63  ;;  %27561 = vmatprep.mubr.f32.mxu0 %v6370_v36 }
 0xf30   :  { %29254 = vmatprep.subr.bf16.mxu0 %v29233_v16 }
 0xf36   :  { %27562 = vmatmul.mubr.f32.vlgmr.msra.gmra.mrb[16].mxu0 %v6380_v52 }
 0xf37   :  { %29256 = vmatpush3.bf16.xpose.msra.mxu0 %v29233_v16  ;;  %27568 = vmatprep.mubr.f32.mxu0 %v6370_v36 }
 0xf3e   :  { %27569 = vmatmul.mubr.f32.vlgmr.msra.gmra.mrb[16].mxu0 %v6380_v52 }
 0xfe0   :  { %v32506_v46 = vpop.f32.mrb[14].mxu0 }
 0xfe1   :  { %v32508_v51 = vpop.f32.mrb[15].mxu0 }
0x1011   :  { %v27570_v39 = vpop.f32.mrb[16].mxu0 }
0x1012   :  { %v6806_v60 = vmul.f32 0.25, %v27570_v39  ;;  %v6795_v8 = vpop.f32.mrb[17].mxu0 }
0x1013   :  { %v6805_v6 = vmul.f32 0.25, %v6795_v8 }
0x1014   :  { %v6808_v24 = vsel %vm32244_vm2, %v6806_v60, -inf }
0x1015   :  { %v6812_v53 = vsel %vm984_vm1, %v6808_v24, -inf  ;;  %v6807_v2 = vsel %vm32249_vm3, %v6805_v6, -inf }
0x1016   :  { %6813 = vmax.xlane.f32.xlu1 %v6812_v53  ;;  %v6809_v50 = vsel %vm984_vm1, %v6807_v2, -inf }
0x1017   :  { %6810 = vmax.xlane.f32.xlu0 %v6809_v50 }
0x1027   :  { %6835 = vrot.lane.b32.xlu1 %v32197_v41, %s31573_s1 }
0x102b   :  { %7351 = vrot.lane.b32.xlu1 %v32173_v0, %s31574_s21 }
0x102f   :  { %7353 = vrot.lane.b32.xlu1 %v32189_v7, %s31574_s21 }
0x1033   :  { %7349 = vrot.lane.b32.xlu1 %v32189_v7, %s31575_s22 }
0x10a3   :  { %v6814_v49 = vpop.xlane.xlu1 %6813 }
0x10a4   :  { %v6816_v44 = vsub.f32 %v6808_v24, %v6814_v49  ;;  %v6811_v54 = vpop.xlane.xlu0 %6810 }
0x10a5   :  { %v6815_v61 = vsub.f32 %v6807_v2, %v6811_v54 }
0x10a6   :  { %v6819_v12 = vmul.f32 1.442695, %v6816_v44 }
0x10a7   :  { %v6817_v18 = vmul.f32 1.442695, %v6815_v61  ;;  %v6836_v38 = vpop.permute.xlu1 %6835 }
0x10a8   :  { %31364 = vpow2.f32 %v6819_v12  ;;  %v6849_v10 = vand.u32 4294901760, %v6836_v38 }
0x10a9   :  { %31366 = vpow2.f32 %v6817_v18 }
0x10aa   :  { %v6941_v14 = vsub.f32 %v6836_v38, %v6849_v10 }
0x10ab   :  { %v7352_v2 = vpop.permute.xlu1 %7351 }
0x10ac   :  { %v6942_v4 = vand.u32 4294901760, %v6941_v14  ;;  %v7359_v61 = vsel %vm984_vm1, %v7352_v2, 0 }
0x10ae   :  { %v6943_v16 = vsub.f32 %v6941_v14, %v6942_v4 }
0x10af   :  { %v7354_v50 = vpop.permute.xlu1 %7353 }
0x10b0   :  { %v6944_v40 = vand.u32 4294901760, %v6943_v16  ;;  %v7361_v54 = vsel %vm984_vm1, %v7354_v50, 0 }
0x10b1   :  { %v7367_v18 = vand.u32 4294901760, %v7361_v54 }
0x10b2   :  { %v31365_v56 = vpop.eup %31364 }
0x10b3   :  { %v6824_v15 = vsel %vm984_vm1, %v31365_v56, 0.0  ;;  %v31367_v17 = vpop.eup %31366 }
0x10b4   :  { %6825 = vadd.xlane.f32.xlu0 %v6824_v15  ;;  %v6821_v34 = vsel %vm984_vm1, %v31367_v17, 0.0 }
0x10b8   :  { %6822 = vadd.xlane.f32.xlu0 %v6821_v34  ;;  %v7350_v34 = vpop.permute.xlu1 %7349 }
0x10ce   :  { %6833 = vrot.lane.b32.xlu0 %v32180_v20, %s31573_s1 }
0x10d2   :  { %7347 = vrot.lane.b32.xlu0 %v32173_v0, %s31575_s22 }
0x1141   :  { %v6826_v45 = vpop.xlane.xlu0 %6825 }
0x1142   :  { %31368 = vrcp.f32 %v6826_v45 }
0x1145   :  { %v6823_v36 = vpop.xlane.xlu0 %6822 }
0x1146   :  { %31370 = vrcp.f32 %v6823_v36 }
0x1149   :  { %v6834_v55 = vpop.permute.xlu0 %6833 }
0x114a   :  { %v6846_v13 = vand.u32 4294901760, %v6834_v55 }
0x114c   :  { %v31369_v22 = vpop.eup %31368  ;;  %v32530_v29 = vpack.c.bf16 %v6849_v10, %v6846_v13  ;;  %v6934_v59 = vsub.f32 %v6834_v55, %v6846_v13  ;;  %v7357_v10 = vsel %vm984_vm1, %v7350_v34, 0 }
0x114d   :  { %v6830_v52 = vmul.f32 %v31369_v22, %v31365_v56  ;;  %v7348_v44 = vpop.permute.xlu0 %7347  ;;  %v7364_v56 = vand.u32 4294901760, %v7359_v61  ;;  %v7440_v55 = vand.u32 4294901760, %v7357_v10 }
0x114e   :  { %v6935_v35 = vand.u32 4294901760, %v6934_v59  ;;  %29258 = vmatprep.subr.bf16.mxu1 %v32530_v29  ;;  %v29265_v53 = vpack.c.bf16 %v6941_v14, %v6934_v59  ;;  %v7355_v12 = vsel %vm984_vm1, %v7348_v44, 0 }
0x114f   :  { %29260 = vmatpush3.bf16.msra.mxu1 %v32530_v29  ;;  %v6843_v58 = vsel %vm984_vm1, %v6830_v52, 0  ;;  %v7430_v15 = vand.u32 4294901760, %v7355_v12  ;;  %v7452_v38 = vsub.f32 %v7359_v61, %v7364_v56  ;;  %v29281_v13 = vpack.c.bf16 %v7367_v18, %v7364_v56 }
0x1150   :  { %v31371_v23 = vpop.eup %31370  ;;  %v6936_v62 = vsub.f32 %v6934_v59, %v6935_v35  ;;  %v32535_v1 = vand.u32 4294901760, %v6843_v58  ;;  %v29273_v49 = vpack.c.bf16 %v6942_v4, %v6935_v35  ;;  %v7441_v59 = vsub.f32 %v7357_v10, %v7440_v55 }
0x1151   :  { %v6829_v27 = vmul.f32 %v31371_v23, %v31367_v17  ;;  %v7459_v17 = vsub.f32 %v7361_v54, %v7367_v18  ;;  %v7431_v45 = vsub.f32 %v7355_v12, %v7430_v15  ;;  %v7453_v14 = vand.u32 4294901760, %v7452_v38 }
0x1152   :  { %v6937_v3 = vand.u32 4294901760, %v6936_v62  ;;  %v6923_v9 = vsub.f32 %v6843_v58, %v32535_v1  ;;  %v7442_v58 = vand.u32 4294901760, %v7441_v59 }
0x1153   :  { %v6840_v19 = vsel %vm984_vm1, %v6829_v27, 0  ;;  %v7460_v36 = vand.u32 4294901760, %v7459_v17  ;;  %v7432_v4 = vand.u32 4294901760, %v7431_v45  ;;  %v7454_v35 = vsub.f32 %v7452_v38, %v7453_v14 }
0x1154   :  { %v29261_v25 = vpack.c.bf16 %v6944_v40, %v6937_v3  ;;  %v6912_v11 = vand.u32 4294901760, %v6840_v19  ;;  %v6924_v37 = vand.u32 4294901760, %v6923_v9  ;;  %v7443_v3 = vsub.f32 %v7441_v59, %v7442_v58 }
0x1155   :  { %v7461_v22 = vsub.f32 %v7459_v17, %v7460_v36  ;;  %v7433_v52 = vsub.f32 %v7431_v45, %v7432_v4  ;;  %v7455_v62 = vand.u32 4294901760, %v7454_v35 }
0x1156   :  { %29262 = vmatprep.subr.bf16.mxu1 %v29261_v25  ;;  %v6913_v63 = vsub.f32 %v6840_v19, %v6912_v11  ;;  %v6925_v60 = vsub.f32 %v6923_v9, %v6924_v37  ;;  %v7444_v40 = vand.u32 4294901760, %v7443_v3 }
0x1157   :  { %v7462_v16 = vand.u32 4294901760, %v7461_v22  ;;  %v7434_v23 = vand.u32 4294901760, %v7433_v52 }
0x1158   :  { %v6914_v39 = vand.u32 4294901760, %v6913_v63  ;;  %v6926_v24 = vand.u32 4294901760, %v6925_v60 }
0x1159   :  { %v29285_v27 = vpack.c.bf16 %v7462_v16, %v7455_v62 }
0x115a   :  { %v6915_v8 = vsub.f32 %v6913_v63, %v6914_v39 }
0x115c   :  { %v6916_v6 = vand.u32 4294901760, %v6915_v8 }
0x115e   :  { %27575 = vmatprep.mubr.f32.mxu1 %v6916_v6 }
0x115f   :  { %27576 = vmatmul.mubr.f32.vlgmr.msra.gmra.mrb[22].mxu1 %v6926_v24 }
0x1160   :  { %29264 = vmatpush3.bf16.msra.mxu1 %v29261_v25  ;;  %27582 = vmatprep.mubr.f32.mxu1 %v6912_v11 }
0x1161   :  { %29266 = vmatprep.subr.bf16.mxu1 %v29265_v53 }
0x1167   :  { %27583 = vmatmul.mubr.f32.vlgmr.msra.gmra.mrb[22].mxu1 %v32535_v1 }
0x1168   :  { %29268 = vmatpush3.bf16.msra.mxu1 %v29265_v53  ;;  %27589 = vmatprep.mubr.f32.mxu1 %v6913_v63 }
0x1169   :  { %29270 = vmatprep.subr.bf16.mxu1 %v32530_v29 }
0x116f   :  { %27590 = vmatmul.mubr.f32.vlgmr.msra.gmra.mrb[22].mxu1 %v6923_v9  ;;  %v29297_v9 = vpack.c.bf16 %v7460_v36, %v7453_v14 }
0x1170   :  { %29272 = vmatpush3.bf16.msra.mxu1 %v32530_v29  ;;  %27596 = vmatprep.mubr.f32.mxu1 %v6914_v39 }
0x1171   :  { %29274 = vmatprep.subr.bf16.mxu1 %v29273_v49 }
0x1177   :  { %27597 = vmatmul.mubr.f32.vlgmr.msra.gmra.mrb[22].mxu1 %v6924_v37 }
0x1178   :  { %29276 = vmatpush3.bf16.msra.mxu1 %v29273_v49  ;;  %27603 = vmatprep.mubr.f32.mxu1 %v6912_v11 }
0x1179   :  { %29278 = vmatprep.subr.bf16.mxu1 %v32530_v29 }
0x117f   :  { %27604 = vmatmul.mubr.f32.vlgmr.msra.gmra.mrb[22].mxu1 %v32535_v1 }
0x1180   :  { %29280 = vmatpush3.bf16.msra.mxu1 %v32530_v29  ;;  %27610 = vmatprep.mubr.f32.mxu1 %v6912_v11  ;;  %v29289_v29 = vpack.c.bf16 %v7459_v17, %v7452_v38 }
0x1181   :  { %29282 = vmatprep.subr.bf16.mxu1 %v29281_v13 }
0x1187   :  { %27611 = vmatmul.mubr.f32.vlgmr.msra.gmra.mrb[22].mxu1 %v32535_v1 }
0x1188   :  { %27617 = vmatprep.mubr.f32.mxu1 %v7434_v23 }
0x1189   :  { %29284 = vmatpush3.bf16.xpose.msra.mxu1 %v29281_v13 }
0x118a   :  { %29286 = vmatprep.subr.bf16.mxu1 %v29285_v27 }
0x1190   :  { %27618 = vmatmul.mubr.f32.vlgmr.msra.gmra.mrb[24].mxu1 %v7444_v40 }
0x1191   :  { %29288 = vmatpush3.bf16.xpose.msra.mxu1 %v29285_v27  ;;  %27624 = vmatprep.mubr.f32.mxu1 %v7430_v15 }
0x1192   :  { %29290 = vmatprep.subr.bf16.mxu1 %v29289_v29 }
0x1198   :  { %27625 = vmatmul.mubr.f32.vlgmr.msra.gmra.mrb[24].mxu1 %v7440_v55 }
0x1199   :  { %29292 = vmatpush3.bf16.xpose.msra.mxu1 %v29289_v29  ;;  %27631 = vmatprep.mubr.f32.mxu1 %v7431_v45 }
0x119a   :  { %29294 = vmatprep.subr.bf16.mxu1 %v29281_v13 }
0x11a0   :  { %27632 = vmatmul.mubr.f32.vlgmr.msra.gmra.mrb[24].mxu1 %v7441_v59 }
0x11a1   :  { %29296 = vmatpush3.bf16.xpose.msra.mxu1 %v29281_v13  ;;  %27638 = vmatprep.mubr.f32.mxu1 %v7432_v4 }
0x11a2   :  { %29298 = vmatprep.subr.bf16.mxu1 %v29297_v9 }
0x11a8   :  { %27639 = vmatmul.mubr.f32.vlgmr.msra.gmra.mrb[24].mxu1 %v7442_v58 }
0x11a9   :  { %29300 = vmatpush3.bf16.xpose.msra.mxu1 %v29297_v9  ;;  %27645 = vmatprep.mubr.f32.mxu1 %v7430_v15 }
0x11aa   :  { %29302 = vmatprep.subr.bf16.mxu1 %v29281_v13 }
0x11b0   :  { %27646 = vmatmul.mubr.f32.vlgmr.msra.gmra.mrb[24].mxu1 %v7440_v55 }
0x11b1   :  { %29304 = vmatpush3.bf16.xpose.msra.mxu1 %v29281_v13  ;;  %27652 = vmatprep.mubr.f32.mxu1 %v7430_v15 }
0x11b8   :  { %27653 = vmatmul.mubr.f32.vlgmr.msra.gmra.mrb[24].mxu1 %v7440_v55 }
0x125a   :  { %v32550_v1 = vpop.f32.mrb[22].mxu1 }
0x125b   :  { %v32552_v19 = vpop.f32.mrb[23].mxu1 }
0x128b   :  { %v27654_v25 = vpop.f32.mrb[24].mxu1 }
0x128c   :  { %v7866_v11 = vmul.f32 0.25, %v27654_v25  ;;  %v7855_v37 = vpop.f32.mrb[25].mxu1 }
0x128d   :  { %v7865_v63 = vmul.f32 0.25, %v7855_v37 }
0x128e   :  { %v7868_v39 = vsel %vm32244_vm2, %v7866_v11, -inf }
0x128f   :  { %v7872_v60 = vsel %vm984_vm1, %v7868_v39, -inf  ;;  %v7867_v8 = vsel %vm32249_vm3, %v7865_v63, -inf }
0x1290   :  { %7873 = vmax.xlane.f32.xlu1 %v7872_v60  ;;  %v7869_v6 = vsel %vm984_vm1, %v7867_v8, -inf }
0x1291   :  { %7870 = vmax.xlane.f32.xlu0 %v7869_v6 }
0x12a1   :  { %7893 = vrot.lane.b32.xlu1 %v32197_v41, %s31575_s22 }
0x12a5   :  { %8409 = vrot.lane.b32.xlu1 %v32173_v0, %s36367_s23 }
0x12a9   :  { %8411 = vrot.lane.b32.xlu1 %v32189_v7, %s36367_s23 }
0x12ad   :  { %8407 = vrot.lane.b32.xlu1 %v32189_v7, %s36365_s24 }
0x131d   :  { %v7874_v24 = vpop.xlane.xlu1 %7873 }
0x131e   :  { %v7876_v53 = vsub.f32 %v7868_v39, %v7874_v24  ;;  %v7871_v2 = vpop.xlane.xlu0 %7870 }
0x131f   :  { %v7875_v50 = vsub.f32 %v7867_v8, %v7871_v2 }
0x1320   :  { %v7879_v49 = vmul.f32 1.442695, %v7876_v53 }
0x1321   :  { %v7877_v44 = vmul.f32 1.442695, %v7875_v50  ;;  %v7894_v7 = vpop.permute.xlu1 %7893 }
0x1322   :  { %31372 = vpow2.f32 %v7879_v49  ;;  %v7907_v15 = vand.u32 4294901760, %v7894_v7 }
0x1323   :  { %31374 = vpow2.f32 %v7877_v44 }
0x1324   :  { %v7999_v34 = vsub.f32 %v7894_v7, %v7907_v15 }
0x1325   :  { %v8410_v8 = vpop.permute.xlu1 %8409 }
0x1326   :  { %v8000_v45 = vand.u32 4294901760, %v7999_v34  ;;  %v8417_v50 = vsel %vm984_vm1, %v8410_v8, 0 }
0x1328   :  { %v8001_v22 = vsub.f32 %v7999_v34, %v8000_v45 }
0x1329   :  { %v8412_v6 = vpop.permute.xlu1 %8411 }
0x132a   :  { %v8002_v23 = vand.u32 4294901760, %v8001_v22  ;;  %v8419_v2 = vsel %vm984_vm1, %v8412_v6, 0 }
0x132b   :  { %v8425_v44 = vand.u32 4294901760, %v8419_v2 }
0x132c   :  { %v31373_v54 = vpop.eup %31372 }
0x132d   :  { %v7884_v61 = vsel %vm984_vm1, %v31373_v54, 0.0  ;;  %v31375_v12 = vpop.eup %31374 }
0x132e   :  { %7885 = vadd.xlane.f32.xlu0 %v7884_v61  ;;  %v7881_v18 = vsel %vm984_vm1, %v31375_v12, 0.0 }
0x1332   :  { %7882 = vadd.xlane.f32.xlu0 %v7881_v18  ;;  %v8408_v18 = vpop.permute.xlu1 %8407 }
0x1348   :  { %7891 = vrot.lane.b32.xlu0 %v32180_v20, %s31575_s22 }
0x134c   :  { %8405 = vrot.lane.b32.xlu0 %v32173_v0, %s36365_s24 }
0x13bb   :  { %v7886_v56 = vpop.xlane.xlu0 %7885 }
0x13bc   :  { %31376 = vrcp.f32 %v7886_v56 }
0x13bf   :  { %v7883_v17 = vpop.xlane.xlu0 %7882 }
0x13c0   :  { %31378 = vrcp.f32 %v7883_v17 }
0x13c3   :  { %v7892_v38 = vpop.permute.xlu0 %7891 }
0x13c4   :  { %v7904_v10 = vand.u32 4294901760, %v7892_v38 }
0x13c6   :  { %v31377_v36 = vpop.eup %31376  ;;  %v32574_v14 = vpack.c.bf16 %v7907_v15, %v7904_v10  ;;  %v7992_v55 = vsub.f32 %v7892_v38, %v7904_v10  ;;  %v8415_v15 = vsel %vm984_vm1, %v8408_v18, 0 }
0x13c7   :  { %v7890_v4 = vmul.f32 %v31377_v36, %v31373_v54  ;;  %v8406_v53 = vpop.permute.xlu0 %8405  ;;  %v8422_v54 = vand.u32 4294901760, %v8417_v50  ;;  %v8498_v38 = vand.u32 4294901760, %v8415_v15 }
0x13c8   :  { %v7993_v13 = vand.u32 4294901760, %v7992_v55  ;;  %29306 = vmatprep.subr.bf16.mxu0 %v32574_v14  ;;  %v29313_v60 = vpack.c.bf16 %v7999_v34, %v7992_v55  ;;  %v8413_v49 = vsel %vm984_vm1, %v8406_v53, 0 }
0x13c9   :  { %29308 = vmatpush3.bf16.msra.mxu0 %v32574_v14  ;;  %v7901_v0 = vsel %vm984_vm1, %v7890_v4, 0  ;;  %v8488_v61 = vand.u32 4294901760, %v8413_v49  ;;  %v8510_v7 = vsub.f32 %v8417_v50, %v8422_v54  ;;  %v29329_v10 = vpack.c.bf16 %v8425_v44, %v8422_v54 }
0x13ca   :  { %v31379_v59 = vpop.eup %31378  ;;  %v7994_v52 = vsub.f32 %v7992_v55, %v7993_v13  ;;  %v32579_v35 = vand.u32 4294901760, %v7901_v0  ;;  %v29321_v24 = vpack.c.bf16 %v8000_v45, %v7993_v13  ;;  %v8499_v55 = vsub.f32 %v8415_v15, %v8498_v38 }
0x13cb   :  { %v7889_v16 = vmul.f32 %v31379_v59, %v31375_v12  ;;  %v8517_v12 = vsub.f32 %v8419_v2, %v8425_v44  ;;  %v8489_v56 = vsub.f32 %v8413_v49, %v8488_v61  ;;  %v8511_v34 = vand.u32 4294901760, %v8510_v7 }
0x13cc   :  { %v7995_v58 = vand.u32 4294901760, %v7994_v52  ;;  %v7981_v62 = vsub.f32 %v7901_v0, %v32579_v35  ;;  %v8500_v0 = vand.u32 4294901760, %v8499_v55 }
0x13cd   :  { %v7898_v27 = vsel %vm984_vm1, %v7889_v16, 0  ;;  %v8518_v17 = vand.u32 4294901760, %v8517_v12  ;;  %v8490_v45 = vand.u32 4294901760, %v8489_v56  ;;  %v8512_v13 = vsub.f32 %v8510_v7, %v8511_v34 }
0x13ce   :  { %v29309_v3 = vpack.c.bf16 %v8002_v23, %v7995_v58  ;;  %v7970_v40 = vand.u32 4294901760, %v7898_v27  ;;  %v7982_v29 = vand.u32 4294901760, %v7981_v62  ;;  %v8501_v58 = vsub.f32 %v8499_v55, %v8500_v0 }
0x13cf   :  { %v8519_v36 = vsub.f32 %v8517_v12, %v8518_v17  ;;  %v8491_v4 = vsub.f32 %v8489_v56, %v8490_v45  ;;  %v8513_v52 = vand.u32 4294901760, %v8512_v13 }
0x13d0   :  { %29310 = vmatprep.subr.bf16.mxu0 %v29309_v3  ;;  %v7971_v9 = vsub.f32 %v7898_v27, %v7970_v40  ;;  %v7983_v11 = vsub.f32 %v7981_v62, %v7982_v29  ;;  %v8502_v23 = vand.u32 4294901760, %v8501_v58 }
0x13d1   :  { %v8520_v22 = vand.u32 4294901760, %v8519_v36  ;;  %v8492_v59 = vand.u32 4294901760, %v8491_v4 }
0x13d2   :  { %v7972_v25 = vand.u32 4294901760, %v7971_v9  ;;  %v7984_v39 = vand.u32 4294901760, %v7983_v11 }
0x13d3   :  { %v29333_v16 = vpack.c.bf16 %v8520_v22, %v8513_v52 }
0x13d4   :  { %v7973_v37 = vsub.f32 %v7971_v9, %v7972_v25 }
0x13d6   :  { %v7974_v63 = vand.u32 4294901760, %v7973_v37 }
0x13d8   :  { %27659 = vmatprep.mubr.f32.mxu0 %v7974_v63 }
0x13d9   :  { %27660 = vmatmul.mubr.f32.vlgmr.msra.gmra.mrb[18].mxu0 %v7984_v39 }
0x13da   :  { %29312 = vmatpush3.bf16.msra.mxu0 %v29309_v3  ;;  %27666 = vmatprep.mubr.f32.mxu0 %v7970_v40 }
0x13db   :  { %29314 = vmatprep.subr.bf16.mxu0 %v29313_v60 }
0x13e1   :  { %27667 = vmatmul.mubr.f32.vlgmr.msra.gmra.mrb[18].mxu0 %v32579_v35 }
0x13e2   :  { %29316 = vmatpush3.bf16.msra.mxu0 %v29313_v60  ;;  %27673 = vmatprep.mubr.f32.mxu0 %v7971_v9 }
0x13e3   :  { %29318 = vmatprep.subr.bf16.mxu0 %v32574_v14 }
0x13e9   :  { %27674 = vmatmul.mubr.f32.vlgmr.msra.gmra.mrb[18].mxu0 %v7981_v62  ;;  %v29345_v62 = vpack.c.bf16 %v8518_v17, %v8511_v34 }
0x13ea   :  { %29320 = vmatpush3.bf16.msra.mxu0 %v32574_v14  ;;  %27680 = vmatprep.mubr.f32.mxu0 %v7972_v25 }
0x13eb   :  { %29322 = vmatprep.subr.bf16.mxu0 %v29321_v24 }
0x13f1   :  { %27681 = vmatmul.mubr.f32.vlgmr.msra.gmra.mrb[18].mxu0 %v7982_v29 }
0x13f2   :  { %29324 = vmatpush3.bf16.msra.mxu0 %v29321_v24  ;;  %27687 = vmatprep.mubr.f32.mxu0 %v7970_v40 }
0x13f3   :  { %29326 = vmatprep.subr.bf16.mxu0 %v32574_v14 }
0x13f9   :  { %27688 = vmatmul.mubr.f32.vlgmr.msra.gmra.mrb[18].mxu0 %v32579_v35 }
0x13fa   :  { %29328 = vmatpush3.bf16.msra.mxu0 %v32574_v14  ;;  %27694 = vmatprep.mubr.f32.mxu0 %v7970_v40  ;;  %v29337_v14 = vpack.c.bf16 %v8517_v12, %v8510_v7 }
0x13fb   :  { %29330 = vmatprep.subr.bf16.mxu0 %v29329_v10 }
0x1401   :  { %27695 = vmatmul.mubr.f32.vlgmr.msra.gmra.mrb[18].mxu0 %v32579_v35 }
0x1402   :  { %27701 = vmatprep.mubr.f32.mxu0 %v8492_v59 }
0x1403   :  { %29332 = vmatpush3.bf16.xpose.msra.mxu0 %v29329_v10 }
0x1404   :  { %29334 = vmatprep.subr.bf16.mxu0 %v29333_v16 }
0x140a   :  { %27702 = vmatmul.mubr.f32.vlgmr.msra.gmra.mrb[20].mxu0 %v8502_v23 }
0x140b   :  { %29336 = vmatpush3.bf16.xpose.msra.mxu0 %v29333_v16  ;;  %27708 = vmatprep.mubr.f32.mxu0 %v8488_v61 }
0x140c   :  { %29338 = vmatprep.subr.bf16.mxu0 %v29337_v14 }
0x1412   :  { %27709 = vmatmul.mubr.f32.vlgmr.msra.gmra.mrb[20].mxu0 %v8498_v38 }
0x1413   :  { %29340 = vmatpush3.bf16.xpose.msra.mxu0 %v29337_v14  ;;  %27715 = vmatprep.mubr.f32.mxu0 %v8489_v56 }
0x1414   :  { %29342 = vmatprep.subr.bf16.mxu0 %v29329_v10 }
0x141a   :  { %27716 = vmatmul.mubr.f32.vlgmr.msra.gmra.mrb[20].mxu0 %v8499_v55 }
0x141b   :  { %29344 = vmatpush3.bf16.xpose.msra.mxu0 %v29329_v10  ;;  %27722 = vmatprep.mubr.f32.mxu0 %v8490_v45 }
0x141c   :  { %29346 = vmatprep.subr.bf16.mxu0 %v29345_v62 }
0x1422   :  { %27723 = vmatmul.mubr.f32.vlgmr.msra.gmra.mrb[20].mxu0 %v8500_v0 }
0x1423   :  { %29348 = vmatpush3.bf16.xpose.msra.mxu0 %v29345_v62  ;;  %27729 = vmatprep.mubr.f32.mxu0 %v8488_v61 }
0x1424   :  { %29350 = vmatprep.subr.bf16.mxu0 %v29329_v10 }
0x142a   :  { %27730 = vmatmul.mubr.f32.vlgmr.msra.gmra.mrb[20].mxu0 %v8498_v38 }
0x142b   :  { %29352 = vmatpush3.bf16.xpose.msra.mxu0 %v29329_v10  ;;  %27736 = vmatprep.mubr.f32.mxu0 %v8488_v61 }
0x1432   :  { %27737 = vmatmul.mubr.f32.vlgmr.msra.gmra.mrb[20].mxu0 %v8498_v38 }
0x1433   :  { %10388 = vmatprep.mubr.f32.mxu0 %v36369_v47 }
0x14d4   :  { %v27696_v35 = vpop.f32.mrb[18].mxu0 }
0x14d5   :  { %v8395_v27 = vpop.f32.mrb[19].mxu0 }
0x1505   :  { %v27738_v3 = vpop.f32.mrb[20].mxu0 }
0x1506   :  { %v8924_v40 = vmul.f32 0.25, %v27738_v3  ;;  %v8913_v29 = vpop.f32.mrb[21].mxu0 }
0x1507   :  { %v8923_v9 = vmul.f32 0.25, %v8913_v29 }
0x1508   :  { %v8926_v25 = vsel %vm32244_vm2, %v8924_v40, -inf }
0x1509   :  { %v8930_v11 = vsel %vm984_vm1, %v8926_v25, -inf  ;;  %v8925_v37 = vsel %vm32249_vm3, %v8923_v9, -inf }
0x150a   :  { %8931 = vmax.xlane.f32.xlu1 %v8930_v11  ;;  %v8927_v63 = vsel %vm984_vm1, %v8925_v37, -inf }
0x150b   :  { %8928 = vmax.xlane.f32.xlu0 %v8927_v63  ;;  %v9494_v63 = vld [vmem:[%s36343_s3 + $0x8] sm:$0xff] }
0x151b   :  { %8951 = vrot.lane.b32.xlu1 %v32197_v41, %s36365_s24 }
0x151f   :  { %5207 = vrot.lane.b32.xlu1 %v32378_v43, %s36367_s23 }
0x1523   :  { %5209 = vrot.lane.b32.xlu1 %v32376_v48, %s36367_s23 }
0x1527   :  { %5217 = vrot.lane.b32.xlu1 %v32437_v21, %s31574_s21 }
0x152b   :  { %5225 = vrot.lane.b32.xlu1 %v32471_v57, %s31572_s19 }
0x152f   :  { %9467 = vrot.lane.b32.xlu1 %v32550_v1, %s36367_s23 }
0x1533   :  { %9475 = vrot.lane.b32.xlu1 %v27696_v35, %s31574_s21 }
0x1597   :  { %v8932_v39 = vpop.xlane.xlu1 %8931 }
0x1598   :  { %v8934_v60 = vsub.f32 %v8926_v25, %v8932_v39  ;;  %v8929_v41 = vpop.xlane.xlu0 %8928 }
0x1599   :  { %v8933_v8 = vsub.f32 %v8925_v37, %v8929_v41 }
0x159a   :  { %v8937_v6 = vmul.f32 1.442695, %v8934_v60  ;;  %v9517_v60 = vand.u32 4294901760, %v9494_v63 }
0x159b   :  { %v8935_v43 = vmul.f32 1.442695, %v8933_v8  ;;  %v8952_v1 = vpop.permute.xlu1 %8951 }
0x159c   :  { %31380 = vpow2.f32 %v8937_v6  ;;  %v8965_v2 = vand.u32 4294901760, %v8952_v1 }
0x159d   :  { %31382 = vpow2.f32 %v8935_v43 }
0x159e   :  { %v9057_v49 = vsub.f32 %v8952_v1, %v8965_v2 }
0x159f   :  { %v5208_v62 = vpop.permute.xlu1 %5207 }
0x15a3   :  { %v5210_v29 = vpop.permute.xlu1 %5209 }
0x15a4   :  { %v5230_v6 = vsel %vm984_vm1, %v32283_v30, %v5210_v29 }
0x15a6   :  { %v31381_v48 = vpop.eup %31380 }
0x15a7   :  { %v8942_v24 = vsel %vm984_vm1, %v31381_v48, 0.0  ;;  %v31383_v21 = vpop.eup %31382  ;;  %v5218_v11 = vpop.permute.xlu1 %5217 }
0x15a8   :  { %8943 = vadd.xlane.f32.xlu0 %v8942_v24  ;;  %v8939_v57 = vsel %vm984_vm1, %v31383_v21, 0.0 }
0x15ab   :  { %v5226_v8 = vpop.permute.xlu1 %5225 }
0x15ac   :  { %8940 = vadd.xlane.f32.xlu0 %v8939_v57  ;;  %v9496_v57 = vld [vmem:[%s36343_s3 + $0x18] sm:$0xff] }
0x15c2   :  { %8949 = vrot.lane.b32.xlu0 %v32180_v20, %s36365_s24  ;;  %v9058_v20 = vand.u32 4294901760, %v9057_v49 }
0x15c6   :  { %5215 = vrot.lane.b32.xlu0 %v32439_v26, %s31574_s21 }
0x15ca   :  { %5223 = vrot.lane.b32.xlu0 %v32473_v28, %s31572_s19 }
0x15ce   :  { %9465 = vrot.lane.b32.xlu0 %v32552_v19, %s36367_s23  ;;  %v9059_v19 = vsub.f32 %v9057_v49, %v9058_v20 }
0x15d0   :  { %v9060_v45 = vand.u32 4294901760, %v9059_v19 }
0x15d2   :  { %9473 = vrot.lane.b32.xlu0 %v8395_v27, %s31574_s21  ;;  %v5229_v27 = vsel %vm984_vm1, %v32285_v42, %v5208_v62  ;;  %v9493_v42 = vld [vmem:[%s36343_s3] sm:$0xff] }
0x15d3   :  { %v9514_v39 = vand.u32 4294901760, %v9493_v42 }
0x15d5   :  { %v32656_v43 = vpack.c.bf16 %v9517_v60, %v9514_v39 }
0x1635   :  { %v8944_v53 = vpop.xlane.xlu0 %8943 }
0x1636   :  { %31384 = vrcp.f32 %v8944_v53  ;;  %v9523_v53 = vand.u32 4294901760, %v9496_v57 }
0x1639   :  { %v8941_v50 = vpop.xlane.xlu0 %8940 }
0x163a   :  { %31386 = vrcp.f32 %v8941_v50 }
0x163d   :  { %v8950_v44 = vpop.permute.xlu0 %8949 }
0x163e   :  { %v8962_v54 = vand.u32 4294901760, %v8950_v44 }
0x1640   :  { %v31385_v61 = vpop.eup %31384  ;;  %v32625_v26 = vpack.c.bf16 %v8965_v2, %v8962_v54  ;;  %v9050_v12 = vsub.f32 %v8950_v44, %v8962_v54  ;;  %v9498_v44 = vld [vmem:[%s36343_s3 + $0x28] sm:$0xff] }
0x1641   :  { %v8948_v28 = vmul.f32 %v31385_v61, %v31381_v48  ;;  %v5216_v14 = vpop.permute.xlu0 %5215  ;;  %v5233_v48 = vsel %vm5231_vm4, %v5230_v6, %v5218_v11 }
0x1642   :  { %v9051_v18 = vand.u32 4294901760, %v9050_v12  ;;  %29354 = vmatprep.subr.bf16.mxu1 %v32625_v26  ;;  %v29361_v23 = vpack.c.bf16 %v9057_v49, %v9050_v12  ;;  %v5232_v3 = vsel %vm5231_vm4, %v5229_v27, %v5216_v14  ;;  %v5236_v1 = vsel %vm5234_vm5, %v5233_v48, %v5226_v8  ;;  %v9497_v49 = vld [vmem:[%s36343_s3 + $0x20] sm:$0xff] }
0x1643   :  { %29356 = vmatpush3.bf16.msra.mxu1 %v32625_v26  ;;  %v8959_v7 = vsel %vm984_vm1, %v8948_v28, 0  ;;  %v9505_v2 = vsel %vm70_vm0, %v5236_v1, 0  ;;  %v9526_v61 = vand.u32 4294901760, %v9497_v49  ;;  %v9499_v28 = vld [vmem:[%s36343_s3 + $0x30] sm:$0xff] }
0x1644   :  { %v31387_v56 = vpop.eup %31386  ;;  %v9052_v15 = vsub.f32 %v9050_v12, %v9051_v18  ;;  %v32630_v17 = vand.u32 4294901760, %v8959_v7  ;;  %v29369_v40 = vpack.c.bf16 %v9058_v20, %v9051_v18  ;;  %v32680_v20 = vand.u32 4294901760, %v9505_v2  ;;  %v9500_v18 = vld [vmem:[%s36343_s3 + $0x38] sm:$0xff] }
0x1645   :  { %v8947_v34 = vmul.f32 %v31387_v56, %v31383_v21  ;;  %v5224_v35 = vpop.permute.xlu0 %5223  ;;  %v9495_v21 = vld [vmem:[%s36343_s3 + $0x10] sm:$0xff]  ;;  %v9532_v56 = vand.u32 4294901760, %v9499_v28  ;;  %v9656_v27 = vsub.f32 %v9497_v49, %v9526_v61 }
0x1646   :  { %v9053_v38 = vand.u32 4294901760, %v9052_v15  ;;  %v9039_v10 = vsub.f32 %v8959_v7, %v32630_v17  ;;  %v5235_v9 = vsel %vm5234_vm5, %v5232_v3, %v5224_v35  ;;  %v9520_v30 = vand.u32 4294901760, %v9495_v21 }
0x1647   :  { %v8956_v36 = vsel %vm984_vm1, %v8947_v34, 0  ;;  %v9502_v25 = vsel %vm70_vm0, %v5235_v9, 0  ;;  %v32693_v19 = vsub.f32 %v9505_v2, %v32680_v20  ;;  %v9535_v15 = vand.u32 4294901760, %v9500_v18 }
0x1648   :  { %v29357_v55 = vpack.c.bf16 %v9060_v45, %v9053_v38  ;;  %v9028_v4 = vand.u32 4294901760, %v8956_v36  ;;  %v9040_v13 = vand.u32 4294901760, %v9039_v10  ;;  %v32642_v37 = vand.u32 4294901760, %v9502_v25 }
0x1649   :  { %v32682_v54 = vpack.c.bf16 %v9523_v53, %v9520_v30  ;;  %v9598_v34 = vand.u32 4294901760, %v32693_v19  ;;  %v32701_v38 = vpack.c.bf16 %v9535_v15, %v9532_v56  ;;  %v9657_v9 = vand.u32 4294901760, %v9656_v27 }
0x164a   :  { %29358 = vmatprep.subr.bf16.mxu1 %v29357_v55  ;;  %v9029_v22 = vsub.f32 %v8956_v36, %v9028_v4  ;;  %v9041_v59 = vsub.f32 %v9039_v10, %v9040_v13  ;;  %v32652_v41 = vsub.f32 %v9502_v25, %v32642_v37  ;;  %v9635_v36 = vsub.f32 %v9494_v63, %v9517_v60 }
0x164b   :  { %v9670_v63 = vsub.f32 %v9499_v28, %v9532_v56 }
0x164c   :  { %v9030_v0 = vand.u32 4294901760, %v9029_v22  ;;  %v9042_v58 = vand.u32 4294901760, %v9041_v59  ;;  %v9588_v24 = vand.u32 4294901760, %v32652_v41  ;;  %v9649_v59 = vsub.f32 %v9496_v57, %v9523_v53 }
0x164d   :  { %v9671_v6 = vand.u32 4294901760, %v9670_v63 }
0x164e   :  { %v9031_v52 = vsub.f32 %v9029_v22, %v9030_v0  ;;  %v9589_v50 = vsub.f32 %v32652_v41, %v9588_v24 }
0x164f   :  { %v9672_v57 = vsub.f32 %v9670_v63, %v9671_v6 }
0x1650   :  { %v9032_v16 = vand.u32 4294901760, %v9031_v52  ;;  %v9590_v12 = vand.u32 4294901760, %v9589_v50 }
0x1651   :  { %v9673_v53 = vand.u32 4294901760, %v9672_v57 }
0x1652   :  { %27743 = vmatprep.mubr.f32.mxu1 %v9032_v16 }
0x1653   :  { %27744 = vmatmul.mubr.f32.vlgmr.msra.gmra.mrb[26].mxu1 %v9042_v58 }
0x1654   :  { %29360 = vmatpush3.bf16.msra.mxu1 %v29357_v55  ;;  %27750 = vmatprep.mubr.f32.mxu1 %v9028_v4 }
0x1655   :  { %29362 = vmatprep.subr.bf16.mxu1 %v29361_v23 }
0x165b   :  { %27751 = vmatmul.mubr.f32.vlgmr.msra.gmra.mrb[26].mxu1 %v32630_v17 }
0x165c   :  { %29364 = vmatpush3.bf16.msra.mxu1 %v29361_v23  ;;  %27757 = vmatprep.mubr.f32.mxu1 %v9029_v22  ;;  %v9650_v23 = vand.u32 4294901760, %v9649_v59 }
0x165d   :  { %29366 = vmatprep.subr.bf16.mxu1 %v32625_v26 }
0x165e   :  { %v9651_v35 = vsub.f32 %v9649_v59, %v9650_v23 }
0x1660   :  { %v9652_v29 = vand.u32 4294901760, %v9651_v35 }
0x1663   :  { %27758 = vmatmul.mubr.f32.vlgmr.msra.gmra.mrb[26].mxu1 %v9039_v10  ;;  %v9628_v10 = vsub.f32 %v9493_v42, %v9514_v39  ;;  %v9658_v42 = vsub.f32 %v9656_v27, %v9657_v9  ;;  %v9677_v39 = vsub.f32 %v9500_v18, %v9535_v15 }
0x1664   :  { %29368 = vmatpush3.bf16.msra.mxu1 %v32625_v26  ;;  %27764 = vmatprep.mubr.f32.mxu1 %v9030_v0  ;;  %v9642_v0 = vsub.f32 %v9495_v21, %v9520_v30 }
0x1665   :  { %29370 = vmatprep.subr.bf16.mxu1 %v29369_v40  ;;  %v9629_v55 = vand.u32 4294901760, %v9628_v10  ;;  %v9659_v8 = vand.u32 4294901760, %v9658_v42  ;;  %v9678_v48 = vand.u32 4294901760, %v9677_v39  ;;  %v29421_v28 = vpack.c.bf16 %v9677_v39, %v9670_v63  ;;  %v31544_v63 = vld [vmem:[%s36545_s26 + $0x18] sm:$0xff] }
0x1666   :  { %v9643_v58 = vand.u32 4294901760, %v9642_v0 }
0x1667   :  { %v9679_v1 = vsub.f32 %v9677_v39, %v9678_v48 }
0x1668   :  { %v9644_v62 = vsub.f32 %v9642_v0, %v9643_v58  ;;  %v29445_v56 = vpack.c.bf16 %v9650_v23, %v9643_v58 }
0x1669   :  { %v9680_v2 = vand.u32 4294901760, %v9679_v1 }
0x166b   :  { %27765 = vmatmul.mubr.f32.vlgmr.msra.gmra.mrb[26].mxu1 %v9040_v13  ;;  %v9630_v13 = vsub.f32 %v9628_v10, %v9629_v55  ;;  %v29405_v49 = vpack.c.bf16 %v9680_v2, %v9673_v53 }
0x166c   :  { %29372 = vmatpush3.bf16.msra.mxu1 %v29369_v40  ;;  %27771 = vmatprep.mubr.f32.mxu1 %v9028_v4  ;;  %v9645_v40 = vand.u32 4294901760, %v9644_v62 }
0x166d   :  { %29374 = vmatprep.subr.bf16.mxu1 %v32625_v26  ;;  %v9631_v52 = vand.u32 4294901760, %v9630_v13  ;;  %v9466_v13 = vpop.permute.xlu0 %9465 }
0x166e   :  { %v29397_v11 = vpack.c.bf16 %v9652_v29, %v9645_v40 }
0x1673   :  { %27772 = vmatmul.mubr.f32.vlgmr.msra.gmra.mrb[26].mxu1 %v32630_v17 }
0x1674   :  { %29376 = vmatpush3.bf16.msra.mxu1 %v32625_v26  ;;  %27778 = vmatprep.mubr.f32.mxu1 %v9028_v4  ;;  %v9529_v26 = vand.u32 4294901760, %v9498_v44  ;;  %v9636_v4 = vand.u32 4294901760, %v9635_v36 }
0x1675   :  { %29378 = vmatprep.subr.bf16.mxu1 %v32656_v43 }
0x1676   :  { %v32696_v7 = vpack.c.bf16 %v9529_v26, %v9526_v61  ;;  %v9637_v22 = vsub.f32 %v9635_v36, %v9636_v4  ;;  %v9663_v3 = vsub.f32 %v9498_v44, %v9529_v26  ;;  %v29409_v61 = vpack.c.bf16 %v9635_v36, %v9628_v10 }
0x1677   :  { %v29413_v26 = vpack.c.bf16 %v9649_v59, %v9642_v0  ;;  %v29441_v18 = vpack.c.bf16 %v9636_v4, %v9629_v55  ;;  %v9487_v10 = vsel %vm984_vm1, %v32508_v51, %v9466_v13 }
0x1678   :  { %v9638_v16 = vand.u32 4294901760, %v9637_v22  ;;  %v9664_v25 = vand.u32 4294901760, %v9663_v3 }
0x167a   :  { %v29393_v14 = vpack.c.bf16 %v9638_v16, %v9631_v52  ;;  %v9665_v60 = vsub.f32 %v9663_v3, %v9664_v25  ;;  %v29449_v15 = vpack.c.bf16 %v9664_v25, %v9657_v9  ;;  %v9474_v52 = vpop.permute.xlu0 %9473 }
0x167b   :  { %27779 = vmatmul.mubr.f32.vlgmr.msra.gmra.mrb[26].mxu1 %v32630_v17  ;;  %v9599_v17 = vsub.f32 %v32693_v19, %v9598_v34  ;;  %v9489_v0 = vsel %vm5231_vm4, %v9487_v10, %v9474_v52  ;;  %v10269_v10 = vld [vmem:[%s36349_s9 + $0x8] sm:$0xff] }
0x167c   :  { %29380 = vmatpush3.bf16.msra.mxu1 %v32656_v43  ;;  %27797 = vmatprep.mubr.f32.mxu1 %v9590_v12  ;;  %v9666_v21 = vand.u32 4294901760, %v9665_v60  ;;  %v29417_v12 = vpack.c.bf16 %v9663_v3, %v9656_v27  ;;  %v31545_v60 = vld [vmem:[%s36545_s26 + $0x10] sm:$0xff] }
0x167d   :  { %29382 = vmatprep.subr.bf16.mxu1 %v32682_v54  ;;  %v9600_v45 = vand.u32 4294901760, %v9599_v17  ;;  %v29453_v17 = vpack.c.bf16 %v9678_v48, %v9671_v6 }
0x167e   :  { %v29401_v30 = vpack.c.bf16 %v9666_v21, %v9659_v8 }
0x1680   :  { %29384 = vmatpush3.bf16.msra.mxu1 %v32682_v54 }
0x1681   :  { %29386 = vmatprep.subr.bf16.mxu1 %v32696_v7 }
0x1684   :  { %29388 = vmatpush3.bf16.msra.mxu1 %v32696_v7 }
0x1685   :  { %29390 = vmatprep.subr.bf16.mxu1 %v32701_v38 }
0x1688   :  { %29392 = vmatpush3.bf16.msra.mxu1 %v32701_v38 }
0x1689   :  { %29394 = vmatprep.subr.bf16.mxu1 %v29393_v14 }
0x168b   :  { %27798 = vmatmul.mubr.f32.vlgmr.msra.gmra.mrb[28].mxu1 %v9600_v45  ;;  %v9468_v45 = vpop.permute.xlu1 %9467 }
0x168c   :  { %29396 = vmatpush3.bf16.msra.mxu1 %v29393_v14  ;;  %v9488_v16 = vsel %vm984_vm1, %v32506_v46, %v9468_v45 }
0x168d   :  { %29398 = vmatprep.subr.bf16.mxu1 %v29397_v11 }
0x168f   :  { %v9476_v22 = vpop.permute.xlu1 %9475 }
0x1690   :  { %29400 = vmatpush3.bf16.msra.mxu1 %v29397_v11  ;;  %v9490_v14 = vsel %vm5231_vm4, %v9488_v16, %v9476_v22 }
0x1691   :  { %29402 = vmatprep.subr.bf16.mxu1 %v29401_v30 }
0x1694   :  { %29404 = vmatpush3.bf16.msra.mxu1 %v29401_v30 }
0x1695   :  { %29406 = vmatprep.subr.bf16.mxu1 %v29405_v49 }
0x1698   :  { %29408 = vmatpush3.bf16.msra.mxu1 %v29405_v49 }
0x1699   :  { %29410 = vmatprep.subr.bf16.mxu1 %v29409_v61 }
0x174e   :  { %v27780_v50 = vpop.f32.mrb[26].mxu1 }
0x174f   :  { %9483 = vrot.lane.b32.xlu1 %v27780_v50, %s31572_s19  ;;  %v9453_v44 = vpop.f32.mrb[27].mxu1 }
0x1750   :  { %9481 = vrot.lane.b32.xlu0 %v9453_v44, %s31572_s19 }
0x17c1   :  { %v9484_v36 = vpop.permute.xlu1 %9483 }
0x17c2   :  { %v9492_v55 = vsel %vm5234_vm5, %v9490_v14, %v9484_v36  ;;  %v9482_v4 = vpop.permute.xlu0 %9481  ;;  %v10271_v36 = vld [vmem:[%s36349_s9 + $0x18] sm:$0xff] }
0x17c3   :  { %v9511_v59 = vsel %vm70_vm0, %v9492_v55, 0  ;;  %v9491_v58 = vsel %vm5234_vm5, %v9489_v0, %v9482_v4  ;;  %v10308_v0 = vand.u32 4294901760, %v10269_v10  ;;  %v10312_v55 = vand.u32 4294901760, %v10271_v36  ;;  %v10268_v4 = vld [vmem:[%s36349_s9] sm:$0xff] }
0x17c4   :  { %v9616_v23 = vand.u32 4294901760, %v9511_v59  ;;  %v9508_v62 = vsel %vm70_vm0, %v9491_v58, 0  ;;  %v10310_v58 = vand.u32 4294901760, %v10268_v4 }
0x17c5   :  { %v9606_v35 = vand.u32 4294901760, %v9508_v62 }
0x17c6   :  { %v9617_v46 = vsub.f32 %v9511_v59, %v9616_v23  ;;  %v10270_v59 = vld [vmem:[%s36349_s9 + $0x10] sm:$0xff] }
0x17c7   :  { %v9607_v27 = vsub.f32 %v9508_v62, %v9606_v35  ;;  %v32816_v62 = vpack.c.bf16 %v10312_v55, %v10308_v0 }
0x17c8   :  { %v9618_v3 = vand.u32 4294901760, %v9617_v46 }
0x17c9   :  { %v9608_v40 = vand.u32 4294901760, %v9607_v27  ;;  %29474 = vmatprep.subr.bf16.mxu0 %v32816_v62 }
0x17ca   :  { %v9619_v29 = vsub.f32 %v9617_v46, %v9618_v3 }
0x17cb   :  { %v9609_v51 = vsub.f32 %v9607_v27, %v9608_v40 }
0x17cc   :  { %v9620_v25 = vand.u32 4294901760, %v9619_v29  ;;  %v10272_v29 = vld [vmem:[%s36349_s9 + $0x20] sm:$0xff] }
0x17cd   :  { %v9610_v9 = vand.u32 4294901760, %v9609_v51  ;;  %v10274_v51 = vld [vmem:[%s36349_s9 + $0x30] sm:$0xff] }
0x17cf   :  { %27800 = vmatprep.mubr.f32.mxu1 %v9610_v9  ;;  %v10318_v9 = vand.u32 4294901760, %v10272_v29 }
0x17d0   :  { %27801 = vmatmul.mubr.f32.gmra.mrb[30].mxu1 %v9620_v25  ;;  %v10322_v25 = vand.u32 4294901760, %v10274_v51 }
0x17d1   :  { %27819 = vmatprep.mubr.f32.mxu1 %v32642_v37 }
0x17d4   :  { %27820 = vmatmul.mubr.f32.vlgmr.msra.gmra.mrb[28].mxu1 %v32680_v20 }
0x17d5   :  { %29412 = vmatpush3.bf16.msra.mxu1 %v29409_v61  ;;  %27822 = vmatprep.mubr.f32.mxu1 %v9606_v35 }
0x17d6   :  { %29414 = vmatprep.subr.bf16.mxu1 %v29413_v26 }
0x17d8   :  { %27823 = vmatmul.mubr.f32.gmra.mrb[30].mxu1 %v9616_v23 }
0x17d9   :  { %29416 = vmatpush3.bf16.msra.mxu1 %v29413_v26  ;;  %27841 = vmatprep.mubr.f32.mxu1 %v32652_v41 }
0x17da   :  { %29418 = vmatprep.subr.bf16.mxu1 %v29417_v12 }
0x17dd   :  { %29420 = vmatpush3.bf16.msra.mxu1 %v29417_v12 }
0x17de   :  { %29422 = vmatprep.subr.bf16.mxu1 %v29421_v28 }
0x17e1   :  { %29424 = vmatpush3.bf16.msra.mxu1 %v29421_v28 }
0x17e2   :  { %29426 = vmatprep.subr.bf16.mxu1 %v32656_v43 }
0x17e4   :  { %27842 = vmatmul.mubr.f32.vlgmr.msra.gmra.mrb[28].mxu1 %v32693_v19  ;;  %v31543_v19 = vld [vmem:[%s36545_s26] sm:$0xff] }
0x17e5   :  { %27844 = vmatprep.mubr.f32.mxu1 %v9607_v27  ;;  %29428 = vmatpush3.bf16.msra.mxu1 %v32656_v43  ;;  %v10275_v27 = vld [vmem:[%s36349_s9 + $0x38] sm:$0xff] }
0x17e6   :  { %29430 = vmatprep.subr.bf16.mxu1 %v32682_v54 }
0x17e8   :  { %27845 = vmatmul.mubr.f32.gmra.mrb[30].mxu1 %v9617_v46  ;;  %v10273_v46 = vld [vmem:[%s36349_s9 + $0x28] sm:$0xff] }
0x17e9   :  { %29432 = vmatpush3.bf16.msra.mxu1 %v32682_v54  ;;  %27863 = vmatprep.mubr.f32.mxu1 %v9588_v24 }
0x17ea   :  { %29434 = vmatprep.subr.bf16.mxu1 %v32696_v7 }
0x17ed   :  { %29436 = vmatpush3.bf16.msra.mxu1 %v32696_v7 }
0x17ee   :  { %29438 = vmatprep.subr.bf16.mxu1 %v32701_v38 }
0x17f1   :  { %29440 = vmatpush3.bf16.msra.mxu1 %v32701_v38 }
0x17f2   :  { %29442 = vmatprep.subr.bf16.mxu1 %v29441_v18 }
0x17f4   :  { %27864 = vmatmul.mubr.f32.vlgmr.msra.gmra.mrb[28].mxu1 %v9598_v34 }
0x17f5   :  { %27866 = vmatprep.mubr.f32.mxu1 %v9608_v40  ;;  %29444 = vmatpush3.bf16.msra.mxu1 %v29441_v18  ;;  %v10320_v40 = vand.u32 4294901760, %v10275_v27 }
0x17f6   :  { %29446 = vmatprep.subr.bf16.mxu1 %v29445_v56 }
0x17f8   :  { %27867 = vmatmul.mubr.f32.gmra.mrb[30].mxu1 %v9618_v3  ;;  %v10316_v3 = vand.u32 4294901760, %v10273_v46 }
0x17f9   :  { %29448 = vmatpush3.bf16.msra.mxu1 %v29445_v56  ;;  %27885 = vmatprep.mubr.f32.mxu1 %v32642_v37 }
0x17fa   :  { %29450 = vmatprep.subr.bf16.mxu1 %v29449_v15 }
0x17fd   :  { %29452 = vmatpush3.bf16.msra.mxu1 %v29449_v15 }
0x17fe   :  { %29454 = vmatprep.subr.bf16.mxu1 %v29453_v17 }
0x1801   :  { %29456 = vmatpush3.bf16.msra.mxu1 %v29453_v17 }
0x1802   :  { %29458 = vmatprep.subr.bf16.mxu1 %v32656_v43 }
0x1804   :  { %27886 = vmatmul.mubr.f32.vlgmr.msra.gmra.mrb[28].mxu1 %v32680_v20 }
0x1805   :  { %27888 = vmatprep.mubr.f32.mxu1 %v9606_v35  ;;  %29460 = vmatpush3.bf16.msra.mxu1 %v32656_v43  ;;  %v25493_v43 = vld [vmem:[%s36344_s4] ss:$0 sm:$0xff] }
0x1806   :  { %29462 = vmatprep.subr.bf16.mxu1 %v32682_v54 }
0x1808   :  { %27889 = vmatmul.mubr.f32.gmra.mrb[30].mxu1 %v9616_v23 }
0x1809   :  { %29464 = vmatpush3.bf16.msra.mxu1 %v32682_v54  ;;  %27907 = vmatprep.mubr.f32.mxu1 %v32642_v37  ;;  %v31542_v37 = vld [vmem:[%s36545_s26 + $0x8] sm:$0xff] }
0x180a   :  { %29466 = vmatprep.subr.bf16.mxu1 %v32696_v7 }
0x180d   :  { %29468 = vmatpush3.bf16.msra.mxu1 %v32696_v7 }
0x180e   :  { %29470 = vmatprep.subr.bf16.mxu1 %v32701_v38 }
0x1811   :  { %29472 = vmatpush3.bf16.msra.mxu1 %v32701_v38 }
0x1814   :  { %27908 = vmatmul.mubr.f32.vlgmr.msra.gmra.mrb[28].mxu1 %v32680_v20 }
0x1815   :  { %27910 = vmatprep.mubr.f32.mxu1 %v9606_v35 }
0x1818   :  { %27911 = vmatmul.mubr.f32.gmra.mrb[30].mxu1 %v9616_v23  ;;  %v10314_v23 = vand.u32 4294901760, %v10270_v59 }
0x181a   :  { %v32818_v35 = vpack.c.bf16 %v10314_v23, %v10310_v58 }
0x181c   :  { %29476 = vmatpush1.bf16.msra.mxu0 %v32818_v35 }
0x18e7   :  { %v27909_v41 = vpop.f32.mrb[28].mxu1 }
0x18e8   :  { %v10180_v24 = vadd.f32 %v31542_v37, %v27909_v41  ;;  %v10157_v54 = vpop.f32.mrb[29].mxu1  ;;  %v32834_v41 = vpack.c.bf16 %v10320_v40, %v10316_v3  ;;  %v10277_v37 = vld [vmem:[%s36349_s9 + $0x48] sm:$0xff] }
0x18e9   :  { %v10179_v7 = vadd.f32 %v31543_v19, %v10157_v54  ;;  %v10324_v54 = vand.u32 4294901760, %v10277_v37 }
0x18ea   :  { %v32758_v34 = vadd.f32 %v25493_v43, %v10180_v24  ;;  %v10279_v24 = vld [vmem:[%s36349_s9 + $0x58] sm:$0xff]  ;;  %29478 = vmatprep.subr.bf16.mxu0 %v32834_v41 }
0x18eb   :  { %v32760_v20 = vadd.f32 %v25493_v43, %v10179_v7  ;;  %v27912_v38 = vpop.f32.mrb[30].mxu1  ;;  %v10328_v19 = vand.u32 4294901760, %v10279_v24  ;;  %v10276_v7 = vld [vmem:[%s36349_s9 + $0x40] sm:$0xff] }
0x18ec   :  { %36560 = vst [vmem:[#allocation9_spill] sm:$0xff] %v32758_v34  ;;  %v10169_v11 = vpop.f32.mrb[31].mxu1  ;;  %v10199_v42 = vsel %vm70_vm0, %v32758_v34, 0.0  ;;  %v10182_v39 = vadd.f32 %v31544_v63, %v27912_v38  ;;  %v10278_v38 = vld [vmem:[%s36349_s9 + $0x50] sm:$0xff]  ;;  %v32852_v63 = vsub.f32 %v10269_v10, %v10308_v0 }
0x18ed   :  { %36561 = vst [vmem:[#allocation10_spill] sm:$0xff] %v32760_v20  ;;  %v10181_v8 = vadd.f32 %v31545_v60, %v10169_v11  ;;  %10200 = vadd.xlane.f32.xlu1 %v10199_v42  ;;  %v10196_v6 = vsel %vm70_vm0, %v32760_v20, 0.0  ;;  %v10326_v11 = vand.u32 4294901760, %v10276_v7  ;;  %v10330_v42 = vand.u32 4294901760, %v10278_v38 }
0x18ee   :  { %10197 = vadd.xlane.f32.xlu0 %v10196_v6  ;;  %v32774_v21 = vadd.f32 %v25493_v43, %v10182_v39  ;;  %v32854_v39 = vsub.f32 %v10271_v36, %v10312_v55  ;;  %v32856_v60 = vpack.c.bf16 %v10328_v19, %v10324_v54  ;;  %v32860_v6 = vsub.f32 %v10270_v59, %v10314_v23 }
0x18ef   :  { %v32772_v48 = vadd.f32 %v25493_v43, %v10181_v8  ;;  %v32836_v43 = vpack.c.bf16 %v10322_v25, %v10318_v9  ;;  %v32858_v8 = vsub.f32 %v10268_v4, %v10310_v58 }
0x18f0   :  { %36563 = vst [vmem:[#allocation12_spill] sm:$0xff] %v32774_v21  ;;  %v10205_v1 = vsel %vm70_vm0, %v32774_v21, 0.0  ;;  %v36373_v36 = vand.u32 4294901760, %v32854_v39  ;;  %v36371_v55 = vand.u32 4294901760, %v32860_v6 }
0x18f1   :  { %36562 = vst [vmem:[#allocation11_spill] sm:$0xff] %v32772_v48  ;;  %v10202_v57 = vsel %vm70_vm0, %v32772_v48, 0.0  ;;  %29480 = vmatpush1.bf16.msra.mxu0 %v32836_v43  ;;  %v36372_v0 = vand.u32 4294901760, %v32858_v8 }
0x18f2   :  { %10203 = vadd.xlane.f32.xlu0 %v10202_v57  ;;  %v32862_v57 = vsub.f32 %v10273_v46, %v10316_v3  ;;  %29482 = vmatprep.subr.bf16.mxu0 %v32856_v60  ;;  %v10448_v3 = vsub.f32 %v32854_v39, %v36373_v36 }
0x18f6   :  { %10206 = vadd.xlane.f32.xlu0 %v10205_v1  ;;  %v32864_v1 = vsub.f32 %v10275_v27, %v10320_v40  ;;  %v10442_v40 = vsub.f32 %v32858_v8, %v36372_v0 }
0x197a   :  { %v10201_v30 = vpop.xlane.xlu1 %10200 }
0x197b   :  { %v10209_v53 = vmul.f32 0.015625, %v10201_v30  ;;  %v10198_v2 = vpop.xlane.xlu0 %10197  ;;  %v10281_v30 = vld [vmem:[%s36349_s9 + $0x68] sm:$0xff] }
0x197c   :  { %v10208_v50 = vmul.f32 0.015625, %v10198_v2  ;;  %v10280_v2 = vld [vmem:[%s36349_s9 + $0x60] sm:$0xff] }
0x197d   :  { %v32781_v49 = vsub.f32 %v32758_v34, %v10209_v53  ;;  %v10283_v53 = vld [vmem:[%s36349_s9 + $0x78] sm:$0xff] }
0x197e   :  { %v32784_v44 = vsub.f32 %v32760_v20, %v10208_v50  ;;  %v32875_v50 = vsub.f32 %v10272_v29, %v10318_v9  ;;  %v10454_v29 = vsub.f32 %v32860_v6, %v36371_v55  ;;  %v10471_v9 = vand.u32 4294901760, %v32864_v1 }
0x197f   :  { %v10204_v61 = vpop.xlane.xlu0 %10203  ;;  %v10217_v26 = vmul.f32 %v32781_v49, %v32781_v49 }
0x1980   :  { %v10210_v12 = vmul.f32 0.015625, %v10204_v61  ;;  %v10216_v28 = vmul.f32 %v32784_v44, %v32784_v44  ;;  %v32877_v61 = vsub.f32 %v10274_v51, %v10322_v25  ;;  %v10459_v51 = vand.u32 4294901760, %v32862_v57 }
0x1981   :  { %v10223_v18 = vsel %vm70_vm0, %v10217_v26, 0.0  ;;  %v32880_v26 = vsub.f32 %v10277_v37, %v10324_v54  ;;  %v10465_v25 = vand.u32 4294901760, %v32875_v50  ;;  %v10443_v54 = vand.u32 4294901760, %v10442_v40 }
0x1982   :  { %v32792_v56 = vsub.f32 %v32772_v48, %v10210_v12  ;;  %10224 = vadd.xlane.f32.xlu1 %v10223_v18  ;;  %v10220_v15 = vsel %vm70_vm0, %v10216_v28, 0.0  ;;  %v32882_v12 = vsub.f32 %v10279_v24, %v10328_v19  ;;  %v10282_v28 = vld [vmem:[%s36349_s9 + $0x70] sm:$0xff]  ;;  %v32887_v18 = vpack.c.bf16 %v10330_v42, %v10326_v11 }
0x1983   :  { %10221 = vadd.xlane.f32.xlu0 %v10220_v15  ;;  %v10207_v17 = vpop.xlane.xlu0 %10206  ;;  %v32889_v15 = vsub.f32 %v10276_v7, %v10326_v11  ;;  %v10449_v24 = vand.u32 4294901760, %v10448_v3  ;;  %v10477_v19 = vand.u32 4294901760, %v32877_v61  ;;  %v10455_v7 = vand.u32 4294901760, %v10454_v29 }
0x1984   :  { %v10211_v45 = vmul.f32 0.015625, %v10207_v17  ;;  %v10218_v13 = vmul.f32 %v32792_v56, %v32792_v56  ;;  %v32891_v17 = vsub.f32 %v10278_v38, %v10330_v42  ;;  %29484 = vmatpush1.bf16.msra.mxu0 %v32887_v18  ;;  %v10460_v38 = vsub.f32 %v32862_v57, %v10459_v51 }
0x1985   :  { %v10472_v11 = vsub.f32 %v32864_v1, %v10471_v9  ;;  %v10466_v42 = vsub.f32 %v32875_v50, %v10465_v25  ;;  %v10489_v29 = vand.u32 4294901760, %v32889_v15 }
0x1986   :  { %v32798_v22 = vsub.f32 %v32774_v21, %v10211_v45  ;;  %v10226_v52 = vsel %vm70_vm0, %v10218_v13, 0.0  ;;  %v10332_v45 = vand.u32 4294901760, %v10281_v30  ;;  %v10336_v13 = vand.u32 4294901760, %v10283_v53 }
0x1987   :  { %10227 = vadd.xlane.f32.xlu0 %v10226_v52  ;;  %v10334_v52 = vand.u32 4294901760, %v10280_v2 }
0x1988   :  { %v10219_v16 = vmul.f32 %v32798_v22, %v32798_v22  ;;  %v32895_v10 = vsub.f32 %v10281_v30, %v10332_v45  ;;  %v32900_v4 = vpack.c.bf16 %v10336_v13, %v10332_v45  ;;  %v32902_v59 = vsub.f32 %v10283_v53, %v10336_v13 }
0x1989   :  { %v32906_v23 = vsub.f32 %v10280_v2, %v10334_v52  ;;  %v10478_v53 = vsub.f32 %v32877_v61, %v10477_v19  ;;  %v10483_v2 = vand.u32 4294901760, %v32880_v26  ;;  %v32934_v45 = vpack.c.bf16 %v10455_v7, %v10443_v54 }
0x198a   :  { %v10229_v14 = vsel %vm70_vm0, %v10219_v16, 0.0  ;;  %v10338_v16 = vand.u32 4294901760, %v10282_v28  ;;  %29486 = vmatprep.subr.bf16.mxu0 %v32900_v4  ;;  %v10461_v13 = vand.u32 4294901760, %v10460_v38  ;;  %v10507_v47 = vand.u32 4294901760, %v32895_v10 }
0x198b   :  { %10230 = vadd.xlane.f32.xlu1 %v10229_v14  ;;  %v36374_v14 = vand.u32 4294901760, %v32852_v63  ;;  %v10484_v3 = vsub.f32 %v32880_v26, %v10483_v2  ;;  %v10519_v54 = vand.u32 4294901760, %v32902_v59 }
0x198c   :  { %v32904_v58 = vpack.c.bf16 %v10338_v16, %v10334_v52  ;;  %v32908_v46 = vsub.f32 %v10282_v28, %v10338_v16  ;;  %v10495_v28 = vand.u32 4294901760, %v32882_v12  ;;  %v10473_v52 = vand.u32 4294901760, %v10472_v11 }
0x198d   :  { %v10436_v27 = vsub.f32 %v32852_v63, %v36374_v14  ;;  %v10467_v16 = vand.u32 4294901760, %v10466_v42  ;;  %v10485_v38 = vand.u32 4294901760, %v10484_v3  ;;  %v10490_v42 = vsub.f32 %v32889_v15, %v10489_v29 }
0x198e   :  { %29488 = vmatpush1.bf16.msra.mxu0 %v32904_v58  ;;  %v10496_v40 = vsub.f32 %v32882_v12, %v10495_v28  ;;  %v10520_v55 = vsub.f32 %v32902_v59, %v10519_v54  ;;  %v10525_v36 = vand.u32 4294901760, %v32908_v46 }
0x198f   :  { %v10437_v37 = vand.u32 4294901760, %v10436_v27  ;;  %v10479_v27 = vand.u32 4294901760, %v10478_v53  ;;  %v10508_v53 = vsub.f32 %v32895_v10, %v10507_v47  ;;  %v10491_v0 = vand.u32 4294901760, %v10490_v42 }
0x1990   :  { %v10497_v11 = vand.u32 4294901760, %v10496_v40  ;;  %v10526_v40 = vsub.f32 %v32908_v46, %v10525_v36 }
0x1991   :  { %v29489_v30 = vpack.c.bf16 %v10449_v24, %v10437_v37  ;;  %v32939_v37 = vpack.c.bf16 %v10473_v52, %v10461_v13  ;;  %v10501_v24 = vand.u32 4294901760, %v32891_v17  ;;  %v32944_v7 = vpack.c.bf16 %v10479_v27, %v10467_v16 }
0x1992   :  { %v10513_v13 = vand.u32 4294901760, %v32906_v23  ;;  %v32951_v52 = vpack.c.bf16 %v10497_v11, %v10485_v38  ;;  %v10509_v16 = vand.u32 4294901760, %v10508_v53  ;;  %v10521_v27 = vand.u32 4294901760, %v10520_v55 }
0x1993   :  { %29490 = vmatprep.subr.bf16.mxu0 %v29489_v30  ;;  %v10502_v30 = vsub.f32 %v32891_v17, %v10501_v24  ;;  %v10527_v48 = vand.u32 4294901760, %v10526_v40  ;;  %v36565_v53 = vand.u32 4294901760, %v32854_v39  ;;  %v32996_v42 = vpack.c.bf16 %v10501_v24, %v10489_v29 }
0x1994   :  { %v10514_v3 = vsub.f32 %v32906_v23, %v10513_v13  ;;  %v32958_v31 = vpack.c.bf16 %v10521_v27, %v10509_v16  ;;  %v36566_v27 = vand.u32 4294901760, %v32858_v8  ;;  %v33000_v55 = vpack.c.bf16 %v10525_v36, %v10513_v13  ;;  %v25494_v36 = vld [vmem:[%s36347_s7] ss:$0 sm:$0xff] }
0x1995   :  { %v10503_v14 = vand.u32 4294901760, %v10502_v30  ;;  %v36564_v30 = vand.u32 4294901760, %v32852_v63 }
0x1996   :  { %v10515_v21 = vand.u32 4294901760, %v10514_v3  ;;  %v36567_v3 = vand.u32 4294901760, %v32860_v6 }
0x1997   :  { %v32956_v33 = vpack.c.bf16 %v10503_v14, %v10491_v0  ;;  %v32982_v16 = vpack.c.bf16 %v36565_v53, %v36564_v30  ;;  %v32990_v14 = vpack.c.bf16 %v10471_v9, %v10459_v51  ;;  %v32992_v0 = vpack.c.bf16 %v10477_v19, %v10465_v25 }
0x1998   :  { %v32960_v34 = vpack.c.bf16 %v10527_v48, %v10515_v21  ;;  %v32988_v40 = vpack.c.bf16 %v36567_v3, %v36566_v27  ;;  %v32994_v48 = vpack.c.bf16 %v10495_v28, %v10483_v2  ;;  %v32998_v21 = vpack.c.bf16 %v10519_v54, %v10507_v47 }
0x1a0f   :  { %v10225_v30 = vpop.xlane.xlu1 %10224 }
0x1a10   :  { %v10233_v53 = vmul.f32 0.015625, %v10225_v30  ;;  %v10222_v11 = vpop.xlane.xlu0 %10221 }
0x1a11   :  { %v10232_v38 = vmul.f32 0.015625, %v10222_v11 }
0x1a12   :  { %v10237_v20 = vadd.f32 1e-05, %v10233_v53 }
0x1a13   :  { %v10236_v5 = vadd.f32 1e-05, %v10232_v38 }
0x1a14   :  { %31388 = vrsqrt.f32 %v10237_v20  ;;  %v10228_v27 = vpop.xlane.xlu0 %10227 }
0x1a15   :  { %31390 = vrsqrt.f32 %v10236_v5  ;;  %v10234_v51 = vmul.f32 0.015625, %v10228_v27  ;;  %v25495_v5 = vld [vmem:[%s36348_s8] ss:$0 sm:$0xff] }
0x1a17   :  { %v10238_v9 = vadd.f32 1e-05, %v10234_v51 }
0x1a18   :  { %v10231_v25 = vpop.xlane.xlu1 %10230 }
0x1a19   :  { %31392 = vrsqrt.f32 %v10238_v9  ;;  %v10235_v19 = vmul.f32 0.015625, %v10231_v25 }
0x1a1b   :  { %v10239_v2 = vadd.f32 1e-05, %v10235_v19 }
0x1a1d   :  { %31394 = vrsqrt.f32 %v10239_v2 }
0x1a1e   :  { %v31389_v47 = vpop.eup %31388 }
0x1a1f   :  { %v31391_v28 = vpop.eup %31390  ;;  %v10245_v29 = vmul.f32 %v31389_v47, %v32781_v49 }
0x1a20   :  { %v10244_v24 = vmul.f32 %v31391_v28, %v32784_v44 }
0x1a21   :  { %v10255_v20 = vmul.f32 %v25494_v36, %v10245_v29 }
0x1a22   :  { %v10254_v54 = vmul.f32 %v25494_v36, %v10244_v24 }
0x1a23   :  { %v31393_v13 = vpop.eup %31392  ;;  %v10265_v38 = vadd.f32 %v25495_v5, %v10255_v20 }
0x1a24   :  { %v10246_v11 = vmul.f32 %v31393_v13, %v32792_v56  ;;  %v10264_v3 = vadd.f32 %v25495_v5, %v10254_v54 }
0x1a25   :  { %v10300_v30 = vsel %vm70_vm0, %v10265_v38, 0 }
0x1a26   :  { %v10297_v53 = vsel %vm70_vm0, %v10264_v3, 0  ;;  %v33013_v27 = vand.u32 4294901760, %v10300_v30  ;;  %v10256_v49 = vmul.f32 %v25494_v36, %v10246_v11 }
0x1a27   :  { %v31395_v51 = vpop.eup %31394  ;;  %v33015_v44 = vand.u32 4294901760, %v10297_v53 }
0x1a28   :  { %v10247_v9 = vmul.f32 %v31395_v51, %v32798_v22  ;;  %v33019_v25 = vsub.f32 %v10300_v30, %v33013_v27  ;;  %v10266_v19 = vadd.f32 %v25495_v5, %v10256_v49  ;;  %v36568_v30 = vmov 0.0  }
0x1a29   :  { %v33022_v2 = vsub.f32 %v10297_v53, %v33015_v44 }
0x1a2a   :  { %v10303_v56 = vsel %vm70_vm0, %v10266_v19, 0  ;;  %v10257_v47 = vmul.f32 %v25494_v36, %v10247_v9  ;;  %v10402_v29 = vand.u32 4294901760, %v33019_v25  ;;  %v33257_v19 = vld [vmem:[%s36351_s11 + $0xa0] sm:$0xff] }
0x1a2b   :  { %v10391_v28 = vand.u32 4294901760, %v33022_v2  ;;  %v33027_v24 = vand.u32 4294901760, %v10303_v56 }
0x1a2c   :  { %v10267_v20 = vadd.f32 %v25495_v5, %v10257_v47  ;;  %v10403_v36 = vsub.f32 %v33019_v25, %v10402_v29 }
0x1a2d   :  { %v10392_v22 = vsub.f32 %v33022_v2, %v10391_v28  ;;  %v33033_v54 = vsub.f32 %v10303_v56, %v33027_v24 }
0x1a2e   :  { %v10306_v13 = vsel %vm70_vm0, %v10267_v20, 0  ;;  %v10404_v53 = vand.u32 4294901760, %v10403_v36  ;;  %v11251_v36 = vand.u32 4294901760, %v33257_v19 }
0x1a2f   :  { %v10393_v38 = vand.u32 4294901760, %v10392_v22  ;;  %v10413_v11 = vand.u32 4294901760, %v33033_v54  ;;  %v33040_v3 = vand.u32 4294901760, %v10306_v13 }
0x1a31   :  { %10394 = vmatmul.mubr.f32.vlgmr.msra.gmra.mrb[22].mxu0 %v10393_v38  ;;  %v33043_v5 = vsub.f32 %v10306_v13, %v33040_v3  ;;  %v10414_v49 = vsub.f32 %v33033_v54, %v10413_v11 }
0x1a32   :  { %29492 = vmatpush1.bf16.msra.mxu0 %v32934_v45  ;;  %10399 = vmatprep.mubr.f32.mxu0 %v36568_v30 }
0x1a33   :  { %29494 = vmatprep.subr.bf16.mxu0 %v32939_v37  ;;  %v10424_v51 = vand.u32 4294901760, %v33043_v5  ;;  %v10415_v9 = vand.u32 4294901760, %v10414_v49 }
0x1a35   :  { %10405 = vmatmul.mubr.f32.gmra.mrb[24].mxu0 %v10404_v53  ;;  %v10425_v45 = vsub.f32 %v33043_v5, %v10424_v51 }
0x1a36   :  { %29496 = vmatpush1.bf16.msra.mxu0 %v32944_v7  ;;  %10410 = vmatprep.mubr.f32.mxu0 %v36568_v30  ;;  %v36569_v7 = vpack.c.bf16 %v32854_v39, %v32852_v63  ;;  %v36574_v63 = vpack.c.bf16 %v32891_v17, %v32889_v15  ;;  %v36575_v39 = vpack.c.bf16 %v32902_v59, %v32895_v10  ;;  %v33202_v15 = vld [vmem:[%s36351_s11 + $0x98] sm:$0xff] }
0x1a37   :  { %29498 = vmatprep.subr.bf16.mxu0 %v32951_v52  ;;  %v10426_v37 = vand.u32 4294901760, %v10425_v45  ;;  %v36570_v52 = vpack.c.bf16 %v32860_v6, %v32858_v8  ;;  %v36576_v8 = vpack.c.bf16 %v32908_v46, %v32906_v23  ;;  %v33170_v6 = vld [vmem:[%s36351_s11 + $0x8] sm:$0xff]  ;;  %v11248_v59 = vand.u32 4294901760, %v33202_v15  ;;  %v33216_v23 = vld [vmem:[%s36351_s11 + $0x18] sm:$0xff] }
0x1a39   :  { %10416 = vmatmul.mubr.f32.gmra.mrb[26].mxu0 %v10415_v9 }
0x1a3a   :  { %29500 = vmatpush1.bf16.msra.mxu0 %v32956_v33  ;;  %10421 = vmatprep.mubr.f32.mxu0 %v36568_v30  ;;  %v36572_v33 = vpack.c.bf16 %v32877_v61, %v32875_v50 }
0x1a3b   :  { %29502 = vmatprep.subr.bf16.mxu0 %v32958_v31  ;;  %v36571_v31 = vpack.c.bf16 %v32864_v1, %v32862_v57  ;;  %v11194_v1 = vand.u32 4294901760, %v33170_v6 }
0x1a3d   :  { %10427 = vmatmul.mubr.f32.gmra.mrb[28].mxu0 %v10426_v37  ;;  %v33295_v37 = vsub.f32 %v33257_v19, %v11251_v36 }
0x1a3e   :  { %29504 = vmatpush1.bf16.msra.mxu0 %v32960_v34  ;;  %10577 = vmatprep.mubr.f32.mxu0 %v36568_v30  ;;  %v36573_v34 = vpack.c.bf16 %v32882_v12, %v32880_v26  ;;  %v33192_v12 = vsub.f32 %v33170_v6, %v11194_v1 }
0x1a3f   :  { %29506 = vmatprep.subr.bf16.mxu0 %v36569_v7 }
0x1a41   :  { %10579 = vmatmul.mubr.f32.vlgmr.msra.gmra.mrb[22].mxu0 %v33015_v44 }
0x1a42   :  { %29508 = vmatpush1.bf16.msra.mxu0 %v36570_v52  ;;  %10584 = vmatprep.mubr.f32.mxu0 %v36568_v30 }
0x1a43   :  { %29510 = vmatprep.subr.bf16.mxu0 %v36571_v31 }
0x1a45   :  { %10586 = vmatmul.mubr.f32.gmra.mrb[24].mxu0 %v33013_v27 }
0x1a46   :  { %29512 = vmatpush1.bf16.msra.mxu0 %v36572_v33  ;;  %10591 = vmatprep.mubr.f32.mxu0 %v36568_v30 }
0x1a47   :  { %29514 = vmatprep.subr.bf16.mxu0 %v36573_v34 }
0x1a49   :  { %10593 = vmatmul.mubr.f32.gmra.mrb[26].mxu0 %v33027_v24 }
0x1a4a   :  { %29516 = vmatpush1.bf16.msra.mxu0 %v36574_v63  ;;  %10598 = vmatprep.mubr.f32.mxu0 %v36568_v30  ;;  %v33307_v63 = vld [vmem:[%s36351_s11 + $0xb0] sm:$0xff] }
0x1a4b   :  { %29518 = vmatprep.subr.bf16.mxu0 %v36575_v39  ;;  %v33312_v39 = vld [vmem:[%s36351_s11 + $0xb8] sm:$0xff] }
0x1a4d   :  { %10600 = vmatmul.mubr.f32.gmra.mrb[28].mxu0 %v33040_v3 }
0x1a4e   :  { %29520 = vmatpush1.bf16.msra.mxu0 %v36576_v8  ;;  %10702 = vmatprep.mubr.f32.mxu0 %v36568_v30 }
0x1a4f   :  { %29522 = vmatprep.subr.bf16.mxu0 %v32816_v62 }
0x1a51   :  { %10705 = vmatmul.mubr.f32.vlgmr.msra.gmra.mrb[22].mxu0 %v33022_v2 }
0x1a52   :  { %29524 = vmatpush1.bf16.msra.mxu0 %v32818_v35  ;;  %10710 = vmatprep.mubr.f32.mxu0 %v36568_v30 }
0x1a53   :  { %29526 = vmatprep.subr.bf16.mxu0 %v32834_v41 }
0x1a55   :  { %10713 = vmatmul.mubr.f32.gmra.mrb[24].mxu0 %v33019_v25 }
0x1a56   :  { %29528 = vmatpush1.bf16.msra.mxu0 %v32836_v43  ;;  %10718 = vmatprep.mubr.f32.mxu0 %v36568_v30 }
0x1a57   :  { %29530 = vmatprep.subr.bf16.mxu0 %v32856_v60 }
0x1a59   :  { %10721 = vmatmul.mubr.f32.gmra.mrb[26].mxu0 %v33033_v54 }
0x1a5a   :  { %29532 = vmatpush1.bf16.msra.mxu0 %v32887_v18  ;;  %10726 = vmatprep.mubr.f32.mxu0 %v36568_v30 }
0x1a5b   :  { %29534 = vmatprep.subr.bf16.mxu0 %v32900_v4 }
0x1a5d   :  { %10729 = vmatmul.mubr.f32.gmra.mrb[28].mxu0 %v33043_v5 }
0x1a5e   :  { %29536 = vmatpush1.bf16.msra.mxu0 %v32904_v58  ;;  %10815 = vmatprep.mubr.f32.mxu0 %v36568_v30 }
0x1a5f   :  { %29538 = vmatprep.subr.bf16.mxu0 %v32982_v16  ;;  %v33236_v16 = vsub.f32 %v33202_v15, %v11248_v59 }
0x1a61   :  { %10819 = vmatmul.mubr.f32.vlgmr.msra.gmra.mrb[22].mxu0 %v10391_v28  ;;  %v33263_v28 = vld [vmem:[%s36351_s11 + $0xa8] sm:$0xff]  ;;  %v36389_v20 = vand.u32 4294901760, %v33236_v16 }
0x1a62   :  { %29540 = vmatpush1.bf16.msra.mxu0 %v32988_v40  ;;  %10824 = vmatprep.mubr.f32.mxu0 %v36568_v30 }
0x1a63   :  { %29542 = vmatprep.subr.bf16.mxu0 %v32990_v14  ;;  %v11200_v14 = vand.u32 4294901760, %v33216_v23  ;;  %v11484_v53 = vsub.f32 %v33236_v16, %v36389_v20 }
0x1a65   :  { %10828 = vmatmul.mubr.f32.gmra.mrb[24].mxu0 %v10402_v29  ;;  %v33252_v25 = vsub.f32 %v33216_v23, %v11200_v14  ;;  %v11485_v52 = vand.u32 4294901760, %v11484_v53 }
0x1a66   :  { %29544 = vmatpush1.bf16.msra.mxu0 %v32992_v0  ;;  %10833 = vmatprep.mubr.f32.mxu0 %v36568_v30 }
0x1a67   :  { %29546 = vmatprep.subr.bf16.mxu0 %v32994_v48  ;;  %v36387_v38 = vand.u32 4294901760, %v33252_v25 }
0x1a69   :  { %10837 = vmatmul.mubr.f32.gmra.mrb[26].mxu0 %v10413_v11  ;;  %v33275_v11 = vld [vmem:[%s36351_s11 + $0x20] sm:$0xff]  ;;  %v11372_v45 = vsub.f32 %v33252_v25, %v36387_v38 }
0x1a6a   :  { %29548 = vmatpush1.bf16.msra.mxu0 %v32996_v42  ;;  %10842 = vmatprep.mubr.f32.mxu0 %v36568_v30  ;;  %v11203_v7 = vand.u32 4294901760, %v33275_v11 }
0x1a6b   :  { %29550 = vmatprep.subr.bf16.mxu0 %v32998_v21  ;;  %v11373_v8 = vand.u32 4294901760, %v11372_v45 }
0x1a6d   :  { %10846 = vmatmul.mubr.f32.gmra.mrb[28].mxu0 %v10424_v51  ;;  %v11254_v51 = vand.u32 4294901760, %v33263_v28 }
0x1a6e   :  { %29552 = vmatpush1.bf16.msra.mxu0 %v33000_v55  ;;  %10964 = vmatprep.mubr.f32.mxu0 %v36568_v30  ;;  %v36394_v55 = vand.u32 4294901760, %v33192_v12 }
0x1a6f   :  { %29554 = vmatprep.subr.bf16.mxu0 %v32816_v62  ;;  %v33153_v62 = vld [vmem:[%s36351_s11 + $0x80] sm:$0xff]  ;;  %v33301_v33 = vsub.f32 %v33263_v28, %v11254_v51 }
0x1a71   :  { %10966 = vmatmul.mubr.f32.vlgmr.msra.gmra.mrb[22].mxu0 %v33015_v44 }
0x1a72   :  { %29556 = vmatpush1.bf16.msra.mxu0 %v32818_v35  ;;  %10971 = vmatprep.mubr.f32.mxu0 %v36568_v30  ;;  %v33158_v35 = vld [vmem:[%s36351_s11 + $0x88] sm:$0xff] }
0x1a73   :  { %29558 = vmatprep.subr.bf16.mxu0 %v32834_v41  ;;  %v11239_v41 = vand.u32 4294901760, %v33153_v62 }
0x1a75   :  { %10973 = vmatmul.mubr.f32.gmra.mrb[24].mxu0 %v33013_v27  ;;  %v33177_v50 = vsub.f32 %v33153_v62, %v11239_v41 }
0x1a76   :  { %29560 = vmatpush1.bf16.msra.mxu0 %v32836_v43  ;;  %10978 = vmatprep.mubr.f32.mxu0 %v36568_v30  ;;  %v11242_v43 = vand.u32 4294901760, %v33158_v35 }
0x1a77   :  { %29562 = vmatprep.subr.bf16.mxu0 %v32856_v60  ;;  %v33165_v60 = vld [vmem:[%s36351_s11] sm:$0xff]  ;;  %36577 = vst [vmem:[#allocation13_spill] sm:$0xff] %v33177_v50  ;;  %v36402_v17 = vand.u32 4294901760, %v33177_v50 }
0x1a78   :  { %v11191_v57 = vand.u32 4294901760, %v33165_v60  ;;  %v33182_v61 = vsub.f32 %v33158_v35, %v11242_v43  ;;  %v33380_v35 = vld [vmem:[%s36351_s11 + $0xc8] sm:$0xff] }
0x1a79   :  { %10980 = vmatmul.mubr.f32.gmra.mrb[26].mxu0 %v33027_v24  ;;  %v11463_v0 = vsub.f32 %v33177_v50, %v36402_v17 }
0x1a7a   :  { %29564 = vmatpush1.bf16.msra.mxu0 %v32887_v18  ;;  %10985 = vmatprep.mubr.f32.mxu0 %v36568_v30  ;;  %36578 = vst [vmem:[#allocation14_spill] sm:$0xff] %v33182_v61  ;;  %v33187_v26 = vsub.f32 %v33165_v60, %v11191_v57  ;;  %v33197_v18 = vld [vmem:[%s36351_s11 + $0x90] sm:$0xff]  ;;  %v36396_v10 = vand.u32 4294901760, %v33182_v61  ;;  %v33416_v60 = vld [vmem:[%s36351_s11 + $0x48] sm:$0xff] }
0x1a7b   :  { %29566 = vmatprep.subr.bf16.mxu0 %v32900_v4  ;;  %v11245_v4 = vand.u32 4294901760, %v33197_v18  ;;  %v11464_v2 = vand.u32 4294901760, %v11463_v0  ;;  %v36386_v0 = vand.u32 4294901760, %v33295_v37 }
0x1a7c   :  { %v36395_v46 = vand.u32 4294901760, %v33187_v26  ;;  %v11470_v48 = vsub.f32 %v33182_v61, %v36396_v10 }
0x1a7d   :  { %10987 = vmatmul.mubr.f32.gmra.mrb[28].mxu0 %v33040_v3  ;;  %v33231_v21 = vsub.f32 %v33197_v18, %v11245_v4  ;;  %v33448_v18 = vld [vmem:[%s36351_s11 + $0xd8] sm:$0xff] }
0x1a7e   :  { %29568 = vmatpush1.bf16.msra.mxu0 %v32904_v58  ;;  %11073 = vmatprep.mubr.f32.mxu0 %v36568_v30  ;;  %v33211_v58 = vld [vmem:[%s36351_s11 + $0x10] sm:$0xff]  ;;  %v11351_v40 = vsub.f32 %v33187_v26, %v36395_v46  ;;  %v11471_v56 = vand.u32 4294901760, %v11470_v48  ;;  %v33318_v48 = vsub.f32 %v33275_v11, %v11203_v7 }
0x1a7f   :  { %v11197_v42 = vand.u32 4294901760, %v33211_v58  ;;  %v36393_v47 = vand.u32 4294901760, %v33231_v21 }
0x1a80   :  { %v11352_v29 = vand.u32 4294901760, %v11351_v40  ;;  %v29601_v54 = vpack.c.bf16 %v11471_v56, %v11464_v2  ;;  %v11257_v40 = vand.u32 4294901760, %v33307_v63  ;;  %v36385_v56 = vand.u32 4294901760, %v33301_v33 }
0x1a81   :  { %11075 = vmatmul.mubr.f32.vlgmr.msra.gmra.mrb[22].mxu0 %v33015_v44  ;;  %v33247_v44 = vsub.f32 %v33211_v58, %v11197_v42  ;;  %v11477_v13 = vsub.f32 %v33231_v21, %v36393_v47 }
0x1a82   :  { %11080 = vmatprep.mubr.f32.mxu0 %v36568_v30  ;;  %29602 = vmatprep.subr.bf16.mxu0 %v29601_v54  ;;  %v33340_v53 = vsub.f32 %v33307_v63, %v11257_v40 }
0x1a83   :  { %v36388_v22 = vand.u32 4294901760, %v33247_v44  ;;  %v11478_v9 = vand.u32 4294901760, %v11477_v13  ;;  %v11491_v13 = vsub.f32 %v33295_v37, %v36386_v0 }
0x1a84   :  { %v36392_v38 = vand.u32 4294901760, %v33340_v53 }
0x1a85   :  { %11082 = vmatmul.mubr.f32.gmra.mrb[24].mxu0 %v33013_v27  ;;  %v11358_v27 = vsub.f32 %v33192_v12, %v36394_v55  ;;  %v11365_v49 = vsub.f32 %v33247_v44, %v36388_v22  ;;  %v29605_v2 = vpack.c.bf16 %v11485_v52, %v11478_v9  ;;  %v11498_v9 = vsub.f32 %v33301_v33, %v36385_v56 }
0x1a86   :  { %11087 = vmatprep.mubr.f32.mxu0 %v36568_v30  ;;  %v11492_v56 = vand.u32 4294901760, %v11491_v13 }
0x1a87   :  { %v11366_v31 = vand.u32 4294901760, %v11365_v49  ;;  %v33345_v49 = vld [vmem:[%s36351_s11 + $0x38] sm:$0xff]  ;;  %v11499_v22 = vand.u32 4294901760, %v11498_v9 }
0x1a88   :  { %v11212_v62 = vand.u32 4294901760, %v33345_v49 }
0x1a89   :  { %11089 = vmatmul.mubr.f32.gmra.mrb[26].mxu0 %v33027_v24  ;;  %v11359_v24 = vand.u32 4294901760, %v11358_v27  ;;  %v33324_v27 = vld [vmem:[%s36351_s11 + $0x30] sm:$0xff]  ;;  %v29607_v54 = vpack.c.bf16 %v11373_v8, %v11366_v31  ;;  %v33360_v8 = vld [vmem:[%s36351_s11 + $0xc0] sm:$0xff] }
0x1a8a   :  { %11094 = vmatprep.mubr.f32.mxu0 %v36568_v30  ;;  %v11209_v31 = vand.u32 4294901760, %v33324_v27  ;;  %v11263_v9 = vand.u32 4294901760, %v33360_v8  ;;  %v33410_v10 = vsub.f32 %v33345_v49, %v11212_v62  ;;  %v11171_v49 = vld [vmem:[%s36351_s11 + $0x68] sm:$0xff] }
0x1a8b   :  { %v29603_v5 = vpack.c.bf16 %v11359_v24, %v11352_v29  ;;  %v11260_v24 = vand.u32 4294901760, %v33312_v39 }
0x1a8c   :  { %v33389_v13 = vsub.f32 %v33324_v27, %v11209_v31 }
0x1a8d   :  { %11096 = vmatmul.mubr.f32.gmra.mrb[28].mxu0 %v33040_v3  ;;  %v33280_v3 = vld [vmem:[%s36351_s11 + $0x28] sm:$0xff]  ;;  %v33354_v52 = vsub.f32 %v33312_v39, %v11260_v24 }
0x1a8e   :  { %29604 = vmatpush3.bf16.msra.mxu0 %v29603_v5  ;;  %v11206_v34 = vand.u32 4294901760, %v33280_v3  ;;  %v36391_v5 = vand.u32 4294901760, %v33318_v48  ;;  %v36397_v46 = vand.u32 4294901760, %v33389_v13 }
0x1a8f   :  { %29606 = vmatprep.subr.bf16.mxu0 %v29605_v2  ;;  %v33366_v2 = vpack.c.bf16 %v11242_v43, %v11239_v41  ;;  %v11505_v43 = vsub.f32 %v33340_v53, %v36392_v38 }
0x1a90   :  { %v33330_v29 = vsub.f32 %v33280_v3, %v11206_v34  ;;  %v11379_v0 = vsub.f32 %v33318_v48, %v36391_v5  ;;  %v29609_v5 = vpack.c.bf16 %v11499_v22, %v11492_v56  ;;  %v11266_v22 = vand.u32 4294901760, %v33380_v35 }
0x1a91   :  { %29570 = vmatprep.subr.bf16.mxu1 %v33366_v2  ;;  %v11506_v55 = vand.u32 4294901760, %v11505_v43  ;;  %v33429_v56 = vpack.c.bf16 %v11248_v59, %v11245_v4  ;;  %v33454_v4 = vpack.c.bf16 %v11200_v14, %v11197_v42  ;;  %v36407_v43 = vand.u32 4294901760, %v33416_v60 }
0x1a92   :  { %v36390_v45 = vand.u32 4294901760, %v33330_v29  ;;  %29608 = vmatpush3.bf16.msra.mxu0 %v29607_v54  ;;  %v36398_v54 = vand.u32 4294901760, %v33354_v52  ;;  %v11380_v41 = vand.u32 4294901760, %v11379_v0  ;;  %v33401_v0 = vpack.c.bf16 %v11194_v1, %v11191_v57 }
0x1a93   :  { %29610 = vmatprep.subr.bf16.mxu0 %v29609_v5  ;;  %v33422_v1 = vsub.f32 %v33360_v8, %v11263_v9  ;;  %v11393_v5 = vsub.f32 %v33389_v13, %v36397_v46  ;;  %v36404_v14 = vand.u32 4294901760, %v33448_v18  ;;  %v33503_v28 = vpack.c.bf16 %v11206_v34, %v11203_v7 }
0x1a94   :  { %v11386_v20 = vsub.f32 %v33330_v29, %v36390_v45  ;;  %v33395_v45 = vld [vmem:[%s36351_s11 + $0x40] sm:$0xff]  ;;  %v11512_v47 = vsub.f32 %v33354_v52, %v36398_v54  ;;  %29572 = vmatpush3.bf16.msra.mxu1 %v33401_v0 }
0x1a95   :  { %v36399_v59 = vand.u32 4294901760, %v33422_v1  ;;  %29574 = vmatprep.subr.bf16.mxu1 %v33429_v56  ;;  %v11394_v46 = vand.u32 4294901760, %v11393_v5  ;;  %v33483_v5 = vpack.c.bf16 %v11254_v51, %v11251_v36  ;;  %v33518_v11 = vsub.f32 %v33448_v18, %v36404_v14 }
0x1a96   :  { %v11387_v38 = vand.u32 4294901760, %v11386_v20  ;;  %v11513_v57 = vand.u32 4294901760, %v11512_v47  ;;  %v36408_v20 = vand.u32 4294901760, %v33395_v45  ;;  %v33438_v47 = vsub.f32 %v33380_v35, %v11266_v22 }
0x1a97   :  { %v11519_v23 = vsub.f32 %v33422_v1, %v36399_v59  ;;  %v36580_v8 = vand.u32 4294901760, %v33395_v45  ;;  %v36581_v35 = vand.u32 4294901760, %v33416_v60 }
0x1a98   :  { %v29611_v6 = vpack.c.bf16 %v11387_v38, %v11380_v41  ;;  %v36400_v38 = vand.u32 4294901760, %v33410_v10  ;;  %v33443_v41 = vld [vmem:[%s36351_s11 + $0xd0] sm:$0xff]  ;;  %v29613_v15 = vpack.c.bf16 %v11513_v57, %v11506_v55  ;;  %v33466_v58 = vsub.f32 %v33395_v45, %v36408_v20  ;;  %29576 = vmatpush3.bf16.msra.mxu1 %v33454_v4  ;;  %v11189_v45 = vld [vmem:[%s36351_s11 + $0xf8] sm:$0xff] }
0x1a99   :  { %v33475_v55 = vsub.f32 %v33416_v60, %v36407_v43  ;;  %v36406_v42 = vand.u32 4294901760, %v33443_v41  ;;  %v11520_v19 = vand.u32 4294901760, %v11519_v23  ;;  %29578 = vmatprep.subr.bf16.mxu1 %v33483_v5  ;;  %v33547_v43 = vld [vmem:[%s36351_s11 + $0x60] sm:$0xff] }
0x1a9a   :  { %29612 = vmatpush3.bf16.msra.mxu0 %v29611_v6  ;;  %v11400_v54 = vsub.f32 %v33410_v10, %v36400_v38  ;;  %v36401_v6 = vand.u32 4294901760, %v33438_v47  ;;  %v36403_v59 = vand.u32 4294901760, %v33466_v58  ;;  %v33492_v38 = vld [vmem:[%s36351_s11 + $0x50] sm:$0xff] }
0x1a9b   :  { %29614 = vmatprep.subr.bf16.mxu0 %v29613_v15  ;;  %v36405_v36 = vand.u32 4294901760, %v33475_v55  ;;  %v33509_v51 = vsub.f32 %v33443_v41, %v36406_v42  ;;  %v11221_v7 = vand.u32 4294901760, %v33492_v38  ;;  %v36411_v42 = vand.u32 4294901760, %v33518_v11 }
0x1a9c   :  { %v11401_v57 = vand.u32 4294901760, %v11400_v54  ;;  %v11526_v15 = vsub.f32 %v33438_v47, %v36401_v6  ;;  %v33497_v54 = vld [vmem:[%s36351_s11 + $0x58] sm:$0xff]  ;;  %v11407_v23 = vsub.f32 %v33466_v58, %v36403_v59  ;;  %29580 = vmatpush3.bf16.msra.mxu1 %v33503_v28 }
0x1a9d   :  { %v11414_v3 = vsub.f32 %v33475_v55, %v36405_v36  ;;  %v11224_v34 = vand.u32 4294901760, %v33497_v54  ;;  %v33541_v36 = vpack.c.bf16 %v11260_v24, %v11257_v40  ;;  %v33559_v63 = vsub.f32 %v33492_v38, %v11221_v7 }
0x1a9e   :  { %v29615_v6 = vpack.c.bf16 %v11401_v57, %v11394_v46  ;;  %v11527_v17 = vand.u32 4294901760, %v11526_v15  ;;  %v36412_v46 = vand.u32 4294901760, %v33509_v51  ;;  %v33530_v57 = vld [vmem:[%s36351_s11 + $0xe0] sm:$0xff]  ;;  %v33535_v15 = vld [vmem:[%s36351_s11 + $0xe8] sm:$0xff]  ;;  %v11408_v14 = vand.u32 4294901760, %v11407_v23 }
0x1a9f   :  { %v11415_v20 = vand.u32 4294901760, %v11414_v3  ;;  %29582 = vmatprep.subr.bf16.mxu1 %v33541_v36  ;;  %v11540_v39 = vsub.f32 %v33518_v11, %v36411_v42  ;;  %v33566_v40 = vsub.f32 %v33497_v54, %v11224_v34  ;;  %v11275_v24 = vand.u32 4294901760, %v33530_v57 }
0x1aa0   :  { %29616 = vmatpush3.bf16.msra.mxu0 %v29615_v6  ;;  %v29617_v59 = vpack.c.bf16 %v11527_v17, %v11520_v19  ;;  %v11533_v6 = vsub.f32 %v33509_v51, %v36412_v46  ;;  %v33556_v17 = vpack.c.bf16 %v11212_v62, %v11209_v31  ;;  %v11278_v27 = vand.u32 4294901760, %v33535_v15 }
0x1aa1   :  { %v29619_v31 = vpack.c.bf16 %v11415_v20, %v11408_v14  ;;  %v36409_v38 = vand.u32 4294901760, %v33559_v63  ;;  %v11541_v19 = vand.u32 4294901760, %v11540_v39  ;;  %v36410_v54 = vand.u32 4294901760, %v33566_v40  ;;  %v11188_v20 = vld [vmem:[%s36351_s11 + $0xf0] sm:$0xff] }
0x1aa2   :  { %29618 = vmatprep.subr.bf16.mxu0 %v29617_v59  ;;  %v11534_v62 = vand.u32 4294901760, %v11533_v6  ;;  %29584 = vmatpush3.bf16.msra.mxu1 %v33556_v17  ;;  %v11227_v59 = vand.u32 4294901760, %v33547_v43  ;;  %v33581_v23 = vpack.c.bf16 %v11266_v22, %v11263_v9  ;;  %v33584_v3 = vsub.f32 %v33530_v57, %v11275_v24 }
0x1aa3   :  { %v11421_v14 = vsub.f32 %v33559_v63, %v36409_v38  ;;  %v33593_v6 = vsub.f32 %v33535_v15, %v11278_v27  ;;  %v33599_v9 = vpack.c.bf16 %v36581_v35, %v36580_v8  ;;  %v11230_v22 = vand.u32 4294901760, %v11171_v49 }
0x1aa4   :  { %36579 = vst [vmem:[#allocation15_spill] sm:$0xff] %v33581_v23  ;;  %29620 = vmatpush3.bf16.msra.mxu0 %v29619_v31  ;;  %v29621_v57 = vpack.c.bf16 %v11541_v19, %v11534_v62  ;;  %v11428_v39 = vsub.f32 %v33566_v40, %v36410_v54  ;;  %29586 = vmatprep.subr.bf16.mxu1 %v33581_v23  ;;  %v36413_v31 = vand.u32 4294901760, %v33584_v3  ;;  %v11281_v19 = vand.u32 4294901760, %v11188_v20 }
0x1aa5   :  { %36582 = vst [vmem:[#allocation16_spill] sm:$0xff] %v33599_v9  ;;  %v33607_v38 = vsub.f32 %v33547_v43, %v11227_v59  ;;  %v11422_v60 = vand.u32 4294901760, %v11421_v14  ;;  %v36414_v15 = vand.u32 4294901760, %v33593_v6  ;;  %v33614_v62 = vsub.f32 %v11171_v49, %v11230_v22 }
0x1aa6   :  { %29588 = vmatpush3.bf16.msra.mxu1 %v33599_v9  ;;  %29622 = vmatprep.subr.bf16.mxu0 %v29621_v57  ;;  %v11429_v8 = vand.u32 4294901760, %v11428_v39  ;;  %v11547_v35 = vsub.f32 %v33584_v3, %v36413_v31  ;;  %v36584_v54 = vand.u32 4294901760, %v33443_v41  ;;  %v36585_v42 = vand.u32 4294901760, %v33448_v18  ;;  %v11172_v31 = vld [vmem:[%s36351_s11 + $0x70] sm:$0xff]  ;;  %v11173_v41 = vld [vmem:[%s36351_s11 + $0x78] sm:$0xff] }
0x1aa7   :  { %36583 = vst [vmem:[#allocation17_spill] sm:$0xff] %v33614_v62  ;;  %v36420_v43 = vand.u32 4294901760, %v33607_v38  ;;  %v11554_v49 = vsub.f32 %v33593_v6, %v36414_v15  ;;  %v36423_v46 = vand.u32 4294901760, %v33614_v62  ;;  %v11284_v57 = vand.u32 4294901760, %v11189_v45 }
0x1aa8   :  { %v33624_v14 = vpack.c.bf16 %v36585_v42, %v36584_v54  ;;  %v33630_v39 = vsub.f32 %v11188_v20, %v11281_v19  ;;  %v29623_v18 = vpack.c.bf16 %v11429_v8, %v11422_v60  ;;  %v11548_v42 = vand.u32 4294901760, %v11547_v35 }
0x1aa9   :  { %v11435_v54 = vsub.f32 %v33607_v38, %v36420_v43  ;;  %v33642_v15 = vpack.c.bf16 %v11224_v34, %v11221_v7  ;;  %v11555_v20 = vand.u32 4294901760, %v11554_v49  ;;  %v11442_v30 = vsub.f32 %v33614_v62, %v36423_v46 }
0x1aaa   :  { %36586 = vst [vmem:[#allocation18_spill] sm:$0xff] %v33624_v14  ;;  %36587 = vst [vmem:[#allocation19_spill] sm:$0xff] %v33630_v39  ;;  %29590 = vmatprep.subr.bf16.mxu1 %v33624_v14  ;;  %v36427_v9 = vand.u32 4294901760, %v33630_v39  ;;  %v33648_v23 = vsub.f32 %v11189_v45, %v11284_v57  ;;  %29624 = vmatpush3.bf16.msra.mxu0 %v29623_v18  ;;  %v11233_v8 = vand.u32 4294901760, %v11172_v31  ;;  %v11236_v35 = vand.u32 4294901760, %v11173_v41 }
0x1aab   :  { %v11436_v60 = vand.u32 4294901760, %v11435_v54  ;;  %29592 = vmatpush3.bf16.msra.mxu1 %v33642_v15  ;;  %v33651_v43 = vpack.c.bf16 %v11278_v27, %v11275_v24  ;;  %v29625_v14 = vpack.c.bf16 %v11555_v20, %v11548_v42  ;;  %v11443_v7 = vand.u32 4294901760, %v11442_v30 }
0x1aac   :  { %36588 = vst [vmem:[#allocation20_spill] sm:$0xff] %v33648_v23  ;;  %v11561_v34 = vsub.f32 %v33630_v39, %v36427_v9  ;;  %v36426_v49 = vand.u32 4294901760, %v33648_v23  ;;  %v33657_v46 = vsub.f32 %v11172_v31, %v11233_v8  ;;  %v33659_v45 = vsub.f32 %v11173_v41, %v11236_v35  ;;  %v36591_v9 = vld [vmem:[#allocation6_spill] sm:$0xff] }
0x1aad   :  { %29594 = vmatprep.subr.bf16.mxu1 %v33651_v43  ;;  %v33662_v18 = vpack.c.bf16 %v11230_v22, %v11227_v59  ;;  %29626 = vmatprep.subr.bf16.mxu0 %v29625_v14  ;;  %v29627_v54 = vpack.c.bf16 %v11443_v7, %v11436_v60  ;;  %v33670_v31 = vpack.c.bf16 %v11284_v57, %v11281_v19 }
0x1aae   :  { %36589 = vst [vmem:[#allocation21_spill] sm:$0xff] %v33657_v46  ;;  %36590 = vst [vmem:[#allocation22_spill] sm:$0xff] %v33659_v45  ;;  %v11562_v24 = vand.u32 4294901760, %v11561_v34  ;;  %v11568_v30 = vsub.f32 %v33648_v23, %v36426_v49  ;;  %v36425_v27 = vand.u32 4294901760, %v33657_v46  ;;  %v36424_v42 = vand.u32 4294901760, %v33659_v45 }
0x1aaf   :  { %29596 = vmatpush3.bf16.msra.mxu1 %v33662_v18  ;;  %29628 = vmatpush3.bf16.msra.mxu0 %v29627_v54  ;;  %v33672_v20 = vpack.c.bf16 %v11236_v35, %v11233_v8  ;;  %v29633_v19 = vpack.c.bf16 %v33182_v61, %v33177_v50 }
0x1ab0   :  { %v11569_v41 = vand.u32 4294901760, %v11568_v30  ;;  %v11449_v59 = vsub.f32 %v33657_v46, %v36425_v27  ;;  %v11456_v22 = vsub.f32 %v33659_v45, %v36424_v42  ;;  %29598 = vmatprep.subr.bf16.mxu1 %v33670_v31  ;;  %v10284_v27 = vld [vmem:[%s36350_s10] sm:$0x3] }
0x1ab1   :  { %v10289_v49 = vrot.slane %v10284_v27, %v32141_v32 }
0x1ab2   :  { %v29629_v14 = vpack.c.bf16 %v11569_v41, %v11562_v24  ;;  %v11450_v60 = vand.u32 4294901760, %v11449_v59  ;;  %v11457_v7 = vand.u32 4294901760, %v11456_v22 }
0x1ab3   :  { %29600 = vmatpush3.bf16.msra.mxu1 %v33672_v20 }
0x1ab4   :  { %29630 = vmatprep.subr.bf16.mxu0 %v29629_v14  ;;  %v29631_v8 = vpack.c.bf16 %v11457_v7, %v11450_v60  ;;  %29634 = vmatprep.subr.bf16.mxu1 %v29633_v19  ;;  %v10293_v60 = vrot.slane %v10284_v27, %v36591_v9 }
0x1ab6   :  { %29632 = vmatpush3.bf16.msra.mxu0 %v29631_v8 }
0x1ab7   :  { %29666 = vmatprep.subr.bf16.mxu0 %v33366_v2 }
0x1b54   :  { %v11076_v14 = vpop.f32.mrb[22].mxu0 }
0x1b55   :  { %v30751_v22 = vadd.f32 %v11076_v14, %v10289_v49  ;;  %v11078_v7 = vpop.f32.mrb[23].mxu0 }
0x1b56   :  { %v30752_v59 = vadd.f32 %v11078_v7, %v10293_v60 }
0x1b57   :  { %v11102_v41 = vmul.f32 -1.702, %v30751_v22 }
0x1b58   :  { %v11103_v19 = vmul.f32 -1.702, %v30752_v59  ;;  %v11083_v30 = vpop.f32.mrb[24].mxu0 }
0x1b59   :  { %v11110_v24 = vmul.f32 1.442695, %v11102_v41  ;;  %v33720_v8 = vadd.f32 %v11083_v30, %v10289_v49  ;;  %v11085_v54 = vpop.f32.mrb[25].mxu0 }
0x1b5a   :  { %v11112_v42 = vmul.f32 1.442695, %v11103_v19  ;;  %v33722_v34 = vadd.f32 %v11085_v54, %v10293_v60 }
0x1b5b   :  { %31396 = vpow2.f32 %v11110_v24  ;;  %v11104_v35 = vmul.f32 -1.702, %v33720_v8 }
0x1b5c   :  { %31398 = vpow2.f32 %v11112_v42  ;;  %v11105_v27 = vmul.f32 -1.702, %v33722_v34  ;;  %v11090_v57 = vpop.f32.mrb[26].mxu0 }
0x1b5d   :  { %v11114_v14 = vmul.f32 1.442695, %v11104_v35  ;;  %v33726_v9 = vadd.f32 %v11090_v57, %v10289_v49  ;;  %v11092_v7 = vpop.f32.mrb[27].mxu0 }
0x1b5e   :  { %v11116_v32 = vmul.f32 1.442695, %v11105_v27  ;;  %v33728_v46 = vadd.f32 %v11092_v7, %v10293_v60 }
0x1b5f   :  { %31400 = vpow2.f32 %v11114_v14  ;;  %v11106_v30 = vmul.f32 -1.702, %v33726_v9 }
0x1b60   :  { %31402 = vpow2.f32 %v11116_v32  ;;  %v11107_v54 = vmul.f32 -1.702, %v33728_v46  ;;  %v11097_v24 = vpop.f32.mrb[28].mxu0 }
0x1b61   :  { %v11118_v41 = vmul.f32 1.442695, %v11106_v30  ;;  %v33732_v19 = vadd.f32 %v11097_v24, %v10289_v49  ;;  %v11099_v42 = vpop.f32.mrb[29].mxu0 }
0x1b62   :  { %v11120_v45 = vmul.f32 1.442695, %v11107_v54  ;;  %v33734_v61 = vadd.f32 %v11099_v42, %v10293_v60 }
0x1b63   :  { %31404 = vpow2.f32 %v11118_v41  ;;  %v11108_v57 = vmul.f32 -1.702, %v33732_v19 }
0x1b64   :  { %31406 = vpow2.f32 %v11120_v45  ;;  %v11109_v35 = vmul.f32 -1.702, %v33734_v61 }
0x1b65   :  { %v31397_v27 = vpop.eup %31396  ;;  %v11122_v14 = vmul.f32 1.442695, %v11108_v57 }
0x1b66   :  { %v31399_v7 = vpop.eup %31398  ;;  %v11126_v32 = vadd.f32 1.0, %v31397_v27  ;;  %v11124_v50 = vmul.f32 1.442695, %v11109_v35 }
0x1b67   :  { %v11127_v39 = vadd.f32 1.0, %v31399_v7  ;;  %31408 = vpow2.f32 %v11122_v14 }
0x1b68   :  { %31410 = vrcp.f32 %v11126_v32 }
0x1b69   :  { %v31401_v49 = vpop.eup %31400  ;;  %31412 = vrcp.f32 %v11127_v39 }
0x1b6a   :  { %v31403_v30 = vpop.eup %31402  ;;  %v11128_v54 = vadd.f32 1.0, %v31401_v49  ;;  %31414 = vpow2.f32 %v11124_v50 }
0x1b6b   :  { %v11129_v60 = vadd.f32 1.0, %v31403_v30 }
0x1b6c   :  { %31416 = vrcp.f32 %v11128_v54 }
0x1b6d   :  { %v31405_v24 = vpop.eup %31404  ;;  %31418 = vrcp.f32 %v11129_v60 }
0x1b6e   :  { %v31407_v45 = vpop.eup %31406  ;;  %v11130_v41 = vadd.f32 1.0, %v31405_v24 }
0x1b6f   :  { %v11131_v42 = vadd.f32 1.0, %v31407_v45 }
0x1b70   :  { %31420 = vrcp.f32 %v11130_v41 }
0x1b71   :  { %v31409_v57 = vpop.eup %31408  ;;  %31422 = vrcp.f32 %v11131_v42 }
0x1b72   :  { %v31411_v27 = vpop.eup %31410  ;;  %v11132_v35 = vadd.f32 1.0, %v31409_v57 }
0x1b73   :  { %v31413_v7 = vpop.eup %31412  ;;  %v11150_v14 = vmul.f32 %v31411_v27, %v30751_v22 }
0x1b74   :  { %v31415_v32 = vpop.eup %31414  ;;  %v11151_v23 = vmul.f32 %v31413_v7, %v30752_v59  ;;  %31424 = vrcp.f32 %v11132_v35 }
0x1b75   :  { %v33738_v39 = vand.u32 4294901760, %v11150_v14  ;;  %v11133_v50 = vadd.f32 1.0, %v31415_v32 }
0x1b76   :  { %v31417_v49 = vpop.eup %31416  ;;  %v33740_v30 = vand.u32 4294901760, %v11151_v23 }
0x1b77   :  { %36592 = vst [vmem:[#allocation23_spill] sm:$0xff] %v33738_v39  ;;  %v31419_v54 = vpop.eup %31418  ;;  %v33743_v60 = vsub.f32 %v11150_v14, %v33738_v39  ;;  %v11152_v24 = vmul.f32 %v31417_v49, %v33720_v8  ;;  %31426 = vrcp.f32 %v11133_v50 }
0x1b78   :  { %v33747_v45 = vsub.f32 %v11151_v23, %v33740_v30  ;;  %v11153_v22 = vmul.f32 %v31419_v54, %v33722_v34  ;;  %11572 = vmatprep.mubr.f32.mxu0 %v33740_v30 }
0x1b79   :  { %v36440_v59 = vand.u32 4294901760, %v33743_v60  ;;  %v33752_v41 = vand.u32 4294901760, %v11152_v24  ;;  %11574 = vmatmul.mubr.f32.vlgmr.msra.gmra.mrb[30].mxu0 %v33738_v39  ;;  %v36627_v39 = vld [vmem:[#allocation21_spill] sm:$0xff] }
0x1b7a   :  { %v31421_v42 = vpop.eup %31420  ;;  %v33755_v57 = vand.u32 4294901760, %v11153_v22  ;;  %29668 = vmatpush3.bf16.msra.mxu0 %v33401_v0  ;;  %v11288_v8 = vand.u32 4294901760, %v33747_v45 }
0x1b7b   :  { %36593 = vst [vmem:[#allocation24_spill] sm:$0xff] %v33752_v41  ;;  %v31423_v27 = vpop.eup %31422  ;;  %v11295_v23 = vsub.f32 %v33743_v60, %v36440_v59  ;;  %v33763_v34 = vsub.f32 %v11152_v24, %v33752_v41  ;;  %v11154_v35 = vmul.f32 %v31421_v42, %v33726_v9  ;;  %29670 = vmatprep.subr.bf16.mxu0 %v33429_v56 }
0x1b7c   :  { %36594 = vst [vmem:[#allocation25_spill] sm:$0xff] %v33755_v57  ;;  %v33768_v7 = vsub.f32 %v11153_v22, %v33755_v57  ;;  %v11155_v14 = vmul.f32 %v31423_v27, %v33728_v46  ;;  %11579 = vmatprep.mubr.f32.mxu0 %v33755_v57  ;;  %v11289_v32 = vsub.f32 %v33747_v45, %v11288_v8 }
0x1b7d   :  { %v33773_v50 = vand.u32 4294901760, %v11154_v35  ;;  %11581 = vmatmul.mubr.f32.gmra.mrb[32].mxu0 %v33752_v41  ;;  %v36443_v49 = vand.u32 4294901760, %v33763_v34  ;;  %v11296_v42 = vand.u32 4294901760, %v11295_v23 }
0x1b7e   :  { %v31425_v54 = vpop.eup %31424  ;;  %v33777_v24 = vand.u32 4294901760, %v11155_v14  ;;  %29672 = vmatpush3.bf16.msra.mxu0 %v33454_v4  ;;  %v11290_v9 = vand.u32 4294901760, %v11289_v32  ;;  %v36444_v22 = vand.u32 4294901760, %v33768_v7 }
0x1b7f   :  { %36595 = vst [vmem:[#allocation26_spill] sm:$0xff] %v33773_v50  ;;  %v33782_v46 = vsub.f32 %v11154_v35, %v33773_v50  ;;  %v11156_v27 = vmul.f32 %v31425_v54, %v33732_v19  ;;  %29674 = vmatprep.subr.bf16.mxu0 %v33483_v5  ;;  %v11310_v59 = vsub.f32 %v33763_v34, %v36443_v49 }
0x1b80   :  { %36596 = vst [vmem:[#allocation27_spill] sm:$0xff] %v33777_v24  ;;  %v33790_v41 = vsub.f32 %v11155_v14, %v33777_v24  ;;  %11291 = vmatprep.mubr.f32.mxu1 %v11290_v9  ;;  %11586 = vmatprep.mubr.f32.mxu0 %v33777_v24  ;;  %v11304_v23 = vsub.f32 %v33768_v7, %v36444_v22  ;;  %v36623_v24 = vld [vmem:[#allocation14_spill] sm:$0xff] }
0x1b81   :  { %v31427_v35 = vpop.eup %31426  ;;  %v33796_v32 = vand.u32 4294901760, %v11156_v27  ;;  %11297 = vmatmul.mubr.f32.vlgmr.msra.gmra.mrb[32].mxu1 %v11296_v42  ;;  %11588 = vmatmul.mubr.f32.gmra.mrb[34].mxu0 %v33773_v50  ;;  %v36598_v14 = vpack.c.bf16 %v33192_v12, %v33187_v26  ;;  %v36599_v42 = vpack.c.bf16 %v33236_v16, %v33231_v21  ;;  %v11311_v19 = vand.u32 4294901760, %v11310_v59 }
0x1b82   :  { %v11157_v54 = vmul.f32 %v31427_v35, %v33734_v61  ;;  %29676 = vmatpush3.bf16.msra.mxu0 %v33503_v28  ;;  %v11305_v9 = vand.u32 4294901760, %v11304_v23  ;;  %v11318_v49 = vand.u32 4294901760, %v33790_v41  ;;  %v36602_v59 = vpack.c.bf16 %v33252_v25, %v33247_v44 }
0x1b83   :  { %36597 = vst [vmem:[#allocation28_spill] sm:$0xff] %v33796_v32  ;;  %29636 = vmatpush3.bf16.msra.mxu1 %v36598_v14  ;;  %v33807_v22 = vsub.f32 %v11156_v27, %v33796_v32  ;;  %29678 = vmatprep.subr.bf16.mxu0 %v33541_v36  ;;  %v36601_v14 = vand.u32 4294901760, %v33782_v46 }
0x1b84   :  { %29638 = vmatprep.subr.bf16.mxu1 %v36599_v42  ;;  %v33813_v61 = vand.u32 4294901760, %v11157_v54  ;;  %11306 = vmatprep.mubr.f32.mxu1 %v11305_v9  ;;  %v11319_v35 = vsub.f32 %v33790_v41, %v11318_v49  ;;  %v36603_v9 = vpack.c.bf16 %v33301_v33, %v33295_v37 }
0x1b85   :  { %v11325_v23 = vsub.f32 %v33782_v46, %v36601_v14  ;;  %11312 = vmatmul.mubr.f32.gmra.mrb[34].mxu1 %v11311_v19  ;;  %v11339_v27 = vand.u32 4294901760, %v33807_v22  ;;  %v36604_v14 = vld [vmem:[#allocation15_spill] sm:$0xff] }
0x1b86   :  { %36600 = vst [vmem:[#allocation29_spill] sm:$0xff] %v33813_v61  ;;  %v33821_v50 = vsub.f32 %v11157_v54, %v33813_v61  ;;  %11593 = vmatprep.mubr.f32.mxu0 %v33813_v61  ;;  %v11320_v42 = vand.u32 4294901760, %v11319_v35  ;;  %29680 = vmatpush3.bf16.msra.mxu0 %v33556_v17 }
0x1b87   :  { %29640 = vmatpush3.bf16.msra.mxu1 %v36602_v59  ;;  %11595 = vmatmul.mubr.f32.gmra.mrb[36].mxu0 %v33796_v32  ;;  %v11326_v19 = vand.u32 4294901760, %v11325_v23  ;;  %v11340_v61 = vsub.f32 %v33807_v22, %v11339_v27  ;;  %v36605_v59 = vpack.c.bf16 %v33330_v29, %v33318_v48  ;;  %v36606_v32 = vld [vmem:[#allocation16_spill] sm:$0xff]  ;;  %v36608_v23 = vld [vmem:[#allocation18_spill] sm:$0xff] }
0x1b88   :  { %29642 = vmatprep.subr.bf16.mxu1 %v36603_v9  ;;  %11864 = vmatprep.mubr.f32.mxu0 %v11288_v8  ;;  %v11333_v54 = vand.u32 4294901760, %v33821_v50  ;;  %v36607_v8 = vpack.c.bf16 %v33354_v52, %v33340_v53 }
0x1b89   :  { %11321 = vmatprep.mubr.f32.mxu1 %v11320_v42  ;;  %29682 = vmatprep.subr.bf16.mxu0 %v36604_v14  ;;  %v11341_v42 = vand.u32 4294901760, %v11340_v61  ;;  %v36612_v61 = vpack.c.bf16 %v33518_v11, %v33509_v51 }
0x1b8a   :  { %11327 = vmatmul.mubr.f32.gmra.mrb[36].mxu1 %v11326_v19  ;;  %v11334_v35 = vsub.f32 %v33821_v50, %v11333_v54  ;;  %29684 = vmatpush3.bf16.msra.mxu0 %v36606_v32  ;;  %v36609_v19 = vpack.c.bf16 %v33410_v10, %v33389_v13 }
0x1b8b   :  { %29644 = vmatpush3.bf16.msra.mxu1 %v36605_v59  ;;  %29686 = vmatprep.subr.bf16.mxu0 %v36608_v23  ;;  %v36611_v59 = vpack.c.bf16 %v33475_v55, %v33466_v58 }
0x1b8c   :  { %v11335_v9 = vand.u32 4294901760, %v11334_v35  ;;  %29646 = vmatprep.subr.bf16.mxu1 %v36607_v8  ;;  %v36610_v35 = vpack.c.bf16 %v33438_v47, %v33422_v1  ;;  %v36615_v8 = vand.u32 4294901760, %v33743_v60 }
0x1b8e   :  { %11336 = vmatprep.mubr.f32.mxu1 %v11335_v9  ;;  %29688 = vmatpush3.bf16.msra.mxu0 %v33642_v15  ;;  %v36614_v9 = vpack.c.bf16 %v33593_v6, %v33584_v3 }
0x1b8f   :  { %11342 = vmatmul.mubr.f32.gmra.mrb[38].mxu1 %v11341_v42  ;;  %29690 = vmatprep.subr.bf16.mxu0 %v33651_v43  ;;  %v36616_v42 = vpack.c.bf16 %v33614_v62, %v33607_v38 }
0x1b90   :  { %29648 = vmatpush3.bf16.msra.mxu1 %v36609_v19  ;;  %11730 = vmatprep.mubr.f32.mxu1 %v33747_v45  ;;  %v36613_v45 = vpack.c.bf16 %v33566_v40, %v33559_v63  ;;  %v36617_v19 = vand.u32 4294901760, %v33768_v7 }
0x1b91   :  { %29650 = vmatprep.subr.bf16.mxu1 %v36610_v35  ;;  %v36618_v35 = vld [vmem:[#allocation20_spill] sm:$0xff] }
0x1b92   :  { %29692 = vmatpush3.bf16.msra.mxu0 %v33662_v18 }
0x1b93   :  { %29694 = vmatprep.subr.bf16.mxu0 %v33670_v31 }
0x1b94   :  { %29652 = vmatpush3.bf16.msra.mxu1 %v36611_v59  ;;  %v36619_v59 = vld [vmem:[#allocation19_spill] sm:$0xff] }
0x1b95   :  { %29654 = vmatprep.subr.bf16.mxu1 %v36612_v61  ;;  %v36620_v61 = vpack.c.bf16 %v36618_v35, %v36619_v59 }
0x1b96   :  { %29696 = vmatpush3.bf16.msra.mxu0 %v33672_v20 }
0x1b97   :  { %29730 = vmatprep.subr.bf16.mxu0 %v33366_v2  ;;  %v36624_v2 = vand.u32 4294901760, %v36623_v24  ;;  %v36632_v24 = vand.u32 4294901760, %v33236_v16  ;;  %v36637_v16 = vand.u32 4294901760, %v33301_v33  ;;  %v36641_v33 = vand.u32 4294901760, %v33354_v52 }
0x1b98   :  { %29656 = vmatpush3.bf16.msra.mxu1 %v36613_v45  ;;  %v36621_v45 = vld [vmem:[#allocation13_spill] sm:$0xff]  ;;  %v36645_v52 = vand.u32 4294901760, %v33438_v47  ;;  %v36649_v47 = vand.u32 4294901760, %v33518_v11 }
0x1b99   :  { %29658 = vmatprep.subr.bf16.mxu1 %v36614_v9  ;;  %11868 = vmatmul.mubr.f32.vlgmr.msra.gmra.mrb[38].mxu0 %v36615_v8  ;;  %v36622_v9 = vand.u32 4294901760, %v36621_v45  ;;  %v36625_v8 = vand.u32 4294901760, %v33763_v34  ;;  %v36655_v11 = vld [vmem:[#allocation17_spill] sm:$0xff] }
0x1b9a   :  { %11875 = vmatprep.mubr.f32.mxu0 %v36617_v19  ;;  %29732 = vmatpush3.bf16.msra.mxu0 %v33401_v0  ;;  %v36629_v0 = vand.u32 4294901760, %v33187_v26  ;;  %v36630_v19 = vand.u32 4294901760, %v33192_v12  ;;  %v36634_v26 = vand.u32 4294901760, %v33247_v44  ;;  %v36635_v12 = vand.u32 4294901760, %v33252_v25 }
0x1b9b   :  { %v29697_v57 = vpack.c.bf16 %v36624_v2, %v36622_v9  ;;  %29734 = vmatprep.subr.bf16.mxu0 %v33429_v56  ;;  %v36631_v56 = vand.u32 4294901760, %v33231_v21  ;;  %v36636_v21 = vand.u32 4294901760, %v33295_v37  ;;  %v36638_v44 = vand.u32 4294901760, %v33318_v48 }
0x1b9c   :  { %29660 = vmatpush3.bf16.msra.mxu1 %v36616_v42  ;;  %v36626_v42 = vld [vmem:[#allocation22_spill] sm:$0xff]  ;;  %v36639_v25 = vand.u32 4294901760, %v33330_v29  ;;  %v36640_v37 = vand.u32 4294901760, %v33340_v53  ;;  %v36642_v48 = vand.u32 4294901760, %v33389_v13  ;;  %v36643_v29 = vand.u32 4294901760, %v33410_v10 }
0x1b9d   :  { %29662 = vmatprep.subr.bf16.mxu1 %v36620_v61  ;;  %11879 = vmatmul.mubr.f32.gmra.mrb[40].mxu0 %v36625_v8  ;;  %v36628_v62 = vpack.c.bf16 %v36626_v42, %v36627_v39  ;;  %v29699_v61 = vpack.c.bf16 %v36630_v19, %v36629_v0  ;;  %v29701_v45 = vpack.c.bf16 %v36632_v24, %v36631_v56  ;;  %v36644_v53 = vand.u32 4294901760, %v33422_v1 }
0x1b9e   :  { %11886 = vmatprep.mubr.f32.mxu0 %v11318_v49  ;;  %29736 = vmatpush3.bf16.msra.mxu0 %v33454_v4  ;;  %v29703_v4 = vpack.c.bf16 %v36635_v12, %v36634_v26  ;;  %v36646_v13 = vand.u32 4294901760, %v33466_v58  ;;  %v36647_v10 = vand.u32 4294901760, %v33475_v55  ;;  %v36648_v1 = vand.u32 4294901760, %v33509_v51 }
0x1b9f   :  { %29738 = vmatprep.subr.bf16.mxu0 %v33483_v5  ;;  %v29705_v5 = vpack.c.bf16 %v36637_v16, %v36636_v21  ;;  %v36652_v58 = vand.u32 4294901760, %v33584_v3  ;;  %v36653_v55 = vand.u32 4294901760, %v33593_v6  ;;  %v36654_v51 = vand.u32 4294901760, %v33607_v38  ;;  %v36660_v3 = vld [vmem:[#allocation25_spill] sm:$0xff]  ;;  %v36663_v38 = vld [vmem:[#allocation24_spill] sm:$0xff] }
0x1ba0   :  { %29664 = vmatpush3.bf16.msra.mxu1 %v36628_v62  ;;  %v36633_v62 = vand.u32 4294901760, %v33782_v46  ;;  %v36661_v6 = vand.u32 4294901760, %v36627_v39  ;;  %v36667_v39 = vld [vmem:[#allocation28_spill] sm:$0xff] }
0x1ba1   :  { %29698 = vmatprep.subr.bf16.mxu1 %v29697_v57  ;;  %v29717_v57 = vpack.c.bf16 %v36649_v47, %v36648_v1 }
0x1ba2   :  { %11890 = vmatmul.mubr.f32.gmra.mrb[42].mxu0 %v36633_v62 }
0x1ba3   :  { %11733 = vmatmul.mubr.f32.vlgmr.msra.gmra.mrb[40].mxu1 %v33743_v60  ;;  %11897 = vmatprep.mubr.f32.mxu0 %v11333_v54  ;;  %v29713_v60 = vpack.c.bf16 %v36645_v52, %v36644_v53 }
0x1ba4   :  { %11739 = vmatprep.mubr.f32.mxu1 %v33768_v7  ;;  %29700 = vmatpush3.bf16.msra.mxu1 %v29699_v61 }
0x1ba5   :  { %29740 = vmatpush3.bf16.msra.mxu0 %v33503_v28  ;;  %29702 = vmatprep.subr.bf16.mxu1 %v29701_v45  ;;  %v29707_v28 = vpack.c.bf16 %v36639_v25, %v36638_v44 }
0x1ba6   :  { %29742 = vmatprep.subr.bf16.mxu0 %v33541_v36  ;;  %11901 = vmatmul.mubr.f32.gmra.mrb[44].mxu0 %v11339_v27  ;;  %v29709_v36 = vpack.c.bf16 %v36641_v33, %v36640_v37  ;;  %v36668_v27 = vmov 0.0  }
0x1ba7   :  { %11742 = vmatmul.mubr.f32.gmra.mrb[42].mxu1 %v33763_v34  ;;  %12192 = vmatprep.mubr.f32.mxu0 %v33740_v30 }
0x1ba8   :  { %11748 = vmatprep.mubr.f32.mxu1 %v33790_v41  ;;  %29704 = vmatpush3.bf16.msra.mxu1 %v29703_v4  ;;  %v29715_v41 = vpack.c.bf16 %v36647_v10, %v36646_v13 }
0x1ba9   :  { %29744 = vmatpush3.bf16.msra.mxu0 %v33556_v17  ;;  %29706 = vmatprep.subr.bf16.mxu1 %v29705_v5  ;;  %v29711_v17 = vpack.c.bf16 %v36643_v29, %v36642_v48 }
0x1baa   :  { %29746 = vmatprep.subr.bf16.mxu0 %v36604_v14 }
0x1bab   :  { %11751 = vmatmul.mubr.f32.gmra.mrb[44].mxu1 %v33782_v46  ;;  %v36665_v46 = vld [vmem:[#allocation26_spill] sm:$0xff] }
0x1bac   :  { %11757 = vmatprep.mubr.f32.mxu1 %v33821_v50  ;;  %29708 = vmatpush3.bf16.msra.mxu1 %v29707_v28 }
0x1bad   :  { %29748 = vmatpush3.bf16.msra.mxu0 %v36606_v32  ;;  %29710 = vmatprep.subr.bf16.mxu1 %v29709_v36  ;;  %v36666_v32 = vld [vmem:[#allocation29_spill] sm:$0xff] }
0x1bae   :  { %29750 = vmatprep.subr.bf16.mxu0 %v36608_v23 }
0x1baf   :  { %11760 = vmatmul.mubr.f32.gmra.mrb[46].mxu1 %v33807_v22  ;;  %v36664_v22 = vld [vmem:[#allocation27_spill] sm:$0xff] }
0x1bb0   :  { %12067 = vmatprep.mubr.f32.mxu1 %v33740_v30  ;;  %29712 = vmatpush3.bf16.msra.mxu1 %v29711_v17  ;;  %v36650_v30 = vand.u32 4294901760, %v33559_v63  ;;  %v36657_v63 = vand.u32 4294901760, %v36619_v59 }
0x1bb1   :  { %29752 = vmatpush3.bf16.msra.mxu0 %v33642_v15  ;;  %29714 = vmatprep.subr.bf16.mxu1 %v29713_v60  ;;  %v36651_v15 = vand.u32 4294901760, %v33566_v40  ;;  %v36658_v40 = vand.u32 4294901760, %v36618_v35 }
0x1bb2   :  { %29754 = vmatprep.subr.bf16.mxu0 %v33651_v43  ;;  %v29721_v43 = vpack.c.bf16 %v36653_v55, %v36652_v58 }
0x1bb3   :  { %v29719_v34 = vpack.c.bf16 %v36651_v15, %v36650_v30  ;;  %v29725_v50 = vpack.c.bf16 %v36658_v40, %v36657_v63 }
0x1bb4   :  { %29716 = vmatpush3.bf16.msra.mxu1 %v29715_v41 }
0x1bb5   :  { %29756 = vmatpush3.bf16.msra.mxu0 %v33662_v18  ;;  %29718 = vmatprep.subr.bf16.mxu1 %v29717_v57  ;;  %v36656_v18 = vand.u32 4294901760, %v36655_v11 }
0x1bb6   :  { %29758 = vmatprep.subr.bf16.mxu0 %v33670_v31  ;;  %v36659_v31 = vld [vmem:[#allocation23_spill] sm:$0xff] }
0x1bb7   :  { %v29723_v7 = vpack.c.bf16 %v36656_v18, %v36654_v51 }
0x1bb8   :  { %29720 = vmatpush3.bf16.msra.mxu1 %v29719_v34 }
0x1bb9   :  { %29760 = vmatpush3.bf16.msra.mxu0 %v33672_v20  ;;  %29722 = vmatprep.subr.bf16.mxu1 %v29721_v43  ;;  %v36662_v20 = vand.u32 4294901760, %v36626_v42 }
0x1bbb   :  { %v29727_v49 = vpack.c.bf16 %v36662_v20, %v36661_v6 }
0x1bbc   :  { %12194 = vmatmul.mubr.f32.vlgmr.msra.gmra.mrb[46].mxu0 %v36659_v31  ;;  %29724 = vmatpush3.bf16.msra.mxu1 %v29723_v7 }
0x1bbd   :  { %12199 = vmatprep.mubr.f32.mxu0 %v36660_v3  ;;  %29726 = vmatprep.subr.bf16.mxu1 %v29725_v50 }
0x1bc0   :  { %12201 = vmatmul.mubr.f32.gmra.mrb[48].mxu0 %v36663_v38  ;;  %29728 = vmatpush3.bf16.msra.mxu1 %v29727_v49 }
0x1bc1   :  { %12206 = vmatprep.mubr.f32.mxu0 %v36664_v22 }
0x1bc3   :  { %12069 = vmatmul.mubr.f32.vlgmr.msra.gmra.mrb[48].mxu1 %v36659_v31 }
0x1bc4   :  { %12208 = vmatmul.mubr.f32.gmra.mrb[50].mxu0 %v36665_v46  ;;  %12074 = vmatprep.mubr.f32.mxu1 %v36660_v3 }
0x1bc5   :  { %12213 = vmatprep.mubr.f32.mxu0 %v36666_v32 }
0x1bc7   :  { %12076 = vmatmul.mubr.f32.gmra.mrb[50].mxu1 %v36663_v38 }
0x1bc8   :  { %12215 = vmatmul.mubr.f32.gmra.mrb[52].mxu0 %v36667_v39  ;;  %12081 = vmatprep.mubr.f32.mxu1 %v36664_v22 }
0x1bcb   :  { %12083 = vmatmul.mubr.f32.gmra.mrb[52].mxu1 %v36665_v46 }
0x1bcc   :  { %12088 = vmatprep.mubr.f32.mxu1 %v36666_v32 }
0x1bcf   :  { %12090 = vmatmul.mubr.f32.gmra.mrb[54].mxu1 %v36667_v39 }
0x1bd0   :  { %12433 = vmatprep.mubr.f32.mxu1 %v36668_v27 }
0x1c4c   :  { %v26117_v54 = vpop.f32.mrb[30].mxu0 }
0x1c4d   :  { %v26118_v14 = vpop.f32.mrb[31].mxu0 }
0x1c4e   :  { %v26119_v23 = vadd.f32 %v26118_v14, %v26117_v54 }
0x1c50   :  { %v26120_v35 = vpop.f32.mrb[32].mxu0 }
0x1c51   :  { %v26121_v59 = vpop.f32.mrb[33].mxu0 }
0x1c52   :  { %v26122_v9 = vadd.f32 %v26121_v59, %v26120_v35 }
0x1c54   :  { %v26073_v2 = vpop.f32.mrb[32].mxu1  ;;  %v26123_v8 = vpop.f32.mrb[34].mxu0 }
0x1c55   :  { %v26074_v42 = vpop.f32.mrb[33].mxu1  ;;  %v26124_v0 = vpop.f32.mrb[35].mxu0 }
0x1c56   :  { %v26075_v19 = vadd.f32 %v26074_v42, %v26073_v2  ;;  %v26125_v61 = vadd.f32 %v26124_v0, %v26123_v8 }
0x1c58   :  { %v11576_v56 = vadd.f32 %v26119_v23, %v26075_v19  ;;  %v26076_v24 = vpop.f32.mrb[34].mxu1 }
0x1c59   :  { %v26077_v45 = vpop.f32.mrb[35].mxu1 }
0x1c5a   :  { %v26126_v62 = vpop.f32.mrb[36].mxu0  ;;  %v26078_v26 = vadd.f32 %v26077_v45, %v26076_v24 }
0x1c5b   :  { %v26127_v12 = vpop.f32.mrb[37].mxu0 }
0x1c5c   :  { %v11583_v4 = vadd.f32 %v26122_v9, %v26078_v26  ;;  %v26128_v21 = vadd.f32 %v26127_v12, %v26126_v62  ;;  %v25496_v12 = vld [vmem:[%s36352_s12] ss:$0 sm:$0xff] }
0x1c5d   :  { %v26079_v16 = vpop.f32.mrb[36].mxu1 }
0x1c5e   :  { %v26080_v5 = vpop.f32.mrb[37].mxu1 }
0x1c5f   :  { %v26081_v44 = vadd.f32 %v26080_v5, %v26079_v16 }
0x1c61   :  { %v11590_v25 = vadd.f32 %v26125_v61, %v26081_v44 }
0x1c62   :  { %v26082_v28 = vpop.f32.mrb[38].mxu1 }
0x1c63   :  { %v26083_v37 = vpop.f32.mrb[39].mxu1 }
0x1c64   :  { %v26084_v33 = vadd.f32 %v26083_v37, %v26082_v28 }
0x1c66   :  { %v11597_v36 = vadd.f32 %v26128_v21, %v26084_v33  ;;  %v36671_v33 = vld [vmem:[#allocation9_spill] sm:$0xff] }
0x1c6c   :  { %v26205_v48 = vpop.f32.mrb[38].mxu0 }
0x1c6d   :  { %v26206_v29 = vpop.f32.mrb[39].mxu0 }
0x1c6e   :  { %v26207_v17 = vadd.f32 %v26206_v29, %v26205_v48 }
0x1c70   :  { %v26208_v53 = vpop.f32.mrb[40].mxu0 }
0x1c71   :  { %v26209_v52 = vpop.f32.mrb[41].mxu0 }
0x1c72   :  { %v26210_v60 = vadd.f32 %v26209_v52, %v26208_v53 }
0x1c75   :  { %v26211_v10 = vpop.f32.mrb[42].mxu0 }
0x1c76   :  { %v26161_v13 = vpop.f32.mrb[40].mxu1  ;;  %v26212_v1 = vpop.f32.mrb[43].mxu0 }
0x1c77   :  { %v26162_v41 = vpop.f32.mrb[41].mxu1  ;;  %v26213_v57 = vadd.f32 %v26212_v1, %v26211_v10  ;;  %v36672_v10 = vld [vmem:[#allocation11_spill] sm:$0xff] }
0x1c78   :  { %v26163_v47 = vadd.f32 %v26162_v41, %v26161_v13 }
0x1c79   :  { %v26214_v34 = vpop.f32.mrb[44].mxu0 }
0x1c7a   :  { %v11735_v30 = vadd.f32 %v26163_v47, %v11576_v56  ;;  %v26164_v15 = vpop.f32.mrb[42].mxu1  ;;  %v26215_v55 = vpop.f32.mrb[45].mxu0 }
0x1c7b   :  { %v26165_v58 = vpop.f32.mrb[43].mxu1  ;;  %v26216_v51 = vadd.f32 %v26215_v55, %v26214_v34 }
0x1c7c   :  { %v26166_v43 = vadd.f32 %v26165_v58, %v26164_v15  ;;  %v11870_v11 = vadd.f32 %v26207_v17, %v11735_v30  ;;  %v36674_v15 = vld [vmem:[#allocation12_spill] sm:$0xff] }
0x1c7e   :  { %v11744_v18 = vadd.f32 %v26166_v43, %v11583_v4  ;;  %v26167_v7 = vpop.f32.mrb[44].mxu1  ;;  %v36669_v4 = vld [vmem:[#allocation10_spill] sm:$0xff] }
0x1c7f   :  { %v26168_v63 = vpop.f32.mrb[45].mxu1 }
0x1c80   :  { %v26169_v40 = vadd.f32 %v26168_v63, %v26167_v7  ;;  %v11881_v50 = vadd.f32 %v26210_v60, %v11744_v18 }
0x1c82   :  { %v11753_v31 = vadd.f32 %v26169_v40, %v11590_v25  ;;  %v26170_v3 = vpop.f32.mrb[46].mxu1 }
0x1c83   :  { %v26171_v6 = vpop.f32.mrb[47].mxu1 }
0x1c84   :  { %v26172_v20 = vadd.f32 %v26171_v6, %v26170_v3  ;;  %v11892_v49 = vadd.f32 %v26213_v57, %v11753_v31 }
0x1c86   :  { %v11762_v38 = vadd.f32 %v26172_v20, %v11597_v36 }
0x1c88   :  { %v11903_v22 = vadd.f32 %v26216_v51, %v11762_v38 }
0x1c8f   :  { %v26293_v46 = vpop.f32.mrb[46].mxu0 }
0x1c90   :  { %v26294_v32 = vpop.f32.mrb[47].mxu0 }
0x1c91   :  { %v26295_v39 = vadd.f32 %v26294_v32, %v26293_v46 }
0x1c93   :  { %v26296_v54 = vpop.f32.mrb[48].mxu0 }
0x1c94   :  { %v26297_v14 = vpop.f32.mrb[49].mxu0 }
0x1c95   :  { %v26298_v23 = vadd.f32 %v26297_v14, %v26296_v54 }
0x1c96   :  { %v26249_v35 = vpop.f32.mrb[48].mxu1 }
0x1c97   :  { %v26299_v59 = vpop.f32.mrb[50].mxu0  ;;  %v26250_v9 = vpop.f32.mrb[49].mxu1 }
0x1c98   :  { %v26300_v2 = vpop.f32.mrb[51].mxu0  ;;  %v26251_v8 = vadd.f32 %v26250_v9, %v26249_v35  ;;  %v25502_v35 = vld [vmem:[%s36546_s20 + $0x88] sm:$0xff] }
0x1c99   :  { %v26301_v42 = vadd.f32 %v26300_v2, %v26299_v59  ;;  %v25504_v59 = vld [vmem:[%s36546_s20 + $0x98] sm:$0xff]  ;;  %v12353_v9 = vand.u32 4294901760, %v25502_v35 }
0x1c9a   :  { %v12071_v0 = vadd.f32 %v26251_v8, %v11870_v11  ;;  %v26252_v19 = vpop.f32.mrb[50].mxu1  ;;  %v12357_v2 = vand.u32 4294901760, %v25504_v59  ;;  %v25501_v8 = vld [vmem:[%s36546_s20 + $0x80] sm:$0xff] }
0x1c9b   :  { %v26302_v61 = vpop.f32.mrb[52].mxu0  ;;  %v26253_v56 = vpop.f32.mrb[51].mxu1 }
0x1c9c   :  { %v26303_v24 = vpop.f32.mrb[53].mxu0  ;;  %v12196_v45 = vadd.f32 %v26295_v39, %v12071_v0  ;;  %v26254_v62 = vadd.f32 %v26253_v56, %v26252_v19  ;;  %v12355_v0 = vand.u32 4294901760, %v25501_v8 }
0x1c9d   :  { %v26304_v26 = vadd.f32 %v26303_v24, %v26302_v61  ;;  %v34048_v61 = vpack.c.bf16 %v12357_v2, %v12353_v9  ;;  %v25506_v24 = vld [vmem:[%s36546_s20 + $0xa8] sm:$0xff] }
0x1c9e   :  { %v12220_v21 = vadd.f32 %v12196_v45, %v36669_v4  ;;  %v12078_v16 = vadd.f32 %v26254_v62, %v11881_v50  ;;  %v26255_v5 = vpop.f32.mrb[52].mxu1  ;;  %v25508_v45 = vld [vmem:[%s36546_s20 + $0xb8] sm:$0xff]  ;;  %v12361_v62 = vand.u32 4294901760, %v25506_v24  ;;  %v25507_v4 = vld [vmem:[%s36546_s20 + $0xb0] sm:$0xff] }
0x1c9f   :  { %v26256_v44 = vpop.f32.mrb[53].mxu1  ;;  %29762 = vmatprep.subr.bf16.mxu1 %v34048_v61 }
0x1ca0   :  { %v12203_v25 = vadd.f32 %v26298_v23, %v12078_v16  ;;  %v26257_v28 = vadd.f32 %v26256_v44, %v26255_v5  ;;  %v33993_v37 = vadd.f32 %v25496_v12, %v12220_v21  ;;  %v12367_v16 = vand.u32 4294901760, %v25507_v4 }
0x1ca2   :  { %36670 = vst [vmem:[#allocation15_spill] sm:$0xff] %v33993_v37  ;;  %v12221_v36 = vadd.f32 %v12203_v25, %v36671_v33  ;;  %v12085_v48 = vadd.f32 %v26257_v28, %v11892_v49  ;;  %v26258_v29 = vpop.f32.mrb[54].mxu1  ;;  %v12239_v17 = vsel %vm70_vm0, %v33993_v37, 0.0  ;;  %v25510_v25 = vld [vmem:[%s36546_s20 + $0xc8] sm:$0xff]  ;;  %v25512_v28 = vld [vmem:[%s36546_s20 + $0xd8] sm:$0xff] }
0x1ca3   :  { %v26259_v53 = vpop.f32.mrb[55].mxu1  ;;  %12240 = vadd.xlane.f32.xlu0 %v12239_v17  ;;  %v12369_v33 = vand.u32 4294901760, %v25510_v25 }
0x1ca4   :  { %v12210_v52 = vadd.f32 %v26301_v42, %v12085_v48  ;;  %v26260_v60 = vadd.f32 %v26259_v53, %v26258_v29  ;;  %v33998_v13 = vadd.f32 %v25496_v12, %v12221_v36  ;;  %v25503_v42 = vld [vmem:[%s36546_s20 + $0x90] sm:$0xff]  ;;  %v12373_v36 = vand.u32 4294901760, %v25512_v28  ;;  %v25509_v48 = vld [vmem:[%s36546_s20 + $0xc0] sm:$0xff] }
0x1ca5   :  { %v12359_v19 = vand.u32 4294901760, %v25503_v42  ;;  %v25511_v29 = vld [vmem:[%s36546_s20 + $0xd0] sm:$0xff]  ;;  %v12371_v17 = vand.u32 4294901760, %v25509_v48 }
0x1ca6   :  { %v12222_v41 = vadd.f32 %v12210_v52, %v36672_v10  ;;  %v12092_v1 = vadd.f32 %v26260_v60, %v11903_v22  ;;  %v12242_v47 = vsel %vm70_vm0, %v33998_v13, 0.0  ;;  %v12375_v53 = vand.u32 4294901760, %v25511_v29 }
0x1ca7   :  { %12243 = vadd.xlane.f32.xlu1 %v12242_v47  ;;  %v34050_v56 = vpack.c.bf16 %v12359_v19, %v12355_v0  ;;  %v34084_v52 = vsub.f32 %v25502_v35, %v12353_v9  ;;  %v34086_v60 = vsub.f32 %v25504_v59, %v12357_v2  ;;  %v34088_v10 = vpack.c.bf16 %v12373_v36, %v12369_v33 }
0x1ca8   :  { %v12217_v57 = vadd.f32 %v26304_v26, %v12092_v1  ;;  %v34003_v30 = vadd.f32 %v25496_v12, %v12222_v41  ;;  %v12365_v26 = vand.u32 4294901760, %v25508_v45  ;;  %v34090_v41 = vsub.f32 %v25501_v8, %v12355_v0 }
0x1ca9   :  { %29764 = vmatpush1.bf16.msra.mxu1 %v34050_v56  ;;  %v34092_v1 = vsub.f32 %v25503_v42, %v12359_v19  ;;  %v34094_v47 = vpack.c.bf16 %v12375_v53, %v12371_v17  ;;  %v34133_v35 = vsub.f32 %v25511_v29, %v12375_v53 }
0x1caa   :  { %36673 = vst [vmem:[#allocation16_spill] sm:$0xff] %v34003_v30  ;;  %v12223_v34 = vadd.f32 %v12217_v57, %v36674_v15  ;;  %v12245_v58 = vsel %vm70_vm0, %v34003_v30, 0.0  ;;  %v34066_v5 = vpack.c.bf16 %v12365_v26, %v12361_v62  ;;  %v25514_v57 = vld [vmem:[%s36546_s20 + $0xe8] sm:$0xff]  ;;  %v25516_v15 = vld [vmem:[%s36546_s20 + $0xf8] sm:$0xff] }
0x1cab   :  { %12246 = vadd.xlane.f32.xlu0 %v12245_v58  ;;  %v12381_v58 = vand.u32 4294901760, %v25516_v15 }
0x1cac   :  { %v34008_v55 = vadd.f32 %v25496_v12, %v12223_v34  ;;  %v25505_v12 = vld [vmem:[%s36546_s20 + $0xa0] sm:$0xff]  ;;  %29766 = vmatprep.subr.bf16.mxu1 %v34066_v5  ;;  %v12377_v34 = vand.u32 4294901760, %v25514_v57 }
0x1cad   :  { %v12363_v21 = vand.u32 4294901760, %v25505_v12  ;;  %v34138_v9 = vsub.f32 %v25516_v15, %v12381_v58 }
0x1cae   :  { %36675 = vst [vmem:[#allocation18_spill] sm:$0xff] %v34008_v55  ;;  %v12248_v43 = vsel %vm70_vm0, %v34008_v55, 0.0  ;;  %v34136_v59 = vsub.f32 %v25514_v57, %v12377_v34 }
0x1caf   :  { %12249 = vadd.xlane.f32.xlu1 %v12248_v43  ;;  %v34068_v44 = vpack.c.bf16 %v12367_v16, %v12363_v21  ;;  %v25513_v43 = vld [vmem:[%s36546_s20 + $0xe0] sm:$0xff] }
0x1cb1   :  { %29768 = vmatpush1.bf16.msra.mxu1 %v34068_v44 }
0x1cb2   :  { %29770 = vmatprep.subr.bf16.mxu1 %v34088_v10 }
0x1cb5   :  { %29772 = vmatpush1.bf16.msra.mxu1 %v34094_v47 }
0x1d30   :  { %v12241_v51 = vpop.xlane.xlu0 %12240 }
0x1d31   :  { %v12251_v11 = vmul.f32 0.015625, %v12241_v51  ;;  %v25515_v51 = vld [vmem:[%s36546_s20 + $0xf0] sm:$0xff] }
0x1d33   :  { %v34013_v18 = vsub.f32 %v33993_v37, %v12251_v11  ;;  %v36461_v11 = vand.u32 4294901760, %v34084_v52 }
0x1d34   :  { %v12244_v7 = vpop.xlane.xlu1 %12243 }
0x1d35   :  { %v12252_v63 = vmul.f32 0.015625, %v12244_v7  ;;  %v12259_v40 = vmul.f32 %v34013_v18, %v34013_v18  ;;  %v36460_v7 = vand.u32 4294901760, %v34086_v60 }
0x1d37   :  { %v34018_v50 = vsub.f32 %v33998_v13, %v12252_v63  ;;  %v12263_v31 = vsel %vm70_vm0, %v12259_v40, 0.0  ;;  %v12379_v63 = vand.u32 4294901760, %v25513_v43  ;;  %v12383_v40 = vand.u32 4294901760, %v25515_v51 }
0x1d38   :  { %12264 = vadd.xlane.f32.xlu0 %v12263_v31  ;;  %v12247_v3 = vpop.xlane.xlu0 %12246  ;;  %v36459_v31 = vand.u32 4294901760, %v34090_v41  ;;  %v12493_v19 = vsub.f32 %v34086_v60, %v36460_v7 }
0x1d39   :  { %v12253_v6 = vmul.f32 0.015625, %v12247_v3  ;;  %v12260_v20 = vmul.f32 %v34018_v50, %v34018_v50  ;;  %v36458_v3 = vand.u32 4294901760, %v34092_v1  ;;  %v34140_v2 = vpack.c.bf16 %v12383_v40, %v12379_v63 }
0x1d3a   :  { %v34142_v8 = vsub.f32 %v25513_v43, %v12379_v63  ;;  %v34144_v42 = vsub.f32 %v25515_v51, %v12383_v40 }
0x1d3b   :  { %v34024_v49 = vsub.f32 %v34003_v30, %v12253_v6  ;;  %v12266_v38 = vsel %vm70_vm0, %v12260_v20, 0.0  ;;  %v34114_v6 = vsub.f32 %v25506_v24, %v12361_v62  ;;  %v34116_v20 = vsub.f32 %v25508_v45, %v12365_v26 }
0x1d3c   :  { %12267 = vadd.xlane.f32.xlu1 %v12266_v38  ;;  %v12250_v22 = vpop.xlane.xlu1 %12249  ;;  %v34118_v38 = vpack.c.bf16 %v12381_v58, %v12377_v34  ;;  %v12487_v24 = vsub.f32 %v34090_v41, %v36459_v31  ;;  %v12499_v45 = vsub.f32 %v34092_v1, %v36458_v3 }
0x1d3d   :  { %v12254_v46 = vmul.f32 0.015625, %v12250_v22  ;;  %v12261_v32 = vmul.f32 %v34024_v49, %v34024_v49  ;;  %v12481_v22 = vsub.f32 %v34084_v52, %v36461_v11  ;;  %v12504_v62 = vand.u32 4294901760, %v34114_v6 }
0x1d3e   :  { %29774 = vmatprep.subr.bf16.mxu1 %v34118_v38  ;;  %v12516_v26 = vand.u32 4294901760, %v34116_v20 }
0x1d3f   :  { %v34030_v39 = vsub.f32 %v34008_v55, %v12254_v46  ;;  %v12269_v54 = vsel %vm70_vm0, %v12261_v32, 0.0  ;;  %v34123_v46 = vsub.f32 %v25505_v12, %v12363_v21  ;;  %v34125_v32 = vsub.f32 %v25507_v4, %v12367_v16  ;;  %29776 = vmatpush1.bf16.msra.mxu1 %v34140_v2 }
0x1d40   :  { %12270 = vadd.xlane.f32.xlu0 %v12269_v54  ;;  %v34127_v54 = vsub.f32 %v25510_v25, %v12369_v33  ;;  %v12482_v0 = vand.u32 4294901760, %v12481_v22  ;;  %v12494_v21 = vand.u32 4294901760, %v12493_v19  ;;  %v12488_v16 = vand.u32 4294901760, %v12487_v24 }
0x1d41   :  { %v12262_v14 = vmul.f32 %v34030_v39, %v34030_v39  ;;  %v12510_v12 = vand.u32 4294901760, %v34123_v46  ;;  %v12522_v4 = vand.u32 4294901760, %v34125_v32  ;;  %v12500_v25 = vand.u32 4294901760, %v12499_v45 }
0x1d42   :  { %v12517_v33 = vsub.f32 %v34116_v20, %v12516_v26  ;;  %v12528_v29 = vand.u32 4294901760, %v34127_v54  ;;  %v12546_v22 = vand.u32 4294901760, %v34133_v35  ;;  %v12552_v19 = vand.u32 4294901760, %v34136_v59 }
0x1d43   :  { %v12272_v23 = vsel %vm70_vm0, %v12262_v14, 0.0  ;;  %v34129_v14 = vsub.f32 %v25512_v28, %v12373_v36  ;;  %v12505_v28 = vsub.f32 %v34114_v6, %v12504_v62  ;;  %v12511_v36 = vsub.f32 %v34123_v46, %v12510_v12 }
0x1d44   :  { %12273 = vadd.xlane.f32.xlu1 %v12272_v23  ;;  %v34131_v23 = vsub.f32 %v25509_v48, %v12371_v17  ;;  %v12523_v48 = vsub.f32 %v34125_v32, %v12522_v4  ;;  %v29777_v17 = vpack.c.bf16 %v12494_v21, %v12482_v0  ;;  %v34165_v53 = vpack.c.bf16 %v12500_v25, %v12488_v16 }
0x1d45   :  { %v12506_v57 = vand.u32 4294901760, %v12505_v28  ;;  %v12540_v15 = vand.u32 4294901760, %v34129_v14  ;;  %v12518_v34 = vand.u32 4294901760, %v12517_v33  ;;  %v12512_v58 = vand.u32 4294901760, %v12511_v36 }
0x1d46   :  { %v12524_v43 = vand.u32 4294901760, %v12523_v48  ;;  %v12529_v51 = vsub.f32 %v34127_v54, %v12528_v29  ;;  %29778 = vmatprep.subr.bf16.mxu1 %v29777_v17  ;;  %v12534_v40 = vand.u32 4294901760, %v34131_v23  ;;  %v12564_v21 = vand.u32 4294901760, %v34138_v9 }
0x1d47   :  { %v12541_v63 = vsub.f32 %v34129_v14, %v12540_v15  ;;  %v34173_v0 = vpack.c.bf16 %v12518_v34, %v12506_v57  ;;  %v12547_v28 = vsub.f32 %v34133_v35, %v12546_v22  ;;  %v12553_v33 = vsub.f32 %v34136_v59, %v12552_v19 }
0x1d48   :  { %v34175_v24 = vpack.c.bf16 %v12524_v43, %v12512_v58  ;;  %v12530_v45 = vand.u32 4294901760, %v12529_v51  ;;  %v12535_v25 = vsub.f32 %v34131_v23, %v12534_v40  ;;  %v12565_v36 = vsub.f32 %v34138_v9, %v12564_v21 }
0x1d49   :  { %v12542_v16 = vand.u32 4294901760, %v12541_v63  ;;  %v12558_v48 = vand.u32 4294901760, %v34142_v8  ;;  %v12570_v17 = vand.u32 4294901760, %v34144_v42  ;;  %v12548_v58 = vand.u32 4294901760, %v12547_v28 }
0x1d4a   :  { %v12536_v34 = vand.u32 4294901760, %v12535_v25  ;;  %v12554_v43 = vand.u32 4294901760, %v12553_v33  ;;  %v12566_v51 = vand.u32 4294901760, %v12565_v36  ;;  %v36676_v36 = vand.u32 4294901760, %v34084_v52 }
0x1d4b   :  { %v34184_v57 = vpack.c.bf16 %v12542_v16, %v12530_v45  ;;  %v12559_v63 = vsub.f32 %v34142_v8, %v12558_v48  ;;  %v12571_v3 = vsub.f32 %v34144_v42, %v12570_v17  ;;  %v34222_v33 = vpack.c.bf16 %v12516_v26, %v12504_v62 }
0x1d4c   :  { %v34188_v31 = vpack.c.bf16 %v12548_v58, %v12536_v34  ;;  %v34190_v7 = vpack.c.bf16 %v12566_v51, %v12554_v43  ;;  %v36677_v34 = vand.u32 4294901760, %v34086_v60  ;;  %v36678_v43 = vand.u32 4294901760, %v34090_v41 }
0x1d4d   :  { %v12560_v11 = vand.u32 4294901760, %v12559_v63  ;;  %v12572_v30 = vand.u32 4294901760, %v12571_v3  ;;  %v36679_v51 = vand.u32 4294901760, %v34092_v1  ;;  %v34224_v3 = vpack.c.bf16 %v12522_v4, %v12510_v12 }
0x1d4e   :  { %v34214_v58 = vpack.c.bf16 %v36677_v34, %v36676_v36  ;;  %v34228_v28 = vpack.c.bf16 %v12546_v22, %v12534_v40  ;;  %v34232_v25 = vpack.c.bf16 %v12570_v17, %v12558_v48 }
0x1d4f   :  { %v34192_v55 = vpack.c.bf16 %v12572_v30, %v12560_v11  ;;  %v34220_v63 = vpack.c.bf16 %v36679_v51, %v36678_v43  ;;  %v34226_v30 = vpack.c.bf16 %v12540_v15, %v12528_v29  ;;  %v34230_v11 = vpack.c.bf16 %v12564_v21, %v12552_v19  ;;  %v25499_v15 = vld [vmem:[%s36345_s5 + $0x1] ss:$0 sm:$0xff] }
0x1d50   :  { %v25500_v19 = vld [vmem:[%s36346_s6 + $0x1] ss:$0 sm:$0xff] }
0x1dc5   :  { %v12265_v36 = vpop.xlane.xlu0 %12264 }
0x1dc6   :  { %v12275_v34 = vmul.f32 0.015625, %v12265_v36 }
0x1dc8   :  { %v12279_v16 = vadd.f32 1e-05, %v12275_v34 }
0x1dc9   :  { %v12268_v45 = vpop.xlane.xlu1 %12267 }
0x1dca   :  { %31428 = vrsqrt.f32 %v12279_v16  ;;  %v12276_v37 = vmul.f32 0.015625, %v12268_v45 }
0x1dcc   :  { %v12280_v43 = vadd.f32 1e-05, %v12276_v37 }
0x1dcd   :  { %v12271_v51 = vpop.xlane.xlu0 %12270 }
0x1dce   :  { %31430 = vrsqrt.f32 %v12280_v43  ;;  %v12277_v62 = vmul.f32 0.015625, %v12271_v51 }
0x1dd0   :  { %v12281_v26 = vadd.f32 1e-05, %v12277_v62 }
0x1dd1   :  { %v12274_v12 = vpop.xlane.xlu1 %12273 }
0x1dd2   :  { %31432 = vrsqrt.f32 %v12281_v26  ;;  %v12278_v4 = vmul.f32 0.015625, %v12274_v12 }
0x1dd4   :  { %v31429_v29 = vpop.eup %31428  ;;  %v12282_v40 = vadd.f32 1e-05, %v12278_v4 }
0x1dd5   :  { %v12287_v22 = vmul.f32 %v31429_v29, %v34013_v18 }
0x1dd6   :  { %31434 = vrsqrt.f32 %v12282_v40 }
0x1dd7   :  { %v12297_v37 = vmul.f32 %v25499_v15, %v12287_v22 }
0x1dd8   :  { %v31431_v21 = vpop.eup %31430 }
0x1dd9   :  { %v12307_v48 = vadd.f32 %v25500_v19, %v12297_v37  ;;  %v12288_v17 = vmul.f32 %v31431_v21, %v34018_v50 }
0x1ddb   :  { %v12342_v45 = vsel %vm70_vm0, %v12307_v48, 0  ;;  %v12298_v16 = vmul.f32 %v25499_v15, %v12288_v17 }
0x1ddc   :  { %v31433_v36 = vpop.eup %31432  ;;  %v34243_v34 = vand.u32 4294901760, %v12342_v45 }
0x1ddd   :  { %v12289_v43 = vmul.f32 %v31433_v36, %v34024_v49  ;;  %v12308_v51 = vadd.f32 %v25500_v19, %v12298_v16 }
0x1dde   :  { %v34247_v18 = vsub.f32 %v12342_v45, %v34243_v34 }
0x1ddf   :  { %v12345_v62 = vsel %vm70_vm0, %v12308_v51, 0  ;;  %v12299_v26 = vmul.f32 %v25499_v15, %v12289_v43 }
0x1de0   :  { %v31435_v12 = vpop.eup %31434  ;;  %v12436_v4 = vand.u32 4294901760, %v34247_v18  ;;  %v34251_v29 = vand.u32 4294901760, %v12345_v62 }
0x1de1   :  { %v12290_v50 = vmul.f32 %v31435_v12, %v34030_v39  ;;  %v12309_v40 = vadd.f32 %v25500_v19, %v12299_v26 }
0x1de2   :  { %v12437_v22 = vsub.f32 %v34247_v18, %v12436_v4  ;;  %v34258_v49 = vsub.f32 %v12345_v62, %v34251_v29 }
0x1de3   :  { %v12348_v37 = vsel %vm70_vm0, %v12309_v40, 0  ;;  %v12300_v21 = vmul.f32 %v25499_v15, %v12290_v50 }
0x1de4   :  { %v12438_v48 = vand.u32 4294901760, %v12437_v22  ;;  %v12447_v17 = vand.u32 4294901760, %v34258_v49  ;;  %v34262_v45 = vand.u32 4294901760, %v12348_v37 }
0x1de5   :  { %v12310_v16 = vadd.f32 %v25500_v19, %v12300_v21 }
0x1de6   :  { %12439 = vmatmul.mubr.f32.vlgmr.msra.gmra.mrb[56].mxu1 %v12438_v48  ;;  %v12448_v39 = vsub.f32 %v34258_v49, %v12447_v17  ;;  %v34268_v36 = vsub.f32 %v12348_v37, %v34262_v45 }
0x1de7   :  { %29780 = vmatpush1.bf16.msra.mxu1 %v34165_v53  ;;  %12444 = vmatprep.mubr.f32.mxu1 %v36668_v27  ;;  %v12351_v15 = vsel %vm70_vm0, %v12310_v16, 0 }
0x1de8   :  { %v12449_v43 = vand.u32 4294901760, %v12448_v39  ;;  %29782 = vmatprep.subr.bf16.mxu1 %v34173_v0  ;;  %v12458_v51 = vand.u32 4294901760, %v34268_v36  ;;  %v34275_v19 = vand.u32 4294901760, %v12351_v15 }
0x1dea   :  { %12450 = vmatmul.mubr.f32.gmra.mrb[58].mxu1 %v12449_v43  ;;  %v12459_v62 = vsub.f32 %v34268_v36, %v12458_v51  ;;  %v12468_v26 = vsub.f32 %v12351_v15, %v34275_v19 }
0x1deb   :  { %29784 = vmatpush1.bf16.msra.mxu1 %v34175_v24  ;;  %12455 = vmatprep.mubr.f32.mxu1 %v36668_v27  ;;  %v36680_v24 = vpack.c.bf16 %v34086_v60, %v34084_v52  ;;  %v36684_v52 = vpack.c.bf16 %v34129_v14, %v34127_v54  ;;  %v36685_v60 = vpack.c.bf16 %v34133_v35, %v34131_v23 }
0x1dec   :  { %v12460_v53 = vand.u32 4294901760, %v12459_v62  ;;  %29786 = vmatprep.subr.bf16.mxu1 %v34184_v57  ;;  %v12469_v12 = vand.u32 4294901760, %v12468_v26  ;;  %v36681_v57 = vpack.c.bf16 %v34092_v1, %v34090_v41  ;;  %v36686_v41 = vpack.c.bf16 %v34138_v9, %v34136_v59 }
0x1ded   :  { %v36687_v1 = vpack.c.bf16 %v34144_v42, %v34142_v8 }
0x1dee   :  { %12461 = vmatmul.mubr.f32.gmra.mrb[60].mxu1 %v12460_v53  ;;  %v12470_v50 = vsub.f32 %v12468_v26, %v12469_v12 }
0x1def   :  { %29788 = vmatpush1.bf16.msra.mxu1 %v34188_v31  ;;  %12466 = vmatprep.mubr.f32.mxu1 %v36668_v27 }
0x1df0   :  { %v12471_v0 = vand.u32 4294901760, %v12470_v50  ;;  %29790 = vmatprep.subr.bf16.mxu1 %v34190_v7  ;;  %v36682_v7 = vpack.c.bf16 %v34116_v20, %v34114_v6 }
0x1df2   :  { %12472 = vmatmul.mubr.f32.gmra.mrb[62].mxu1 %v12471_v0 }
0x1df3   :  { %29792 = vmatpush1.bf16.msra.mxu1 %v34192_v55  ;;  %12622 = vmatprep.mubr.f32.mxu1 %v36668_v27  ;;  %v36683_v55 = vpack.c.bf16 %v34125_v32, %v34123_v46 }
0x1df4   :  { %29794 = vmatprep.subr.bf16.mxu1 %v36680_v24 }
0x1df6   :  { %12624 = vmatmul.mubr.f32.vlgmr.msra.gmra.mrb[56].mxu1 %v34243_v34 }
0x1df7   :  { %29796 = vmatpush1.bf16.msra.mxu1 %v36681_v57  ;;  %12629 = vmatprep.mubr.f32.mxu1 %v36668_v27 }
0x1df8   :  { %29798 = vmatprep.subr.bf16.mxu1 %v36682_v7 }
0x1dfa   :  { %12631 = vmatmul.mubr.f32.gmra.mrb[58].mxu1 %v34251_v29 }
0x1dfb   :  { %29800 = vmatpush1.bf16.msra.mxu1 %v36683_v55  ;;  %12636 = vmatprep.mubr.f32.mxu1 %v36668_v27 }
0x1dfc   :  { %29802 = vmatprep.subr.bf16.mxu1 %v36684_v52 }
0x1dfe   :  { %12638 = vmatmul.mubr.f32.gmra.mrb[60].mxu1 %v34262_v45 }
0x1dff   :  { %29804 = vmatpush1.bf16.msra.mxu1 %v36685_v60  ;;  %12643 = vmatprep.mubr.f32.mxu1 %v36668_v27 }
0x1e00   :  { %29806 = vmatprep.subr.bf16.mxu1 %v36686_v41 }
0x1e02   :  { %12645 = vmatmul.mubr.f32.gmra.mrb[62].mxu1 %v34275_v19 }
0x1e03   :  { %29808 = vmatpush1.bf16.msra.mxu1 %v36687_v1  ;;  %12747 = vmatprep.mubr.f32.mxu1 %v36668_v27 }
0x1e04   :  { %29810 = vmatprep.subr.bf16.mxu1 %v34048_v61 }
0x1e06   :  { %12750 = vmatmul.mubr.f32.vlgmr.msra.gmra.mrb[56].mxu1 %v34247_v18 }
0x1e07   :  { %29812 = vmatpush1.bf16.msra.mxu1 %v34050_v56  ;;  %12755 = vmatprep.mubr.f32.mxu1 %v36668_v27 }
0x1e08   :  { %29814 = vmatprep.subr.bf16.mxu1 %v34066_v5 }
0x1e0a   :  { %12758 = vmatmul.mubr.f32.gmra.mrb[58].mxu1 %v34258_v49 }
0x1e0b   :  { %29816 = vmatpush1.bf16.msra.mxu1 %v34068_v44  ;;  %12763 = vmatprep.mubr.f32.mxu1 %v36668_v27 }
0x1e0c   :  { %29818 = vmatprep.subr.bf16.mxu1 %v34088_v10 }
0x1e0e   :  { %12766 = vmatmul.mubr.f32.gmra.mrb[60].mxu1 %v34268_v36 }
0x1e0f   :  { %29820 = vmatpush1.bf16.msra.mxu1 %v34094_v47  ;;  %12771 = vmatprep.mubr.f32.mxu1 %v36668_v27 }
0x1e10   :  { %29822 = vmatprep.subr.bf16.mxu1 %v34118_v38 }
0x1e12   :  { %12774 = vmatmul.mubr.f32.gmra.mrb[62].mxu1 %v12468_v26 }
0x1e13   :  { %29824 = vmatpush1.bf16.msra.mxu1 %v34140_v2  ;;  %12860 = vmatprep.mubr.f32.mxu1 %v36668_v27 }
0x1e14   :  { %29826 = vmatprep.subr.bf16.mxu1 %v34214_v58 }
0x1e16   :  { %12864 = vmatmul.mubr.f32.vlgmr.msra.gmra.mrb[56].mxu1 %v12436_v4 }
0x1e17   :  { %29828 = vmatpush1.bf16.msra.mxu1 %v34220_v63  ;;  %12869 = vmatprep.mubr.f32.mxu1 %v36668_v27 }
0x1e18   :  { %29830 = vmatprep.subr.bf16.mxu1 %v34222_v33 }
0x1e1a   :  { %12873 = vmatmul.mubr.f32.gmra.mrb[58].mxu1 %v12447_v17 }
0x1e1b   :  { %29832 = vmatpush1.bf16.msra.mxu1 %v34224_v3  ;;  %12878 = vmatprep.mubr.f32.mxu1 %v36668_v27 }
0x1e1c   :  { %29834 = vmatprep.subr.bf16.mxu1 %v34226_v30 }
0x1e1e   :  { %12882 = vmatmul.mubr.f32.gmra.mrb[60].mxu1 %v12458_v51 }
0x1e1f   :  { %29836 = vmatpush1.bf16.msra.mxu1 %v34228_v28  ;;  %12887 = vmatprep.mubr.f32.mxu1 %v36668_v27 }
0x1e20   :  { %29838 = vmatprep.subr.bf16.mxu1 %v34230_v11 }
0x1e22   :  { %12891 = vmatmul.mubr.f32.gmra.mrb[62].mxu1 %v12469_v12 }
0x1e23   :  { %29840 = vmatpush1.bf16.msra.mxu1 %v34232_v25  ;;  %13009 = vmatprep.mubr.f32.mxu1 %v36668_v27 }
0x1e24   :  { %29842 = vmatprep.subr.bf16.mxu1 %v34048_v61  ;;  %v25517_v61 = vld [vmem:[%s36342_s2 + $0x2] sm:$0x3]  ;;  %s36692_s2 = smov 16  }
0x1e26   :  { %13011 = vmatmul.mubr.f32.vlgmr.msra.gmra.mrb[56].mxu1 %v34243_v34 }
0x1e27   :  { %29844 = vmatpush1.bf16.msra.mxu1 %v34050_v56  ;;  %13016 = vmatprep.mubr.f32.mxu1 %v36668_v27  ;;  %v36688_v56 = vld [vmem:[#allocation5_spill] sm:$0xff] }
0x1e28   :  { %29846 = vmatprep.subr.bf16.mxu1 %v34066_v5  ;;  %v12334_v5 = vrot.slane %v25517_v61, %v36688_v56 }
0x1e2a   :  { %13018 = vmatmul.mubr.f32.gmra.mrb[58].mxu1 %v34251_v29 }
0x1e2b   :  { %29848 = vmatpush1.bf16.msra.mxu1 %v34068_v44  ;;  %13023 = vmatprep.mubr.f32.mxu1 %v36668_v27  ;;  %v36689_v44 = vld [vmem:[#allocation6_spill] sm:$0xff] }
0x1e2c   :  { %29850 = vmatprep.subr.bf16.mxu1 %v34088_v10  ;;  %v12338_v10 = vrot.slane %v25517_v61, %v36689_v44 }
0x1e2e   :  { %13025 = vmatmul.mubr.f32.gmra.mrb[60].mxu1 %v34262_v45 }
0x1e2f   :  { %29852 = vmatpush1.bf16.msra.mxu1 %v34094_v47  ;;  %13030 = vmatprep.mubr.f32.mxu1 %v36668_v27 }
0x1e30   :  { %29854 = vmatprep.subr.bf16.mxu1 %v34118_v38 }
0x1e32   :  { %13032 = vmatmul.mubr.f32.gmra.mrb[62].mxu1 %v34275_v19 }
0x1e33   :  { %29856 = vmatpush1.bf16.msra.mxu1 %v34140_v2  ;;  %13118 = vmatprep.mubr.f32.mxu1 %v36668_v27 }
0x1e36   :  { %13120 = vmatmul.mubr.f32.vlgmr.msra.gmra.mrb[56].mxu1 %v34243_v34 }
0x1e37   :  { %13125 = vmatprep.mubr.f32.mxu1 %v36668_v27 }
0x1e3a   :  { %13127 = vmatmul.mubr.f32.gmra.mrb[58].mxu1 %v34251_v29 }
0x1e3b   :  { %13132 = vmatprep.mubr.f32.mxu1 %v36668_v27 }
0x1e3e   :  { %13134 = vmatmul.mubr.f32.gmra.mrb[60].mxu1 %v34262_v45 }
0x1e3f   :  { %13139 = vmatprep.mubr.f32.mxu1 %v36668_v27 }
0x1e42   :  { %13141 = vmatmul.mubr.f32.gmra.mrb[62].mxu1 %v34275_v19 }
0x1f09   :  { %v13121_v47 = vpop.f32.mrb[56].mxu1 }
0x1f0a   :  { %v34378_v31 = vadd.f32 %v13121_v47, %v12334_v5  ;;  %v13123_v6 = vpop.f32.mrb[57].mxu1 }
0x1f0b   :  { %v34380_v20 = vadd.f32 %v13123_v6, %v12338_v10 }
0x1f0c   :  { %13149 = vrot.lane.b32.xlu0 %v34378_v31, %s31571_s18  ;;  %v13153_v38 = vsel %vm984_vm1, %v34378_v31, 0 }
0x1f0d   :  { %v13128_v46 = vpop.f32.mrb[58].mxu1  ;;  %v34386_v32 = vand.u32 4294901760, %v13153_v38  ;;  %v13696_v54 = vand.u32 4294901760, %v34380_v20 }
0x1f0e   :  { %v34389_v14 = vadd.f32 %v13128_v46, %v12334_v5  ;;  %v13130_v23 = vpop.f32.mrb[59].mxu1 }
0x1f0f   :  { %v34391_v35 = vadd.f32 %v13130_v23, %v12338_v10  ;;  %v34394_v59 = vsub.f32 %v13153_v38, %v34386_v32  ;;  %v34405_v28 = vsub.f32 %v34380_v20, %v13696_v54 }
0x1f10   :  { %13151 = vrot.lane.b32.xlu1 %v34389_v14, %s31571_s18  ;;  %v13155_v36 = vsel %vm984_vm1, %v34389_v14, 0 }
0x1f11   :  { %v13699_v9 = vand.u32 4294901760, %v34391_v35  ;;  %v13135_v2 = vpop.f32.mrb[60].mxu1  ;;  %v13230_v8 = vand.u32 4294901760, %v34394_v59  ;;  %v13785_v4 = vand.u32 4294901760, %v34405_v28  ;;  %v13238_v43 = vand.u32 4294901760, %v13155_v36 }
0x1f12   :  { %v34400_v42 = vadd.f32 %v13135_v2, %v12334_v5  ;;  %v13137_v25 = vpop.f32.mrb[61].mxu1 }
0x1f13   :  { %v34407_v33 = vadd.f32 %v13137_v25, %v12338_v10  ;;  %v13231_v3 = vsub.f32 %v34394_v59, %v13230_v8  ;;  %v34413_v30 = vsub.f32 %v34391_v35, %v13699_v9  ;;  %v13239_v53 = vsub.f32 %v13155_v36, %v13238_v43 }
0x1f14   :  { %v34462_v38 = vpack.c.bf16 %v13699_v9, %v13696_v54  ;;  %v13786_v23 = vsub.f32 %v34405_v28, %v13785_v4 }
0x1f15   :  { %v17952_v11 = vand.u32 4294901760, %v34407_v33  ;;  %v13142_v58 = vpop.f32.mrb[62].mxu1  ;;  %v13232_v63 = vand.u32 4294901760, %v13231_v3  ;;  %v13792_v29 = vand.u32 4294901760, %v34413_v30  ;;  %v34422_v40 = vpack.c.bf16 %v34413_v30, %v34405_v28 }
0x1f16   :  { %v34416_v34 = vadd.f32 %v13142_v58, %v12334_v5  ;;  %v13144_v18 = vpop.f32.mrb[63].mxu1  ;;  %v13240_v7 = vand.u32 4294901760, %v13239_v53  ;;  %v13787_v2 = vand.u32 4294901760, %v13786_v23 }
0x1f17   :  { %v34424_v22 = vadd.f32 %v13144_v18, %v12338_v10  ;;  %27917 = vmatprep.mubr.f32.mxu0 %v13232_v63  ;;  %v34426_v49 = vpack.c.bf16 %v13792_v29, %v13785_v4  ;;  %v34432_v21 = vsub.f32 %v34407_v33, %v17952_v11  ;;  %v13793_v46 = vsub.f32 %v34413_v30, %v13792_v29 }
0x1f18   :  { %v13241_v41 = vsub.f32 %v13239_v53, %v13240_v7 }
0x1f19   :  { %v17955_v37 = vand.u32 4294901760, %v34424_v22  ;;  %v18041_v17 = vand.u32 4294901760, %v34432_v21 }
0x1f1a   :  { %v13242_v5 = vand.u32 4294901760, %v13241_v41 }
0x1f1b   :  { %v34437_v48 = vsub.f32 %v34424_v22, %v17955_v37 }
0x1f1d   :  { %v18048_v45 = vand.u32 4294901760, %v34437_v48  ;;  %v34443_v16 = vpack.c.bf16 %v34437_v48, %v34432_v21 }
0x1f1f   :  { %v34449_v39 = vpack.c.bf16 %v18048_v45, %v18041_v17 }
0x1f7e   :  { %v13150_v15 = vpop.permute.xlu0 %13149 }
0x1f7f   :  { %v13157_v51 = vsel %vm984_vm1, %v13150_v15, 0 }
0x1f80   :  { %v13162_v19 = vand.u32 4294901760, %v13157_v51 }
0x1f82   :  { %v13250_v62 = vsub.f32 %v13157_v51, %v13162_v19  ;;  %v13152_v26 = vpop.permute.xlu1 %13151 }
0x1f83   :  { %v13159_v12 = vsel %vm984_vm1, %v13152_v26, 0 }
0x1f84   :  { %v13251_v50 = vand.u32 4294901760, %v13250_v62  ;;  %v13165_v0 = vand.u32 4294901760, %v13159_v12 }
0x1f86   :  { %v29857_v24 = vpack.c.bf16 %v13165_v0, %v13162_v19  ;;  %v13257_v57 = vsub.f32 %v13159_v12, %v13165_v0  ;;  %v13252_v55 = vsub.f32 %v13250_v62, %v13251_v50 }
0x1f88   :  { %v13258_v52 = vand.u32 4294901760, %v13257_v57  ;;  %29858 = vmatprep.subr.bf16.mxu0 %v29857_v24  ;;  %v13253_v1 = vand.u32 4294901760, %v13252_v55  ;;  %v29865_v47 = vpack.c.bf16 %v13257_v57, %v13250_v62 }
0x1f89   :  { %29860 = vmatpush3.bf16.xpose.msra.mxu0 %v29857_v24 }
0x1f8a   :  { %v13259_v60 = vsub.f32 %v13257_v57, %v13258_v52  ;;  %v29873_v6 = vpack.c.bf16 %v13258_v52, %v13251_v50 }
0x1f8c   :  { %v13260_v61 = vand.u32 4294901760, %v13259_v60 }
0x1f8e   :  { %v29861_v10 = vpack.c.bf16 %v13260_v61, %v13253_v1 }
0x1f90   :  { %27918 = vmatmul.mubr.f32.vlgmr.msra.gmra.mrb[54].mxu0 %v13242_v5  ;;  %29862 = vmatprep.subr.bf16.mxu0 %v29861_v10 }
0x1f91   :  { %29864 = vmatpush3.bf16.xpose.msra.mxu0 %v29861_v10  ;;  %27924 = vmatprep.mubr.f32.mxu0 %v34386_v32 }
0x1f92   :  { %29866 = vmatprep.subr.bf16.mxu0 %v29865_v47 }
0x1f98   :  { %27925 = vmatmul.mubr.f32.vlgmr.msra.gmra.mrb[54].mxu0 %v13238_v43 }
0x1f99   :  { %29868 = vmatpush3.bf16.xpose.msra.mxu0 %v29865_v47  ;;  %27931 = vmatprep.mubr.f32.mxu0 %v34394_v59  ;;  %v13794_v59 = vand.u32 4294901760, %v13793_v46 }
0x1f9a   :  { %29870 = vmatprep.subr.bf16.mxu0 %v29857_v24 }
0x1fa0   :  { %27932 = vmatmul.mubr.f32.vlgmr.msra.gmra.mrb[54].mxu0 %v13239_v53 }
0x1fa1   :  { %29872 = vmatpush3.bf16.xpose.msra.mxu0 %v29857_v24  ;;  %27938 = vmatprep.mubr.f32.mxu0 %v13230_v8  ;;  %v29885_v8 = vpack.c.bf16 %v13794_v59, %v13787_v2 }
0x1fa2   :  { %29874 = vmatprep.subr.bf16.mxu0 %v29873_v6 }
0x1fa8   :  { %27939 = vmatmul.mubr.f32.vlgmr.msra.gmra.mrb[54].mxu0 %v13240_v7 }
0x1fa9   :  { %29876 = vmatpush3.bf16.xpose.msra.mxu0 %v29873_v6  ;;  %27945 = vmatprep.mubr.f32.mxu0 %v34386_v32 }
0x1faa   :  { %29878 = vmatprep.subr.bf16.mxu0 %v29857_v24 }
0x1fb0   :  { %27946 = vmatmul.mubr.f32.vlgmr.msra.gmra.mrb[54].mxu0 %v13238_v43 }
0x1fb1   :  { %29880 = vmatpush3.bf16.xpose.msra.mxu0 %v29857_v24  ;;  %27952 = vmatprep.mubr.f32.mxu0 %v34386_v32 }
0x1fb2   :  { %29882 = vmatprep.subr.bf16.mxu0 %v34462_v38 }
0x1fb8   :  { %27953 = vmatmul.mubr.f32.vlgmr.msra.gmra.mrb[54].mxu0 %v13238_v43 }
0x1fb9   :  { %29884 = vmatpush3.bf16.msra.mxu0 %v34462_v38 }
0x1fba   :  { %29886 = vmatprep.subr.bf16.mxu0 %v29885_v8 }
0x208b   :  { %v27954_v25 = vpop.f32.mrb[54].mxu0 }
0x208c   :  { %v13664_v54 = vmul.f32 0.25, %v27954_v25  ;;  %v13653_v9 = vpop.f32.mrb[55].mxu0 }
0x208d   :  { %v13663_v3 = vmul.f32 0.25, %v13653_v9 }
0x208e   :  { %v13666_v30 = vsel %vm32244_vm2, %v13664_v54, -inf }
0x208f   :  { %v13665_v32 = vsel %vm32249_vm3, %v13663_v3, -inf  ;;  %v13670_v18 = vsel %vm984_vm1, %v13666_v30, -inf }
0x2090   :  { %13671 = vmax.xlane.f32.xlu0 %v13670_v18  ;;  %v13667_v28 = vsel %vm984_vm1, %v13665_v32, -inf }
0x2091   :  { %13668 = vmax.xlane.f32.xlu1 %v13667_v28 }
0x211d   :  { %v13672_v4 = vpop.xlane.xlu0 %13671 }
0x211e   :  { %v13674_v29 = vsub.f32 %v13666_v30, %v13672_v4  ;;  %v13669_v36 = vpop.xlane.xlu1 %13668 }
0x211f   :  { %v13673_v15 = vsub.f32 %v13665_v32, %v13669_v36 }
0x2120   :  { %v13677_v43 = vmul.f32 1.442695, %v13674_v29 }
0x2121   :  { %v13675_v51 = vmul.f32 1.442695, %v13673_v15 }
0x2122   :  { %31436 = vpow2.f32 %v13677_v43 }
0x2123   :  { %31438 = vpow2.f32 %v13675_v51 }
0x212c   :  { %v31437_v19 = vpop.eup %31436 }
0x212d   :  { %v31439_v62 = vpop.eup %31438  ;;  %v13682_v26 = vsel %vm984_vm1, %v31437_v19, 0.0 }
0x212e   :  { %13683 = vadd.xlane.f32.xlu1 %v13682_v26  ;;  %v13679_v53 = vsel %vm984_vm1, %v31439_v62, 0.0 }
0x212f   :  { %13680 = vadd.xlane.f32.xlu0 %v13679_v53 }
0x213f   :  { %14203 = vrot.lane.b32.xlu1 %v34389_v14, %s31572_s19 }
0x2143   :  { %14197 = vrot.lane.b32.xlu1 %v34378_v31, %s31573_s1 }
0x2145   :  { %14201 = vrot.lane.b32.xlu0 %v34378_v31, %s31572_s19 }
0x2147   :  { %14199 = vrot.lane.b32.xlu1 %v34389_v14, %s31573_s1 }
0x21bb   :  { %v13684_v12 = vpop.xlane.xlu1 %13683 }
0x21bc   :  { %31440 = vrcp.f32 %v13684_v12  ;;  %v13681_v50 = vpop.xlane.xlu0 %13680 }
0x21bd   :  { %31442 = vrcp.f32 %v13681_v50 }
0x21bf   :  { %v14204_v59 = vpop.permute.xlu1 %14203 }
0x21c0   :  { %v14202_v2 = vpop.permute.xlu0 %14201  ;;  %v14211_v54 = vsel %vm984_vm1, %v14204_v59, 0 }
0x21c1   :  { %v14217_v3 = vand.u32 4294901760, %v14211_v54 }
0x21c3   :  { %v14198_v25 = vpop.permute.xlu1 %14197  ;;  %v14309_v32 = vsub.f32 %v14211_v54, %v14217_v3 }
0x21c4   :  { %v14205_v9 = vsel %vm984_vm1, %v14198_v25, 0 }
0x21c5   :  { %v14280_v30 = vand.u32 4294901760, %v14205_v9  ;;  %v14310_v36 = vand.u32 4294901760, %v14309_v32 }
0x21c6   :  { %v31441_v0 = vpop.eup %31440 }
0x21c7   :  { %v31443_v24 = vpop.eup %31442  ;;  %v13688_v57 = vmul.f32 %v31441_v0, %v31437_v19  ;;  %v14200_v28 = vpop.permute.xlu1 %14199  ;;  %v14281_v4 = vsub.f32 %v14205_v9, %v14280_v30 }
0x21c8   :  { %v13687_v7 = vmul.f32 %v31443_v24, %v31439_v62  ;;  %v14207_v29 = vsel %vm984_vm1, %v14200_v28, 0  ;;  %v14311_v62 = vsub.f32 %v14309_v32, %v14310_v36 }
0x21c9   :  { %v13693_v55 = vsel %vm984_vm1, %v13688_v57, 0  ;;  %v14282_v43 = vand.u32 4294901760, %v14281_v4  ;;  %v14290_v51 = vand.u32 4294901760, %v14207_v29 }
0x21ca   :  { %v13690_v52 = vsel %vm984_vm1, %v13687_v7, 0  ;;  %v13772_v60 = vand.u32 4294901760, %v13693_v55  ;;  %v14312_v50 = vand.u32 4294901760, %v14311_v62 }
0x21cb   :  { %v13762_v41 = vand.u32 4294901760, %v13690_v52  ;;  %v14291_v53 = vsub.f32 %v14207_v29, %v14290_v51 }
0x21cc   :  { %v13773_v1 = vsub.f32 %v13693_v55, %v13772_v60 }
0x21cd   :  { %v13763_v61 = vsub.f32 %v13690_v52, %v13762_v41  ;;  %v14292_v0 = vand.u32 4294901760, %v14291_v53 }
0x21ce   :  { %v13774_v5 = vand.u32 4294901760, %v13773_v1 }
0x21cf   :  { %v13764_v10 = vand.u32 4294901760, %v13763_v61  ;;  %v14293_v7 = vsub.f32 %v14291_v53, %v14292_v0 }
0x21d0   :  { %v13775_v47 = vsub.f32 %v13773_v1, %v13774_v5 }
0x21d1   :  { %v13765_v6 = vsub.f32 %v13763_v61, %v13764_v10  ;;  %v14294_v55 = vand.u32 4294901760, %v14293_v7 }
0x21d2   :  { %v13776_v23 = vand.u32 4294901760, %v13775_v47 }
0x21d3   :  { %v13766_v46 = vand.u32 4294901760, %v13765_v6 }
0x21d5   :  { %27959 = vmatprep.mubr.f32.mxu0 %v13766_v46 }
0x21d6   :  { %27960 = vmatmul.mubr.f32.vlgmr.msra.gmra.mrb[56].mxu0 %v13776_v23 }
0x21d7   :  { %29888 = vmatpush3.bf16.msra.mxu0 %v29885_v8  ;;  %27966 = vmatprep.mubr.f32.mxu0 %v13762_v41  ;;  %v14209_v8 = vsel %vm984_vm1, %v14202_v2, 0 }
0x21d8   :  { %29890 = vmatprep.subr.bf16.mxu0 %v34422_v40 }
0x21de   :  { %27967 = vmatmul.mubr.f32.vlgmr.msra.gmra.mrb[56].mxu0 %v13772_v60 }
0x21df   :  { %29892 = vmatpush3.bf16.msra.mxu0 %v34422_v40  ;;  %27973 = vmatprep.mubr.f32.mxu0 %v13763_v61  ;;  %v14214_v40 = vand.u32 4294901760, %v14209_v8 }
0x21e0   :  { %29894 = vmatprep.subr.bf16.mxu0 %v34462_v38 }
0x21e1   :  { %v14302_v18 = vsub.f32 %v14209_v8, %v14214_v40  ;;  %v29905_v19 = vpack.c.bf16 %v14217_v3, %v14214_v40 }
0x21e3   :  { %v14303_v15 = vand.u32 4294901760, %v14302_v18  ;;  %v29913_v52 = vpack.c.bf16 %v14309_v32, %v14302_v18 }
0x21e5   :  { %v14304_v26 = vsub.f32 %v14302_v18, %v14303_v15 }
0x21e6   :  { %27974 = vmatmul.mubr.f32.vlgmr.msra.gmra.mrb[56].mxu0 %v13773_v1 }
0x21e7   :  { %29896 = vmatpush3.bf16.msra.mxu0 %v34462_v38  ;;  %27980 = vmatprep.mubr.f32.mxu0 %v13764_v10  ;;  %v14305_v12 = vand.u32 4294901760, %v14304_v26 }
0x21e8   :  { %29898 = vmatprep.subr.bf16.mxu0 %v34426_v49 }
0x21e9   :  { %v29909_v57 = vpack.c.bf16 %v14312_v50, %v14305_v12 }
0x21ee   :  { %27981 = vmatmul.mubr.f32.vlgmr.msra.gmra.mrb[56].mxu0 %v13774_v5 }
0x21ef   :  { %29900 = vmatpush3.bf16.msra.mxu0 %v34426_v49  ;;  %27987 = vmatprep.mubr.f32.mxu0 %v13762_v41  ;;  %v14283_v49 = vsub.f32 %v14281_v4, %v14282_v43 }
0x21f0   :  { %29902 = vmatprep.subr.bf16.mxu0 %v34462_v38 }
0x21f1   :  { %v14284_v24 = vand.u32 4294901760, %v14283_v49 }
0x21f6   :  { %27988 = vmatmul.mubr.f32.vlgmr.msra.gmra.mrb[56].mxu0 %v13772_v60 }
0x21f7   :  { %29904 = vmatpush3.bf16.msra.mxu0 %v34462_v38  ;;  %27994 = vmatprep.mubr.f32.mxu0 %v13762_v41  ;;  %v29921_v38 = vpack.c.bf16 %v14310_v36, %v14303_v15 }
0x21f8   :  { %29906 = vmatprep.subr.bf16.mxu0 %v29905_v19 }
0x21fe   :  { %27995 = vmatmul.mubr.f32.vlgmr.msra.gmra.mrb[56].mxu0 %v13772_v60 }
0x21ff   :  { %28001 = vmatprep.mubr.f32.mxu0 %v14284_v24 }
0x2200   :  { %29908 = vmatpush3.bf16.xpose.msra.mxu0 %v29905_v19 }
0x2201   :  { %29910 = vmatprep.subr.bf16.mxu0 %v29909_v57 }
0x2207   :  { %28002 = vmatmul.mubr.f32.vlgmr.msra.gmra.mrb[58].mxu0 %v14294_v55 }
0x2208   :  { %29912 = vmatpush3.bf16.xpose.msra.mxu0 %v29909_v57  ;;  %28008 = vmatprep.mubr.f32.mxu0 %v14280_v30 }
0x2209   :  { %29914 = vmatprep.subr.bf16.mxu0 %v29913_v52 }
0x220f   :  { %28009 = vmatmul.mubr.f32.vlgmr.msra.gmra.mrb[58].mxu0 %v14290_v51 }
0x2210   :  { %29916 = vmatpush3.bf16.xpose.msra.mxu0 %v29913_v52  ;;  %28015 = vmatprep.mubr.f32.mxu0 %v14281_v4 }
0x2211   :  { %29918 = vmatprep.subr.bf16.mxu0 %v29905_v19 }
0x2217   :  { %28016 = vmatmul.mubr.f32.vlgmr.msra.gmra.mrb[58].mxu0 %v14291_v53 }
0x2218   :  { %29920 = vmatpush3.bf16.xpose.msra.mxu0 %v29905_v19  ;;  %28022 = vmatprep.mubr.f32.mxu0 %v14282_v43 }
0x2219   :  { %29922 = vmatprep.subr.bf16.mxu0 %v29921_v38 }
0x221f   :  { %28023 = vmatmul.mubr.f32.vlgmr.msra.gmra.mrb[58].mxu0 %v14292_v0 }
0x2220   :  { %29924 = vmatpush3.bf16.xpose.msra.mxu0 %v29921_v38  ;;  %28029 = vmatprep.mubr.f32.mxu0 %v14280_v30 }
0x2221   :  { %29926 = vmatprep.subr.bf16.mxu0 %v29905_v19 }
0x2227   :  { %28030 = vmatmul.mubr.f32.vlgmr.msra.gmra.mrb[58].mxu0 %v14290_v51 }
0x2228   :  { %29928 = vmatpush3.bf16.xpose.msra.mxu0 %v29905_v19  ;;  %28036 = vmatprep.mubr.f32.mxu0 %v14280_v30 }
0x222f   :  { %28037 = vmatmul.mubr.f32.vlgmr.msra.gmra.mrb[58].mxu0 %v14290_v51 }
0x22d1   :  { %v34499_v60 = vpop.f32.mrb[56].mxu0 }
0x22d2   :  { %v34501_v41 = vpop.f32.mrb[57].mxu0 }
0x2302   :  { %v28038_v1 = vpop.f32.mrb[58].mxu0 }
0x2303   :  { %v14716_v61 = vmul.f32 0.25, %v28038_v1  ;;  %v14705_v5 = vpop.f32.mrb[59].mxu0 }
0x2304   :  { %v14715_v10 = vmul.f32 0.25, %v14705_v5 }
0x2305   :  { %v14718_v47 = vsel %vm32244_vm2, %v14716_v61, -inf }
0x2306   :  { %v14717_v6 = vsel %vm32249_vm3, %v14715_v10, -inf  ;;  %v14722_v46 = vsel %vm984_vm1, %v14718_v47, -inf }
0x2307   :  { %14723 = vmax.xlane.f32.xlu1 %v14722_v46  ;;  %v14719_v23 = vsel %vm984_vm1, %v14717_v6, -inf }
0x2308   :  { %14720 = vmax.xlane.f32.xlu0 %v14719_v23 }
0x2318   :  { %14745 = vrot.lane.b32.xlu1 %v34391_v35, %s31573_s1 }
0x231c   :  { %15261 = vrot.lane.b32.xlu1 %v34378_v31, %s31574_s21 }
0x2320   :  { %15263 = vrot.lane.b32.xlu1 %v34389_v14, %s31574_s21 }
0x2324   :  { %15259 = vrot.lane.b32.xlu1 %v34389_v14, %s31575_s22 }
0x2394   :  { %v14724_v59 = vpop.xlane.xlu1 %14723 }
0x2395   :  { %v14726_v2 = vsub.f32 %v14718_v47, %v14724_v59  ;;  %v14721_v25 = vpop.xlane.xlu0 %14720 }
0x2396   :  { %v14725_v54 = vsub.f32 %v14717_v6, %v14721_v25 }
0x2397   :  { %v14729_v8 = vmul.f32 1.442695, %v14726_v2 }
0x2398   :  { %v14727_v9 = vmul.f32 1.442695, %v14725_v54  ;;  %v14746_v18 = vpop.permute.xlu1 %14745 }
0x2399   :  { %31444 = vpow2.f32 %v14729_v8  ;;  %v14759_v4 = vand.u32 4294901760, %v14746_v18 }
0x239a   :  { %31446 = vpow2.f32 %v14727_v9 }
0x239b   :  { %v14851_v36 = vsub.f32 %v14746_v18, %v14759_v4 }
0x239c   :  { %v15262_v54 = vpop.permute.xlu1 %15261 }
0x239d   :  { %v14852_v43 = vand.u32 4294901760, %v14851_v36 }
0x239f   :  { %v14853_v49 = vsub.f32 %v14851_v36, %v14852_v43 }
0x23a0   :  { %v15264_v8 = vpop.permute.xlu1 %15263 }
0x23a1   :  { %v14854_v38 = vand.u32 4294901760, %v14853_v49 }
0x23a3   :  { %v31445_v3 = vpop.eup %31444 }
0x23a4   :  { %v14734_v40 = vsel %vm984_vm1, %v31445_v3, 0.0  ;;  %v31447_v30 = vpop.eup %31446 }
0x23a5   :  { %14735 = vadd.xlane.f32.xlu0 %v14734_v40  ;;  %v14731_v32 = vsel %vm984_vm1, %v31447_v30, 0.0  ;;  %v15271_v40 = vsel %vm984_vm1, %v15264_v8, 0 }
0x23a6   :  { %v15277_v18 = vand.u32 4294901760, %v15271_v40 }
0x23a9   :  { %14732 = vadd.xlane.f32.xlu0 %v14731_v32 }
0x23bf   :  { %14743 = vrot.lane.b32.xlu0 %v34380_v20, %s31573_s1 }
0x23c3   :  { %15257 = vrot.lane.b32.xlu0 %v34378_v31, %s31575_s22 }
0x2432   :  { %v14736_v28 = vpop.xlane.xlu0 %14735 }
0x2433   :  { %31448 = vrcp.f32 %v14736_v28 }
0x2436   :  { %v14733_v29 = vpop.xlane.xlu0 %14732 }
0x2437   :  { %31450 = vrcp.f32 %v14733_v29  ;;  %v15369_v29 = vsub.f32 %v15271_v40, %v15277_v18 }
0x243a   :  { %v14744_v15 = vpop.permute.xlu0 %14743 }
0x243b   :  { %v14756_v51 = vand.u32 4294901760, %v14744_v15 }
0x243d   :  { %v31449_v19 = vpop.eup %31448  ;;  %v34523_v62 = vpack.c.bf16 %v14759_v4, %v14756_v51  ;;  %v14844_v26 = vsub.f32 %v14744_v15, %v14756_v51 }
0x243e   :  { %v14740_v53 = vmul.f32 %v31449_v19, %v31445_v3  ;;  %v15258_v3 = vpop.permute.xlu0 %15257  ;;  %v15370_v19 = vand.u32 4294901760, %v15369_v29 }
0x243f   :  { %v14845_v12 = vand.u32 4294901760, %v14844_v26  ;;  %29930 = vmatprep.subr.bf16.mxu1 %v34523_v62  ;;  %v29937_v25 = vpack.c.bf16 %v14851_v36, %v14844_v26  ;;  %v15265_v32 = vsel %vm984_vm1, %v15258_v3, 0  ;;  %v15260_v36 = vpop.permute.xlu1 %15259 }
0x2440   :  { %v14753_v50 = vsel %vm984_vm1, %v14740_v53, 0  ;;  %29932 = vmatpush3.bf16.msra.mxu1 %v34523_v62  ;;  %v15340_v4 = vand.u32 4294901760, %v15265_v32  ;;  %v15267_v51 = vsel %vm984_vm1, %v15260_v36, 0 }
0x2441   :  { %v31451_v0 = vpop.eup %31450  ;;  %v34528_v24 = vand.u32 4294901760, %v14753_v50  ;;  %v14846_v57 = vsub.f32 %v14844_v26, %v14845_v12  ;;  %v29945_v9 = vpack.c.bf16 %v14852_v43, %v14845_v12  ;;  %v15350_v53 = vand.u32 4294901760, %v15267_v51 }
0x2442   :  { %v14739_v7 = vmul.f32 %v31451_v0, %v31447_v30  ;;  %v15269_v30 = vsel %vm984_vm1, %v15262_v54, 0  ;;  %v15341_v43 = vsub.f32 %v15265_v32, %v15340_v4 }
0x2443   :  { %v14833_v55 = vsub.f32 %v14753_v50, %v34528_v24  ;;  %v14847_v52 = vand.u32 4294901760, %v14846_v57  ;;  %v15274_v28 = vand.u32 4294901760, %v15269_v30  ;;  %v15371_v50 = vsub.f32 %v15369_v29, %v15370_v19 }
0x2444   :  { %v14750_v1 = vsel %vm984_vm1, %v14739_v7, 0  ;;  %v15342_v49 = vand.u32 4294901760, %v15341_v43  ;;  %v15351_v57 = vsub.f32 %v15267_v51, %v15350_v53 }
0x2445   :  { %v29933_v61 = vpack.c.bf16 %v14854_v38, %v14847_v52  ;;  %v14822_v5 = vand.u32 4294901760, %v14750_v1  ;;  %v14834_v10 = vand.u32 4294901760, %v14833_v55  ;;  %v15362_v15 = vsub.f32 %v15269_v30, %v15274_v28 }
0x2446   :  { %v29953_v12 = vpack.c.bf16 %v15277_v18, %v15274_v28  ;;  %v15343_v7 = vsub.f32 %v15341_v43, %v15342_v49  ;;  %v15352_v52 = vand.u32 4294901760, %v15351_v57 }
0x2447   :  { %29934 = vmatprep.subr.bf16.mxu1 %v29933_v61  ;;  %v14823_v47 = vsub.f32 %v14750_v1, %v14822_v5  ;;  %v14835_v46 = vsub.f32 %v14833_v55, %v14834_v10  ;;  %v15363_v26 = vand.u32 4294901760, %v15362_v15 }
0x2448   :  { %v15344_v38 = vand.u32 4294901760, %v15343_v7 }
0x2449   :  { %v14824_v6 = vand.u32 4294901760, %v14823_v47  ;;  %v14836_v2 = vand.u32 4294901760, %v14835_v46  ;;  %v15364_v0 = vsub.f32 %v15362_v15, %v15363_v26 }
0x244b   :  { %v14825_v23 = vsub.f32 %v14823_v47, %v14824_v6  ;;  %v15365_v1 = vand.u32 4294901760, %v15364_v0 }
0x244d   :  { %v14826_v59 = vand.u32 4294901760, %v14825_v23 }
0x244f   :  { %28043 = vmatprep.mubr.f32.mxu1 %v14826_v59 }
0x2450   :  { %28044 = vmatmul.mubr.f32.vlgmr.msra.gmra.mrb[64].mxu1 %v14836_v2 }
0x2451   :  { %29936 = vmatpush3.bf16.msra.mxu1 %v29933_v61  ;;  %28050 = vmatprep.mubr.f32.mxu1 %v14822_v5 }
0x2452   :  { %29938 = vmatprep.subr.bf16.mxu1 %v29937_v25 }
0x2458   :  { %28051 = vmatmul.mubr.f32.vlgmr.msra.gmra.mrb[64].mxu1 %v34528_v24 }
0x2459   :  { %29940 = vmatpush3.bf16.msra.mxu1 %v29937_v25  ;;  %28057 = vmatprep.mubr.f32.mxu1 %v14823_v47 }
0x245a   :  { %29942 = vmatprep.subr.bf16.mxu1 %v34523_v62 }
0x2460   :  { %28058 = vmatmul.mubr.f32.vlgmr.msra.gmra.mrb[64].mxu1 %v14833_v55  ;;  %v15372_v55 = vand.u32 4294901760, %v15371_v50 }
0x2461   :  { %29944 = vmatpush3.bf16.msra.mxu1 %v34523_v62  ;;  %28064 = vmatprep.mubr.f32.mxu1 %v14824_v6  ;;  %v29961_v6 = vpack.c.bf16 %v15369_v29, %v15362_v15 }
0x2462   :  { %29946 = vmatprep.subr.bf16.mxu1 %v29945_v9  ;;  %v29957_v61 = vpack.c.bf16 %v15372_v55, %v15365_v1 }
0x2468   :  { %28065 = vmatmul.mubr.f32.vlgmr.msra.gmra.mrb[64].mxu1 %v14834_v10  ;;  %v15353_v10 = vsub.f32 %v15351_v57, %v15352_v52 }
0x2469   :  { %29948 = vmatpush3.bf16.msra.mxu1 %v29945_v9  ;;  %28071 = vmatprep.mubr.f32.mxu1 %v14822_v5 }
0x246a   :  { %29950 = vmatprep.subr.bf16.mxu1 %v34523_v62  ;;  %v15354_v47 = vand.u32 4294901760, %v15353_v10 }
0x2470   :  { %28072 = vmatmul.mubr.f32.vlgmr.msra.gmra.mrb[64].mxu1 %v34528_v24 }
0x2471   :  { %29952 = vmatpush3.bf16.msra.mxu1 %v34523_v62  ;;  %28078 = vmatprep.mubr.f32.mxu1 %v14822_v5  ;;  %v29969_v62 = vpack.c.bf16 %v15370_v19, %v15363_v26 }
0x2472   :  { %29954 = vmatprep.subr.bf16.mxu1 %v29953_v12 }
0x2478   :  { %28079 = vmatmul.mubr.f32.vlgmr.msra.gmra.mrb[64].mxu1 %v34528_v24 }
0x2479   :  { %28085 = vmatprep.mubr.f32.mxu1 %v15344_v38 }
0x247a   :  { %29956 = vmatpush3.bf16.xpose.msra.mxu1 %v29953_v12 }
0x247b   :  { %29958 = vmatprep.subr.bf16.mxu1 %v29957_v61 }
0x2481   :  { %28086 = vmatmul.mubr.f32.vlgmr.msra.gmra.mrb[66].mxu1 %v15354_v47 }
0x2482   :  { %29960 = vmatpush3.bf16.xpose.msra.mxu1 %v29957_v61  ;;  %28092 = vmatprep.mubr.f32.mxu1 %v15340_v4 }
0x2483   :  { %29962 = vmatprep.subr.bf16.mxu1 %v29961_v6 }
0x2489   :  { %28093 = vmatmul.mubr.f32.vlgmr.msra.gmra.mrb[66].mxu1 %v15350_v53 }
0x248a   :  { %29964 = vmatpush3.bf16.xpose.msra.mxu1 %v29961_v6  ;;  %28099 = vmatprep.mubr.f32.mxu1 %v15341_v43 }
0x248b   :  { %29966 = vmatprep.subr.bf16.mxu1 %v29953_v12 }
0x2491   :  { %28100 = vmatmul.mubr.f32.vlgmr.msra.gmra.mrb[66].mxu1 %v15351_v57 }
0x2492   :  { %29968 = vmatpush3.bf16.xpose.msra.mxu1 %v29953_v12  ;;  %28106 = vmatprep.mubr.f32.mxu1 %v15342_v49 }
0x2493   :  { %29970 = vmatprep.subr.bf16.mxu1 %v29969_v62 }
0x2499   :  { %28107 = vmatmul.mubr.f32.vlgmr.msra.gmra.mrb[66].mxu1 %v15352_v52 }
0x249a   :  { %29972 = vmatpush3.bf16.xpose.msra.mxu1 %v29969_v62  ;;  %28113 = vmatprep.mubr.f32.mxu1 %v15340_v4 }
0x249b   :  { %29974 = vmatprep.subr.bf16.mxu1 %v29953_v12 }
0x24a1   :  { %28114 = vmatmul.mubr.f32.vlgmr.msra.gmra.mrb[66].mxu1 %v15350_v53 }
0x24a2   :  { %29976 = vmatpush3.bf16.xpose.msra.mxu1 %v29953_v12  ;;  %28120 = vmatprep.mubr.f32.mxu1 %v15340_v4 }
0x24a9   :  { %28121 = vmatmul.mubr.f32.vlgmr.msra.gmra.mrb[66].mxu1 %v15350_v53 }
0x254b   :  { %v34543_v24 = vpop.f32.mrb[64].mxu1 }
0x254c   :  { %v34545_v5 = vpop.f32.mrb[65].mxu1 }
0x257c   :  { %v28122_v46 = vpop.f32.mrb[66].mxu1 }
0x257d   :  { %v15776_v23 = vmul.f32 0.25, %v28122_v46  ;;  %v15765_v59 = vpop.f32.mrb[67].mxu1 }
0x257e   :  { %v15775_v2 = vmul.f32 0.25, %v15765_v59 }
0x257f   :  { %v15778_v25 = vsel %vm32244_vm2, %v15776_v23, -inf }
0x2580   :  { %v15777_v54 = vsel %vm32249_vm3, %v15775_v2, -inf  ;;  %v15782_v8 = vsel %vm984_vm1, %v15778_v25, -inf }
0x2581   :  { %15783 = vmax.xlane.f32.xlu1 %v15782_v8  ;;  %v15779_v9 = vsel %vm984_vm1, %v15777_v54, -inf }
0x2582   :  { %15780 = vmax.xlane.f32.xlu0 %v15779_v9 }
0x2592   :  { %15803 = vrot.lane.b32.xlu1 %v34391_v35, %s31575_s22 }
0x2596   :  { %16319 = vrot.lane.b32.xlu1 %v34378_v31, %s36692_s2 }
0x259a   :  { %16321 = vrot.lane.b32.xlu1 %v34389_v14, %s36692_s2 }
0x259e   :  { %16317 = vrot.lane.b32.xlu1 %v34389_v14, %s36693_s30 }
0x260e   :  { %v15784_v3 = vpop.xlane.xlu1 %15783 }
0x260f   :  { %v15786_v40 = vsub.f32 %v15778_v25, %v15784_v3  ;;  %v15781_v30 = vpop.xlane.xlu0 %15780 }
0x2610   :  { %v15785_v32 = vsub.f32 %v15777_v54, %v15781_v30 }
0x2611   :  { %v15789_v18 = vmul.f32 1.442695, %v15786_v40 }
0x2612   :  { %v15787_v28 = vmul.f32 1.442695, %v15785_v32  ;;  %v15804_v14 = vpop.permute.xlu1 %15803 }
0x2613   :  { %31452 = vpow2.f32 %v15789_v18  ;;  %v15817_v51 = vand.u32 4294901760, %v15804_v14 }
0x2614   :  { %31454 = vpow2.f32 %v15787_v28 }
0x2615   :  { %v15909_v26 = vsub.f32 %v15804_v14, %v15817_v51 }
0x2616   :  { %v16320_v32 = vpop.permute.xlu1 %16319 }
0x2617   :  { %v15910_v49 = vand.u32 4294901760, %v15909_v26 }
0x2619   :  { %v15911_v55 = vsub.f32 %v15909_v26, %v15910_v49 }
0x261a   :  { %v16322_v18 = vpop.permute.xlu1 %16321 }
0x261b   :  { %v15912_v6 = vand.u32 4294901760, %v15911_v55 }
0x261d   :  { %v31453_v4 = vpop.eup %31452 }
0x261e   :  { %v15794_v29 = vsel %vm984_vm1, %v31453_v4, 0.0  ;;  %v31455_v36 = vpop.eup %31454 }
0x261f   :  { %15795 = vadd.xlane.f32.xlu0 %v15794_v29  ;;  %v15791_v15 = vsel %vm984_vm1, %v31455_v36, 0.0  ;;  %v16329_v29 = vsel %vm984_vm1, %v16322_v18, 0 }
0x2620   :  { %v16335_v14 = vand.u32 4294901760, %v16329_v29 }
0x2623   :  { %15792 = vadd.xlane.f32.xlu0 %v15791_v15 }
0x2639   :  { %15801 = vrot.lane.b32.xlu0 %v34380_v20, %s31575_s22 }
0x263d   :  { %16315 = vrot.lane.b32.xlu0 %v34378_v31, %s36693_s30 }
0x26ac   :  { %v15796_v43 = vpop.xlane.xlu0 %15795 }
0x26ad   :  { %31456 = vrcp.f32 %v15796_v43 }
0x26b0   :  { %v15793_v19 = vpop.xlane.xlu0 %15792 }
0x26b1   :  { %31458 = vrcp.f32 %v15793_v19  ;;  %v16427_v19 = vsub.f32 %v16329_v29, %v16335_v14 }
0x26b4   :  { %v15802_v53 = vpop.permute.xlu0 %15801 }
0x26b5   :  { %v15814_v12 = vand.u32 4294901760, %v15802_v53 }
0x26b7   :  { %v31457_v50 = vpop.eup %31456  ;;  %v34567_v0 = vpack.c.bf16 %v15817_v51, %v15814_v12  ;;  %v15902_v57 = vsub.f32 %v15802_v53, %v15814_v12 }
0x26b8   :  { %v15800_v7 = vmul.f32 %v31457_v50, %v31453_v4  ;;  %v16316_v4 = vpop.permute.xlu0 %16315  ;;  %v16428_v50 = vand.u32 4294901760, %v16427_v19 }
0x26b9   :  { %v15903_v52 = vand.u32 4294901760, %v15902_v57  ;;  %29978 = vmatprep.subr.bf16.mxu0 %v34567_v0  ;;  %v29985_v30 = vpack.c.bf16 %v15909_v26, %v15902_v57  ;;  %v16323_v15 = vsel %vm984_vm1, %v16316_v4, 0  ;;  %v16318_v26 = vpop.permute.xlu1 %16317 }
0x26ba   :  { %29980 = vmatpush3.bf16.msra.mxu0 %v34567_v0  ;;  %v15811_v31 = vsel %vm984_vm1, %v15800_v7, 0  ;;  %v16398_v51 = vand.u32 4294901760, %v16323_v15  ;;  %v16325_v12 = vsel %vm984_vm1, %v16318_v26, 0 }
0x26bb   :  { %v31459_v38 = vpop.eup %31458  ;;  %v15904_v1 = vsub.f32 %v15902_v57, %v15903_v52  ;;  %v34572_v61 = vand.u32 4294901760, %v15811_v31  ;;  %v29993_v28 = vpack.c.bf16 %v15910_v49, %v15903_v52  ;;  %v16408_v7 = vand.u32 4294901760, %v16325_v12 }
0x26bc   :  { %v15799_v10 = vmul.f32 %v31459_v38, %v31455_v36  ;;  %v16327_v36 = vsel %vm984_vm1, %v16320_v32, 0  ;;  %v16399_v49 = vsub.f32 %v16323_v15, %v16398_v51 }
0x26bd   :  { %v15905_v47 = vand.u32 4294901760, %v15904_v1  ;;  %v15891_v62 = vsub.f32 %v15811_v31, %v34572_v61  ;;  %v16332_v43 = vand.u32 4294901760, %v16327_v36  ;;  %v16429_v31 = vsub.f32 %v16427_v19, %v16428_v50 }
0x26be   :  { %v15808_v46 = vsel %vm984_vm1, %v15799_v10, 0  ;;  %v16400_v55 = vand.u32 4294901760, %v16399_v49  ;;  %v16409_v1 = vsub.f32 %v16325_v12, %v16408_v7 }
0x26bf   :  { %v29981_v23 = vpack.c.bf16 %v15912_v6, %v15905_v47  ;;  %v15880_v59 = vand.u32 4294901760, %v15808_v46  ;;  %v15892_v2 = vand.u32 4294901760, %v15891_v62  ;;  %v16420_v53 = vsub.f32 %v16327_v36, %v16332_v43 }
0x26c0   :  { %v30001_v52 = vpack.c.bf16 %v16335_v14, %v16332_v43  ;;  %v16401_v10 = vsub.f32 %v16399_v49, %v16400_v55  ;;  %v16430_v47 = vand.u32 4294901760, %v16429_v31  ;;  %v16410_v6 = vand.u32 4294901760, %v16409_v1 }
0x26c1   :  { %29982 = vmatprep.subr.bf16.mxu0 %v29981_v23  ;;  %v15881_v25 = vsub.f32 %v15808_v46, %v15880_v59  ;;  %v15893_v8 = vsub.f32 %v15891_v62, %v15892_v2  ;;  %v16421_v57 = vand.u32 4294901760, %v16420_v53 }
0x26c3   :  { %v15882_v54 = vand.u32 4294901760, %v15881_v25  ;;  %v15894_v40 = vand.u32 4294901760, %v15893_v8  ;;  %v16422_v38 = vsub.f32 %v16420_v53, %v16421_v57  ;;  %v18042_v8 = vsub.f32 %v34432_v21, %v18041_v17 }
0x26c5   :  { %v15883_v9 = vsub.f32 %v15881_v25, %v15882_v54  ;;  %v16423_v46 = vand.u32 4294901760, %v16422_v38 }
0x26c7   :  { %v15884_v3 = vand.u32 4294901760, %v15883_v9 }
0x26c9   :  { %28127 = vmatprep.mubr.f32.mxu0 %v15884_v3  ;;  %v18043_v3 = vand.u32 4294901760, %v18042_v8 }
0x26ca   :  { %28128 = vmatmul.mubr.f32.vlgmr.msra.gmra.mrb[60].mxu0 %v15894_v40 }
0x26cb   :  { %29984 = vmatpush3.bf16.msra.mxu0 %v29981_v23  ;;  %28134 = vmatprep.mubr.f32.mxu0 %v15880_v59  ;;  %v30005_v23 = vpack.c.bf16 %v16430_v47, %v16423_v46 }
0x26cc   :  { %29986 = vmatprep.subr.bf16.mxu0 %v29985_v30 }
0x26d2   :  { %28135 = vmatmul.mubr.f32.vlgmr.msra.gmra.mrb[60].mxu0 %v34572_v61 }
0x26d3   :  { %29988 = vmatpush3.bf16.msra.mxu0 %v29985_v30  ;;  %28141 = vmatprep.mubr.f32.mxu0 %v15881_v25 }
0x26d4   :  { %29990 = vmatprep.subr.bf16.mxu0 %v34567_v0 }
0x26da   :  { %28142 = vmatmul.mubr.f32.vlgmr.msra.gmra.mrb[60].mxu0 %v15891_v62  ;;  %v16402_v62 = vand.u32 4294901760, %v16401_v10 }
0x26db   :  { %29992 = vmatpush3.bf16.msra.mxu0 %v34567_v0  ;;  %28148 = vmatprep.mubr.f32.mxu0 %v15882_v54  ;;  %v30009_v54 = vpack.c.bf16 %v16427_v19, %v16420_v53 }
0x26dc   :  { %29994 = vmatprep.subr.bf16.mxu0 %v29993_v28 }
0x26e2   :  { %28149 = vmatmul.mubr.f32.vlgmr.msra.gmra.mrb[60].mxu0 %v15892_v2  ;;  %v16411_v2 = vsub.f32 %v16409_v1, %v16410_v6 }
0x26e3   :  { %29996 = vmatpush3.bf16.msra.mxu0 %v29993_v28  ;;  %28155 = vmatprep.mubr.f32.mxu0 %v15880_v59 }
0x26e4   :  { %29998 = vmatprep.subr.bf16.mxu0 %v34567_v0  ;;  %v16412_v25 = vand.u32 4294901760, %v16411_v2 }
0x26ea   :  { %28156 = vmatmul.mubr.f32.vlgmr.msra.gmra.mrb[60].mxu0 %v34572_v61 }
0x26eb   :  { %30000 = vmatpush3.bf16.msra.mxu0 %v34567_v0  ;;  %28162 = vmatprep.mubr.f32.mxu0 %v15880_v59  ;;  %v30017_v0 = vpack.c.bf16 %v16428_v50, %v16421_v57  ;;  %v18049_v59 = vsub.f32 %v34437_v48, %v18048_v45 }
0x26ec   :  { %30002 = vmatprep.subr.bf16.mxu0 %v30001_v52 }
0x26ed   :  { %v18050_v9 = vand.u32 4294901760, %v18049_v59 }
0x26ef   :  { %v34600_v40 = vpack.c.bf16 %v18050_v9, %v18043_v3 }
0x26f2   :  { %28163 = vmatmul.mubr.f32.vlgmr.msra.gmra.mrb[60].mxu0 %v34572_v61  ;;  %v34591_v61 = vpack.c.bf16 %v17955_v37, %v17952_v11 }
0x26f3   :  { %28169 = vmatprep.mubr.f32.mxu0 %v16402_v62 }
0x26f4   :  { %30004 = vmatpush3.bf16.xpose.msra.mxu0 %v30001_v52 }
0x26f5   :  { %30006 = vmatprep.subr.bf16.mxu0 %v30005_v23 }
0x26fb   :  { %28170 = vmatmul.mubr.f32.vlgmr.msra.gmra.mrb[62].mxu0 %v16412_v25 }
0x26fc   :  { %30008 = vmatpush3.bf16.xpose.msra.mxu0 %v30005_v23  ;;  %28176 = vmatprep.mubr.f32.mxu0 %v16398_v51 }
0x26fd   :  { %30010 = vmatprep.subr.bf16.mxu0 %v30009_v54 }
0x2703   :  { %28177 = vmatmul.mubr.f32.vlgmr.msra.gmra.mrb[62].mxu0 %v16408_v7 }
0x2704   :  { %30012 = vmatpush3.bf16.xpose.msra.mxu0 %v30009_v54  ;;  %28183 = vmatprep.mubr.f32.mxu0 %v16399_v49 }
0x2705   :  { %30014 = vmatprep.subr.bf16.mxu0 %v30001_v52 }
0x270b   :  { %28184 = vmatmul.mubr.f32.vlgmr.msra.gmra.mrb[62].mxu0 %v16409_v1 }
0x270c   :  { %30016 = vmatpush3.bf16.xpose.msra.mxu0 %v30001_v52  ;;  %28190 = vmatprep.mubr.f32.mxu0 %v16400_v55 }
0x270d   :  { %30018 = vmatprep.subr.bf16.mxu0 %v30017_v0 }
0x2713   :  { %28191 = vmatmul.mubr.f32.vlgmr.msra.gmra.mrb[62].mxu0 %v16410_v6 }
0x2714   :  { %30020 = vmatpush3.bf16.xpose.msra.mxu0 %v30017_v0  ;;  %28197 = vmatprep.mubr.f32.mxu0 %v16398_v51 }
0x2715   :  { %30022 = vmatprep.subr.bf16.mxu0 %v30001_v52 }
0x271b   :  { %28198 = vmatmul.mubr.f32.vlgmr.msra.gmra.mrb[62].mxu0 %v16408_v7 }
0x271c   :  { %30024 = vmatpush3.bf16.xpose.msra.mxu0 %v30001_v52  ;;  %28204 = vmatprep.mubr.f32.mxu0 %v16398_v51 }
0x271d   :  { %30074 = vmatprep.subr.bf16.mxu0 %v34591_v61 }
0x2723   :  { %28205 = vmatmul.mubr.f32.vlgmr.msra.gmra.mrb[62].mxu0 %v16408_v7 }
0x2724   :  { %30076 = vmatpush3.bf16.msra.mxu0 %v34591_v61 }
0x2725   :  { %30078 = vmatprep.subr.bf16.mxu0 %v34600_v40 }
0x27c5   :  { %v34604_v11 = vpop.f32.mrb[60].mxu0 }
0x27c6   :  { %v34606_v37 = vpop.f32.mrb[61].mxu0 }
0x27f6   :  { %v28206_v48 = vpop.f32.mrb[62].mxu0 }
0x27f7   :  { %v16834_v45 = vmul.f32 0.25, %v28206_v48  ;;  %v16823_v30 = vpop.f32.mrb[63].mxu0 }
0x27f8   :  { %v16833_v32 = vmul.f32 0.25, %v16823_v30 }
0x27f9   :  { %v16836_v21 = vsel %vm32244_vm2, %v16834_v45, -inf }
0x27fa   :  { %v16835_v17 = vsel %vm32249_vm3, %v16833_v32, -inf  ;;  %v16840_v18 = vsel %vm984_vm1, %v16836_v21, -inf }
0x27fb   :  { %16841 = vmax.xlane.f32.xlu1 %v16840_v18  ;;  %v16837_v28 = vsel %vm984_vm1, %v16835_v17, -inf }
0x27fc   :  { %16838 = vmax.xlane.f32.xlu0 %v16837_v28 }
0x280c   :  { %16861 = vrot.lane.b32.xlu1 %v34391_v35, %s36693_s30 }
0x2810   :  { %17405 = vrot.lane.b32.xlu1 %v34400_v42, %s31571_s18 }
0x2814   :  { %17407 = vrot.lane.b32.xlu1 %v34416_v34, %s31571_s18 }
0x2888   :  { %v16842_v4 = vpop.xlane.xlu1 %16841 }
0x2889   :  { %v16844_v29 = vsub.f32 %v16836_v21, %v16842_v4  ;;  %v16839_v36 = vpop.xlane.xlu0 %16838 }
0x288a   :  { %v16843_v15 = vsub.f32 %v16835_v17, %v16839_v36 }
0x288b   :  { %v16847_v14 = vmul.f32 1.442695, %v16844_v29 }
0x288c   :  { %v16845_v43 = vmul.f32 1.442695, %v16843_v15  ;;  %v16862_v53 = vpop.permute.xlu1 %16861 }
0x288d   :  { %31460 = vpow2.f32 %v16847_v14  ;;  %v16875_v12 = vand.u32 4294901760, %v16862_v53  ;;  %v17409_v14 = vsel %vm984_vm1, %v34400_v42, 0 }
0x288e   :  { %31462 = vpow2.f32 %v16845_v43 }
0x288f   :  { %v16967_v57 = vsub.f32 %v16862_v53, %v16875_v12 }
0x2890   :  { %v17406_v28 = vpop.permute.xlu1 %17405 }
0x2891   :  { %v16968_v55 = vand.u32 4294901760, %v16967_v57  ;;  %v17413_v15 = vsel %vm984_vm1, %v17406_v28, 0 }
0x2893   :  { %v16969_v47 = vsub.f32 %v16967_v57, %v16968_v55 }
0x2894   :  { %v17408_v4 = vpop.permute.xlu1 %17407 }
0x2895   :  { %v16970_v54 = vand.u32 4294901760, %v16969_v47  ;;  %v17415_v36 = vsel %vm984_vm1, %v17408_v4, 0 }
0x2896   :  { %v17421_v43 = vand.u32 4294901760, %v17415_v36 }
0x2897   :  { %v31461_v51 = vpop.eup %31460 }
0x2898   :  { %v16852_v19 = vsel %vm984_vm1, %v31461_v51, 0.0  ;;  %v31463_v26 = vpop.eup %31462 }
0x2899   :  { %16853 = vadd.xlane.f32.xlu0 %v16852_v19  ;;  %v16849_v35 = vsel %vm984_vm1, %v31463_v26, 0.0  ;;  %v17484_v19 = vand.u32 4294901760, %v17409_v14 }
0x289b   :  { %v17485_v53 = vsub.f32 %v17409_v14, %v17484_v19 }
0x289d   :  { %16850 = vadd.xlane.f32.xlu0 %v16849_v35 }
0x28b3   :  { %16859 = vrot.lane.b32.xlu0 %v34380_v20, %s36693_s30 }
0x2926   :  { %v16854_v49 = vpop.xlane.xlu0 %16853 }
0x2927   :  { %31464 = vrcp.f32 %v16854_v49  ;;  %v17411_v49 = vsel %vm984_vm1, %v34416_v34, 0 }
0x292a   :  { %v16851_v50 = vpop.xlane.xlu0 %16850 }
0x292b   :  { %31466 = vrcp.f32 %v16851_v50 }
0x292e   :  { %v16860_v7 = vpop.permute.xlu0 %16859 }
0x292f   :  { %v16872_v52 = vand.u32 4294901760, %v16860_v7 }
0x2931   :  { %v31465_v31 = vpop.eup %31464  ;;  %v34624_v38 = vpack.c.bf16 %v16875_v12, %v16872_v52  ;;  %v16960_v1 = vsub.f32 %v16860_v7, %v16872_v52  ;;  %v17494_v7 = vand.u32 4294901760, %v17411_v49 }
0x2932   :  { %v16858_v10 = vmul.f32 %v31465_v31, %v31461_v51  ;;  %v17418_v51 = vand.u32 4294901760, %v17413_v15 }
0x2933   :  { %v16961_v6 = vand.u32 4294901760, %v16960_v1  ;;  %30026 = vmatprep.subr.bf16.mxu1 %v34624_v38  ;;  %v30033_v18 = vpack.c.bf16 %v16967_v57, %v16960_v1  ;;  %v17486_v57 = vand.u32 4294901760, %v17485_v53 }
0x2934   :  { %30028 = vmatpush3.bf16.msra.mxu1 %v34624_v38  ;;  %v16869_v20 = vsel %vm984_vm1, %v16858_v10, 0  ;;  %v17506_v35 = vsub.f32 %v17413_v15, %v17418_v51  ;;  %v17495_v10 = vsub.f32 %v17411_v49, %v17494_v7 }
0x2935   :  { %v31467_v62 = vpop.eup %31466  ;;  %v16962_v46 = vsub.f32 %v16960_v1, %v16961_v6  ;;  %v34629_v23 = vand.u32 4294901760, %v16869_v20  ;;  %v30041_v29 = vpack.c.bf16 %v16968_v55, %v16961_v6  ;;  %v30049_v55 = vpack.c.bf16 %v17421_v43, %v17418_v51 }
0x2936   :  { %v16857_v2 = vmul.f32 %v31467_v62, %v31463_v26  ;;  %v17513_v26 = vsub.f32 %v17415_v36, %v17421_v43  ;;  %v17507_v50 = vand.u32 4294901760, %v17506_v35  ;;  %v17487_v1 = vsub.f32 %v17485_v53, %v17486_v57 }
0x2937   :  { %v16963_v25 = vand.u32 4294901760, %v16962_v46  ;;  %v16949_v0 = vsub.f32 %v16869_v20, %v34629_v23  ;;  %v17496_v62 = vand.u32 4294901760, %v17495_v10 }
0x2938   :  { %v16866_v59 = vsel %vm984_vm1, %v16857_v2, 0  ;;  %v17514_v12 = vand.u32 4294901760, %v17513_v26  ;;  %v17508_v31 = vsub.f32 %v17506_v35, %v17507_v50  ;;  %v17488_v6 = vand.u32 4294901760, %v17487_v1 }
0x2939   :  { %v30029_v8 = vpack.c.bf16 %v16970_v54, %v16963_v25  ;;  %v16938_v9 = vand.u32 4294901760, %v16866_v59  ;;  %v16950_v3 = vand.u32 4294901760, %v16949_v0  ;;  %v17497_v2 = vsub.f32 %v17495_v10, %v17496_v62 }
0x293a   :  { %v17515_v52 = vsub.f32 %v17513_v26, %v17514_v12  ;;  %v17509_v20 = vand.u32 4294901760, %v17508_v31  ;;  %v30057_v54 = vpack.c.bf16 %v17513_v26, %v17506_v35 }
0x293b   :  { %30030 = vmatprep.subr.bf16.mxu1 %v30029_v8  ;;  %v16939_v48 = vsub.f32 %v16866_v59, %v16938_v9  ;;  %v16951_v30 = vsub.f32 %v16949_v0, %v16950_v3  ;;  %v17498_v25 = vand.u32 4294901760, %v17497_v2 }
0x293c   :  { %v17516_v47 = vand.u32 4294901760, %v17515_v52 }
0x293d   :  { %v16940_v45 = vand.u32 4294901760, %v16939_v48  ;;  %v16952_v17 = vand.u32 4294901760, %v16951_v30 }
0x293e   :  { %v30053_v46 = vpack.c.bf16 %v17516_v47, %v17509_v20 }
0x293f   :  { %v16941_v32 = vsub.f32 %v16939_v48, %v16940_v45 }
0x2941   :  { %v16942_v21 = vand.u32 4294901760, %v16941_v32 }
0x2943   :  { %28211 = vmatprep.mubr.f32.mxu1 %v16942_v21 }
0x2944   :  { %28212 = vmatmul.mubr.f32.vlgmr.msra.gmra.mrb[68].mxu1 %v16952_v17 }
0x2945   :  { %30032 = vmatpush3.bf16.msra.mxu1 %v30029_v8  ;;  %28218 = vmatprep.mubr.f32.mxu1 %v16938_v9 }
0x2946   :  { %30034 = vmatprep.subr.bf16.mxu1 %v30033_v18 }
0x294c   :  { %28219 = vmatmul.mubr.f32.vlgmr.msra.gmra.mrb[68].mxu1 %v34629_v23 }
0x294d   :  { %30036 = vmatpush3.bf16.msra.mxu1 %v30033_v18  ;;  %28225 = vmatprep.mubr.f32.mxu1 %v16939_v48 }
0x294e   :  { %30038 = vmatprep.subr.bf16.mxu1 %v34624_v38 }
0x2954   :  { %28226 = vmatmul.mubr.f32.vlgmr.msra.gmra.mrb[68].mxu1 %v16949_v0 }
0x2955   :  { %30040 = vmatpush3.bf16.msra.mxu1 %v34624_v38  ;;  %28232 = vmatprep.mubr.f32.mxu1 %v16940_v45 }
0x2956   :  { %30042 = vmatprep.subr.bf16.mxu1 %v30041_v29 }
0x295c   :  { %28233 = vmatmul.mubr.f32.vlgmr.msra.gmra.mrb[68].mxu1 %v16950_v3 }
0x295d   :  { %30044 = vmatpush3.bf16.msra.mxu1 %v30041_v29  ;;  %28239 = vmatprep.mubr.f32.mxu1 %v16938_v9 }
0x295e   :  { %30046 = vmatprep.subr.bf16.mxu1 %v34624_v38 }
0x2964   :  { %28240 = vmatmul.mubr.f32.vlgmr.msra.gmra.mrb[68].mxu1 %v34629_v23 }
0x2965   :  { %30048 = vmatpush3.bf16.msra.mxu1 %v34624_v38  ;;  %28246 = vmatprep.mubr.f32.mxu1 %v16938_v9  ;;  %v30065_v38 = vpack.c.bf16 %v17514_v12, %v17507_v50 }
0x2966   :  { %30050 = vmatprep.subr.bf16.mxu1 %v30049_v55 }
0x296c   :  { %28247 = vmatmul.mubr.f32.vlgmr.msra.gmra.mrb[68].mxu1 %v34629_v23 }
0x296d   :  { %28253 = vmatprep.mubr.f32.mxu1 %v17488_v6 }
0x296e   :  { %30052 = vmatpush3.bf16.xpose.msra.mxu1 %v30049_v55 }
0x296f   :  { %30054 = vmatprep.subr.bf16.mxu1 %v30053_v46 }
0x2975   :  { %28254 = vmatmul.mubr.f32.vlgmr.msra.gmra.mrb[70].mxu1 %v17498_v25 }
0x2976   :  { %30056 = vmatpush3.bf16.xpose.msra.mxu1 %v30053_v46  ;;  %28260 = vmatprep.mubr.f32.mxu1 %v17484_v19 }
0x2977   :  { %30058 = vmatprep.subr.bf16.mxu1 %v30057_v54 }
0x297d   :  { %28261 = vmatmul.mubr.f32.vlgmr.msra.gmra.mrb[70].mxu1 %v17494_v7 }
0x297e   :  { %30060 = vmatpush3.bf16.xpose.msra.mxu1 %v30057_v54  ;;  %28267 = vmatprep.mubr.f32.mxu1 %v17485_v53 }
0x297f   :  { %30062 = vmatprep.subr.bf16.mxu1 %v30049_v55 }
0x2985   :  { %28268 = vmatmul.mubr.f32.vlgmr.msra.gmra.mrb[70].mxu1 %v17495_v10 }
0x2986   :  { %30064 = vmatpush3.bf16.xpose.msra.mxu1 %v30049_v55  ;;  %28274 = vmatprep.mubr.f32.mxu1 %v17486_v57 }
0x2987   :  { %30066 = vmatprep.subr.bf16.mxu1 %v30065_v38 }
0x298d   :  { %28275 = vmatmul.mubr.f32.vlgmr.msra.gmra.mrb[70].mxu1 %v17496_v62 }
0x298e   :  { %30068 = vmatpush3.bf16.xpose.msra.mxu1 %v30065_v38  ;;  %28281 = vmatprep.mubr.f32.mxu1 %v17484_v19 }
0x298f   :  { %30070 = vmatprep.subr.bf16.mxu1 %v30049_v55 }
0x2995   :  { %28282 = vmatmul.mubr.f32.vlgmr.msra.gmra.mrb[70].mxu1 %v17494_v7 }
0x2996   :  { %30072 = vmatpush3.bf16.xpose.msra.mxu1 %v30049_v55  ;;  %28288 = vmatprep.mubr.f32.mxu1 %v17484_v19 }
0x299d   :  { %28289 = vmatmul.mubr.f32.vlgmr.msra.gmra.mrb[70].mxu1 %v17494_v7 }
0x2a3f   :  { %v34646_v23 = vpop.f32.mrb[68].mxu1 }
0x2a40   :  { %v34648_v0 = vpop.f32.mrb[69].mxu1 }
0x2a70   :  { %v28290_v59 = vpop.f32.mrb[70].mxu1 }
0x2a71   :  { %v17920_v8 = vmul.f32 0.25, %v28290_v59  ;;  %v17909_v9 = vpop.f32.mrb[71].mxu1 }
0x2a72   :  { %v17919_v3 = vmul.f32 0.25, %v17909_v9 }
0x2a73   :  { %v17922_v48 = vsel %vm32244_vm2, %v17920_v8, -inf }
0x2a74   :  { %v17921_v45 = vsel %vm32249_vm3, %v17919_v3, -inf  ;;  %v17926_v30 = vsel %vm984_vm1, %v17922_v48, -inf }
0x2a75   :  { %17927 = vmax.xlane.f32.xlu1 %v17926_v30  ;;  %v17923_v32 = vsel %vm984_vm1, %v17921_v45, -inf }
0x2a76   :  { %17924 = vmax.xlane.f32.xlu0 %v17923_v32 }
0x2a86   :  { %18459 = vrot.lane.b32.xlu1 %v34416_v34, %s31572_s19 }
0x2a8a   :  { %18453 = vrot.lane.b32.xlu1 %v34400_v42, %s31573_s1 }
0x2a8e   :  { %18455 = vrot.lane.b32.xlu1 %v34416_v34, %s31573_s1 }
0x2b02   :  { %v17928_v21 = vpop.xlane.xlu1 %17927 }
0x2b03   :  { %v17930_v17 = vsub.f32 %v17922_v48, %v17928_v21  ;;  %v17925_v18 = vpop.xlane.xlu0 %17924 }
0x2b04   :  { %v17929_v28 = vsub.f32 %v17921_v45, %v17925_v18 }
0x2b05   :  { %v17933_v4 = vmul.f32 1.442695, %v17930_v17 }
0x2b06   :  { %v17931_v29 = vmul.f32 1.442695, %v17929_v28  ;;  %v18460_v62 = vpop.permute.xlu1 %18459 }
0x2b08   :  { %31468 = vpow2.f32 %v17931_v29 }
0x2b09   :  { %31470 = vpow2.f32 %v17933_v4 }
0x2b0a   :  { %v18454_v2 = vpop.permute.xlu1 %18453 }
0x2b0b   :  { %v18461_v54 = vsel %vm984_vm1, %v18454_v2, 0 }
0x2b0c   :  { %v18536_v59 = vand.u32 4294901760, %v18461_v54 }
0x2b0e   :  { %v18456_v8 = vpop.permute.xlu1 %18455  ;;  %v18537_v48 = vsub.f32 %v18461_v54, %v18536_v59 }
0x2b0f   :  { %v18463_v45 = vsel %vm984_vm1, %v18456_v8, 0 }
0x2b10   :  { %v18538_v21 = vand.u32 4294901760, %v18537_v48  ;;  %v18546_v17 = vand.u32 4294901760, %v18463_v45 }
0x2b12   :  { %v31469_v36 = vpop.eup %31468  ;;  %v18539_v29 = vsub.f32 %v18537_v48, %v18538_v21 }
0x2b13   :  { %v17935_v15 = vsel %vm984_vm1, %v31469_v36, 0.0  ;;  %v31471_v14 = vpop.eup %31470 }
0x2b14   :  { %17936 = vadd.xlane.f32.xlu0 %v17935_v15  ;;  %v17938_v43 = vsel %vm984_vm1, %v31471_v14, 0.0 }
0x2b18   :  { %17939 = vadd.xlane.f32.xlu0 %v17938_v43 }
0x2b2e   :  { %18457 = vrot.lane.b32.xlu0 %v34400_v42, %s31572_s19 }
0x2ba1   :  { %v17937_v51 = vpop.xlane.xlu0 %17936 }
0x2ba2   :  { %31472 = vrcp.f32 %v17937_v51 }
0x2ba5   :  { %v17940_v19 = vpop.xlane.xlu0 %17939 }
0x2ba6   :  { %31474 = vrcp.f32 %v17940_v19 }
0x2ba9   :  { %v18458_v46 = vpop.permute.xlu0 %18457 }
0x2baa   :  { %v18465_v25 = vsel %vm984_vm1, %v18458_v46, 0 }
0x2bab   :  { %v18470_v38 = vand.u32 4294901760, %v18465_v25 }
0x2bac   :  { %v31473_v26 = vpop.eup %31472 }
0x2bad   :  { %v17943_v35 = vmul.f32 %v31473_v26, %v31469_v36  ;;  %v18558_v9 = vsub.f32 %v18465_v25, %v18470_v38 }
0x2baf   :  { %v17946_v53 = vsel %vm984_vm1, %v17943_v35, 0  ;;  %v18559_v30 = vand.u32 4294901760, %v18558_v9 }
0x2bb0   :  { %v31475_v49 = vpop.eup %31474  ;;  %v18018_v12 = vand.u32 4294901760, %v17946_v53 }
0x2bb1   :  { %v17944_v50 = vmul.f32 %v31475_v49, %v31471_v14  ;;  %v18560_v28 = vsub.f32 %v18558_v9, %v18559_v30  ;;  %v18540_v14 = vand.u32 4294901760, %v18539_v29 }
0x2bb2   :  { %v18019_v57 = vsub.f32 %v17946_v53, %v18018_v12 }
0x2bb3   :  { %v17949_v7 = vsel %vm984_vm1, %v17944_v50, 0  ;;  %v18561_v36 = vand.u32 4294901760, %v18560_v28 }
0x2bb4   :  { %v18020_v55 = vand.u32 4294901760, %v18019_v57  ;;  %v18028_v52 = vand.u32 4294901760, %v17949_v7 }
0x2bb6   :  { %v18021_v31 = vsub.f32 %v18019_v57, %v18020_v55  ;;  %v18029_v1 = vsub.f32 %v17949_v7, %v18028_v52 }
0x2bb8   :  { %v18022_v10 = vand.u32 4294901760, %v18021_v31  ;;  %v18030_v47 = vand.u32 4294901760, %v18029_v1 }
0x2bba   :  { %28295 = vmatprep.mubr.f32.mxu0 %v18022_v10  ;;  %v18031_v6 = vsub.f32 %v18029_v1, %v18030_v47 }
0x2bbc   :  { %v18032_v20 = vand.u32 4294901760, %v18031_v6 }
0x2bbe   :  { %28296 = vmatmul.mubr.f32.vlgmr.msra.gmra.mrb[64].mxu0 %v18032_v20 }
0x2bbf   :  { %30080 = vmatpush3.bf16.msra.mxu0 %v34600_v40  ;;  %28302 = vmatprep.mubr.f32.mxu0 %v18018_v12  ;;  %v18467_v40 = vsel %vm984_vm1, %v18460_v62, 0 }
0x2bc0   :  { %30082 = vmatprep.subr.bf16.mxu0 %v34443_v16 }
0x2bc6   :  { %28303 = vmatmul.mubr.f32.vlgmr.msra.gmra.mrb[64].mxu0 %v18028_v52 }
0x2bc7   :  { %30084 = vmatpush3.bf16.msra.mxu0 %v34443_v16  ;;  %28309 = vmatprep.mubr.f32.mxu0 %v18019_v57  ;;  %v18473_v16 = vand.u32 4294901760, %v18467_v40 }
0x2bc8   :  { %30086 = vmatprep.subr.bf16.mxu0 %v34591_v61 }
0x2bc9   :  { %v18565_v3 = vsub.f32 %v18467_v40, %v18473_v16  ;;  %v30097_v18 = vpack.c.bf16 %v18473_v16, %v18470_v38 }
0x2bcb   :  { %v18566_v32 = vand.u32 4294901760, %v18565_v3  ;;  %v30105_v35 = vpack.c.bf16 %v18565_v3, %v18558_v9 }
0x2bcd   :  { %v18567_v4 = vsub.f32 %v18565_v3, %v18566_v32 }
0x2bce   :  { %28310 = vmatmul.mubr.f32.vlgmr.msra.gmra.mrb[64].mxu0 %v18029_v1 }
0x2bcf   :  { %30088 = vmatpush3.bf16.msra.mxu0 %v34591_v61  ;;  %28316 = vmatprep.mubr.f32.mxu0 %v18020_v55  ;;  %v18568_v43 = vand.u32 4294901760, %v18567_v4 }
0x2bd0   :  { %30090 = vmatprep.subr.bf16.mxu0 %v34449_v39 }
0x2bd1   :  { %v30101_v51 = vpack.c.bf16 %v18568_v43, %v18561_v36 }
0x2bd6   :  { %28317 = vmatmul.mubr.f32.vlgmr.msra.gmra.mrb[64].mxu0 %v18030_v47 }
0x2bd7   :  { %30092 = vmatpush3.bf16.msra.mxu0 %v34449_v39  ;;  %28323 = vmatprep.mubr.f32.mxu0 %v18018_v12  ;;  %v18547_v39 = vsub.f32 %v18463_v45, %v18546_v17 }
0x2bd8   :  { %30094 = vmatprep.subr.bf16.mxu0 %v34591_v61 }
0x2bd9   :  { %v18548_v15 = vand.u32 4294901760, %v18547_v39 }
0x2bdb   :  { %v18549_v19 = vsub.f32 %v18547_v39, %v18548_v15 }
0x2bdd   :  { %v18550_v26 = vand.u32 4294901760, %v18549_v19 }
0x2bde   :  { %28324 = vmatmul.mubr.f32.vlgmr.msra.gmra.mrb[64].mxu0 %v18028_v52 }
0x2bdf   :  { %30096 = vmatpush3.bf16.msra.mxu0 %v34591_v61  ;;  %28330 = vmatprep.mubr.f32.mxu0 %v18018_v12  ;;  %v30113_v61 = vpack.c.bf16 %v18566_v32, %v18559_v30 }
0x2be0   :  { %30098 = vmatprep.subr.bf16.mxu0 %v30097_v18 }
0x2be6   :  { %28331 = vmatmul.mubr.f32.vlgmr.msra.gmra.mrb[64].mxu0 %v18028_v52 }
0x2be7   :  { %28337 = vmatprep.mubr.f32.mxu0 %v18540_v14 }
0x2be8   :  { %30100 = vmatpush3.bf16.xpose.msra.mxu0 %v30097_v18 }
0x2be9   :  { %30102 = vmatprep.subr.bf16.mxu0 %v30101_v51 }
0x2bef   :  { %28338 = vmatmul.mubr.f32.vlgmr.msra.gmra.mrb[66].mxu0 %v18550_v26 }
0x2bf0   :  { %30104 = vmatpush3.bf16.xpose.msra.mxu0 %v30101_v51  ;;  %28344 = vmatprep.mubr.f32.mxu0 %v18536_v59 }
0x2bf1   :  { %30106 = vmatprep.subr.bf16.mxu0 %v30105_v35 }
0x2bf7   :  { %28345 = vmatmul.mubr.f32.vlgmr.msra.gmra.mrb[66].mxu0 %v18546_v17 }
0x2bf8   :  { %30108 = vmatpush3.bf16.xpose.msra.mxu0 %v30105_v35  ;;  %28351 = vmatprep.mubr.f32.mxu0 %v18537_v48 }
0x2bf9   :  { %30110 = vmatprep.subr.bf16.mxu0 %v30097_v18 }
0x2bff   :  { %28352 = vmatmul.mubr.f32.vlgmr.msra.gmra.mrb[66].mxu0 %v18547_v39 }
0x2c00   :  { %30112 = vmatpush3.bf16.xpose.msra.mxu0 %v30097_v18  ;;  %28358 = vmatprep.mubr.f32.mxu0 %v18538_v21 }
0x2c01   :  { %30114 = vmatprep.subr.bf16.mxu0 %v30113_v61 }
0x2c07   :  { %28359 = vmatmul.mubr.f32.vlgmr.msra.gmra.mrb[66].mxu0 %v18548_v15 }
0x2c08   :  { %30116 = vmatpush3.bf16.xpose.msra.mxu0 %v30113_v61  ;;  %28365 = vmatprep.mubr.f32.mxu0 %v18536_v59 }
0x2c09   :  { %30118 = vmatprep.subr.bf16.mxu0 %v30097_v18 }
0x2c0f   :  { %28366 = vmatmul.mubr.f32.vlgmr.msra.gmra.mrb[66].mxu0 %v18546_v17 }
0x2c10   :  { %30120 = vmatpush3.bf16.xpose.msra.mxu0 %v30097_v18  ;;  %28372 = vmatprep.mubr.f32.mxu0 %v18536_v59 }
0x2c17   :  { %28373 = vmatmul.mubr.f32.vlgmr.msra.gmra.mrb[66].mxu0 %v18546_v17 }
0x2cb9   :  { %v34681_v53 = vpop.f32.mrb[64].mxu0 }
0x2cba   :  { %v34683_v49 = vpop.f32.mrb[65].mxu0 }
0x2cea   :  { %v28374_v12 = vpop.f32.mrb[66].mxu0 }
0x2ceb   :  { %v18972_v50 = vmul.f32 0.25, %v28374_v12  ;;  %v18961_v57 = vpop.f32.mrb[67].mxu0 }
0x2cec   :  { %v18971_v7 = vmul.f32 0.25, %v18961_v57 }
0x2ced   :  { %v18974_v55 = vsel %vm32244_vm2, %v18972_v50, -inf }
0x2cee   :  { %v18973_v52 = vsel %vm32249_vm3, %v18971_v7, -inf  ;;  %v18978_v31 = vsel %vm984_vm1, %v18974_v55, -inf }
0x2cef   :  { %18979 = vmax.xlane.f32.xlu1 %v18978_v31  ;;  %v18975_v1 = vsel %vm984_vm1, %v18973_v52, -inf }
0x2cf0   :  { %18976 = vmax.xlane.f32.xlu0 %v18975_v1 }
0x2d00   :  { %19001 = vrot.lane.b32.xlu1 %v34424_v22, %s31573_s1 }
0x2d04   :  { %19517 = vrot.lane.b32.xlu1 %v34400_v42, %s31574_s21 }
0x2d08   :  { %19519 = vrot.lane.b32.xlu1 %v34416_v34, %s31574_s21 }
0x2d0c   :  { %19515 = vrot.lane.b32.xlu1 %v34416_v34, %s31575_s22 }
0x2d7c   :  { %v18980_v10 = vpop.xlane.xlu1 %18979 }
0x2d7d   :  { %v18982_v47 = vsub.f32 %v18974_v55, %v18980_v10  ;;  %v18977_v6 = vpop.xlane.xlu0 %18976 }
0x2d7e   :  { %v18981_v20 = vsub.f32 %v18973_v52, %v18977_v6 }
0x2d7f   :  { %v18985_v62 = vmul.f32 1.442695, %v18982_v47 }
0x2d80   :  { %v18983_v46 = vmul.f32 1.442695, %v18981_v20  ;;  %v19002_v38 = vpop.permute.xlu1 %19001 }
0x2d81   :  { %31476 = vpow2.f32 %v18985_v62  ;;  %v19015_v59 = vand.u32 4294901760, %v19002_v38 }
0x2d82   :  { %31478 = vpow2.f32 %v18983_v46 }
0x2d83   :  { %v19107_v9 = vsub.f32 %v19002_v38, %v19015_v59 }
0x2d84   :  { %v19518_v1 = vpop.permute.xlu1 %19517 }
0x2d85   :  { %v19108_v48 = vand.u32 4294901760, %v19107_v9  ;;  %v19525_v62 = vsel %vm984_vm1, %v19518_v1, 0 }
0x2d87   :  { %v19109_v18 = vsub.f32 %v19107_v9, %v19108_v48 }
0x2d88   :  { %v19520_v10 = vpop.permute.xlu1 %19519 }
0x2d89   :  { %v19110_v43 = vand.u32 4294901760, %v19109_v18  ;;  %v19527_v20 = vsel %vm984_vm1, %v19520_v10, 0 }
0x2d8b   :  { %v31477_v2 = vpop.eup %31476 }
0x2d8c   :  { %v18990_v25 = vsel %vm984_vm1, %v31477_v2, 0.0  ;;  %v31479_v40 = vpop.eup %31478  ;;  %v19516_v38 = vpop.permute.xlu1 %19515 }
0x2d8d   :  { %18991 = vadd.xlane.f32.xlu0 %v18990_v25  ;;  %v18987_v54 = vsel %vm984_vm1, %v31479_v40, 0.0  ;;  %v19530_v25 = vand.u32 4294901760, %v19525_v62 }
0x2d91   :  { %18988 = vadd.xlane.f32.xlu0 %v18987_v54 }
0x2da7   :  { %18999 = vrot.lane.b32.xlu0 %v34407_v33, %s31573_s1 }
0x2dab   :  { %19513 = vrot.lane.b32.xlu0 %v34400_v42, %s31575_s22 }
0x2e1a   :  { %v18992_v16 = vpop.xlane.xlu0 %18991 }
0x2e1b   :  { %31480 = vrcp.f32 %v18992_v16  ;;  %v19618_v16 = vsub.f32 %v19525_v62, %v19530_v25 }
0x2e1e   :  { %v18989_v8 = vpop.xlane.xlu0 %18988 }
0x2e1f   :  { %31482 = vrcp.f32 %v18989_v8  ;;  %v19523_v8 = vsel %vm984_vm1, %v19516_v38, 0 }
0x2e22   :  { %v19000_v3 = vpop.permute.xlu0 %18999 }
0x2e23   :  { %v19012_v45 = vand.u32 4294901760, %v19000_v3 }
0x2e25   :  { %v31481_v30 = vpop.eup %31480  ;;  %v34705_v32 = vpack.c.bf16 %v19015_v59, %v19012_v45  ;;  %v19100_v21 = vsub.f32 %v19000_v3, %v19012_v45  ;;  %v19619_v3 = vand.u32 4294901760, %v19618_v16 }
0x2e26   :  { %v18996_v17 = vmul.f32 %v31481_v30, %v31477_v2  ;;  %v19514_v6 = vpop.permute.xlu0 %19513  ;;  %v19533_v2 = vand.u32 4294901760, %v19527_v20 }
0x2e27   :  { %v19101_v28 = vand.u32 4294901760, %v19100_v21  ;;  %30122 = vmatprep.subr.bf16.mxu1 %v34705_v32  ;;  %v30129_v31 = vpack.c.bf16 %v19107_v9, %v19100_v21  ;;  %v19521_v46 = vsel %vm984_vm1, %v19514_v6, 0 }
0x2e28   :  { %30124 = vmatpush3.bf16.msra.mxu1 %v34705_v32  ;;  %v19009_v4 = vsel %vm984_vm1, %v18996_v17, 0  ;;  %v19625_v54 = vsub.f32 %v19527_v20, %v19533_v2  ;;  %v30145_v30 = vpack.c.bf16 %v19533_v2, %v19530_v25  ;;  %v19620_v17 = vsub.f32 %v19618_v16, %v19619_v3 }
0x2e29   :  { %v31483_v39 = vpop.eup %31482  ;;  %v19102_v29 = vsub.f32 %v19100_v21, %v19101_v28  ;;  %v34710_v36 = vand.u32 4294901760, %v19009_v4  ;;  %v30137_v47 = vpack.c.bf16 %v19108_v48, %v19101_v28  ;;  %v19606_v48 = vand.u32 4294901760, %v19523_v8 }
0x2e2a   :  { %v18995_v15 = vmul.f32 %v31483_v39, %v31479_v40  ;;  %v19596_v40 = vand.u32 4294901760, %v19521_v46  ;;  %v19626_v9 = vand.u32 4294901760, %v19625_v54 }
0x2e2b   :  { %v19103_v14 = vand.u32 4294901760, %v19102_v29  ;;  %v19089_v51 = vsub.f32 %v19009_v4, %v34710_v36  ;;  %v19607_v18 = vsub.f32 %v19523_v8, %v19606_v48 }
0x2e2c   :  { %v19006_v19 = vsel %vm984_vm1, %v18995_v15, 0  ;;  %v19597_v59 = vsub.f32 %v19521_v46, %v19596_v40  ;;  %v19627_v21 = vsub.f32 %v19625_v54, %v19626_v9  ;;  %v19621_v15 = vand.u32 4294901760, %v19620_v17 }
0x2e2d   :  { %v30125_v26 = vpack.c.bf16 %v19110_v43, %v19103_v14  ;;  %v19078_v35 = vand.u32 4294901760, %v19006_v19  ;;  %v19090_v61 = vand.u32 4294901760, %v19089_v51  ;;  %v19608_v39 = vand.u32 4294901760, %v19607_v18 }
0x2e2e   :  { %v19598_v45 = vand.u32 4294901760, %v19597_v59  ;;  %v19628_v4 = vand.u32 4294901760, %v19627_v21 }
0x2e2f   :  { %30126 = vmatprep.subr.bf16.mxu1 %v30125_v26  ;;  %v19079_v12 = vsub.f32 %v19006_v19, %v19078_v35  ;;  %v19091_v57 = vsub.f32 %v19089_v51, %v19090_v61  ;;  %v19609_v43 = vsub.f32 %v19607_v18, %v19608_v39  ;;  %v30153_v19 = vpack.c.bf16 %v19625_v54, %v19618_v16 }
0x2e30   :  { %v19599_v28 = vsub.f32 %v19597_v59, %v19598_v45  ;;  %v30149_v14 = vpack.c.bf16 %v19628_v4, %v19621_v15 }
0x2e31   :  { %v19080_v50 = vand.u32 4294901760, %v19079_v12  ;;  %v19092_v52 = vand.u32 4294901760, %v19091_v57 }
0x2e32   :  { %v19600_v29 = vand.u32 4294901760, %v19599_v28 }
0x2e33   :  { %v19081_v7 = vsub.f32 %v19079_v12, %v19080_v50 }
0x2e35   :  { %v19082_v55 = vand.u32 4294901760, %v19081_v7 }
0x2e37   :  { %28379 = vmatprep.mubr.f32.mxu1 %v19082_v55 }
0x2e38   :  { %28380 = vmatmul.mubr.f32.vlgmr.msra.gmra.mrb[72].mxu1 %v19092_v52 }
0x2e39   :  { %30128 = vmatpush3.bf16.msra.mxu1 %v30125_v26  ;;  %28386 = vmatprep.mubr.f32.mxu1 %v19078_v35 }
0x2e3a   :  { %30130 = vmatprep.subr.bf16.mxu1 %v30129_v31 }
0x2e40   :  { %28387 = vmatmul.mubr.f32.vlgmr.msra.gmra.mrb[72].mxu1 %v34710_v36 }
0x2e41   :  { %30132 = vmatpush3.bf16.msra.mxu1 %v30129_v31  ;;  %28393 = vmatprep.mubr.f32.mxu1 %v19079_v12 }
0x2e42   :  { %30134 = vmatprep.subr.bf16.mxu1 %v34705_v32 }
0x2e48   :  { %28394 = vmatmul.mubr.f32.vlgmr.msra.gmra.mrb[72].mxu1 %v19089_v51  ;;  %v19610_v51 = vand.u32 4294901760, %v19609_v43 }
0x2e49   :  { %30136 = vmatpush3.bf16.msra.mxu1 %v34705_v32  ;;  %28400 = vmatprep.mubr.f32.mxu1 %v19080_v50 }
0x2e4a   :  { %30138 = vmatprep.subr.bf16.mxu1 %v30137_v47 }
0x2e50   :  { %28401 = vmatmul.mubr.f32.vlgmr.msra.gmra.mrb[72].mxu1 %v19090_v61 }
0x2e51   :  { %30140 = vmatpush3.bf16.msra.mxu1 %v30137_v47  ;;  %28407 = vmatprep.mubr.f32.mxu1 %v19078_v35 }
0x2e52   :  { %30142 = vmatprep.subr.bf16.mxu1 %v34705_v32 }
0x2e58   :  { %28408 = vmatmul.mubr.f32.vlgmr.msra.gmra.mrb[72].mxu1 %v34710_v36 }
0x2e59   :  { %30144 = vmatpush3.bf16.msra.mxu1 %v34705_v32  ;;  %28414 = vmatprep.mubr.f32.mxu1 %v19078_v35  ;;  %v30161_v32 = vpack.c.bf16 %v19626_v9, %v19619_v3 }
0x2e5a   :  { %30146 = vmatprep.subr.bf16.mxu1 %v30145_v30 }
0x2e60   :  { %28415 = vmatmul.mubr.f32.vlgmr.msra.gmra.mrb[72].mxu1 %v34710_v36 }
0x2e61   :  { %28421 = vmatprep.mubr.f32.mxu1 %v19600_v29 }
0x2e62   :  { %30148 = vmatpush3.bf16.xpose.msra.mxu1 %v30145_v30 }
0x2e63   :  { %30150 = vmatprep.subr.bf16.mxu1 %v30149_v14 }
0x2e69   :  { %28422 = vmatmul.mubr.f32.vlgmr.msra.gmra.mrb[74].mxu1 %v19610_v51 }
0x2e6a   :  { %30152 = vmatpush3.bf16.xpose.msra.mxu1 %v30149_v14  ;;  %28428 = vmatprep.mubr.f32.mxu1 %v19596_v40 }
0x2e6b   :  { %30154 = vmatprep.subr.bf16.mxu1 %v30153_v19 }
0x2e71   :  { %28429 = vmatmul.mubr.f32.vlgmr.msra.gmra.mrb[74].mxu1 %v19606_v48 }
0x2e72   :  { %30156 = vmatpush3.bf16.xpose.msra.mxu1 %v30153_v19  ;;  %28435 = vmatprep.mubr.f32.mxu1 %v19597_v59 }
0x2e73   :  { %30158 = vmatprep.subr.bf16.mxu1 %v30145_v30 }
0x2e79   :  { %28436 = vmatmul.mubr.f32.vlgmr.msra.gmra.mrb[74].mxu1 %v19607_v18 }
0x2e7a   :  { %30160 = vmatpush3.bf16.xpose.msra.mxu1 %v30145_v30  ;;  %28442 = vmatprep.mubr.f32.mxu1 %v19598_v45 }
0x2e7b   :  { %30162 = vmatprep.subr.bf16.mxu1 %v30161_v32 }
0x2e81   :  { %28443 = vmatmul.mubr.f32.vlgmr.msra.gmra.mrb[74].mxu1 %v19608_v39 }
0x2e82   :  { %30164 = vmatpush3.bf16.xpose.msra.mxu1 %v30161_v32  ;;  %28449 = vmatprep.mubr.f32.mxu1 %v19596_v40 }
0x2e83   :  { %30166 = vmatprep.subr.bf16.mxu1 %v30145_v30 }
0x2e89   :  { %28450 = vmatmul.mubr.f32.vlgmr.msra.gmra.mrb[74].mxu1 %v19606_v48 }
0x2e8a   :  { %30168 = vmatpush3.bf16.xpose.msra.mxu1 %v30145_v30  ;;  %28456 = vmatprep.mubr.f32.mxu1 %v19596_v40 }
0x2e91   :  { %28457 = vmatmul.mubr.f32.vlgmr.msra.gmra.mrb[74].mxu1 %v19606_v48 }
0x2f33   :  { %v34725_v36 = vpop.f32.mrb[72].mxu1 }
0x2f34   :  { %v34727_v26 = vpop.f32.mrb[73].mxu1 }
0x2f64   :  { %v28458_v35 = vpop.f32.mrb[74].mxu1 }
0x2f65   :  { %v20032_v61 = vmul.f32 0.25, %v28458_v35  ;;  %v20021_v12 = vpop.f32.mrb[75].mxu1 }
0x2f66   :  { %v20031_v50 = vmul.f32 0.25, %v20021_v12 }
0x2f67   :  { %v20034_v57 = vsel %vm32244_vm2, %v20032_v61, -inf }
0x2f68   :  { %v20033_v7 = vsel %vm32249_vm3, %v20031_v50, -inf  ;;  %v20038_v55 = vsel %vm984_vm1, %v20034_v57, -inf }
0x2f69   :  { %20039 = vmax.xlane.f32.xlu1 %v20038_v55  ;;  %v20035_v52 = vsel %vm984_vm1, %v20033_v7, -inf }
0x2f6a   :  { %20036 = vmax.xlane.f32.xlu0 %v20035_v52 }
0x2f7a   :  { %20059 = vrot.lane.b32.xlu1 %v34424_v22, %s31575_s22 }
0x2f7e   :  { %20575 = vrot.lane.b32.xlu1 %v34400_v42, %s36692_s2 }
0x2f82   :  { %20577 = vrot.lane.b32.xlu1 %v34416_v34, %s36692_s2 }
0x2f86   :  { %20573 = vrot.lane.b32.xlu1 %v34416_v34, %s36693_s30 }
0x2ff6   :  { %v20040_v31 = vpop.xlane.xlu1 %20039 }
0x2ff7   :  { %v20042_v1 = vsub.f32 %v20034_v57, %v20040_v31  ;;  %v20037_v10 = vpop.xlane.xlu0 %20036 }
0x2ff8   :  { %v20041_v47 = vsub.f32 %v20033_v7, %v20037_v10 }
0x2ff9   :  { %v20045_v6 = vmul.f32 1.442695, %v20042_v1 }
0x2ffa   :  { %v20043_v20 = vmul.f32 1.442695, %v20041_v47  ;;  %v20060_v34 = vpop.permute.xlu1 %20059 }
0x2ffb   :  { %31484 = vpow2.f32 %v20045_v6  ;;  %v20073_v54 = vand.u32 4294901760, %v20060_v34 }
0x2ffc   :  { %31486 = vpow2.f32 %v20043_v20 }
0x2ffd   :  { %v20165_v16 = vsub.f32 %v20060_v34, %v20073_v54 }
0x2ffe   :  { %v20576_v52 = vpop.permute.xlu1 %20575 }
0x2fff   :  { %v20166_v8 = vand.u32 4294901760, %v20165_v16  ;;  %v20583_v6 = vsel %vm984_vm1, %v20576_v52, 0 }
0x3001   :  { %v20167_v21 = vsub.f32 %v20165_v16, %v20166_v8 }
0x3002   :  { %v20578_v31 = vpop.permute.xlu1 %20577 }
0x3003   :  { %v20168_v15 = vand.u32 4294901760, %v20167_v21  ;;  %v20585_v47 = vsel %vm984_vm1, %v20578_v31, 0 }
0x3005   :  { %v31485_v62 = vpop.eup %31484 }
0x3006   :  { %v20050_v46 = vsel %vm984_vm1, %v31485_v62, 0.0  ;;  %v31487_v2 = vpop.eup %31486  ;;  %v20574_v34 = vpop.permute.xlu1 %20573 }
0x3007   :  { %20051 = vadd.xlane.f32.xlu0 %v20050_v46  ;;  %v20047_v25 = vsel %vm984_vm1, %v31487_v2, 0.0  ;;  %v20588_v46 = vand.u32 4294901760, %v20583_v6 }
0x300b   :  { %20048 = vadd.xlane.f32.xlu0 %v20047_v25 }
0x3021   :  { %20057 = vrot.lane.b32.xlu0 %v34407_v33, %s31575_s22 }
0x3025   :  { %20571 = vrot.lane.b32.xlu0 %v34400_v42, %s36693_s30 }
0x3094   :  { %v20052_v40 = vpop.xlane.xlu0 %20051 }
0x3095   :  { %31488 = vrcp.f32 %v20052_v40  ;;  %v20676_v40 = vsub.f32 %v20583_v6, %v20588_v46 }
0x3098   :  { %v20049_v38 = vpop.xlane.xlu0 %20048 }
0x3099   :  { %31490 = vrcp.f32 %v20049_v38  ;;  %v20581_v38 = vsel %vm984_vm1, %v20574_v34, 0 }
0x309c   :  { %v20058_v59 = vpop.permute.xlu0 %20057 }
0x309d   :  { %v20070_v9 = vand.u32 4294901760, %v20058_v59 }
0x309f   :  { %v31489_v3 = vpop.eup %31488  ;;  %v34749_v48 = vpack.c.bf16 %v20073_v54, %v20070_v9  ;;  %v20158_v45 = vsub.f32 %v20058_v59, %v20070_v9  ;;  %v20677_v59 = vand.u32 4294901760, %v20676_v40 }
0x30a0   :  { %v20056_v30 = vmul.f32 %v31489_v3, %v31485_v62  ;;  %v20572_v10 = vpop.permute.xlu0 %20571  ;;  %v20591_v62 = vand.u32 4294901760, %v20585_v47 }
0x30a1   :  { %v20159_v17 = vand.u32 4294901760, %v20158_v45  ;;  %30170 = vmatprep.subr.bf16.mxu0 %v34749_v48  ;;  %v30177_v55 = vpack.c.bf16 %v20165_v16, %v20158_v45  ;;  %v20579_v20 = vsel %vm984_vm1, %v20572_v10, 0 }
0x30a2   :  { %30172 = vmatpush3.bf16.msra.mxu0 %v34749_v48  ;;  %v20067_v42 = vsel %vm984_vm1, %v20056_v30, 0  ;;  %v20683_v25 = vsub.f32 %v20585_v47, %v20591_v62  ;;  %v30193_v3 = vpack.c.bf16 %v20591_v62, %v20588_v46  ;;  %v20678_v30 = vsub.f32 %v20676_v40, %v20677_v59 }
0x30a3   :  { %v31491_v18 = vpop.eup %31490  ;;  %v20160_v28 = vsub.f32 %v20158_v45, %v20159_v17  ;;  %v34754_v4 = vand.u32 4294901760, %v20067_v42  ;;  %v30185_v1 = vpack.c.bf16 %v20166_v8, %v20159_v17  ;;  %v20664_v8 = vand.u32 4294901760, %v20581_v38 }
0x30a4   :  { %v20055_v39 = vmul.f32 %v31491_v18, %v31487_v2  ;;  %v20654_v2 = vand.u32 4294901760, %v20579_v20  ;;  %v20684_v16 = vand.u32 4294901760, %v20683_v25 }
0x30a5   :  { %v20161_v29 = vand.u32 4294901760, %v20160_v28  ;;  %v20147_v14 = vsub.f32 %v20067_v42, %v34754_v4  ;;  %v20665_v21 = vsub.f32 %v20581_v38, %v20664_v8 }
0x30a6   :  { %v20064_v43 = vsel %vm984_vm1, %v20055_v39, 0  ;;  %v20655_v54 = vsub.f32 %v20579_v20, %v20654_v2  ;;  %v20685_v45 = vsub.f32 %v20683_v25, %v20684_v16  ;;  %v20679_v39 = vand.u32 4294901760, %v20678_v30 }
0x30a7   :  { %v30173_v51 = vpack.c.bf16 %v20168_v15, %v20161_v29  ;;  %v20136_v19 = vand.u32 4294901760, %v20064_v43  ;;  %v20148_v32 = vand.u32 4294901760, %v20147_v14  ;;  %v20666_v18 = vand.u32 4294901760, %v20665_v21 }
0x30a8   :  { %v20656_v9 = vand.u32 4294901760, %v20655_v54  ;;  %v20686_v42 = vand.u32 4294901760, %v20685_v45 }
0x30a9   :  { %30174 = vmatprep.subr.bf16.mxu0 %v30173_v51  ;;  %v20137_v35 = vsub.f32 %v20064_v43, %v20136_v19  ;;  %v20149_v12 = vsub.f32 %v20147_v14, %v20148_v32  ;;  %v20667_v15 = vsub.f32 %v20665_v21, %v20666_v18  ;;  %v30201_v43 = vpack.c.bf16 %v20683_v25, %v20676_v40 }
0x30aa   :  { %v20657_v17 = vsub.f32 %v20655_v54, %v20656_v9  ;;  %v30197_v29 = vpack.c.bf16 %v20686_v42, %v20679_v39 }
0x30ab   :  { %v20138_v61 = vand.u32 4294901760, %v20137_v35  ;;  %v20150_v7 = vand.u32 4294901760, %v20149_v12 }
0x30ac   :  { %v20658_v28 = vand.u32 4294901760, %v20657_v17 }
0x30ad   :  { %v20139_v50 = vsub.f32 %v20137_v35, %v20138_v61 }
0x30af   :  { %v20140_v57 = vand.u32 4294901760, %v20139_v50 }
0x30b1   :  { %28463 = vmatprep.mubr.f32.mxu0 %v20140_v57 }
0x30b2   :  { %28464 = vmatmul.mubr.f32.vlgmr.msra.gmra.mrb[68].mxu0 %v20150_v7 }
0x30b3   :  { %30176 = vmatpush3.bf16.msra.mxu0 %v30173_v51  ;;  %28470 = vmatprep.mubr.f32.mxu0 %v20136_v19 }
0x30b4   :  { %30178 = vmatprep.subr.bf16.mxu0 %v30177_v55 }
0x30ba   :  { %28471 = vmatmul.mubr.f32.vlgmr.msra.gmra.mrb[68].mxu0 %v34754_v4 }
0x30bb   :  { %30180 = vmatpush3.bf16.msra.mxu0 %v30177_v55  ;;  %28477 = vmatprep.mubr.f32.mxu0 %v20137_v35 }
0x30bc   :  { %30182 = vmatprep.subr.bf16.mxu0 %v34749_v48 }
0x30c2   :  { %28478 = vmatmul.mubr.f32.vlgmr.msra.gmra.mrb[68].mxu0 %v20147_v14  ;;  %v20668_v14 = vand.u32 4294901760, %v20667_v15 }
0x30c3   :  { %30184 = vmatpush3.bf16.msra.mxu0 %v34749_v48  ;;  %28484 = vmatprep.mubr.f32.mxu0 %v20138_v61 }
0x30c4   :  { %30186 = vmatprep.subr.bf16.mxu0 %v30185_v1 }
0x30ca   :  { %28485 = vmatmul.mubr.f32.vlgmr.msra.gmra.mrb[68].mxu0 %v20148_v32 }
0x30cb   :  { %30188 = vmatpush3.bf16.msra.mxu0 %v30185_v1  ;;  %28491 = vmatprep.mubr.f32.mxu0 %v20136_v19 }
0x30cc   :  { %30190 = vmatprep.subr.bf16.mxu0 %v34749_v48 }
0x30d2   :  { %28492 = vmatmul.mubr.f32.vlgmr.msra.gmra.mrb[68].mxu0 %v34754_v4 }
0x30d3   :  { %30192 = vmatpush3.bf16.msra.mxu0 %v34749_v48  ;;  %28498 = vmatprep.mubr.f32.mxu0 %v20136_v19  ;;  %v30209_v48 = vpack.c.bf16 %v20684_v16, %v20677_v59 }
0x30d4   :  { %30194 = vmatprep.subr.bf16.mxu0 %v30193_v3 }
0x30da   :  { %28499 = vmatmul.mubr.f32.vlgmr.msra.gmra.mrb[68].mxu0 %v34754_v4 }
0x30db   :  { %28505 = vmatprep.mubr.f32.mxu0 %v20658_v28 }
0x30dc   :  { %30196 = vmatpush3.bf16.xpose.msra.mxu0 %v30193_v3 }
0x30dd   :  { %30198 = vmatprep.subr.bf16.mxu0 %v30197_v29 }
0x30e3   :  { %28506 = vmatmul.mubr.f32.vlgmr.msra.gmra.mrb[70].mxu0 %v20668_v14 }
0x30e4   :  { %30200 = vmatpush3.bf16.xpose.msra.mxu0 %v30197_v29  ;;  %28512 = vmatprep.mubr.f32.mxu0 %v20654_v2 }
0x30e5   :  { %30202 = vmatprep.subr.bf16.mxu0 %v30201_v43 }
0x30eb   :  { %28513 = vmatmul.mubr.f32.vlgmr.msra.gmra.mrb[70].mxu0 %v20664_v8 }
0x30ec   :  { %30204 = vmatpush3.bf16.xpose.msra.mxu0 %v30201_v43  ;;  %28519 = vmatprep.mubr.f32.mxu0 %v20655_v54 }
0x30ed   :  { %30206 = vmatprep.subr.bf16.mxu0 %v30193_v3 }
0x30f3   :  { %28520 = vmatmul.mubr.f32.vlgmr.msra.gmra.mrb[70].mxu0 %v20665_v21 }
0x30f4   :  { %30208 = vmatpush3.bf16.xpose.msra.mxu0 %v30193_v3  ;;  %28526 = vmatprep.mubr.f32.mxu0 %v20656_v9 }
0x30f5   :  { %30210 = vmatprep.subr.bf16.mxu0 %v30209_v48 }
0x30fb   :  { %28527 = vmatmul.mubr.f32.vlgmr.msra.gmra.mrb[70].mxu0 %v20666_v18 }
0x30fc   :  { %30212 = vmatpush3.bf16.xpose.msra.mxu0 %v30209_v48  ;;  %28533 = vmatprep.mubr.f32.mxu0 %v20654_v2 }
0x30fd   :  { %30214 = vmatprep.subr.bf16.mxu0 %v30193_v3 }
0x3103   :  { %28534 = vmatmul.mubr.f32.vlgmr.msra.gmra.mrb[70].mxu0 %v20664_v8 }
0x3104   :  { %30216 = vmatpush3.bf16.xpose.msra.mxu0 %v30193_v3  ;;  %28540 = vmatprep.mubr.f32.mxu0 %v20654_v2 }
0x310b   :  { %28541 = vmatmul.mubr.f32.vlgmr.msra.gmra.mrb[70].mxu0 %v20664_v8 }
0x310c   :  { %22560 = vmatprep.mubr.f32.mxu0 %v36668_v27 }
0x31ad   :  { %v28500_v4 = vpop.f32.mrb[68].mxu0 }
0x31ae   :  { %v20561_v51 = vpop.f32.mrb[69].mxu0 }
0x31de   :  { %v28542_v19 = vpop.f32.mrb[70].mxu0 }
0x31df   :  { %v21090_v32 = vmul.f32 0.25, %v28542_v19  ;;  %v21079_v35 = vpop.f32.mrb[71].mxu0 }
0x31e0   :  { %v21089_v61 = vmul.f32 0.25, %v21079_v35 }
0x31e1   :  { %v21092_v12 = vsel %vm32244_vm2, %v21090_v32, -inf }
0x31e2   :  { %v21091_v50 = vsel %vm32249_vm3, %v21089_v61, -inf  ;;  %v21096_v57 = vsel %vm984_vm1, %v21092_v12, -inf }
0x31e3   :  { %21097 = vmax.xlane.f32.xlu1 %v21096_v57  ;;  %v21093_v7 = vsel %vm984_vm1, %v21091_v50, -inf  ;;  %v25519_v57 = vld [vmem:[%s36343_s3 + $0x48] sm:$0xff] }
0x31e4   :  { %21094 = vmax.xlane.f32.xlu0 %v21093_v7 }
0x31f4   :  { %21117 = vrot.lane.b32.xlu1 %v34424_v22, %s36693_s30 }
0x31f8   :  { %17375 = vrot.lane.b32.xlu1 %v34545_v5, %s36692_s2 }
0x31fc   :  { %17377 = vrot.lane.b32.xlu1 %v34543_v24, %s36692_s2 }
0x3200   :  { %17385 = vrot.lane.b32.xlu1 %v34604_v11, %s31574_s21 }
0x3204   :  { %17393 = vrot.lane.b32.xlu1 %v34646_v23, %s31572_s19 }
0x3208   :  { %21633 = vrot.lane.b32.xlu1 %v34725_v36, %s36692_s2 }
0x320c   :  { %21641 = vrot.lane.b32.xlu1 %v28500_v4, %s31574_s21 }
0x3270   :  { %v21098_v58 = vpop.xlane.xlu1 %21097 }
0x3271   :  { %v21100_v63 = vsub.f32 %v21092_v12, %v21098_v58  ;;  %v21095_v22 = vpop.xlane.xlu0 %21094  ;;  %v21684_v58 = vand.u32 4294901760, %v25519_v57 }
0x3272   :  { %v21099_v55 = vsub.f32 %v21091_v50, %v21095_v22 }
0x3273   :  { %v21103_v52 = vmul.f32 1.442695, %v21100_v63 }
0x3274   :  { %v21101_v5 = vmul.f32 1.442695, %v21099_v55  ;;  %v21118_v36 = vpop.permute.xlu1 %21117 }
0x3275   :  { %31492 = vpow2.f32 %v21103_v52  ;;  %v21131_v10 = vand.u32 4294901760, %v21118_v36 }
0x3276   :  { %31494 = vpow2.f32 %v21101_v5 }
0x3277   :  { %v21223_v6 = vsub.f32 %v21118_v36, %v21131_v10 }
0x3278   :  { %v17376_v43 = vpop.permute.xlu1 %17375 }
0x3279   :  { %v17397_v4 = vsel %vm984_vm1, %v34501_v41, %v17376_v43  ;;  %v25518_v41 = vld [vmem:[%s36343_s3 + $0x40] sm:$0xff] }
0x327a   :  { %v21681_v7 = vand.u32 4294901760, %v25518_v41 }
0x327c   :  { %v17378_v32 = vpop.permute.xlu1 %17377  ;;  %v34831_v52 = vpack.c.bf16 %v21684_v58, %v21681_v7 }
0x327d   :  { %v17398_v55 = vsel %vm984_vm1, %v34499_v60, %v17378_v32 }
0x327f   :  { %v31493_v24 = vpop.eup %31492 }
0x3280   :  { %v21108_v31 = vsel %vm984_vm1, %v31493_v24, 0.0  ;;  %v31495_v11 = vpop.eup %31494  ;;  %v17386_v12 = vpop.permute.xlu1 %17385 }
0x3281   :  { %21109 = vadd.xlane.f32.xlu0 %v21108_v31  ;;  %v21105_v23 = vsel %vm984_vm1, %v31495_v11, 0.0  ;;  %v17400_v5 = vsel %vm5231_vm4, %v17398_v55, %v17386_v12  ;;  %v25520_v31 = vld [vmem:[%s36343_s3 + $0x50] sm:$0xff] }
0x3282   :  { %v21687_v60 = vand.u32 4294901760, %v25520_v31 }
0x3284   :  { %v17394_v22 = vpop.permute.xlu1 %17393 }
0x3285   :  { %21106 = vadd.xlane.f32.xlu0 %v21105_v23  ;;  %v17402_v23 = vsel %vm5234_vm5, %v17400_v5, %v17394_v22 }
0x329b   :  { %21115 = vrot.lane.b32.xlu0 %v34407_v33, %s36693_s30  ;;  %v21224_v33 = vand.u32 4294901760, %v21223_v6 }
0x329d   :  { %v21225_v25 = vsub.f32 %v21223_v6, %v21224_v33 }
0x329f   :  { %17383 = vrot.lane.b32.xlu0 %v34606_v37, %s31574_s21  ;;  %v21226_v8 = vand.u32 4294901760, %v21225_v25 }
0x32a3   :  { %17391 = vrot.lane.b32.xlu0 %v34648_v0, %s31572_s19 }
0x32a7   :  { %21631 = vrot.lane.b32.xlu0 %v34727_v26, %s36692_s2 }
0x32ab   :  { %21639 = vrot.lane.b32.xlu0 %v20561_v51, %s31574_s21 }
0x330e   :  { %v21110_v1 = vpop.xlane.xlu0 %21109 }
0x330f   :  { %31496 = vrcp.f32 %v21110_v1  ;;  %v21672_v1 = vsel %vm70_vm0, %v17402_v23, 0 }
0x3312   :  { %v21107_v47 = vpop.xlane.xlu0 %21106 }
0x3313   :  { %31498 = vrcp.f32 %v21107_v47  ;;  %v25522_v47 = vld [vmem:[%s36343_s3 + $0x60] sm:$0xff] }
0x3316   :  { %v21116_v20 = vpop.permute.xlu0 %21115 }
0x3317   :  { %v21128_v62 = vand.u32 4294901760, %v21116_v20 }
0x3319   :  { %v31497_v46 = vpop.eup %31496  ;;  %v34800_v37 = vpack.c.bf16 %v21131_v10, %v21128_v62  ;;  %v21216_v2 = vsub.f32 %v21116_v20, %v21128_v62  ;;  %v34855_v20 = vand.u32 4294901760, %v21672_v1  ;;  %v21693_v62 = vand.u32 4294901760, %v25522_v47 }
0x331a   :  { %v21114_v0 = vmul.f32 %v31497_v46, %v31493_v24  ;;  %v17384_v14 = vpop.permute.xlu0 %17383 }
0x331b   :  { %v21217_v34 = vand.u32 4294901760, %v21216_v2  ;;  %30218 = vmatprep.subr.bf16.mxu1 %v34800_v37  ;;  %v30225_v15 = vpack.c.bf16 %v21223_v6, %v21216_v2  ;;  %v17399_v51 = vsel %vm5231_vm4, %v17397_v4, %v17384_v14  ;;  %v25523_v6 = vld [vmem:[%s36343_s3 + $0x68] sm:$0xff]  ;;  %v34868_v25 = vsub.f32 %v21672_v1, %v34855_v20 }
0x331c   :  { %30220 = vmatpush3.bf16.msra.mxu1 %v34800_v37  ;;  %v21125_v26 = vsel %vm984_vm1, %v21114_v0, 0  ;;  %v21696_v46 = vand.u32 4294901760, %v25523_v6  ;;  %v25525_v0 = vld [vmem:[%s36343_s3 + $0x78] sm:$0xff] }
0x331d   :  { %v31499_v40 = vpop.eup %31498  ;;  %v21218_v54 = vsub.f32 %v21216_v2, %v21217_v34  ;;  %v34805_v38 = vand.u32 4294901760, %v21125_v26  ;;  %v30233_v19 = vpack.c.bf16 %v21224_v33, %v21217_v34  ;;  %v25524_v2 = vld [vmem:[%s36343_s3 + $0x70] sm:$0xff] }
0x331e   :  { %v21113_v16 = vmul.f32 %v31499_v40, %v31495_v11  ;;  %v17392_v48 = vpop.permute.xlu0 %17391  ;;  %v25521_v11 = vld [vmem:[%s36343_s3 + $0x58] sm:$0xff]  ;;  %v34871_v34 = vpack.c.bf16 %v21696_v46, %v21693_v62  ;;  %v21702_v40 = vand.u32 4294901760, %v25525_v0  ;;  %v21830_v4 = vsub.f32 %v25523_v6, %v21696_v46 }
0x331f   :  { %v21219_v59 = vand.u32 4294901760, %v21218_v54  ;;  %v21205_v9 = vsub.f32 %v21125_v26, %v34805_v38  ;;  %v17401_v35 = vsel %vm5234_vm5, %v17399_v51, %v17392_v48  ;;  %v21690_v36 = vand.u32 4294901760, %v25521_v11 }
0x3320   :  { %v21122_v3 = vsel %vm984_vm1, %v21113_v16, 0  ;;  %v21669_v61 = vsel %vm70_vm0, %v17401_v35, 0  ;;  %v21699_v26 = vand.u32 4294901760, %v25524_v2  ;;  %v21765_v54 = vand.u32 4294901760, %v34868_v25 }
0x3321   :  { %v30221_v45 = vpack.c.bf16 %v21226_v8, %v21219_v59  ;;  %v21194_v30 = vand.u32 4294901760, %v21122_v3  ;;  %v21206_v21 = vand.u32 4294901760, %v21205_v9  ;;  %v34817_v50 = vand.u32 4294901760, %v21669_v61 }
0x3322   :  { %v34857_v33 = vpack.c.bf16 %v21690_v36, %v21687_v60  ;;  %v34876_v16 = vpack.c.bf16 %v21702_v40, %v21699_v26  ;;  %v21795_v8 = vsub.f32 %v25518_v41, %v21681_v7  ;;  %v21823_v48 = vsub.f32 %v25522_v47, %v21693_v62 }
0x3323   :  { %30222 = vmatprep.subr.bf16.mxu1 %v30221_v45  ;;  %v21195_v17 = vsub.f32 %v21122_v3, %v21194_v30  ;;  %v21207_v18 = vsub.f32 %v21205_v9, %v21206_v21  ;;  %v34827_v63 = vsub.f32 %v21669_v61, %v34817_v50  ;;  %v21831_v35 = vand.u32 4294901760, %v21830_v4 }
0x3324   :  { %v21796_v3 = vand.u32 4294901760, %v21795_v8  ;;  %v21824_v32 = vand.u32 4294901760, %v21823_v48  ;;  %v21837_v41 = vsub.f32 %v25524_v2, %v21699_v26  ;;  %v30281_v46 = vpack.c.bf16 %v21830_v4, %v21823_v48 }
0x3325   :  { %v21196_v42 = vand.u32 4294901760, %v21195_v17  ;;  %v21208_v29 = vand.u32 4294901760, %v21207_v18  ;;  %v21755_v24 = vand.u32 4294901760, %v34827_v63  ;;  %v21832_v7 = vsub.f32 %v21830_v4, %v21831_v35 }
0x3326   :  { %v21825_v12 = vsub.f32 %v21823_v48, %v21824_v32  ;;  %v21838_v22 = vand.u32 4294901760, %v21837_v41  ;;  %v30313_v26 = vpack.c.bf16 %v21831_v35, %v21824_v32 }
0x3327   :  { %v21197_v28 = vsub.f32 %v21195_v17, %v21196_v42  ;;  %v21756_v10 = vsub.f32 %v34827_v63, %v21755_v24  ;;  %v21833_v5 = vand.u32 4294901760, %v21832_v7 }
0x3329   :  { %v21198_v39 = vand.u32 4294901760, %v21197_v28 }
0x332b   :  { %28547 = vmatprep.mubr.f32.mxu1 %v21198_v39 }
0x332c   :  { %28548 = vmatmul.mubr.f32.vlgmr.msra.gmra.mrb[76].mxu1 %v21208_v29 }
0x332d   :  { %30224 = vmatpush3.bf16.msra.mxu1 %v30221_v45  ;;  %28554 = vmatprep.mubr.f32.mxu1 %v21194_v30 }
0x332e   :  { %30226 = vmatprep.subr.bf16.mxu1 %v30225_v15 }
0x3334   :  { %28555 = vmatmul.mubr.f32.vlgmr.msra.gmra.mrb[76].mxu1 %v34805_v38 }
0x3335   :  { %30228 = vmatpush3.bf16.msra.mxu1 %v30225_v15  ;;  %28561 = vmatprep.mubr.f32.mxu1 %v21195_v17  ;;  %v21809_v17 = vsub.f32 %v25520_v31, %v21687_v60  ;;  %v21839_v31 = vsub.f32 %v21837_v41, %v21838_v22 }
0x3336   :  { %30230 = vmatprep.subr.bf16.mxu1 %v34800_v37 }
0x3337   :  { %v21810_v39 = vand.u32 4294901760, %v21809_v17  ;;  %v21840_v60 = vand.u32 4294901760, %v21839_v31 }
0x3339   :  { %v21811_v14 = vsub.f32 %v21809_v17, %v21810_v39 }
0x333b   :  { %v21812_v51 = vand.u32 4294901760, %v21811_v14 }
0x333c   :  { %28562 = vmatmul.mubr.f32.vlgmr.msra.gmra.mrb[76].mxu1 %v21205_v9  ;;  %v21802_v9 = vsub.f32 %v25519_v57, %v21684_v58  ;;  %v21844_v57 = vsub.f32 %v25525_v0, %v21702_v40  ;;  %v21826_v58 = vand.u32 4294901760, %v21825_v12 }
0x333d   :  { %30232 = vmatpush3.bf16.msra.mxu1 %v34800_v37  ;;  %28568 = vmatprep.mubr.f32.mxu1 %v21196_v42  ;;  %v21816_v42 = vsub.f32 %v25521_v11, %v21690_v36 }
0x333e   :  { %30234 = vmatprep.subr.bf16.mxu1 %v30233_v19  ;;  %v21803_v45 = vand.u32 4294901760, %v21802_v9  ;;  %v21845_v55 = vand.u32 4294901760, %v21844_v57  ;;  %v30265_v23 = vpack.c.bf16 %v21833_v5, %v21826_v58  ;;  %v30273_v6 = vpack.c.bf16 %v21802_v9, %v21795_v8 }
0x333f   :  { %v21817_v29 = vand.u32 4294901760, %v21816_v42  ;;  %v30277_v62 = vpack.c.bf16 %v21816_v42, %v21809_v17 }
0x3340   :  { %v21846_v11 = vsub.f32 %v21844_v57, %v21845_v55  ;;  %v30305_v2 = vpack.c.bf16 %v21803_v45, %v21796_v3  ;;  %v30317_v40 = vpack.c.bf16 %v21845_v55, %v21838_v22 }
0x3341   :  { %v21818_v43 = vsub.f32 %v21816_v42, %v21817_v29  ;;  %v30309_v0 = vpack.c.bf16 %v21817_v29, %v21810_v39 }
0x3342   :  { %v21847_v36 = vand.u32 4294901760, %v21846_v11 }
0x3344   :  { %28569 = vmatmul.mubr.f32.vlgmr.msra.gmra.mrb[76].mxu1 %v21206_v21  ;;  %v21804_v21 = vsub.f32 %v21802_v9, %v21803_v45 }
0x3345   :  { %30236 = vmatpush3.bf16.msra.mxu1 %v30233_v19  ;;  %28575 = vmatprep.mubr.f32.mxu1 %v21194_v30  ;;  %v21819_v19 = vand.u32 4294901760, %v21818_v43 }
0x3346   :  { %30238 = vmatprep.subr.bf16.mxu1 %v34800_v37  ;;  %v21805_v28 = vand.u32 4294901760, %v21804_v21 }
0x3347   :  { %v30261_v61 = vpack.c.bf16 %v21819_v19, %v21812_v51 }
0x334c   :  { %28576 = vmatmul.mubr.f32.vlgmr.msra.gmra.mrb[76].mxu1 %v34805_v38 }
0x334d   :  { %30240 = vmatpush3.bf16.msra.mxu1 %v34800_v37  ;;  %28582 = vmatprep.mubr.f32.mxu1 %v21194_v30  ;;  %v21757_v37 = vand.u32 4294901760, %v21756_v10  ;;  %v21797_v30 = vsub.f32 %v21795_v8, %v21796_v3  ;;  %v30269_v10 = vpack.c.bf16 %v21847_v36, %v21840_v60 }
0x334e   :  { %30242 = vmatprep.subr.bf16.mxu1 %v34831_v52 }
0x334f   :  { %v21798_v18 = vand.u32 4294901760, %v21797_v30 }
0x3351   :  { %v30257_v15 = vpack.c.bf16 %v21805_v28, %v21798_v18 }
0x3354   :  { %28583 = vmatmul.mubr.f32.vlgmr.msra.gmra.mrb[76].mxu1 %v34805_v38  ;;  %v21766_v38 = vsub.f32 %v34868_v25, %v21765_v54 }
0x3355   :  { %30244 = vmatpush3.bf16.msra.mxu1 %v34831_v52  ;;  %28601 = vmatprep.mubr.f32.mxu1 %v21757_v37  ;;  %v30285_v37 = vpack.c.bf16 %v21844_v57, %v21837_v41  ;;  %v36698_v41 = vld [vmem:[#allocation16_spill] sm:$0xff] }
0x3356   :  { %30246 = vmatprep.subr.bf16.mxu1 %v34857_v33  ;;  %v21767_v59 = vand.u32 4294901760, %v21766_v38  ;;  %v21634_v38 = vpop.permute.xlu1 %21633 }
0x3357   :  { %v21654_v18 = vsel %vm984_vm1, %v34681_v53, %v21634_v38 }
0x3359   :  { %30248 = vmatpush3.bf16.msra.mxu1 %v34857_v33 }
0x335a   :  { %30250 = vmatprep.subr.bf16.mxu1 %v34871_v34  ;;  %v21642_v30 = vpop.permute.xlu1 %21641 }
0x335b   :  { %v21656_v28 = vsel %vm5231_vm4, %v21654_v18, %v21642_v30  ;;  %v25535_v18 = vld [vmem:[%s36349_s9 + $0x98] sm:$0xff] }
0x335d   :  { %30252 = vmatpush3.bf16.msra.mxu1 %v34871_v34 }
0x335e   :  { %30254 = vmatprep.subr.bf16.mxu1 %v34876_v16 }
0x3361   :  { %30256 = vmatpush3.bf16.msra.mxu1 %v34876_v16 }
0x3362   :  { %30258 = vmatprep.subr.bf16.mxu1 %v30257_v15 }
0x3364   :  { %28602 = vmatmul.mubr.f32.vlgmr.msra.gmra.mrb[78].mxu1 %v21767_v59  ;;  %v21632_v59 = vpop.permute.xlu0 %21631 }
0x3365   :  { %30260 = vmatpush3.bf16.msra.mxu1 %v30257_v15  ;;  %v21653_v8 = vsel %vm984_vm1, %v34683_v49, %v21632_v59 }
0x3366   :  { %30262 = vmatprep.subr.bf16.mxu1 %v30261_v61 }
0x3368   :  { %v21640_v21 = vpop.permute.xlu0 %21639 }
0x3369   :  { %30264 = vmatpush3.bf16.msra.mxu1 %v30261_v61  ;;  %v21655_v17 = vsel %vm5231_vm4, %v21653_v8, %v21640_v21  ;;  %v36697_v61 = vld [vmem:[#allocation18_spill] sm:$0xff]  ;;  %v22484_v8 = vand.u32 4294901760, %v25535_v18 }
0x336a   :  { %30266 = vmatprep.subr.bf16.mxu1 %v30265_v23  ;;  %v25533_v21 = vld [vmem:[%s36349_s9 + $0x88] sm:$0xff] }
0x336d   :  { %30268 = vmatpush3.bf16.msra.mxu1 %v30265_v23 }
0x336e   :  { %30270 = vmatprep.subr.bf16.mxu1 %v30269_v10 }
0x3371   :  { %30272 = vmatpush3.bf16.msra.mxu1 %v30269_v10 }
0x3372   :  { %30274 = vmatprep.subr.bf16.mxu1 %v30273_v6 }
0x3427   :  { %v28584_v1 = vpop.f32.mrb[76].mxu1 }
0x3428   :  { %21649 = vrot.lane.b32.xlu1 %v28584_v1, %s31572_s19  ;;  %v21619_v47 = vpop.f32.mrb[77].mxu1 }
0x3429   :  { %21647 = vrot.lane.b32.xlu0 %v21619_v47, %s31572_s19 }
0x349a   :  { %v21650_v9 = vpop.permute.xlu1 %21649 }
0x349b   :  { %v21658_v3 = vsel %vm5234_vm5, %v21656_v28, %v21650_v9  ;;  %v21648_v45 = vpop.permute.xlu0 %21647  ;;  %v22480_v28 = vand.u32 4294901760, %v25533_v21  ;;  %v25532_v9 = vld [vmem:[%s36349_s9 + $0x80] sm:$0xff] }
0x349c   :  { %v21678_v42 = vsel %vm70_vm0, %v21658_v3, 0  ;;  %v21657_v39 = vsel %vm5234_vm5, %v21655_v17, %v21648_v45  ;;  %v25534_v17 = vld [vmem:[%s36349_s9 + $0x90] sm:$0xff]  ;;  %v22482_v3 = vand.u32 4294901760, %v25532_v9 }
0x349d   :  { %v21783_v29 = vand.u32 4294901760, %v21678_v42  ;;  %v21675_v15 = vsel %vm70_vm0, %v21657_v39, 0  ;;  %v22486_v45 = vand.u32 4294901760, %v25534_v17 }
0x349e   :  { %v21773_v14 = vand.u32 4294901760, %v21675_v15 }
0x349f   :  { %v21784_v53 = vsub.f32 %v21678_v42, %v21783_v29  ;;  %v34983_v42 = vpack.c.bf16 %v22484_v8, %v22480_v28  ;;  %v34985_v39 = vpack.c.bf16 %v22486_v45, %v22482_v3 }
0x34a0   :  { %v21774_v43 = vsub.f32 %v21675_v15, %v21773_v14  ;;  %v25539_v15 = vld [vmem:[%s36349_s9 + $0xb8] sm:$0xff] }
0x34a1   :  { %v21785_v48 = vand.u32 4294901760, %v21784_v53  ;;  %30338 = vmatprep.subr.bf16.mxu0 %v34983_v42 }
0x34a2   :  { %v21775_v4 = vand.u32 4294901760, %v21774_v43  ;;  %30340 = vmatpush1.bf16.msra.mxu0 %v34985_v39 }
0x34a3   :  { %v21786_v51 = vsub.f32 %v21784_v53, %v21785_v48 }
0x34a4   :  { %v21776_v49 = vsub.f32 %v21774_v43, %v21775_v4 }
0x34a5   :  { %v21787_v32 = vand.u32 4294901760, %v21786_v51 }
0x34a6   :  { %v21777_v19 = vand.u32 4294901760, %v21776_v49 }
0x34a8   :  { %28604 = vmatprep.mubr.f32.mxu1 %v21777_v19 }
0x34a9   :  { %28605 = vmatmul.mubr.f32.gmra.mrb[80].mxu1 %v21787_v32  ;;  %v25541_v32 = vld [vmem:[%s36349_s9 + $0xc8] sm:$0xff] }
0x34aa   :  { %28623 = vmatprep.mubr.f32.mxu1 %v34817_v50 }
0x34ad   :  { %28624 = vmatmul.mubr.f32.vlgmr.msra.gmra.mrb[78].mxu1 %v34855_v20 }
0x34ae   :  { %30276 = vmatpush3.bf16.msra.mxu1 %v30273_v6  ;;  %28626 = vmatprep.mubr.f32.mxu1 %v21773_v14 }
0x34af   :  { %30278 = vmatprep.subr.bf16.mxu1 %v30277_v62 }
0x34b1   :  { %28627 = vmatmul.mubr.f32.gmra.mrb[80].mxu1 %v21783_v29 }
0x34b2   :  { %30280 = vmatpush3.bf16.msra.mxu1 %v30277_v62  ;;  %28645 = vmatprep.mubr.f32.mxu1 %v34827_v63 }
0x34b3   :  { %30282 = vmatprep.subr.bf16.mxu1 %v30281_v46 }
0x34b6   :  { %30284 = vmatpush3.bf16.msra.mxu1 %v30281_v46 }
0x34b7   :  { %30286 = vmatprep.subr.bf16.mxu1 %v30285_v37 }
0x34ba   :  { %30288 = vmatpush3.bf16.msra.mxu1 %v30285_v37 }
0x34bb   :  { %30290 = vmatprep.subr.bf16.mxu1 %v34831_v52 }
0x34bd   :  { %28646 = vmatmul.mubr.f32.vlgmr.msra.gmra.mrb[78].mxu1 %v34868_v25 }
0x34be   :  { %28648 = vmatprep.mubr.f32.mxu1 %v21774_v43  ;;  %30292 = vmatpush3.bf16.msra.mxu1 %v34831_v52  ;;  %v25536_v43 = vld [vmem:[%s36349_s9 + $0xa0] sm:$0xff] }
0x34bf   :  { %30294 = vmatprep.subr.bf16.mxu1 %v34857_v33 }
0x34c1   :  { %28649 = vmatmul.mubr.f32.gmra.mrb[80].mxu1 %v21784_v53  ;;  %v22492_v53 = vand.u32 4294901760, %v25539_v15 }
0x34c2   :  { %30296 = vmatpush3.bf16.msra.mxu1 %v34857_v33  ;;  %28667 = vmatprep.mubr.f32.mxu1 %v21755_v24 }
0x34c3   :  { %30298 = vmatprep.subr.bf16.mxu1 %v34871_v34 }
0x34c6   :  { %30300 = vmatpush3.bf16.msra.mxu1 %v34871_v34 }
0x34c7   :  { %30302 = vmatprep.subr.bf16.mxu1 %v34876_v16 }
0x34ca   :  { %30304 = vmatpush3.bf16.msra.mxu1 %v34876_v16 }
0x34cb   :  { %30306 = vmatprep.subr.bf16.mxu1 %v30305_v2 }
0x34cd   :  { %28668 = vmatmul.mubr.f32.vlgmr.msra.gmra.mrb[78].mxu1 %v21765_v54 }
0x34ce   :  { %28670 = vmatprep.mubr.f32.mxu1 %v21775_v4  ;;  %30308 = vmatpush3.bf16.msra.mxu1 %v30305_v2  ;;  %v22490_v4 = vand.u32 4294901760, %v25536_v43 }
0x34cf   :  { %30310 = vmatprep.subr.bf16.mxu1 %v30309_v0 }
0x34d1   :  { %28671 = vmatmul.mubr.f32.gmra.mrb[80].mxu1 %v21785_v48  ;;  %v25538_v48 = vld [vmem:[%s36349_s9 + $0xb0] sm:$0xff] }
0x34d2   :  { %30312 = vmatpush3.bf16.msra.mxu1 %v30309_v0  ;;  %28689 = vmatprep.mubr.f32.mxu1 %v34817_v50  ;;  %v22494_v51 = vand.u32 4294901760, %v25538_v48 }
0x34d3   :  { %30314 = vmatprep.subr.bf16.mxu1 %v30313_v26 }
0x34d4   :  { %v35003_v19 = vpack.c.bf16 %v22494_v51, %v22490_v4 }
0x34d6   :  { %30316 = vmatpush3.bf16.msra.mxu1 %v30313_v26 }
0x34d7   :  { %30318 = vmatprep.subr.bf16.mxu1 %v30317_v40 }
0x34da   :  { %30320 = vmatpush3.bf16.msra.mxu1 %v30317_v40 }
0x34db   :  { %30322 = vmatprep.subr.bf16.mxu1 %v34831_v52 }
0x34dd   :  { %28690 = vmatmul.mubr.f32.vlgmr.msra.gmra.mrb[78].mxu1 %v34855_v20 }
0x34de   :  { %28692 = vmatprep.mubr.f32.mxu1 %v21773_v14  ;;  %30324 = vmatpush3.bf16.msra.mxu1 %v34831_v52  ;;  %v25527_v52 = vld [vmem:[%s36344_s4 + $0x1] ss:$0 sm:$0xff] }
0x34df   :  { %30326 = vmatprep.subr.bf16.mxu1 %v34857_v33 }
0x34e1   :  { %28693 = vmatmul.mubr.f32.gmra.mrb[80].mxu1 %v21783_v29 }
0x34e2   :  { %30328 = vmatpush3.bf16.msra.mxu1 %v34857_v33  ;;  %28711 = vmatprep.mubr.f32.mxu1 %v34817_v50  ;;  %v36694_v33 = vld [vmem:[#allocation15_spill] sm:$0xff] }
0x34e3   :  { %30330 = vmatprep.subr.bf16.mxu1 %v34871_v34 }
0x34e6   :  { %30332 = vmatpush3.bf16.msra.mxu1 %v34871_v34 }
0x34e7   :  { %30334 = vmatprep.subr.bf16.mxu1 %v34876_v16 }
0x34ea   :  { %30336 = vmatpush3.bf16.msra.mxu1 %v34876_v16 }
0x34ed   :  { %28712 = vmatmul.mubr.f32.vlgmr.msra.gmra.mrb[78].mxu1 %v34855_v20 }
0x34ee   :  { %28714 = vmatprep.mubr.f32.mxu1 %v21773_v14 }
0x34f1   :  { %28715 = vmatmul.mubr.f32.gmra.mrb[80].mxu1 %v21783_v29  ;;  %v25537_v29 = vld [vmem:[%s36349_s9 + $0xa8] sm:$0xff] }
0x34f2   :  { %v22488_v14 = vand.u32 4294901760, %v25537_v29 }
0x34f4   :  { %v35001_v49 = vpack.c.bf16 %v22492_v53, %v22488_v14 }
0x34f6   :  { %30342 = vmatprep.subr.bf16.mxu0 %v35001_v49 }
0x34f7   :  { %30344 = vmatpush1.bf16.msra.mxu0 %v35003_v19 }
0x35c0   :  { %v28713_v63 = vpop.f32.mrb[78].mxu1 }
0x35c1   :  { %v22347_v24 = vadd.f32 %v28713_v63, %v33998_v13  ;;  %v22324_v50 = vpop.f32.mrb[79].mxu1  ;;  %v25543_v63 = vld [vmem:[%s36349_s9 + $0xd8] sm:$0xff] }
0x35c2   :  { %v22346_v25 = vadd.f32 %v22324_v50, %v36694_v33  ;;  %v25540_v50 = vld [vmem:[%s36349_s9 + $0xc0] sm:$0xff]  ;;  %v25542_v33 = vld [vmem:[%s36349_s9 + $0xd0] sm:$0xff] }
0x35c3   :  { %v34929_v54 = vadd.f32 %v25527_v52, %v22347_v24  ;;  %v22500_v24 = vand.u32 4294901760, %v25543_v63 }
0x35c4   :  { %v34931_v34 = vadd.f32 %v25527_v52, %v22346_v25  ;;  %v28716_v35 = vpop.f32.mrb[80].mxu1  ;;  %v22498_v25 = vand.u32 4294901760, %v25540_v50 }
0x35c5   :  { %36695 = vst [vmem:[#allocation20_spill] sm:$0xff] %v34929_v54  ;;  %v22336_v16 = vpop.f32.mrb[81].mxu1  ;;  %v22369_v20 = vsel %vm70_vm0, %v34929_v54, 0.0  ;;  %v22349_v12 = vadd.f32 %v28716_v35, %v36697_v61  ;;  %v22502_v35 = vand.u32 4294901760, %v25542_v33 }
0x35c6   :  { %36696 = vst [vmem:[#allocation19_spill] sm:$0xff] %v34931_v34  ;;  %v22348_v57 = vadd.f32 %v22336_v16, %v36698_v41  ;;  %22370 = vadd.xlane.f32.xlu1 %v22369_v20  ;;  %v22366_v13 = vsel %vm70_vm0, %v34931_v34, 0.0  ;;  %v35019_v16 = vsub.f32 %v25533_v21, %v22480_v28  ;;  %v35021_v20 = vsub.f32 %v25535_v18, %v22484_v8 }
0x35c7   :  { %22367 = vadd.xlane.f32.xlu0 %v22366_v13  ;;  %v34941_v58 = vadd.f32 %v25527_v52, %v22349_v12  ;;  %v35025_v12 = vsub.f32 %v25532_v9, %v22482_v3  ;;  %v35027_v41 = vsub.f32 %v25534_v17, %v22486_v45  ;;  %v35031_v13 = vsub.f32 %v25539_v15, %v22492_v53 }
0x35c8   :  { %v34939_v7 = vadd.f32 %v25527_v52, %v22348_v57  ;;  %v22496_v52 = vand.u32 4294901760, %v25541_v32  ;;  %v35029_v57 = vsub.f32 %v25537_v29, %v22488_v14 }
0x35c9   :  { %36700 = vst [vmem:[#allocation14_spill] sm:$0xff] %v34941_v58  ;;  %v22375_v55 = vsel %vm70_vm0, %v34941_v58, 0.0  ;;  %v36466_v21 = vand.u32 4294901760, %v35025_v12  ;;  %v36465_v18 = vand.u32 4294901760, %v35027_v41 }
0x35ca   :  { %36699 = vst [vmem:[#allocation13_spill] sm:$0xff] %v34939_v7  ;;  %v22372_v22 = vsel %vm70_vm0, %v34939_v7, 0.0  ;;  %v35023_v61 = vpack.c.bf16 %v22500_v24, %v22496_v52  ;;  %v22631_v53 = vand.u32 4294901760, %v35029_v57 }
0x35cb   :  { %22373 = vadd.xlane.f32.xlu0 %v22372_v22  ;;  %v25545_v22 = vld [vmem:[%s36349_s9 + $0xe8] sm:$0xff]  ;;  %v22614_v15 = vsub.f32 %v35025_v12, %v36466_v21  ;;  %v22626_v14 = vsub.f32 %v35027_v41, %v36465_v18 }
0x35cc   :  { %30346 = vmatprep.subr.bf16.mxu0 %v35023_v61 }
0x35cf   :  { %22376 = vadd.xlane.f32.xlu0 %v22375_v55  ;;  %v25547_v55 = vld [vmem:[%s36349_s9 + $0xf8] sm:$0xff] }
0x3653   :  { %v22371_v5 = vpop.xlane.xlu1 %22370 }
0x3654   :  { %v22379_v31 = vmul.f32 0.015625, %v22371_v5  ;;  %v22368_v11 = vpop.xlane.xlu0 %22367  ;;  %v25544_v5 = vld [vmem:[%s36349_s9 + $0xe0] sm:$0xff] }
0x3655   :  { %v22378_v23 = vmul.f32 0.015625, %v22368_v11  ;;  %v35044_v11 = vsub.f32 %v25538_v48, %v22494_v51 }
0x3656   :  { %v34948_v60 = vsub.f32 %v34929_v54, %v22379_v31  ;;  %v35042_v31 = vsub.f32 %v25536_v43, %v22490_v4  ;;  %v22643_v43 = vand.u32 4294901760, %v35031_v13 }
0x3657   :  { %v34951_v36 = vsub.f32 %v34931_v34, %v22378_v23  ;;  %v35047_v23 = vsub.f32 %v25541_v32, %v22496_v52  ;;  %v22615_v32 = vand.u32 4294901760, %v22614_v15  ;;  %v22627_v52 = vand.u32 4294901760, %v22626_v14 }
0x3658   :  { %v22374_v1 = vpop.xlane.xlu0 %22373  ;;  %v22387_v10 = vmul.f32 %v34948_v60, %v34948_v60  ;;  %v22637_v48 = vand.u32 4294901760, %v35042_v31 }
0x3659   :  { %v22380_v47 = vmul.f32 0.015625, %v22374_v1  ;;  %v22386_v6 = vmul.f32 %v34951_v36, %v34951_v36  ;;  %v35049_v1 = vsub.f32 %v25543_v63, %v22500_v24  ;;  %v22649_v63 = vand.u32 4294901760, %v35044_v11 }
0x365a   :  { %v22393_v62 = vsel %vm70_vm0, %v22387_v10, 0.0  ;;  %v25546_v10 = vld [vmem:[%s36349_s9 + $0xf0] sm:$0xff]  ;;  %v22632_v24 = vsub.f32 %v35029_v57, %v22631_v53 }
0x365b   :  { %v34959_v46 = vsub.f32 %v34939_v7, %v22380_v47  ;;  %22394 = vadd.xlane.f32.xlu1 %v22393_v62  ;;  %v22390_v37 = vsel %vm70_vm0, %v22386_v6, 0.0  ;;  %v35054_v47 = vpack.c.bf16 %v22502_v35, %v22498_v25  ;;  %v35056_v6 = vsub.f32 %v25540_v50, %v22498_v25 }
0x365c   :  { %22391 = vadd.xlane.f32.xlu0 %v22390_v37  ;;  %v22377_v2 = vpop.xlane.xlu0 %22376  ;;  %v35058_v62 = vsub.f32 %v25542_v33, %v22502_v35  ;;  %v22504_v37 = vand.u32 4294901760, %v25545_v22  ;;  %v22644_v50 = vsub.f32 %v35031_v13, %v22643_v43  ;;  %v22638_v33 = vsub.f32 %v35042_v31, %v22637_v48 }
0x365d   :  { %v22381_v0 = vmul.f32 0.015625, %v22377_v2  ;;  %v22388_v26 = vmul.f32 %v34959_v46, %v34959_v46  ;;  %v22508_v2 = vand.u32 4294901760, %v25547_v55  ;;  %30348 = vmatpush1.bf16.msra.mxu0 %v35054_v47  ;;  %v22650_v35 = vsub.f32 %v35044_v11, %v22649_v63 }
0x365e   :  { %v22673_v14 = vand.u32 4294901760, %v35058_v62 }
0x365f   :  { %v34965_v40 = vsub.f32 %v34941_v58, %v22381_v0  ;;  %v22396_v38 = vsel %vm70_vm0, %v22388_v26, 0.0  ;;  %v22506_v0 = vand.u32 4294901760, %v25544_v5  ;;  %v22510_v26 = vand.u32 4294901760, %v25546_v10 }
0x3660   :  { %22397 = vadd.xlane.f32.xlu0 %v22396_v38  ;;  %v36468_v38 = vand.u32 4294901760, %v35019_v16  ;;  %v35067_v28 = vpack.c.bf16 %v22508_v2, %v22504_v37  ;;  %v35069_v8 = vsub.f32 %v25547_v55, %v22508_v2  ;;  %v22667_v55 = vand.u32 4294901760, %v35049_v1 }
0x3661   :  { %v22389_v59 = vmul.f32 %v34965_v40, %v34965_v40  ;;  %v35071_v9 = vpack.c.bf16 %v22510_v26, %v22506_v0  ;;  %v35073_v17 = vsub.f32 %v25544_v5, %v22506_v0  ;;  %v35075_v3 = vsub.f32 %v25546_v10, %v22510_v26 }
0x3662   :  { %v22608_v45 = vsub.f32 %v35019_v16, %v36468_v38  ;;  %30350 = vmatprep.subr.bf16.mxu0 %v35067_v28  ;;  %v35101_v5 = vpack.c.bf16 %v22627_v52, %v22615_v32  ;;  %v22633_v10 = vand.u32 4294901760, %v22632_v24  ;;  %v22639_v2 = vand.u32 4294901760, %v22638_v33 }
0x3663   :  { %v22399_v30 = vsel %vm70_vm0, %v22389_v59, 0.0  ;;  %v35062_v59 = vsub.f32 %v25545_v22, %v22504_v37  ;;  %30352 = vmatpush1.bf16.msra.mxu0 %v35071_v9  ;;  %v22655_v22 = vand.u32 4294901760, %v35047_v23  ;;  %v22645_v37 = vand.u32 4294901760, %v22644_v50 }
0x3664   :  { %22400 = vadd.xlane.f32.xlu1 %v22399_v30  ;;  %v36467_v30 = vand.u32 4294901760, %v35021_v20  ;;  %v22609_v4 = vand.u32 4294901760, %v22608_v45  ;;  %v22651_v0 = vand.u32 4294901760, %v22650_v35  ;;  %v22668_v45 = vsub.f32 %v35049_v1, %v22667_v55 }
0x3665   :  { %v22656_v26 = vsub.f32 %v35047_v23, %v22655_v22  ;;  %v35106_v15 = vpack.c.bf16 %v22645_v37, %v22633_v10  ;;  %v22674_v33 = vsub.f32 %v35058_v62, %v22673_v14  ;;  %v22685_v10 = vand.u32 4294901760, %v35073_v17 }
0x3666   :  { %v22620_v29 = vsub.f32 %v35021_v20, %v36467_v30  ;;  %v35111_v32 = vpack.c.bf16 %v22651_v0, %v22639_v2  ;;  %v22669_v24 = vand.u32 4294901760, %v22668_v45  ;;  %v22697_v21 = vand.u32 4294901760, %v35075_v3 }
0x3667   :  { %v22657_v52 = vand.u32 4294901760, %v22656_v26  ;;  %v22675_v30 = vand.u32 4294901760, %v22674_v33  ;;  %v22686_v26 = vsub.f32 %v35073_v17, %v22685_v10 }
0x3668   :  { %v22621_v51 = vand.u32 4294901760, %v22620_v29  ;;  %v22661_v29 = vand.u32 4294901760, %v35056_v6  ;;  %v22698_v45 = vsub.f32 %v35075_v3, %v22697_v21 }
0x3669   :  { %v35118_v37 = vpack.c.bf16 %v22669_v24, %v22657_v52  ;;  %v22687_v7 = vand.u32 4294901760, %v22686_v26  ;;  %v36704_v26 = vand.u32 4294901760, %v35027_v41 }
0x366a   :  { %v30353_v25 = vpack.c.bf16 %v22621_v51, %v22609_v4  ;;  %v22679_v4 = vand.u32 4294901760, %v35062_v59  ;;  %v22691_v51 = vand.u32 4294901760, %v35069_v8  ;;  %v22662_v50 = vsub.f32 %v35056_v6, %v22661_v29 }
0x366b   :  { %v22699_v54 = vand.u32 4294901760, %v22698_v45  ;;  %v35163_v33 = vpack.c.bf16 %v22673_v14, %v22661_v29 }
0x366c   :  { %30354 = vmatprep.subr.bf16.mxu0 %v30353_v25  ;;  %v22680_v25 = vsub.f32 %v35062_v59, %v22679_v4  ;;  %v22692_v35 = vsub.f32 %v35069_v8, %v22691_v51  ;;  %v22663_v18 = vand.u32 4294901760, %v22662_v50  ;;  %v35167_v50 = vpack.c.bf16 %v22697_v21, %v22685_v10  ;;  %v25530_v21 = vld [vmem:[%s36347_s7 + $0x1] ss:$0 sm:$0xff] }
0x366d   :  { %v35127_v34 = vpack.c.bf16 %v22699_v54, %v22687_v7  ;;  %v35161_v54 = vpack.c.bf16 %v22667_v55, %v22655_v22  ;;  %v35165_v7 = vpack.c.bf16 %v22691_v51, %v22679_v4 }
0x366e   :  { %v22681_v2 = vand.u32 4294901760, %v22680_v25  ;;  %v22693_v0 = vand.u32 4294901760, %v22692_v35  ;;  %v35123_v38 = vpack.c.bf16 %v22675_v30, %v22663_v18  ;;  %v36701_v25 = vand.u32 4294901760, %v35019_v16 }
0x366f   :  { %v36702_v35 = vand.u32 4294901760, %v35021_v20  ;;  %v35157_v30 = vpack.c.bf16 %v22643_v43, %v22631_v53  ;;  %v35159_v18 = vpack.c.bf16 %v22649_v63, %v22637_v48 }
0x3670   :  { %v35125_v58 = vpack.c.bf16 %v22693_v0, %v22681_v2  ;;  %v36703_v0 = vand.u32 4294901760, %v35025_v12 }
0x3671   :  { %v35149_v2 = vpack.c.bf16 %v36702_v35, %v36701_v25 }
0x3672   :  { %v35155_v45 = vpack.c.bf16 %v36704_v26, %v36703_v0 }
0x36e8   :  { %v22395_v25 = vpop.xlane.xlu1 %22394 }
0x36e9   :  { %v22403_v35 = vmul.f32 0.015625, %v22395_v25  ;;  %v22392_v24 = vpop.xlane.xlu0 %22391 }
0x36ea   :  { %v22402_v52 = vmul.f32 0.015625, %v22392_v24 }
0x36eb   :  { %v22407_v44 = vadd.f32 1e-05, %v22403_v35 }
0x36ec   :  { %v22406_v56 = vadd.f32 1e-05, %v22402_v52 }
0x36ed   :  { %31500 = vrsqrt.f32 %v22407_v44  ;;  %v22398_v0 = vpop.xlane.xlu0 %22397 }
0x36ee   :  { %31502 = vrsqrt.f32 %v22406_v56  ;;  %v22404_v53 = vmul.f32 0.015625, %v22398_v0  ;;  %v25531_v56 = vld [vmem:[%s36348_s8 + $0x1] ss:$0 sm:$0xff] }
0x36f0   :  { %v22408_v43 = vadd.f32 1e-05, %v22404_v53 }
0x36f1   :  { %v22401_v48 = vpop.xlane.xlu1 %22400 }
0x36f2   :  { %31504 = vrsqrt.f32 %v22408_v43  ;;  %v22405_v63 = vmul.f32 0.015625, %v22401_v48 }
0x36f4   :  { %v22409_v22 = vadd.f32 1e-05, %v22405_v63 }
0x36f6   :  { %31506 = vrsqrt.f32 %v22409_v22 }
0x36f7   :  { %v31501_v55 = vpop.eup %31500 }
0x36f8   :  { %v31503_v29 = vpop.eup %31502  ;;  %v22415_v14 = vmul.f32 %v31501_v55, %v34948_v60 }
0x36f9   :  { %v22414_v4 = vmul.f32 %v31503_v29, %v34951_v36 }
0x36fa   :  { %v22425_v44 = vmul.f32 %v25530_v21, %v22415_v14 }
0x36fb   :  { %v22424_v51 = vmul.f32 %v25530_v21, %v22414_v4 }
0x36fc   :  { %v31505_v10 = vpop.eup %31504  ;;  %v22435_v52 = vadd.f32 %v25531_v56, %v22425_v44 }
0x36fd   :  { %v22416_v24 = vmul.f32 %v31505_v10, %v34959_v46  ;;  %v22434_v26 = vadd.f32 %v25531_v56, %v22424_v51 }
0x36fe   :  { %v22472_v25 = vsel %vm70_vm0, %v22435_v52, 0 }
0x36ff   :  { %v22469_v35 = vsel %vm70_vm0, %v22434_v26, 0  ;;  %v35180_v0 = vand.u32 4294901760, %v22472_v25  ;;  %v22426_v60 = vmul.f32 %v25530_v21, %v22416_v24 }
0x3700   :  { %v31507_v53 = vpop.eup %31506  ;;  %v35182_v36 = vand.u32 4294901760, %v22469_v35 }
0x3701   :  { %v22417_v43 = vmul.f32 %v31507_v53, %v34965_v40  ;;  %v35186_v48 = vsub.f32 %v22472_v25, %v35180_v0  ;;  %v22436_v63 = vadd.f32 %v25531_v56, %v22426_v60 }
0x3702   :  { %v35189_v22 = vsub.f32 %v22469_v35, %v35182_v36 }
0x3703   :  { %v22475_v46 = vsel %vm70_vm0, %v22436_v63, 0  ;;  %v22427_v55 = vmul.f32 %v25530_v21, %v22417_v43  ;;  %v22574_v14 = vand.u32 4294901760, %v35186_v48 }
0x3704   :  { %v22563_v29 = vand.u32 4294901760, %v35189_v22  ;;  %v35194_v4 = vand.u32 4294901760, %v22475_v46 }
0x3705   :  { %v22437_v44 = vadd.f32 %v25531_v56, %v22427_v55  ;;  %v22575_v21 = vsub.f32 %v35186_v48, %v22574_v14  ;;  %v35430_v55 = vld [vmem:[%s36351_s11 + $0x1a8] sm:$0xff] }
0x3706   :  { %v22564_v40 = vsub.f32 %v35189_v22, %v22563_v29  ;;  %v35200_v51 = vsub.f32 %v22475_v46, %v35194_v4 }
0x3707   :  { %v22478_v10 = vsel %vm70_vm0, %v22437_v44, 0  ;;  %v22576_v25 = vand.u32 4294901760, %v22575_v21  ;;  %v35442_v21 = vld [vmem:[%s36351_s11 + $0x120] sm:$0xff] }
0x3708   :  { %v22565_v52 = vand.u32 4294901760, %v22564_v40  ;;  %v22585_v24 = vand.u32 4294901760, %v35200_v51  ;;  %v35207_v26 = vand.u32 4294901760, %v22478_v10 }
0x370a   :  { %22566 = vmatmul.mubr.f32.vlgmr.msra.gmra.mrb[72].mxu0 %v22565_v52  ;;  %v35210_v56 = vsub.f32 %v22478_v10, %v35207_v26  ;;  %v22586_v35 = vsub.f32 %v35200_v51, %v22585_v24 }
0x370b   :  { %30356 = vmatpush1.bf16.msra.mxu0 %v35101_v5  ;;  %22571 = vmatprep.mubr.f32.mxu0 %v36668_v27 }
0x370c   :  { %30358 = vmatprep.subr.bf16.mxu0 %v35106_v15  ;;  %v22596_v60 = vand.u32 4294901760, %v35210_v56  ;;  %v22587_v53 = vand.u32 4294901760, %v22586_v35  ;;  %v23427_v35 = vand.u32 4294901760, %v35430_v55 }
0x370e   :  { %22577 = vmatmul.mubr.f32.gmra.mrb[74].mxu0 %v22576_v25  ;;  %v22597_v5 = vsub.f32 %v35210_v56, %v22596_v60 }
0x370f   :  { %30360 = vmatpush1.bf16.msra.mxu0 %v35111_v32  ;;  %22582 = vmatprep.mubr.f32.mxu0 %v36668_v27  ;;  %v36705_v32 = vpack.c.bf16 %v35021_v20, %v35019_v16  ;;  %v36709_v16 = vpack.c.bf16 %v35049_v1, %v35047_v23  ;;  %v36710_v20 = vpack.c.bf16 %v35058_v62, %v35056_v6  ;;  %v35364_v6 = vld [vmem:[%s36351_s11 + $0x190] sm:$0xff]  ;;  %v35369_v62 = vld [vmem:[%s36351_s11 + $0x198] sm:$0xff] }
0x3710   :  { %30362 = vmatprep.subr.bf16.mxu0 %v35118_v37  ;;  %v22598_v15 = vand.u32 4294901760, %v22597_v5  ;;  %v36706_v37 = vpack.c.bf16 %v35027_v41, %v35025_v12  ;;  %v36711_v12 = vpack.c.bf16 %v35069_v8, %v35062_v59  ;;  %v36712_v41 = vpack.c.bf16 %v35075_v3, %v35073_v17  ;;  %v35383_v17 = vld [vmem:[%s36351_s11 + $0x118] sm:$0xff] }
0x3711   :  { %v23421_v8 = vand.u32 4294901760, %v35369_v62 }
0x3712   :  { %22588 = vmatmul.mubr.f32.gmra.mrb[76].mxu0 %v22587_v53 }
0x3713   :  { %30364 = vmatpush1.bf16.msra.mxu0 %v35123_v38  ;;  %22593 = vmatprep.mubr.f32.mxu0 %v36668_v27 }
0x3714   :  { %30366 = vmatprep.subr.bf16.mxu0 %v35125_v58  ;;  %v36707_v58 = vpack.c.bf16 %v35031_v13, %v35029_v57  ;;  %v35337_v57 = vld [vmem:[%s36351_s11 + $0x108] sm:$0xff] }
0x3716   :  { %22599 = vmatmul.mubr.f32.gmra.mrb[78].mxu0 %v22598_v15  ;;  %v23376_v15 = vand.u32 4294901760, %v35442_v21 }
0x3717   :  { %30368 = vmatpush1.bf16.msra.mxu0 %v35127_v34  ;;  %22749 = vmatprep.mubr.f32.mxu0 %v36668_v27  ;;  %v36708_v34 = vpack.c.bf16 %v35044_v11, %v35042_v31  ;;  %v23367_v31 = vand.u32 4294901760, %v35337_v57 }
0x3718   :  { %30370 = vmatprep.subr.bf16.mxu0 %v36705_v32 }
0x371a   :  { %22751 = vmatmul.mubr.f32.vlgmr.msra.gmra.mrb[72].mxu0 %v35182_v36 }
0x371b   :  { %30372 = vmatpush1.bf16.msra.mxu0 %v36706_v37  ;;  %22756 = vmatprep.mubr.f32.mxu0 %v36668_v27 }
0x371c   :  { %30374 = vmatprep.subr.bf16.mxu0 %v36707_v58  ;;  %v35468_v58 = vsub.f32 %v35430_v55, %v23427_v35 }
0x371e   :  { %22758 = vmatmul.mubr.f32.gmra.mrb[74].mxu0 %v35180_v0 }
0x371f   :  { %30376 = vmatpush1.bf16.msra.mxu0 %v36708_v34  ;;  %22763 = vmatprep.mubr.f32.mxu0 %v36668_v27 }
0x3720   :  { %30378 = vmatprep.subr.bf16.mxu0 %v36709_v16  ;;  %v35474_v16 = vld [vmem:[%s36351_s11 + $0x1b0] sm:$0xff] }
0x3722   :  { %22765 = vmatmul.mubr.f32.gmra.mrb[76].mxu0 %v35194_v4 }
0x3723   :  { %30380 = vmatpush1.bf16.msra.mxu0 %v36710_v20  ;;  %22770 = vmatprep.mubr.f32.mxu0 %v36668_v27  ;;  %v35479_v20 = vld [vmem:[%s36351_s11 + $0x1b8] sm:$0xff] }
0x3724   :  { %30382 = vmatprep.subr.bf16.mxu0 %v36711_v12 }
0x3726   :  { %22772 = vmatmul.mubr.f32.gmra.mrb[78].mxu0 %v35207_v26 }
0x3727   :  { %30384 = vmatpush1.bf16.msra.mxu0 %v36712_v41  ;;  %22874 = vmatprep.mubr.f32.mxu0 %v36668_v27 }
0x3728   :  { %30386 = vmatprep.subr.bf16.mxu0 %v34983_v42 }
0x372a   :  { %22877 = vmatmul.mubr.f32.vlgmr.msra.gmra.mrb[72].mxu0 %v35189_v22 }
0x372b   :  { %30388 = vmatpush1.bf16.msra.mxu0 %v34985_v39  ;;  %22882 = vmatprep.mubr.f32.mxu0 %v36668_v27 }
0x372c   :  { %30390 = vmatprep.subr.bf16.mxu0 %v35001_v49 }
0x372e   :  { %22885 = vmatmul.mubr.f32.gmra.mrb[74].mxu0 %v35186_v48  ;;  %v35424_v48 = vld [vmem:[%s36351_s11 + $0x1a0] sm:$0xff] }
0x372f   :  { %30392 = vmatpush1.bf16.msra.mxu0 %v35003_v19  ;;  %22890 = vmatprep.mubr.f32.mxu0 %v36668_v27  ;;  %v23424_v52 = vand.u32 4294901760, %v35424_v48 }
0x3730   :  { %30394 = vmatprep.subr.bf16.mxu0 %v35023_v61 }
0x3731   :  { %v35462_v5 = vsub.f32 %v35424_v48, %v23424_v52 }
0x3732   :  { %22893 = vmatmul.mubr.f32.gmra.mrb[76].mxu0 %v35200_v51 }
0x3733   :  { %30396 = vmatpush1.bf16.msra.mxu0 %v35054_v47  ;;  %22898 = vmatprep.mubr.f32.mxu0 %v36668_v27  ;;  %v36474_v41 = vand.u32 4294901760, %v35462_v5 }
0x3734   :  { %30398 = vmatprep.subr.bf16.mxu0 %v35067_v28 }
0x3736   :  { %22901 = vmatmul.mubr.f32.gmra.mrb[78].mxu0 %v35210_v56 }
0x3737   :  { %30400 = vmatpush1.bf16.msra.mxu0 %v35071_v9  ;;  %22987 = vmatprep.mubr.f32.mxu0 %v36668_v27 }
0x3738   :  { %30402 = vmatprep.subr.bf16.mxu0 %v35149_v2  ;;  %v35403_v2 = vsub.f32 %v35369_v62, %v23421_v8 }
0x373a   :  { %22991 = vmatmul.mubr.f32.vlgmr.msra.gmra.mrb[72].mxu0 %v22563_v29 }
0x373b   :  { %30404 = vmatpush1.bf16.msra.mxu0 %v35155_v45  ;;  %22996 = vmatprep.mubr.f32.mxu0 %v36668_v27 }
0x373c   :  { %30406 = vmatprep.subr.bf16.mxu0 %v35157_v30  ;;  %v23373_v30 = vand.u32 4294901760, %v35383_v17 }
0x373e   :  { %23000 = vmatmul.mubr.f32.gmra.mrb[74].mxu0 %v22574_v14  ;;  %v35419_v43 = vsub.f32 %v35383_v17, %v23373_v30 }
0x373f   :  { %30408 = vmatpush1.bf16.msra.mxu0 %v35159_v18  ;;  %23005 = vmatprep.mubr.f32.mxu0 %v36668_v27 }
0x3740   :  { %30410 = vmatprep.subr.bf16.mxu0 %v35161_v54  ;;  %v36475_v10 = vand.u32 4294901760, %v35419_v43 }
0x3742   :  { %23009 = vmatmul.mubr.f32.gmra.mrb[76].mxu0 %v22585_v24  ;;  %v35447_v24 = vld [vmem:[%s36351_s11 + $0x128] sm:$0xff]  ;;  %v23545_v53 = vsub.f32 %v35419_v43, %v36475_v10 }
0x3743   :  { %30412 = vmatpush1.bf16.msra.mxu0 %v35163_v33  ;;  %23014 = vmatprep.mubr.f32.mxu0 %v36668_v27  ;;  %v23379_v34 = vand.u32 4294901760, %v35447_v24 }
0x3744   :  { %30414 = vmatprep.subr.bf16.mxu0 %v35165_v7  ;;  %v23546_v12 = vand.u32 4294901760, %v23545_v53 }
0x3745   :  { %v35670_v55 = vpack.c.bf16 %v23379_v34, %v23376_v15 }
0x3746   :  { %23018 = vmatmul.mubr.f32.gmra.mrb[78].mxu0 %v22596_v60 }
0x3747   :  { %30416 = vmatpush1.bf16.msra.mxu0 %v35167_v50  ;;  %23136 = vmatprep.mubr.f32.mxu0 %v36668_v27 }
0x3748   :  { %30418 = vmatprep.subr.bf16.mxu0 %v34983_v42  ;;  %v35320_v42 = vld [vmem:[%s36351_s11 + $0x180] sm:$0xff] }
0x374a   :  { %23138 = vmatmul.mubr.f32.vlgmr.msra.gmra.mrb[72].mxu0 %v35182_v36 }
0x374b   :  { %30420 = vmatpush1.bf16.msra.mxu0 %v34985_v39  ;;  %23143 = vmatprep.mubr.f32.mxu0 %v36668_v27  ;;  %v35325_v39 = vld [vmem:[%s36351_s11 + $0x188] sm:$0xff] }
0x374c   :  { %30422 = vmatprep.subr.bf16.mxu0 %v35001_v49  ;;  %v23412_v49 = vand.u32 4294901760, %v35320_v42 }
0x374e   :  { %23145 = vmatmul.mubr.f32.gmra.mrb[74].mxu0 %v35180_v0  ;;  %v35344_v11 = vsub.f32 %v35320_v42, %v23412_v49 }
0x374f   :  { %30424 = vmatpush1.bf16.msra.mxu0 %v35003_v19  ;;  %23150 = vmatprep.mubr.f32.mxu0 %v36668_v27  ;;  %v23415_v19 = vand.u32 4294901760, %v35325_v39 }
0x3750   :  { %30426 = vmatprep.subr.bf16.mxu0 %v35023_v61  ;;  %v35332_v61 = vld [vmem:[%s36351_s11 + $0x100] sm:$0xff]  ;;  %36713 = vst [vmem:[#allocation22_spill] sm:$0xff] %v35344_v11  ;;  %v36491_v38 = vand.u32 4294901760, %v35344_v11 }
0x3751   :  { %v23364_v13 = vand.u32 4294901760, %v35332_v61  ;;  %v35349_v23 = vsub.f32 %v35325_v39, %v23415_v19  ;;  %v35547_v39 = vld [vmem:[%s36351_s11 + $0x1c8] sm:$0xff] }
0x3752   :  { %23152 = vmatmul.mubr.f32.gmra.mrb[76].mxu0 %v35194_v4  ;;  %v23636_v18 = vsub.f32 %v35344_v11, %v36491_v38 }
0x3753   :  { %30428 = vmatpush1.bf16.msra.mxu0 %v35054_v47  ;;  %23157 = vmatprep.mubr.f32.mxu0 %v36668_v27  ;;  %36714 = vst [vmem:[#allocation21_spill] sm:$0xff] %v35349_v23  ;;  %v35354_v1 = vsub.f32 %v35332_v61, %v23364_v13  ;;  %v35359_v47 = vsub.f32 %v35337_v57, %v23367_v31  ;;  %v36489_v59 = vand.u32 4294901760, %v35349_v23  ;;  %v35583_v61 = vld [vmem:[%s36351_s11 + $0x148] sm:$0xff] }
0x3754   :  { %30430 = vmatprep.subr.bf16.mxu0 %v35067_v28  ;;  %v23418_v28 = vand.u32 4294901760, %v35364_v6  ;;  %v23637_v63 = vand.u32 4294901760, %v23636_v18  ;;  %v35485_v18 = vsub.f32 %v35442_v21, %v23376_v15 }
0x3755   :  { %v36483_v3 = vand.u32 4294901760, %v35354_v1  ;;  %v36482_v50 = vand.u32 4294901760, %v35359_v47  ;;  %v23643_v54 = vsub.f32 %v35349_v23, %v36489_v59 }
0x3756   :  { %23159 = vmatmul.mubr.f32.gmra.mrb[78].mxu0 %v35207_v26  ;;  %v35398_v7 = vsub.f32 %v35364_v6, %v23418_v28  ;;  %v35615_v6 = vld [vmem:[%s36351_s11 + $0x1d8] sm:$0xff] }
0x3757   :  { %30432 = vmatpush1.bf16.msra.mxu0 %v35071_v9  ;;  %23245 = vmatprep.mubr.f32.mxu0 %v36668_v27  ;;  %v35378_v9 = vld [vmem:[%s36351_s11 + $0x110] sm:$0xff]  ;;  %v23524_v45 = vsub.f32 %v35354_v1, %v36483_v3  ;;  %v23644_v22 = vand.u32 4294901760, %v23643_v54  ;;  %v23430_v54 = vand.u32 4294901760, %v35474_v16 }
0x3758   :  { %v23370_v33 = vand.u32 4294901760, %v35378_v9  ;;  %v36481_v46 = vand.u32 4294901760, %v35398_v7 }
0x3759   :  { %v23525_v29 = vand.u32 4294901760, %v23524_v45  ;;  %v30465_v40 = vpack.c.bf16 %v23644_v22, %v23637_v63  ;;  %v35491_v45 = vld [vmem:[%s36351_s11 + $0x130] sm:$0xff]  ;;  %v36473_v63 = vand.u32 4294901760, %v35468_v58  ;;  %v35497_v22 = vsub.f32 %v35447_v24, %v23379_v34 }
0x375a   :  { %23247 = vmatmul.mubr.f32.vlgmr.msra.gmra.mrb[72].mxu0 %v35182_v36  ;;  %v35414_v36 = vsub.f32 %v35378_v9, %v23370_v33  ;;  %v23650_v51 = vsub.f32 %v35398_v7, %v36481_v46 }
0x375b   :  { %23252 = vmatprep.mubr.f32.mxu0 %v36668_v27  ;;  %30466 = vmatprep.subr.bf16.mxu0 %v30465_v40  ;;  %v23664_v40 = vsub.f32 %v35462_v5, %v36474_v41 }
0x375c   :  { %v36476_v44 = vand.u32 4294901760, %v35414_v36  ;;  %v23651_v60 = vand.u32 4294901760, %v23650_v51  ;;  %v36478_v51 = vand.u32 4294901760, %v35485_v18 }
0x375e   :  { %23254 = vmatmul.mubr.f32.gmra.mrb[74].mxu0 %v35180_v0  ;;  %v23531_v0 = vsub.f32 %v35359_v47, %v36482_v50  ;;  %v23538_v25 = vsub.f32 %v35414_v36, %v36476_v44 }
0x375f   :  { %23259 = vmatprep.mubr.f32.mxu0 %v36668_v27 }
0x3760   :  { %v23532_v14 = vand.u32 4294901760, %v23531_v0  ;;  %v23539_v37 = vand.u32 4294901760, %v23538_v25  ;;  %v23671_v25 = vsub.f32 %v35468_v58, %v36473_v63  ;;  %v23552_v63 = vsub.f32 %v35485_v18, %v36478_v51 }
0x3762   :  { %23261 = vmatmul.mubr.f32.gmra.mrb[76].mxu0 %v35194_v4  ;;  %v36480_v4 = vand.u32 4294901760, %v35403_v2  ;;  %v23672_v10 = vand.u32 4294901760, %v23671_v25 }
0x3763   :  { %23266 = vmatprep.mubr.f32.mxu0 %v36668_v27 }
0x3764   :  { %v23657_v56 = vsub.f32 %v35403_v2, %v36480_v4 }
0x3766   :  { %23268 = vmatmul.mubr.f32.gmra.mrb[78].mxu0 %v35207_v26  ;;  %v30467_v26 = vpack.c.bf16 %v23532_v14, %v23525_v29  ;;  %v23658_v32 = vand.u32 4294901760, %v23657_v56  ;;  %v23433_v29 = vand.u32 4294901760, %v35479_v20  ;;  %v30471_v14 = vpack.c.bf16 %v23546_v12, %v23539_v37  ;;  %v35512_v56 = vld [vmem:[%s36351_s11 + $0x138] sm:$0xff]  ;;  %v35527_v37 = vld [vmem:[%s36351_s11 + $0x1c0] sm:$0xff] }
0x3767   :  { %v35533_v12 = vpack.c.bf16 %v23415_v19, %v23412_v49  ;;  %v23385_v42 = vand.u32 4294901760, %v35512_v56  ;;  %v23553_v49 = vand.u32 4294901760, %v23552_v63  ;;  %v23436_v25 = vand.u32 4294901760, %v35527_v37 }
0x3768   :  { %30468 = vmatpush3.bf16.msra.mxu0 %v30467_v26  ;;  %v30469_v0 = vpack.c.bf16 %v23658_v32, %v23651_v60  ;;  %v35507_v26 = vsub.f32 %v35474_v16, %v23430_v54  ;;  %v36477_v60 = vand.u32 4294901760, %v35497_v22  ;;  %v35521_v53 = vsub.f32 %v35479_v20, %v23433_v29 }
0x3769   :  { %v23382_v32 = vand.u32 4294901760, %v35491_v45  ;;  %30434 = vmatprep.subr.bf16.mxu1 %v35533_v12  ;;  %v35568_v63 = vpack.c.bf16 %v23367_v31, %v23364_v13  ;;  %v35577_v3 = vsub.f32 %v35512_v56, %v23385_v42  ;;  %v35589_v31 = vsub.f32 %v35527_v37, %v23436_v25  ;;  %v25562_v56 = vld [vmem:[%s36351_s11 + $0x168] sm:$0xff] }
0x376a   :  { %30470 = vmatprep.subr.bf16.mxu0 %v30469_v0  ;;  %v23665_v0 = vand.u32 4294901760, %v23664_v40  ;;  %v36479_v41 = vand.u32 4294901760, %v35507_v26  ;;  %v23559_v44 = vsub.f32 %v35497_v22, %v36477_v60  ;;  %v35562_v60 = vld [vmem:[%s36351_s11 + $0x140] sm:$0xff]  ;;  %v36715_v37 = vand.u32 4294901760, %v35583_v61 }
0x376b   :  { %v35556_v40 = vsub.f32 %v35491_v45, %v23382_v32  ;;  %30436 = vmatpush3.bf16.msra.mxu1 %v35568_v63 }
0x376c   :  { %30472 = vmatpush3.bf16.msra.mxu0 %v30471_v14  ;;  %v36485_v14 = vand.u32 4294901760, %v35521_v53  ;;  %v23678_v19 = vsub.f32 %v35507_v26, %v36479_v41  ;;  %v30473_v51 = vpack.c.bf16 %v23672_v10, %v23665_v0  ;;  %v23560_v41 = vand.u32 4294901760, %v23559_v44 }
0x376d   :  { %v36484_v50 = vand.u32 4294901760, %v35556_v40  ;;  %v23439_v10 = vand.u32 4294901760, %v35547_v39  ;;  %v23388_v44 = vand.u32 4294901760, %v35562_v60  ;;  %v35596_v0 = vpack.c.bf16 %v23421_v8, %v23418_v28 }
0x376e   :  { %v23685_v4 = vsub.f32 %v35521_v53, %v36485_v14  ;;  %v23679_v46 = vand.u32 4294901760, %v23678_v19  ;;  %30474 = vmatprep.subr.bf16.mxu0 %v30473_v51  ;;  %v30475_v57 = vpack.c.bf16 %v23560_v41, %v23553_v49  ;;  %v36487_v41 = vand.u32 4294901760, %v35577_v3  ;;  %v35610_v49 = vld [vmem:[%s36351_s11 + $0x1d0] sm:$0xff] }
0x376f   :  { %v23566_v51 = vsub.f32 %v35556_v40, %v36484_v50  ;;  %v35621_v28 = vpack.c.bf16 %v23373_v30, %v23370_v33  ;;  %v36486_v8 = vand.u32 4294901760, %v35589_v31  ;;  %v36495_v19 = vand.u32 4294901760, %v35583_v61  ;;  %30438 = vmatprep.subr.bf16.mxu1 %v35596_v0 }
0x3770   :  { %v23686_v13 = vand.u32 4294901760, %v23685_v4  ;;  %v35605_v4 = vsub.f32 %v35547_v39, %v23439_v10  ;;  %30476 = vmatpush3.bf16.msra.mxu0 %v30475_v57  ;;  %v23573_v14 = vsub.f32 %v35577_v3, %v36487_v41  ;;  %v35633_v9 = vsub.f32 %v35562_v60, %v23388_v44  ;;  %v35659_v41 = vld [vmem:[%s36351_s11 + $0x150] sm:$0xff]  ;;  %v25580_v60 = vld [vmem:[%s36351_s11 + $0x1f8] sm:$0xff] }
0x3771   :  { %v23567_v50 = vand.u32 4294901760, %v23566_v51  ;;  %30440 = vmatpush3.bf16.msra.mxu1 %v35621_v28  ;;  %v23692_v17 = vsub.f32 %v35589_v31, %v36486_v8  ;;  %v35642_v33 = vsub.f32 %v35583_v61, %v36495_v19  ;;  %v36494_v30 = vand.u32 4294901760, %v35610_v49 }
0x3772   :  { %v30477_v62 = vpack.c.bf16 %v23686_v13, %v23679_v46  ;;  %v36488_v57 = vand.u32 4294901760, %v35605_v4  ;;  %v36493_v46 = vand.u32 4294901760, %v35615_v6  ;;  %v23574_v13 = vand.u32 4294901760, %v23573_v14  ;;  %v35664_v14 = vld [vmem:[%s36351_s11 + $0x158] sm:$0xff] }
0x3773   :  { %v35650_v51 = vpack.c.bf16 %v23427_v35, %v23424_v52  ;;  %v36490_v8 = vand.u32 4294901760, %v35633_v9  ;;  %v23693_v48 = vand.u32 4294901760, %v23692_v17  ;;  %v36492_v52 = vand.u32 4294901760, %v35642_v33 }
0x3774   :  { %30478 = vmatprep.subr.bf16.mxu0 %v30477_v62  ;;  %v23699_v62 = vsub.f32 %v35605_v4, %v36488_v57  ;;  %v35676_v35 = vsub.f32 %v35610_v49, %v36494_v30  ;;  %v30479_v57 = vpack.c.bf16 %v23574_v13, %v23567_v50  ;;  %v35685_v21 = vsub.f32 %v35615_v6, %v36493_v46  ;;  %v35697_v13 = vld [vmem:[%s36351_s11 + $0x1e0] sm:$0xff] }
0x3775   :  { %30442 = vmatprep.subr.bf16.mxu1 %v35650_v51  ;;  %v23580_v17 = vsub.f32 %v35633_v9, %v36490_v8  ;;  %v23587_v24 = vsub.f32 %v35642_v33, %v36492_v52  ;;  %v23394_v15 = vand.u32 4294901760, %v35659_v41  ;;  %v23397_v34 = vand.u32 4294901760, %v35664_v14  ;;  %v35714_v30 = vld [vmem:[%s36351_s11 + $0x160] sm:$0xff] }
0x3776   :  { %v23700_v59 = vand.u32 4294901760, %v23699_v62  ;;  %30444 = vmatpush3.bf16.msra.mxu1 %v35670_v55  ;;  %v36501_v50 = vand.u32 4294901760, %v35676_v35  ;;  %v35702_v62 = vld [vmem:[%s36351_s11 + $0x1e8] sm:$0xff]  ;;  %30480 = vmatpush3.bf16.msra.mxu0 %v30479_v57  ;;  %v35708_v52 = vpack.c.bf16 %v23433_v29, %v23430_v54  ;;  %v36498_v46 = vand.u32 4294901760, %v35685_v21 }
0x3777   :  { %v23581_v38 = vand.u32 4294901760, %v23580_v17  ;;  %v23588_v19 = vand.u32 4294901760, %v23587_v24  ;;  %v35726_v16 = vsub.f32 %v35659_v41, %v23394_v15  ;;  %v35733_v54 = vsub.f32 %v35664_v14, %v23397_v34 }
0x3778   :  { %v30481_v8 = vpack.c.bf16 %v23700_v59, %v23693_v48  ;;  %v23706_v57 = vsub.f32 %v35676_v35, %v36501_v50  ;;  %v35723_v59 = vpack.c.bf16 %v23385_v42, %v23382_v32  ;;  %30446 = vmatprep.subr.bf16.mxu1 %v35708_v52  ;;  %v23713_v20 = vsub.f32 %v35685_v21, %v36498_v46 }
0x3779   :  { %v23448_v29 = vand.u32 4294901760, %v35697_v13  ;;  %v23451_v45 = vand.u32 4294901760, %v35702_v62  ;;  %v30483_v32 = vpack.c.bf16 %v23588_v19, %v23581_v38  ;;  %v36497_v41 = vand.u32 4294901760, %v35726_v16  ;;  %v25579_v38 = vld [vmem:[%s36351_s11 + $0x1f0] sm:$0xff] }
0x377a   :  { %30482 = vmatprep.subr.bf16.mxu0 %v30481_v8  ;;  %v23707_v42 = vand.u32 4294901760, %v23706_v57  ;;  %30448 = vmatpush3.bf16.msra.mxu1 %v35723_v59  ;;  %v23400_v8 = vand.u32 4294901760, %v35714_v30  ;;  %v23714_v48 = vand.u32 4294901760, %v23713_v20  ;;  %v36496_v14 = vand.u32 4294901760, %v35733_v54 }
0x377b   :  { %v35748_v17 = vpack.c.bf16 %v23439_v10, %v23436_v25  ;;  %v35751_v24 = vsub.f32 %v35697_v13, %v23448_v29  ;;  %30484 = vmatpush3.bf16.msra.mxu0 %v30483_v32  ;;  %v23594_v19 = vsub.f32 %v35726_v16, %v36497_v41  ;;  %v35760_v57 = vsub.f32 %v35702_v62, %v23451_v45 }
0x377c   :  { %v35766_v39 = vpack.c.bf16 %v36715_v37, %v23388_v44  ;;  %v23403_v25 = vand.u32 4294901760, %v25562_v56  ;;  %v30485_v10 = vpack.c.bf16 %v23714_v48, %v23707_v42  ;;  %v23601_v13 = vsub.f32 %v35733_v54, %v36496_v14 }
0x377d   :  { %30450 = vmatprep.subr.bf16.mxu1 %v35748_v17  ;;  %v36499_v20 = vand.u32 4294901760, %v35751_v24  ;;  %v35774_v32 = vsub.f32 %v35714_v30, %v23400_v8  ;;  %v23595_v61 = vand.u32 4294901760, %v23594_v19  ;;  %v36500_v44 = vand.u32 4294901760, %v35760_v57 }
0x377e   :  { %36716 = vst [vmem:[#allocation17_spill] sm:$0xff] %v35766_v39  ;;  %30452 = vmatpush3.bf16.msra.mxu1 %v35766_v39  ;;  %v35781_v62 = vsub.f32 %v25562_v56, %v23403_v25  ;;  %v23454_v42 = vand.u32 4294901760, %v25579_v38  ;;  %30486 = vmatprep.subr.bf16.mxu0 %v30485_v10  ;;  %v23602_v48 = vand.u32 4294901760, %v23601_v13  ;;  %v36719_v14 = vand.u32 4294901760, %v35610_v49  ;;  %v25564_v49 = vld [vmem:[%s36351_s11 + $0x178] sm:$0xff] }
0x377f   :  { %36717 = vst [vmem:[#allocation23_spill] sm:$0xff] %v35774_v32  ;;  %v23720_v37 = vsub.f32 %v35751_v24, %v36499_v20  ;;  %v36505_v30 = vand.u32 4294901760, %v35774_v32  ;;  %v36720_v41 = vand.u32 4294901760, %v35615_v6  ;;  %v23727_v56 = vsub.f32 %v35760_v57, %v36500_v44  ;;  %v25563_v20 = vld [vmem:[%s36351_s11 + $0x170] sm:$0xff] }
0x3780   :  { %36718 = vst [vmem:[#allocation25_spill] sm:$0xff] %v35781_v62  ;;  %v36508_v46 = vand.u32 4294901760, %v35781_v62  ;;  %v23457_v10 = vand.u32 4294901760, %v25580_v60  ;;  %v35797_v13 = vsub.f32 %v25579_v38, %v23454_v42  ;;  %v30487_v6 = vpack.c.bf16 %v23602_v48, %v23595_v61 }
0x3781   :  { %v35791_v19 = vpack.c.bf16 %v36720_v41, %v36719_v14  ;;  %v23721_v41 = vand.u32 4294901760, %v23720_v37  ;;  %v23608_v14 = vsub.f32 %v35774_v32, %v36505_v30  ;;  %v35809_v44 = vpack.c.bf16 %v23397_v34, %v23394_v15 }
0x3782   :  { %36722 = vst [vmem:[#allocation27_spill] sm:$0xff] %v35797_v13  ;;  %v23728_v38 = vand.u32 4294901760, %v23727_v56  ;;  %v23615_v50 = vsub.f32 %v35781_v62, %v36508_v46  ;;  %v36512_v27 = vand.u32 4294901760, %v35797_v13  ;;  %v35815_v39 = vsub.f32 %v25580_v60, %v23457_v10  ;;  %30488 = vmatpush3.bf16.msra.mxu0 %v30487_v6 }
0x3783   :  { %36721 = vst [vmem:[#allocation24_spill] sm:$0xff] %v35791_v19  ;;  %30454 = vmatprep.subr.bf16.mxu1 %v35791_v19  ;;  %v23609_v61 = vand.u32 4294901760, %v23608_v14  ;;  %v23406_v48 = vand.u32 4294901760, %v25563_v20  ;;  %v23409_v37 = vand.u32 4294901760, %v25564_v49  ;;  %v35818_v30 = vpack.c.bf16 %v23451_v45, %v23448_v29 }
0x3784   :  { %36723 = vst [vmem:[#allocation26_spill] sm:$0xff] %v35815_v39  ;;  %30456 = vmatpush3.bf16.msra.mxu1 %v35809_v44  ;;  %v30489_v19 = vpack.c.bf16 %v23728_v38, %v23721_v41  ;;  %v23616_v15 = vand.u32 4294901760, %v23615_v50  ;;  %v23734_v34 = vsub.f32 %v35797_v13, %v36512_v27  ;;  %v36511_v56 = vand.u32 4294901760, %v35815_v39 }
0x3785   :  { %v35824_v46 = vsub.f32 %v25563_v20, %v23406_v48  ;;  %v35826_v60 = vsub.f32 %v25564_v49, %v23409_v37  ;;  %30458 = vmatprep.subr.bf16.mxu1 %v35818_v30  ;;  %v35829_v6 = vpack.c.bf16 %v23403_v25, %v23400_v8  ;;  %v35837_v20 = vpack.c.bf16 %v23457_v10, %v23454_v42 }
0x3786   :  { %30490 = vmatprep.subr.bf16.mxu0 %v30489_v19  ;;  %v30491_v14 = vpack.c.bf16 %v23616_v15, %v23609_v61  ;;  %v23735_v29 = vand.u32 4294901760, %v23734_v34  ;;  %v23741_v50 = vsub.f32 %v35815_v39, %v36511_v56  ;;  %v35839_v38 = vpack.c.bf16 %v23409_v37, %v23406_v48  ;;  %v36726_v56 = vld [vmem:[#allocation5_spill] sm:$0xff] }
0x3787   :  { %36724 = vst [vmem:[#allocation29_spill] sm:$0xff] %v35824_v46  ;;  %36725 = vst [vmem:[#allocation28_spill] sm:$0xff] %v35826_v60  ;;  %v36510_v45 = vand.u32 4294901760, %v35824_v46  ;;  %v36509_v41 = vand.u32 4294901760, %v35826_v60  ;;  %v30497_v42 = vpack.c.bf16 %v35349_v23, %v35344_v11 }
0x3788   :  { %30460 = vmatpush3.bf16.msra.mxu1 %v35829_v6  ;;  %30492 = vmatpush3.bf16.msra.mxu0 %v30491_v14  ;;  %v23742_v49 = vand.u32 4294901760, %v23741_v50 }
0x3789   :  { %v23622_v8 = vsub.f32 %v35824_v46, %v36510_v45  ;;  %v23629_v25 = vsub.f32 %v35826_v60, %v36509_v41  ;;  %30462 = vmatprep.subr.bf16.mxu1 %v35837_v20  ;;  %v25548_v45 = vld [vmem:[%s36350_s10 + $0x2] sm:$0x3] }
0x378a   :  { %v30493_v19 = vpack.c.bf16 %v23742_v49, %v23735_v29  ;;  %v22461_v27 = vrot.slane %v25548_v45, %v36726_v56 }
0x378b   :  { %v23623_v61 = vand.u32 4294901760, %v23622_v8  ;;  %v23630_v15 = vand.u32 4294901760, %v23629_v25 }
0x378c   :  { %30464 = vmatpush3.bf16.msra.mxu1 %v35839_v38  ;;  %30494 = vmatprep.subr.bf16.mxu0 %v30493_v19  ;;  %v36727_v19 = vld [vmem:[#allocation6_spill] sm:$0xff] }
0x378d   :  { %v30495_v48 = vpack.c.bf16 %v23630_v15, %v23623_v61  ;;  %30498 = vmatprep.subr.bf16.mxu1 %v30497_v42  ;;  %v22465_v61 = vrot.slane %v25548_v45, %v36727_v19 }
0x378f   :  { %30496 = vmatpush3.bf16.msra.mxu0 %v30495_v48 }
0x3790   :  { %30530 = vmatprep.subr.bf16.mxu0 %v35533_v12 }
0x382d   :  { %v23248_v25 = vpop.f32.mrb[72].mxu0 }
0x382e   :  { %v30767_v8 = vadd.f32 %v23248_v25, %v22461_v27  ;;  %v23250_v15 = vpop.f32.mrb[73].mxu0 }
0x382f   :  { %v30768_v49 = vadd.f32 %v23250_v15, %v22465_v61 }
0x3830   :  { %v23274_v50 = vmul.f32 -1.702, %v30767_v8 }
0x3831   :  { %v23275_v42 = vmul.f32 -1.702, %v30768_v49  ;;  %v23255_v29 = vpop.f32.mrb[74].mxu0 }
0x3832   :  { %v23282_v14 = vmul.f32 1.442695, %v23274_v50  ;;  %v35887_v48 = vadd.f32 %v23255_v29, %v22461_v27  ;;  %v23257_v34 = vpop.f32.mrb[75].mxu0 }
0x3833   :  { %v23284_v41 = vmul.f32 1.442695, %v23275_v42  ;;  %v35889_v37 = vadd.f32 %v23257_v34, %v22465_v61 }
0x3834   :  { %31508 = vpow2.f32 %v23282_v14  ;;  %v23276_v10 = vmul.f32 -1.702, %v35887_v48 }
0x3835   :  { %31510 = vpow2.f32 %v23284_v41  ;;  %v23277_v56 = vmul.f32 -1.702, %v35889_v37  ;;  %v23262_v45 = vpop.f32.mrb[76].mxu0 }
0x3836   :  { %v23286_v25 = vmul.f32 1.442695, %v23276_v10  ;;  %v35893_v19 = vadd.f32 %v23262_v45, %v22461_v27  ;;  %v23264_v15 = vpop.f32.mrb[77].mxu0 }
0x3837   :  { %v23288_v46 = vmul.f32 1.442695, %v23277_v56  ;;  %v35895_v60 = vadd.f32 %v23264_v15, %v22465_v61 }
0x3838   :  { %31512 = vpow2.f32 %v23286_v25  ;;  %v23278_v29 = vmul.f32 -1.702, %v35893_v19 }
0x3839   :  { %31514 = vpow2.f32 %v23288_v46  ;;  %v23279_v34 = vmul.f32 -1.702, %v35895_v60  ;;  %v23269_v14 = vpop.f32.mrb[78].mxu0 }
0x383a   :  { %v23290_v50 = vmul.f32 1.442695, %v23278_v29  ;;  %v35899_v42 = vadd.f32 %v23269_v14, %v22461_v27  ;;  %v23271_v41 = vpop.f32.mrb[79].mxu0 }
0x383b   :  { %v23292_v23 = vmul.f32 1.442695, %v23279_v34  ;;  %v35901_v11 = vadd.f32 %v23271_v41, %v22465_v61 }
0x383c   :  { %31516 = vpow2.f32 %v23290_v50  ;;  %v23280_v10 = vmul.f32 -1.702, %v35899_v42 }
0x383d   :  { %31518 = vpow2.f32 %v23292_v23  ;;  %v23281_v56 = vmul.f32 -1.702, %v35901_v11 }
0x383e   :  { %v31509_v45 = vpop.eup %31508  ;;  %v23294_v25 = vmul.f32 1.442695, %v23280_v10 }
0x383f   :  { %v31511_v15 = vpop.eup %31510  ;;  %v23298_v46 = vadd.f32 1.0, %v31509_v45  ;;  %v23296_v13 = vmul.f32 1.442695, %v23281_v56 }
0x3840   :  { %v23299_v39 = vadd.f32 1.0, %v31511_v15  ;;  %31520 = vpow2.f32 %v23294_v25 }
0x3841   :  { %31522 = vrcp.f32 %v23298_v46 }
0x3842   :  { %v31513_v27 = vpop.eup %31512  ;;  %31524 = vrcp.f32 %v23299_v39 }
0x3843   :  { %v31515_v29 = vpop.eup %31514  ;;  %v23300_v34 = vadd.f32 1.0, %v31513_v27  ;;  %31526 = vpow2.f32 %v23296_v13 }
0x3844   :  { %v23301_v61 = vadd.f32 1.0, %v31515_v29 }
0x3845   :  { %31528 = vrcp.f32 %v23300_v34 }
0x3846   :  { %v31517_v14 = vpop.eup %31516  ;;  %31530 = vrcp.f32 %v23301_v61 }
0x3847   :  { %v31519_v23 = vpop.eup %31518  ;;  %v23302_v50 = vadd.f32 1.0, %v31517_v14 }
0x3848   :  { %v23303_v41 = vadd.f32 1.0, %v31519_v23 }
0x3849   :  { %31532 = vrcp.f32 %v23302_v50 }
0x384a   :  { %v31521_v10 = vpop.eup %31520  ;;  %31534 = vrcp.f32 %v23303_v41 }
0x384b   :  { %v31523_v45 = vpop.eup %31522  ;;  %v23304_v56 = vadd.f32 1.0, %v31521_v10 }
0x384c   :  { %v31525_v15 = vpop.eup %31524  ;;  %v23322_v25 = vmul.f32 %v31523_v45, %v30767_v8 }
0x384d   :  { %v31527_v46 = vpop.eup %31526  ;;  %v23323_v32 = vmul.f32 %v31525_v15, %v30768_v49  ;;  %31536 = vrcp.f32 %v23304_v56 }
0x384e   :  { %v35905_v39 = vand.u32 4294901760, %v23322_v25  ;;  %v23305_v13 = vadd.f32 1.0, %v31527_v46 }
0x384f   :  { %v31529_v27 = vpop.eup %31528  ;;  %v35907_v29 = vand.u32 4294901760, %v23323_v32 }
0x3850   :  { %36728 = vst [vmem:[#allocation10_spill] sm:$0xff] %v35905_v39  ;;  %v31531_v34 = vpop.eup %31530  ;;  %v35910_v61 = vsub.f32 %v23322_v25, %v35905_v39  ;;  %v23324_v14 = vmul.f32 %v31529_v27, %v35887_v48  ;;  %31538 = vrcp.f32 %v23305_v13 }
0x3851   :  { %v35914_v23 = vsub.f32 %v23323_v32, %v35907_v29  ;;  %v23325_v8 = vmul.f32 %v31531_v34, %v35889_v37  ;;  %23745 = vmatprep.mubr.f32.mxu0 %v35907_v29 }
0x3852   :  { %v36525_v49 = vand.u32 4294901760, %v35910_v61  ;;  %v35919_v50 = vand.u32 4294901760, %v23324_v14  ;;  %23747 = vmatmul.mubr.f32.vlgmr.msra.gmra.mrb[80].mxu0 %v35905_v39  ;;  %v36763_v39 = vld [vmem:[#allocation29_spill] sm:$0xff] }
0x3853   :  { %v31533_v41 = vpop.eup %31532  ;;  %v35922_v10 = vand.u32 4294901760, %v23325_v8  ;;  %30532 = vmatpush3.bf16.msra.mxu0 %v35568_v63  ;;  %v23461_v48 = vand.u32 4294901760, %v35914_v23 }
0x3854   :  { %36729 = vst [vmem:[#allocation9_spill] sm:$0xff] %v35919_v50  ;;  %v31535_v45 = vpop.eup %31534  ;;  %v23468_v32 = vsub.f32 %v35910_v61, %v36525_v49  ;;  %v35930_v37 = vsub.f32 %v23324_v14, %v35919_v50  ;;  %v23326_v56 = vmul.f32 %v31533_v41, %v35893_v19  ;;  %30534 = vmatprep.subr.bf16.mxu0 %v35596_v0 }
0x3855   :  { %36730 = vst [vmem:[#allocation11_spill] sm:$0xff] %v35922_v10  ;;  %v35935_v15 = vsub.f32 %v23325_v8, %v35922_v10  ;;  %v23327_v25 = vmul.f32 %v31535_v45, %v35895_v60  ;;  %23752 = vmatprep.mubr.f32.mxu0 %v35922_v10  ;;  %v23462_v46 = vsub.f32 %v35914_v23, %v23461_v48 }
0x3856   :  { %v35940_v13 = vand.u32 4294901760, %v23326_v56  ;;  %23754 = vmatmul.mubr.f32.gmra.mrb[82].mxu0 %v35919_v50  ;;  %v36528_v27 = vand.u32 4294901760, %v35930_v37  ;;  %v23469_v41 = vand.u32 4294901760, %v23468_v32 }
0x3857   :  { %v31537_v34 = vpop.eup %31536  ;;  %v35944_v14 = vand.u32 4294901760, %v23327_v25  ;;  %30536 = vmatpush3.bf16.msra.mxu0 %v35621_v28  ;;  %v23463_v19 = vand.u32 4294901760, %v23462_v46  ;;  %v36529_v8 = vand.u32 4294901760, %v35935_v15 }
0x3858   :  { %36731 = vst [vmem:[#allocation12_spill] sm:$0xff] %v35940_v13  ;;  %v35949_v60 = vsub.f32 %v23326_v56, %v35940_v13  ;;  %v23328_v45 = vmul.f32 %v31537_v34, %v35899_v42  ;;  %30538 = vmatprep.subr.bf16.mxu0 %v35650_v51  ;;  %v23483_v49 = vsub.f32 %v35930_v37, %v36528_v27 }
0x3859   :  { %36732 = vst [vmem:[#allocation7_spill] sm:$0xff] %v35944_v14  ;;  %v35957_v50 = vsub.f32 %v23327_v25, %v35944_v14  ;;  %23464 = vmatprep.mubr.f32.mxu1 %v23463_v19  ;;  %23759 = vmatprep.mubr.f32.mxu0 %v35944_v14  ;;  %v23477_v32 = vsub.f32 %v35935_v15, %v36529_v8  ;;  %v36759_v14 = vld [vmem:[#allocation21_spill] sm:$0xff] }
0x385a   :  { %v31539_v56 = vpop.eup %31538  ;;  %v35963_v46 = vand.u32 4294901760, %v23328_v45  ;;  %23470 = vmatmul.mubr.f32.vlgmr.msra.gmra.mrb[82].mxu1 %v23469_v41  ;;  %23761 = vmatmul.mubr.f32.gmra.mrb[84].mxu0 %v35940_v13  ;;  %v36734_v25 = vpack.c.bf16 %v35359_v47, %v35354_v1  ;;  %v36735_v41 = vpack.c.bf16 %v35403_v2, %v35398_v7  ;;  %v23484_v42 = vand.u32 4294901760, %v23483_v49 }
0x385b   :  { %v23329_v34 = vmul.f32 %v31539_v56, %v35901_v11  ;;  %30540 = vmatpush3.bf16.msra.mxu0 %v35670_v55  ;;  %v23478_v19 = vand.u32 4294901760, %v23477_v32  ;;  %v23491_v27 = vand.u32 4294901760, %v35957_v50  ;;  %v36738_v49 = vpack.c.bf16 %v35419_v43, %v35414_v36 }
0x385c   :  { %36733 = vst [vmem:[#allocation8_spill] sm:$0xff] %v35963_v46  ;;  %30500 = vmatpush3.bf16.msra.mxu1 %v36734_v25  ;;  %v35974_v8 = vsub.f32 %v23328_v45, %v35963_v46  ;;  %30542 = vmatprep.subr.bf16.mxu0 %v35708_v52  ;;  %v36737_v25 = vand.u32 4294901760, %v35949_v60 }
0x385d   :  { %30502 = vmatprep.subr.bf16.mxu1 %v36735_v41  ;;  %v35980_v11 = vand.u32 4294901760, %v23329_v34  ;;  %23479 = vmatprep.mubr.f32.mxu1 %v23478_v19  ;;  %v23492_v56 = vsub.f32 %v35957_v50, %v23491_v27  ;;  %v36739_v19 = vpack.c.bf16 %v35468_v58, %v35462_v5 }
0x385e   :  { %v23498_v32 = vsub.f32 %v35949_v60, %v36737_v25  ;;  %23485 = vmatmul.mubr.f32.gmra.mrb[84].mxu1 %v23484_v42  ;;  %v23512_v45 = vand.u32 4294901760, %v35974_v8 }
0x385f   :  { %36736 = vst [vmem:[#allocation15_spill] sm:$0xff] %v35980_v11  ;;  %v35988_v13 = vsub.f32 %v23329_v34, %v35980_v11  ;;  %23766 = vmatprep.mubr.f32.mxu0 %v35980_v11  ;;  %v23493_v41 = vand.u32 4294901760, %v23492_v56  ;;  %30544 = vmatpush3.bf16.msra.mxu0 %v35723_v59  ;;  %v36757_v11 = vld [vmem:[#allocation22_spill] sm:$0xff] }
0x3860   :  { %30504 = vmatpush3.bf16.msra.mxu1 %v36738_v49  ;;  %23768 = vmatmul.mubr.f32.gmra.mrb[86].mxu0 %v35963_v46  ;;  %v23499_v42 = vand.u32 4294901760, %v23498_v32  ;;  %v23513_v25 = vsub.f32 %v35974_v8, %v23512_v45  ;;  %v36740_v49 = vpack.c.bf16 %v35497_v22, %v35485_v18  ;;  %v36741_v46 = vld [vmem:[#allocation17_spill] sm:$0xff]  ;;  %v36743_v32 = vld [vmem:[#allocation24_spill] sm:$0xff] }
0x3861   :  { %30506 = vmatprep.subr.bf16.mxu1 %v36739_v19  ;;  %24037 = vmatprep.mubr.f32.mxu0 %v23461_v48  ;;  %v23506_v34 = vand.u32 4294901760, %v35988_v13  ;;  %v36742_v48 = vpack.c.bf16 %v35521_v53, %v35507_v26 }
0x3862   :  { %23494 = vmatprep.mubr.f32.mxu1 %v23493_v41  ;;  %30546 = vmatprep.subr.bf16.mxu0 %v35748_v17  ;;  %v23514_v41 = vand.u32 4294901760, %v23513_v25  ;;  %v36747_v25 = vpack.c.bf16 %v35685_v21, %v35676_v35 }
0x3863   :  { %23500 = vmatmul.mubr.f32.gmra.mrb[86].mxu1 %v23499_v42  ;;  %v23507_v56 = vsub.f32 %v35988_v13, %v23506_v34  ;;  %30548 = vmatpush3.bf16.msra.mxu0 %v36741_v46  ;;  %v36744_v42 = vpack.c.bf16 %v35577_v3, %v35556_v40 }
0x3864   :  { %30508 = vmatpush3.bf16.msra.mxu1 %v36740_v49  ;;  %30550 = vmatprep.subr.bf16.mxu0 %v36743_v32  ;;  %v36746_v49 = vpack.c.bf16 %v35642_v33, %v35633_v9 }
0x3865   :  { %v23508_v19 = vand.u32 4294901760, %v23507_v56  ;;  %30510 = vmatprep.subr.bf16.mxu1 %v36742_v48  ;;  %v36745_v56 = vpack.c.bf16 %v35605_v4, %v35589_v31  ;;  %v36750_v48 = vand.u32 4294901760, %v35910_v61 }
0x3867   :  { %23509 = vmatprep.mubr.f32.mxu1 %v23508_v19  ;;  %30552 = vmatpush3.bf16.msra.mxu0 %v35809_v44  ;;  %v36749_v19 = vpack.c.bf16 %v35760_v57, %v35751_v24 }
0x3868   :  { %23515 = vmatmul.mubr.f32.gmra.mrb[88].mxu1 %v23514_v41  ;;  %30554 = vmatprep.subr.bf16.mxu0 %v35818_v30  ;;  %v36751_v41 = vld [vmem:[#allocation23_spill] sm:$0xff] }
0x3869   :  { %30512 = vmatpush3.bf16.msra.mxu1 %v36744_v42  ;;  %23903 = vmatprep.mubr.f32.mxu1 %v35914_v23  ;;  %v36748_v23 = vpack.c.bf16 %v35733_v54, %v35726_v16  ;;  %v36752_v42 = vpack.c.bf16 %v35781_v62, %v36751_v41 }
0x386a   :  { %30514 = vmatprep.subr.bf16.mxu1 %v36745_v56  ;;  %v36753_v56 = vand.u32 4294901760, %v35935_v15 }
0x386b   :  { %30556 = vmatpush3.bf16.msra.mxu0 %v35829_v6 }
0x386c   :  { %30558 = vmatprep.subr.bf16.mxu0 %v35837_v20 }
0x386d   :  { %30516 = vmatpush3.bf16.msra.mxu1 %v36746_v49  ;;  %v36754_v49 = vld [vmem:[#allocation26_spill] sm:$0xff] }
0x386e   :  { %30518 = vmatprep.subr.bf16.mxu1 %v36747_v25  ;;  %v36755_v25 = vld [vmem:[#allocation27_spill] sm:$0xff] }
0x386f   :  { %30560 = vmatpush3.bf16.msra.mxu0 %v35839_v38 }
0x3870   :  { %30594 = vmatprep.subr.bf16.mxu0 %v35533_v12  ;;  %v36760_v12 = vand.u32 4294901760, %v36759_v14  ;;  %v36768_v14 = vand.u32 4294901760, %v35403_v2  ;;  %v36773_v2 = vand.u32 4294901760, %v35468_v58  ;;  %v36777_v58 = vand.u32 4294901760, %v35521_v53 }
0x3871   :  { %30520 = vmatpush3.bf16.msra.mxu1 %v36748_v23  ;;  %v36756_v23 = vpack.c.bf16 %v36754_v49, %v36755_v25  ;;  %v36781_v53 = vand.u32 4294901760, %v35605_v4  ;;  %v36785_v4 = vand.u32 4294901760, %v35685_v21  ;;  %v36791_v21 = vld [vmem:[#allocation25_spill] sm:$0xff] }
0x3872   :  { %30522 = vmatprep.subr.bf16.mxu1 %v36749_v19  ;;  %24041 = vmatmul.mubr.f32.vlgmr.msra.gmra.mrb[88].mxu0 %v36750_v48  ;;  %v36758_v19 = vand.u32 4294901760, %v36757_v11  ;;  %v36761_v48 = vand.u32 4294901760, %v35930_v37  ;;  %v36766_v11 = vand.u32 4294901760, %v35359_v47  ;;  %v36771_v47 = vand.u32 4294901760, %v35419_v43 }
0x3873   :  { %24048 = vmatprep.mubr.f32.mxu0 %v36753_v56  ;;  %30596 = vmatpush3.bf16.msra.mxu0 %v35568_v63  ;;  %v36765_v63 = vand.u32 4294901760, %v35354_v1  ;;  %v36770_v1 = vand.u32 4294901760, %v35414_v36  ;;  %v36774_v36 = vand.u32 4294901760, %v35485_v18  ;;  %v36775_v43 = vand.u32 4294901760, %v35497_v22 }
0x3874   :  { %v30561_v10 = vpack.c.bf16 %v36760_v12, %v36758_v19  ;;  %30598 = vmatprep.subr.bf16.mxu0 %v35596_v0  ;;  %v36767_v0 = vand.u32 4294901760, %v35398_v7  ;;  %v36772_v7 = vand.u32 4294901760, %v35462_v5  ;;  %v36776_v5 = vand.u32 4294901760, %v35507_v26 }
0x3875   :  { %30524 = vmatpush3.bf16.msra.mxu1 %v36752_v42  ;;  %v36762_v42 = vld [vmem:[#allocation28_spill] sm:$0xff]  ;;  %v30563_v56 = vpack.c.bf16 %v36766_v11, %v36765_v63  ;;  %v36778_v18 = vand.u32 4294901760, %v35556_v40  ;;  %v36779_v22 = vand.u32 4294901760, %v35577_v3  ;;  %v36780_v26 = vand.u32 4294901760, %v35589_v31 }
0x3876   :  { %30526 = vmatprep.subr.bf16.mxu1 %v36756_v23  ;;  %24052 = vmatmul.mubr.f32.gmra.mrb[90].mxu0 %v36761_v48  ;;  %v36764_v62 = vpack.c.bf16 %v36762_v42, %v36763_v39  ;;  %v30565_v23 = vpack.c.bf16 %v36768_v14, %v36767_v0  ;;  %v36782_v40 = vand.u32 4294901760, %v35633_v9  ;;  %v36783_v3 = vand.u32 4294901760, %v35642_v33 }
0x3877   :  { %24059 = vmatprep.mubr.f32.mxu0 %v23491_v27  ;;  %30600 = vmatpush3.bf16.msra.mxu0 %v35621_v28  ;;  %v30567_v28 = vpack.c.bf16 %v36771_v47, %v36770_v1  ;;  %v36784_v31 = vand.u32 4294901760, %v35676_v35  ;;  %v36788_v9 = vand.u32 4294901760, %v35751_v24  ;;  %v36789_v33 = vand.u32 4294901760, %v35760_v57  ;;  %v36796_v24 = vld [vmem:[#allocation11_spill] sm:$0xff]  ;;  %v36799_v27 = vld [vmem:[#allocation9_spill] sm:$0xff] }
0x3878   :  { %30602 = vmatprep.subr.bf16.mxu0 %v35650_v51  ;;  %v30569_v51 = vpack.c.bf16 %v36773_v2, %v36772_v7  ;;  %v36790_v35 = vand.u32 4294901760, %v36751_v41  ;;  %v36797_v57 = vand.u32 4294901760, %v36763_v39  ;;  %v36803_v39 = vld [vmem:[#allocation8_spill] sm:$0xff] }
0x3879   :  { %30528 = vmatpush3.bf16.msra.mxu1 %v36764_v62  ;;  %v36769_v62 = vand.u32 4294901760, %v35949_v60 }
0x387a   :  { %30562 = vmatprep.subr.bf16.mxu1 %v30561_v10 }
0x387b   :  { %24063 = vmatmul.mubr.f32.gmra.mrb[92].mxu0 %v36769_v62 }
0x387c   :  { %23906 = vmatmul.mubr.f32.vlgmr.msra.gmra.mrb[90].mxu1 %v35910_v61  ;;  %24070 = vmatprep.mubr.f32.mxu0 %v23506_v34  ;;  %v30579_v61 = vpack.c.bf16 %v36783_v3, %v36782_v40  ;;  %v36804_v34 = vmov 0.0  }
0x387d   :  { %23912 = vmatprep.mubr.f32.mxu1 %v35935_v15  ;;  %30564 = vmatpush3.bf16.msra.mxu1 %v30563_v56 }
0x387e   :  { %30604 = vmatpush3.bf16.msra.mxu0 %v35670_v55  ;;  %30566 = vmatprep.subr.bf16.mxu1 %v30565_v23  ;;  %v30571_v55 = vpack.c.bf16 %v36775_v43, %v36774_v36 }
0x387f   :  { %30606 = vmatprep.subr.bf16.mxu0 %v35708_v52  ;;  %24074 = vmatmul.mubr.f32.gmra.mrb[94].mxu0 %v23512_v45  ;;  %v30573_v52 = vpack.c.bf16 %v36777_v58, %v36776_v5  ;;  %v31578_v45 = vmov 0.0|0.0  }
0x3880   :  { %23915 = vmatmul.mubr.f32.gmra.mrb[92].mxu1 %v35930_v37  ;;  %24365 = vmatprep.mubr.f32.mxu0 %v35907_v29 }
0x3881   :  { %23921 = vmatprep.mubr.f32.mxu1 %v35957_v50  ;;  %30568 = vmatpush3.bf16.msra.mxu1 %v30567_v28  ;;  %v30581_v50 = vpack.c.bf16 %v36785_v4, %v36784_v31 }
0x3882   :  { %30608 = vmatpush3.bf16.msra.mxu0 %v35723_v59  ;;  %30570 = vmatprep.subr.bf16.mxu1 %v30569_v51  ;;  %v30575_v59 = vpack.c.bf16 %v36779_v22, %v36778_v18 }
0x3883   :  { %30610 = vmatprep.subr.bf16.mxu0 %v35748_v17  ;;  %v30577_v17 = vpack.c.bf16 %v36781_v53, %v36780_v26 }
0x3884   :  { %23924 = vmatmul.mubr.f32.gmra.mrb[94].mxu1 %v35949_v60  ;;  %v36801_v60 = vld [vmem:[#allocation12_spill] sm:$0xff] }
0x3885   :  { %23930 = vmatprep.mubr.f32.mxu1 %v35988_v13  ;;  %30572 = vmatpush3.bf16.msra.mxu1 %v30571_v55 }
0x3886   :  { %30612 = vmatpush3.bf16.msra.mxu0 %v36741_v46  ;;  %30574 = vmatprep.subr.bf16.mxu1 %v30573_v52  ;;  %v36802_v46 = vld [vmem:[#allocation15_spill] sm:$0xff] }
0x3887   :  { %30614 = vmatprep.subr.bf16.mxu0 %v36743_v32 }
0x3888   :  { %23933 = vmatmul.mubr.f32.gmra.mrb[96].mxu1 %v35974_v8  ;;  %v36800_v8 = vld [vmem:[#allocation7_spill] sm:$0xff] }
0x3889   :  { %24240 = vmatprep.mubr.f32.mxu1 %v35907_v29  ;;  %30576 = vmatpush3.bf16.msra.mxu1 %v30575_v59  ;;  %v36786_v29 = vand.u32 4294901760, %v35726_v16  ;;  %v36793_v16 = vand.u32 4294901760, %v36755_v25 }
0x388a   :  { %30616 = vmatpush3.bf16.msra.mxu0 %v35809_v44  ;;  %30578 = vmatprep.subr.bf16.mxu1 %v30577_v17  ;;  %v36787_v44 = vand.u32 4294901760, %v35733_v54  ;;  %v36794_v54 = vand.u32 4294901760, %v36754_v49 }
0x388b   :  { %30618 = vmatprep.subr.bf16.mxu0 %v35818_v30  ;;  %v30585_v30 = vpack.c.bf16 %v36789_v33, %v36788_v9 }
0x388c   :  { %v30583_v10 = vpack.c.bf16 %v36787_v44, %v36786_v29  ;;  %v30589_v15 = vpack.c.bf16 %v36794_v54, %v36793_v16 }
0x388d   :  { %30580 = vmatpush3.bf16.msra.mxu1 %v30579_v61 }
0x388e   :  { %30620 = vmatpush3.bf16.msra.mxu0 %v35829_v6  ;;  %30582 = vmatprep.subr.bf16.mxu1 %v30581_v50  ;;  %v36792_v6 = vand.u32 4294901760, %v36791_v21 }
0x388f   :  { %30622 = vmatprep.subr.bf16.mxu0 %v35837_v20  ;;  %v36795_v20 = vld [vmem:[#allocation10_spill] sm:$0xff] }
0x3890   :  { %v30587_v37 = vpack.c.bf16 %v36792_v6, %v36790_v35 }
0x3891   :  { %30584 = vmatpush3.bf16.msra.mxu1 %v30583_v10 }
0x3892   :  { %30624 = vmatpush3.bf16.msra.mxu0 %v35839_v38  ;;  %30586 = vmatprep.subr.bf16.mxu1 %v30585_v30  ;;  %v36798_v38 = vand.u32 4294901760, %v36762_v42 }
0x3893   :  { %30661 = vmatprep.subr.bf16.mxu0 %v31578_v45 }
0x3894   :  { %v30591_v13 = vpack.c.bf16 %v36798_v38, %v36797_v57 }
0x3895   :  { %24367 = vmatmul.mubr.f32.vlgmr.msra.gmra.mrb[96].mxu0 %v36795_v20  ;;  %30588 = vmatpush3.bf16.msra.mxu1 %v30587_v37 }
0x3896   :  { %24372 = vmatprep.mubr.f32.mxu0 %v36796_v24  ;;  %30590 = vmatprep.subr.bf16.mxu1 %v30589_v15 }
0x3899   :  { %24374 = vmatmul.mubr.f32.gmra.mrb[98].mxu0 %v36799_v27  ;;  %30592 = vmatpush3.bf16.msra.mxu1 %v30591_v13 }
0x389a   :  { %24379 = vmatprep.mubr.f32.mxu0 %v36800_v8  ;;  %30625 = vmatprep.subr.bf16.mxu1 %v31578_v45 }
0x389c   :  { %24242 = vmatmul.mubr.f32.vlgmr.msra.gmra.mrb[98].mxu1 %v36795_v20 }
0x389d   :  { %24381 = vmatmul.mubr.f32.gmra.mrb[100].mxu0 %v36801_v60  ;;  %24247 = vmatprep.mubr.f32.mxu1 %v36796_v24 }
0x389e   :  { %24386 = vmatprep.mubr.f32.mxu0 %v36802_v46 }
0x38a0   :  { %24249 = vmatmul.mubr.f32.gmra.mrb[100].mxu1 %v36799_v27 }
0x38a1   :  { %24388 = vmatmul.mubr.f32.gmra.mrb[102].mxu0 %v36803_v39  ;;  %24254 = vmatprep.mubr.f32.mxu1 %v36800_v8 }
0x38a2   :  { %28799 = vmatprep.mubr.msk.f32.mxu0 %vm31579_vm6, %v36804_v34 }
0x38a4   :  { %24256 = vmatmul.mubr.f32.gmra.mrb[102].mxu1 %v36801_v60 }
0x38a5   :  { %24261 = vmatprep.mubr.f32.mxu1 %v36802_v46 }
0x38a8   :  { %24263 = vmatmul.mubr.f32.gmra.mrb[104].mxu1 %v36803_v39 }
0x38a9   :  { %28725 = vmatprep.mubr.msk.f32.mxu1 %vm31579_vm6, %v36804_v34 }
0x3925   :  { %v26837_v32 = vpop.f32.mrb[80].mxu0 }
0x3926   :  { %v26838_v41 = vpop.f32.mrb[81].mxu0 }
0x3927   :  { %v26839_v49 = vadd.f32 %v26838_v41, %v26837_v32 }
0x3929   :  { %v26840_v25 = vpop.f32.mrb[82].mxu0 }
0x392a   :  { %v26841_v19 = vpop.f32.mrb[83].mxu0 }
0x392b   :  { %v26842_v12 = vadd.f32 %v26841_v19, %v26840_v25 }
0x392d   :  { %v26793_v48 = vpop.f32.mrb[82].mxu1  ;;  %v26843_v42 = vpop.f32.mrb[84].mxu0 }
0x392e   :  { %v26794_v63 = vpop.f32.mrb[83].mxu1  ;;  %v26844_v11 = vpop.f32.mrb[85].mxu0 }
0x392f   :  { %v26795_v56 = vadd.f32 %v26794_v63, %v26793_v48  ;;  %v26845_v0 = vadd.f32 %v26844_v11, %v26843_v42 }
0x3931   :  { %v23749_v14 = vadd.f32 %v26839_v49, %v26795_v56  ;;  %v26796_v23 = vpop.f32.mrb[84].mxu1 }
0x3932   :  { %v26797_v62 = vpop.f32.mrb[85].mxu1 }
0x3933   :  { %v26846_v1 = vpop.f32.mrb[86].mxu0  ;;  %v26798_v47 = vadd.f32 %v26797_v62, %v26796_v23 }
0x3934   :  { %v26847_v28 = vpop.f32.mrb[87].mxu0 }
0x3935   :  { %v23756_v7 = vadd.f32 %v26842_v12, %v26798_v47  ;;  %v26848_v2 = vadd.f32 %v26847_v28, %v26846_v1  ;;  %v24409_v1 = vld [vmem:[%s36356_s16] sm:$0x3] }
0x3936   :  { %v26799_v51 = vpop.f32.mrb[86].mxu1 }
0x3937   :  { %v26800_v36 = vpop.f32.mrb[87].mxu1 }
0x3938   :  { %v26801_v43 = vadd.f32 %v26800_v36, %v26799_v51  ;;  %v36805_v51 = vld [vmem:[#allocation19_spill] sm:$0xff] }
0x393a   :  { %v23763_v55 = vadd.f32 %v26845_v0, %v26801_v43 }
0x393b   :  { %v26802_v5 = vpop.f32.mrb[88].mxu1 }
0x393c   :  { %v26803_v58 = vpop.f32.mrb[89].mxu1 }
0x393d   :  { %v26804_v52 = vadd.f32 %v26803_v58, %v26802_v5  ;;  %v24411_v5 = vsel %vm5231_vm4, %v24409_v1, 0 }
0x393f   :  { %v23770_v18 = vadd.f32 %v26848_v2, %v26804_v52  ;;  %v25582_v2 = vld [vmem:[%s36352_s12 + $0x1] ss:$0 sm:$0xff] }
0x3945   :  { %v26925_v22 = vpop.f32.mrb[88].mxu0 }
0x3946   :  { %v26926_v59 = vpop.f32.mrb[89].mxu0 }
0x3947   :  { %v26927_v26 = vadd.f32 %v26926_v59, %v26925_v22  ;;  %v36169_v59 = vand.u32 4294901760, %v24411_v5 }
0x3949   :  { %v26928_v53 = vpop.f32.mrb[90].mxu0 }
0x394a   :  { %v26929_v17 = vpop.f32.mrb[91].mxu0 }
0x394b   :  { %v26930_v40 = vadd.f32 %v26929_v17, %v26928_v53 }
0x394e   :  { %v26931_v61 = vpop.f32.mrb[92].mxu0 }
0x394f   :  { %v26881_v3 = vpop.f32.mrb[90].mxu1  ;;  %v26932_v4 = vpop.f32.mrb[93].mxu0 }
0x3950   :  { %v26882_v31 = vpop.f32.mrb[91].mxu1  ;;  %v26933_v29 = vadd.f32 %v26932_v4, %v26931_v61 }
0x3951   :  { %v26883_v50 = vadd.f32 %v26882_v31, %v26881_v3 }
0x3952   :  { %v26934_v9 = vpop.f32.mrb[94].mxu0 }
0x3953   :  { %v23908_v44 = vadd.f32 %v26883_v50, %v23749_v14  ;;  %v26884_v10 = vpop.f32.mrb[92].mxu1  ;;  %v26935_v30 = vpop.f32.mrb[95].mxu0 }
0x3954   :  { %v26885_v33 = vpop.f32.mrb[93].mxu1  ;;  %v26936_v21 = vadd.f32 %v26935_v30, %v26934_v9 }
0x3955   :  { %v26886_v35 = vadd.f32 %v26885_v33, %v26884_v10  ;;  %v24043_v6 = vadd.f32 %v26927_v26, %v23908_v44  ;;  %v36806_v26 = vld [vmem:[#allocation20_spill] sm:$0xff]  ;;  %v24483_v44 = vsub.f32 %v24411_v5, %v36169_v59  ;;  %v36807_v10 = vld [vmem:[#allocation13_spill] sm:$0xff] }
0x3956   :  { %v24928_v5 = vld [vmem:[%s36355_s15] sm:$0xff] }
0x3957   :  { %v23917_v37 = vadd.f32 %v26886_v35, %v23756_v7  ;;  %v26887_v16 = vpop.f32.mrb[94].mxu1 }
0x3958   :  { %v26888_v54 = vpop.f32.mrb[95].mxu1 }
0x3959   :  { %v26889_v15 = vadd.f32 %v26888_v54, %v26887_v16  ;;  %v24054_v20 = vadd.f32 %v26930_v40, %v23917_v37  ;;  %v24484_v54 = vand.u32 4294901760, %v24483_v44 }
0x395b   :  { %v23926_v24 = vadd.f32 %v26889_v15, %v23763_v55  ;;  %v26890_v57 = vpop.f32.mrb[96].mxu1 }
0x395c   :  { %v26891_v38 = vpop.f32.mrb[97].mxu1 }
0x395d   :  { %v26892_v13 = vadd.f32 %v26891_v38, %v26890_v57  ;;  %v24065_v27 = vadd.f32 %v26933_v29, %v23926_v24 }
0x395f   :  { %v23935_v8 = vadd.f32 %v26892_v13, %v23770_v18 }
0x3961   :  { %v24076_v60 = vadd.f32 %v26936_v21, %v23935_v8 }
0x3968   :  { %v27013_v46 = vpop.f32.mrb[96].mxu0 }
0x3969   :  { %v27014_v39 = vpop.f32.mrb[97].mxu0 }
0x396a   :  { %v27015_v32 = vadd.f32 %v27014_v39, %v27013_v46  ;;  %v24485_v39 = vsub.f32 %v24483_v44, %v24484_v54 }
0x396c   :  { %v27016_v41 = vpop.f32.mrb[98].mxu0 }
0x396d   :  { %v27017_v49 = vpop.f32.mrb[99].mxu0 }
0x396e   :  { %v27018_v25 = vadd.f32 %v27017_v49, %v27016_v41 }
0x396f   :  { %v26969_v19 = vpop.f32.mrb[98].mxu1 }
0x3970   :  { %v27019_v12 = vpop.f32.mrb[100].mxu0  ;;  %v26970_v48 = vpop.f32.mrb[99].mxu1 }
0x3971   :  { %v27020_v42 = vpop.f32.mrb[101].mxu0  ;;  %v26971_v63 = vadd.f32 %v26970_v48, %v26969_v19 }
0x3972   :  { %v27021_v11 = vadd.f32 %v27020_v42, %v27019_v12  ;;  %v24486_v42 = vand.u32 4294901760, %v24485_v39 }
0x3973   :  { %v24244_v56 = vadd.f32 %v26971_v63, %v24043_v6  ;;  %v26972_v0 = vpop.f32.mrb[100].mxu1 }
0x3974   :  { %v27022_v14 = vpop.f32.mrb[102].mxu0  ;;  %v26973_v23 = vpop.f32.mrb[101].mxu1 }
0x3975   :  { %v27023_v62 = vpop.f32.mrb[103].mxu0  ;;  %v24369_v47 = vadd.f32 %v27015_v32, %v24244_v56  ;;  %v26974_v28 = vadd.f32 %v26973_v23, %v26972_v0 }
0x3976   :  { %v27024_v7 = vadd.f32 %v27023_v62, %v27022_v14 }
0x3977   :  { %v24393_v36 = vadd.f32 %v24369_v47, %v36805_v51  ;;  %v24251_v43 = vadd.f32 %v26974_v28, %v24054_v20  ;;  %v26975_v55 = vpop.f32.mrb[102].mxu1  ;;  %v36808_v20 = vld [vmem:[#allocation14_spill] sm:$0xff] }
0x3978   :  { %v26976_v58 = vpop.f32.mrb[103].mxu1 }
0x3979   :  { %v24405_v52 = vadd.f32 %v25582_v2, %v24393_v36  ;;  %v24376_v18 = vadd.f32 %v27018_v25, %v24251_v43  ;;  %v26977_v22 = vadd.f32 %v26976_v58, %v26975_v55  ;;  %v24929_v58 = vld [vmem:[%s36355_s15 + $0x8] sm:$0xff] }
0x397b   :  { %v24394_v53 = vadd.f32 %v24376_v18, %v36806_v26  ;;  %v24258_v17 = vadd.f32 %v26977_v22, %v24065_v27  ;;  %v26978_v40 = vpop.f32.mrb[104].mxu1  ;;  %v24414_v3 = vand.u32 4294901760, %v24405_v52  ;;  %v24943_v18 = vand.u32 4294901760, %v24929_v58  ;;  %v24931_v26 = vld [vmem:[%s36355_s15 + $0x18] sm:$0xff] }
0x397c   :  { %v26979_v61 = vpop.f32.mrb[105].mxu1 }
0x397d   :  { %v24406_v31 = vadd.f32 %v25582_v2, %v24394_v53  ;;  %v24383_v4 = vadd.f32 %v27021_v11, %v24258_v17  ;;  %v26980_v50 = vadd.f32 %v26979_v61, %v26978_v40  ;;  %v24494_v29 = vsub.f32 %v24405_v52, %v24414_v3  ;;  %v24933_v61 = vld [vmem:[%s36355_s15 + $0x28] sm:$0xff] }
0x397e   :  { %v24940_v52 = vand.u32 4294901760, %v24928_v5  ;;  %v24949_v17 = vand.u32 4294901760, %v24931_v26 }
0x397f   :  { %v24395_v9 = vadd.f32 %v24383_v4, %v36807_v10  ;;  %v24265_v33 = vadd.f32 %v26980_v50, %v24076_v60  ;;  %v24417_v30 = vand.u32 4294901760, %v24406_v31  ;;  %v24495_v35 = vand.u32 4294901760, %v24494_v29 }
0x3980   :  { %v36209_v22 = vpack.c.bf16 %v24943_v18, %v24940_v52  ;;  %v24955_v4 = vand.u32 4294901760, %v24933_v61  ;;  %v36228_v50 = vsub.f32 %v24928_v5, %v24940_v52  ;;  %v36234_v10 = vsub.f32 %v24931_v26, %v24949_v17 }
0x3981   :  { %v24407_v21 = vadd.f32 %v25582_v2, %v24395_v9  ;;  %v24390_v6 = vadd.f32 %v27024_v7, %v24265_v33  ;;  %v30626_v37 = vpack.c.bf16 %v24417_v30, %v24414_v3  ;;  %v24501_v16 = vsub.f32 %v24406_v31, %v24417_v30  ;;  %v24932_v3 = vld [vmem:[%s36355_s15 + $0x20] sm:$0xff]  ;;  %v24934_v9 = vld [vmem:[%s36355_s15 + $0x30] sm:$0xff]  ;;  %v24935_v33 = vld [vmem:[%s36355_s15 + $0x38] sm:$0xff] }
0x3982   :  { %v24496_v15 = vsub.f32 %v24494_v29, %v24495_v35  ;;  %30663 = vmatpush3.bf16.msra.mxu0 %v36209_v22  ;;  %v24952_v31 = vand.u32 4294901760, %v24932_v3 }
0x3983   :  { %v24396_v24 = vadd.f32 %v24390_v6, %v36808_v20  ;;  %30627 = vmatpush3.bf16.msra.mxu1 %v30626_v37  ;;  %v24420_v57 = vand.u32 4294901760, %v24407_v21  ;;  %v24502_v38 = vand.u32 4294901760, %v24501_v16  ;;  %v30638_v13 = vpack.c.bf16 %v24501_v16, %v24494_v29  ;;  %30664 = vmatprep.subr.bf16.mxu0 %v31578_v45 }
0x3984   :  { %30628 = vmatprep.subr.bf16.mxu1 %v31578_v45  ;;  %v24497_v41 = vand.u32 4294901760, %v24496_v15  ;;  %v36230_v29 = vsub.f32 %v24929_v58, %v24943_v18  ;;  %v36243_v30 = vpack.c.bf16 %v24955_v4, %v24952_v31  ;;  %v24958_v6 = vand.u32 4294901760, %v24934_v9 }
0x3985   :  { %v24408_v27 = vadd.f32 %v25582_v2, %v24396_v24  ;;  %v24508_v8 = vsub.f32 %v24407_v21, %v24420_v57  ;;  %v24503_v46 = vsub.f32 %v24501_v16, %v24502_v38  ;;  %v30650_v60 = vpack.c.bf16 %v24502_v38, %v24495_v35 }
0x3986   :  { %v36245_v35 = vsub.f32 %v24932_v3, %v24952_v31  ;;  %v36247_v21 = vsub.f32 %v24933_v61, %v24955_v4  ;;  %v36250_v16 = vsub.f32 %v24934_v9, %v24958_v6  ;;  %v25032_v15 = vand.u32 4294901760, %v36230_v29  ;;  %v25584_v61 = vld [vmem:[%s36354_s14] ss:$0 sm:$0xff] }
0x3987   :  { %v24423_v32 = vand.u32 4294901760, %v24408_v27  ;;  %v24504_v49 = vand.u32 4294901760, %v24503_v46  ;;  %v24509_v25 = vand.u32 4294901760, %v24508_v8  ;;  %v25046_v46 = vand.u32 4294901760, %v36234_v10 }
0x3988   :  { %v25033_v38 = vsub.f32 %v36230_v29, %v25032_v15 }
0x3989   :  { %v30629_v19 = vpack.c.bf16 %v24423_v32, %v24420_v57  ;;  %v24515_v12 = vsub.f32 %v24408_v27, %v24423_v32  ;;  %v30632_v48 = vpack.c.bf16 %v24504_v49, %v24497_v41  ;;  %v24510_v63 = vsub.f32 %v24508_v8, %v24509_v25 }
0x398a   :  { %v25034_v27 = vand.u32 4294901760, %v25033_v38  ;;  %v25047_v32 = vsub.f32 %v36234_v10, %v25046_v46 }
0x398b   :  { %30630 = vmatpush3.bf16.msra.mxu1 %v30629_v19  ;;  %v24516_v11 = vand.u32 4294901760, %v24515_v12  ;;  %v30641_v56 = vpack.c.bf16 %v24515_v12, %v24508_v8  ;;  %v24511_v23 = vand.u32 4294901760, %v24510_v63 }
0x398c   :  { %30631 = vmatprep.subr.bf16.mxu1 %v31578_v45  ;;  %v25048_v49 = vand.u32 4294901760, %v25047_v32 }
0x398d   :  { %v24517_v0 = vsub.f32 %v24515_v12, %v24516_v11  ;;  %v30653_v14 = vpack.c.bf16 %v24516_v11, %v24509_v25  ;;  %v25053_v25 = vand.u32 4294901760, %v36245_v35 }
0x398e   :  { %28726 = vmatmul.mubr.f32.vlgmr.msra.gmra.mrb[106].mxu1 %v24486_v42 }
0x398f   :  { %30633 = vmatpush3.bf16.msra.mxu1 %v30632_v48  ;;  %v24518_v62 = vand.u32 4294901760, %v24517_v0  ;;  %28736 = vmatprep.mubr.msk.f32.mxu1 %vm31579_vm6, %v36804_v34  ;;  %v25054_v48 = vsub.f32 %v36245_v35, %v25053_v25 }
0x3990   :  { %30634 = vmatprep.subr.bf16.mxu1 %v31578_v45 }
0x3991   :  { %v30635_v1 = vpack.c.bf16 %v24518_v62, %v24511_v23  ;;  %v25055_v63 = vand.u32 4294901760, %v25054_v48 }
0x3993   :  { %30636 = vmatpush3.bf16.msra.mxu1 %v30635_v1 }
0x3994   :  { %30637 = vmatprep.subr.bf16.mxu1 %v31578_v45 }
0x3996   :  { %28737 = vmatmul.mubr.f32.vlgmr.msra.gmra.mrb[106].mxu1 %v36169_v59 }
0x3997   :  { %30639 = vmatpush3.bf16.msra.mxu1 %v30638_v13  ;;  %28747 = vmatprep.mubr.msk.f32.mxu1 %vm31579_vm6, %v36804_v34 }
0x3998   :  { %30640 = vmatprep.subr.bf16.mxu1 %v31578_v45 }
0x399b   :  { %30642 = vmatpush3.bf16.msra.mxu1 %v30641_v56  ;;  %v25067_v56 = vand.u32 4294901760, %v36250_v16 }
0x399c   :  { %30643 = vmatprep.subr.bf16.mxu1 %v31578_v45 }
0x399d   :  { %v25068_v23 = vsub.f32 %v36250_v16, %v25067_v56 }
0x399e   :  { %28748 = vmatmul.mubr.f32.vlgmr.msra.gmra.mrb[106].mxu1 %v24483_v44 }
0x399f   :  { %30645 = vmatpush3.bf16.msra.mxu1 %v30626_v37  ;;  %28758 = vmatprep.mubr.msk.f32.mxu1 %vm31579_vm6, %v36804_v34  ;;  %v25069_v1 = vand.u32 4294901760, %v25068_v23 }
0x39a0   :  { %30646 = vmatprep.subr.bf16.mxu1 %v31578_v45 }
0x39a3   :  { %30648 = vmatpush3.bf16.msra.mxu1 %v30629_v19 }
0x39a4   :  { %30649 = vmatprep.subr.bf16.mxu1 %v31578_v45 }
0x39a6   :  { %28759 = vmatmul.mubr.f32.vlgmr.msra.gmra.mrb[106].mxu1 %v24484_v54  ;;  %v25025_v54 = vand.u32 4294901760, %v36228_v50 }
0x39a7   :  { %30651 = vmatpush3.bf16.msra.mxu1 %v30650_v60  ;;  %28769 = vmatprep.mubr.msk.f32.mxu1 %vm31579_vm6, %v36804_v34 }
0x39a8   :  { %30652 = vmatprep.subr.bf16.mxu1 %v31578_v45  ;;  %v25026_v57 = vsub.f32 %v36228_v50, %v25025_v54 }
0x39aa   :  { %v25027_v13 = vand.u32 4294901760, %v25026_v57 }
0x39ab   :  { %30654 = vmatpush3.bf16.msra.mxu1 %v30653_v14 }
0x39ac   :  { %30655 = vmatprep.subr.bf16.mxu1 %v31578_v45  ;;  %v30674_v60 = vpack.c.bf16 %v25034_v27, %v25027_v13 }
0x39ae   :  { %28770 = vmatmul.mubr.f32.vlgmr.msra.gmra.mrb[106].mxu1 %v36169_v59 }
0x39af   :  { %30657 = vmatpush3.bf16.msra.mxu1 %v30626_v37  ;;  %28780 = vmatprep.mubr.msk.f32.mxu1 %vm31579_vm6, %v36804_v34  ;;  %v24961_v37 = vand.u32 4294901760, %v24935_v33 }
0x39b0   :  { %30658 = vmatprep.subr.bf16.mxu1 %v31578_v45 }
0x39b1   :  { %v36255_v20 = vpack.c.bf16 %v24961_v37, %v24958_v6  ;;  %v36257_v24 = vsub.f32 %v24935_v33, %v24961_v37 }
0x39b3   :  { %30660 = vmatpush3.bf16.msra.mxu1 %v30629_v19  ;;  %v25060_v19 = vand.u32 4294901760, %v36247_v21  ;;  %v25074_v0 = vand.u32 4294901760, %v36257_v24 }
0x39b5   :  { %v25061_v42 = vsub.f32 %v36247_v21, %v25060_v19  ;;  %v25075_v62 = vsub.f32 %v36257_v24, %v25074_v0  ;;  %v30716_v58 = vpack.c.bf16 %v25060_v19, %v25053_v25  ;;  %v30719_v52 = vpack.c.bf16 %v25074_v0, %v25067_v56 }
0x39b6   :  { %28781 = vmatmul.mubr.f32.vlgmr.msra.gmra.mrb[106].mxu1 %v36169_v59  ;;  %v24930_v59 = vld [vmem:[%s36355_s15 + $0x10] sm:$0xff] }
0x39b7   :  { %v24946_v53 = vand.u32 4294901760, %v24930_v59  ;;  %v25062_v11 = vand.u32 4294901760, %v25061_v42 }
0x39b9   :  { %v36219_v40 = vpack.c.bf16 %v24949_v17, %v24946_v53  ;;  %v36232_v44 = vsub.f32 %v24930_v59, %v24946_v53  ;;  %v30680_v14 = vpack.c.bf16 %v25062_v11, %v25055_v63  ;;  %v25583_v17 = vld [vmem:[%s36353_s13] ss:$0 sm:$0xff]  ;;  %s31580_s13 = smov [#allocation2]  }
0x39ba   :  { %s25483_s14 = sshll.u32 %s31580_s13, 4  ;;  %s25484_s14 = int_to_ptr.vmem [resolvable:$true] %s25483_s14 }
0x39bb   :  { %30666 = vmatpush3.bf16.msra.mxu0 %v36219_v40  ;;  %v25039_v8 = vand.u32 4294901760, %v36232_v44  ;;  %s31546_s24 = scalar_lea.vmem %s25484_s14, 32  ;;  %p31551_p1 = scmp.lt.s32.totalorder %s25484_s14, %s25484_s14 }
0x39bc   :  { %30667 = vmatprep.subr.bf16.mxu0 %v31578_v45  ;;  %p31547_p0 = scmp.ne.s32.totalorder %s25484_s14, %s31546_s24  ;;  %p31552_p2 = scmp.lt.s32.totalorder %s31546_s24, %s31546_s24 }
0x39bd   :  { %v25040_v39 = vsub.f32 %v36232_v44, %v25039_v8  ;;  %v30713_v5 = vpack.c.bf16 %v25046_v46, %v25039_v8 }
0x39be   :  { %p31553_p3 = por %p31552_p2, %p31551_p1 }
0x39bf   :  { %30669 = vmatpush3.bf16.msra.mxu0 %v36243_v30  ;;  %v25041_v41 = vand.u32 4294901760, %v25040_v39 }
0x39c0   :  { %30670 = vmatprep.subr.bf16.mxu0 %v31578_v45  ;;  %p31554_p4 = pnand %p31553_p3, %p31547_p0 }
0x39c1   :  { %v30677_v12 = vpack.c.bf16 %v25048_v49, %v25041_v41 }
0x39c3   :  { %30672 = vmatpush3.bf16.msra.mxu0 %v36255_v20 }
0x39c4   :  { %30673 = vmatprep.subr.bf16.mxu0 %v31578_v45 }
0x3a89   :  { %v24894_v47 = vpop.f32.mrb[106].mxu1 }
0x3a8a   :  { %v28782_v28 = vpop.f32.mrb[107].mxu1  ;;  %v24901_v7 = vsel %vm24900_vm7, %v24894_v47, 0.0 }
0x3a8b   :  { %24902 = vadd.xlane.f32.xlu0 %v24901_v7  ;;  %v30686_v7 = vpack.c.bf16 %v36230_v29, %v36228_v50 }
0x3b18   :  { %v24903_v2 = vpop.xlane.xlu0 %24902 }
0x3b19   :  { %v24904_v51 = vmul.f32 0.015625, %v24903_v2  ;;  %v30689_v2 = vpack.c.bf16 %v36234_v10, %v36232_v44 }
0x3b1b   :  { %v36199_v36 = vsub.f32 %v24894_v47, %v24904_v51  ;;  %v25076_v47 = vand.u32 4294901760, %v25075_v62  ;;  %v30692_v51 = vpack.c.bf16 %v36247_v21, %v36245_v35 }
0x3b1d   :  { %v24906_v43 = vmul.f32 %v36199_v36, %v36199_v36  ;;  %v30683_v28 = vpack.c.bf16 %v25076_v47, %v25069_v1 }
0x3b1f   :  { %v24907_v55 = vsel %vm24900_vm7, %v24906_v43, 0.0  ;;  %v30695_v43 = vpack.c.bf16 %v36257_v24, %v36250_v16 }
0x3b20   :  { %24908 = vadd.xlane.f32.xlu1 %v24907_v55  ;;  %v30710_v55 = vpack.c.bf16 %v25032_v15, %v25025_v54 }
0x3bad   :  { %v24909_v18 = vpop.xlane.xlu1 %24908 }
0x3bae   :  { %v24910_v59 = vmul.f32 0.015625, %v24909_v18 }
0x3bb0   :  { %v24911_v26 = vadd.f32 1e-05, %v24910_v59 }
0x3bb2   :  { %31540 = vrsqrt.f32 %v24911_v26 }
0x3bbc   :  { %v31541_v53 = vpop.eup %31540 }
0x3bbd   :  { %v24913_v3 = vmul.f32 %v31541_v53, %v36199_v36 }
0x3bbf   :  { %v24920_v31 = vmul.f32 %v25583_v17, %v24913_v3 }
0x3bc1   :  { %v24927_v4 = vadd.f32 %v25584_v61, %v24920_v31 }
0x3bc3   :  { %v24937_v50 = vsel %vm70_vm0, %v24927_v4, 0 }
0x3bc4   :  { %v25012_v29 = vand.u32 4294901760, %v24937_v50 }
0x3bc6   :  { %v25013_v44 = vsub.f32 %v24937_v50, %v25012_v29 }
0x3bc8   :  { %v25014_v10 = vand.u32 4294901760, %v25013_v44 }
0x3bca   :  { %v25015_v9 = vsub.f32 %v25013_v44, %v25014_v10 }
0x3bcc   :  { %v25016_v33 = vand.u32 4294901760, %v25015_v9 }
0x3bce   :  { %28800 = vmatmul.mubr.f32.vlgmr.msra.gmra.mrb[104].mxu0 %v25016_v33 }
0x3bcf   :  { %30675 = vmatpush3.bf16.msra.mxu0 %v30674_v60  ;;  %28818 = vmatprep.mubr.msk.f32.mxu0 %vm31579_vm6, %v36804_v34 }
0x3bd0   :  { %30676 = vmatprep.subr.bf16.mxu0 %v31578_v45 }
0x3bd3   :  { %30678 = vmatpush3.bf16.msra.mxu0 %v30677_v12 }
0x3bd4   :  { %30679 = vmatprep.subr.bf16.mxu0 %v31578_v45 }
0x3bd7   :  { %30681 = vmatpush3.bf16.msra.mxu0 %v30680_v14 }
0x3bd8   :  { %30682 = vmatprep.subr.bf16.mxu0 %v31578_v45 }
0x3bdb   :  { %30684 = vmatpush3.bf16.msra.mxu0 %v30683_v28 }
0x3bdc   :  { %30685 = vmatprep.subr.bf16.mxu0 %v31578_v45 }
0x3bde   :  { %28819 = vmatmul.mubr.f32.vlgmr.msra.gmra.mrb[104].mxu0 %v25012_v29 }
0x3bdf   :  { %30687 = vmatpush3.bf16.msra.mxu0 %v30686_v7  ;;  %28837 = vmatprep.mubr.msk.f32.mxu0 %vm31579_vm6, %v36804_v34 }
0x3be0   :  { %30688 = vmatprep.subr.bf16.mxu0 %v31578_v45 }
0x3be3   :  { %30690 = vmatpush3.bf16.msra.mxu0 %v30689_v2 }
0x3be4   :  { %30691 = vmatprep.subr.bf16.mxu0 %v31578_v45 }
0x3be7   :  { %30693 = vmatpush3.bf16.msra.mxu0 %v30692_v51 }
0x3be8   :  { %30694 = vmatprep.subr.bf16.mxu0 %v31578_v45 }
0x3beb   :  { %30696 = vmatpush3.bf16.msra.mxu0 %v30695_v43 }
0x3bec   :  { %30697 = vmatprep.subr.bf16.mxu0 %v31578_v45 }
0x3bee   :  { %28838 = vmatmul.mubr.f32.vlgmr.msra.gmra.mrb[104].mxu0 %v25013_v44 }
0x3bef   :  { %30699 = vmatpush3.bf16.msra.mxu0 %v36209_v22  ;;  %28856 = vmatprep.mubr.msk.f32.mxu0 %vm31579_vm6, %v36804_v34 }
0x3bf0   :  { %30700 = vmatprep.subr.bf16.mxu0 %v31578_v45 }
0x3bf3   :  { %30702 = vmatpush3.bf16.msra.mxu0 %v36219_v40 }
0x3bf4   :  { %30703 = vmatprep.subr.bf16.mxu0 %v31578_v45 }
0x3bf7   :  { %30705 = vmatpush3.bf16.msra.mxu0 %v36243_v30 }
0x3bf8   :  { %30706 = vmatprep.subr.bf16.mxu0 %v31578_v45 }
0x3bfb   :  { %30708 = vmatpush3.bf16.msra.mxu0 %v36255_v20 }
0x3bfc   :  { %30709 = vmatprep.subr.bf16.mxu0 %v31578_v45 }
0x3bfe   :  { %28857 = vmatmul.mubr.f32.vlgmr.msra.gmra.mrb[104].mxu0 %v25014_v10 }
0x3bff   :  { %30711 = vmatpush3.bf16.msra.mxu0 %v30710_v55  ;;  %28875 = vmatprep.mubr.msk.f32.mxu0 %vm31579_vm6, %v36804_v34 }
0x3c00   :  { %30712 = vmatprep.subr.bf16.mxu0 %v31578_v45 }
0x3c03   :  { %30714 = vmatpush3.bf16.msra.mxu0 %v30713_v5 }
0x3c04   :  { %30715 = vmatprep.subr.bf16.mxu0 %v31578_v45 }
0x3c07   :  { %30717 = vmatpush3.bf16.msra.mxu0 %v30716_v58 }
0x3c08   :  { %30718 = vmatprep.subr.bf16.mxu0 %v31578_v45 }
0x3c0b   :  { %30720 = vmatpush3.bf16.msra.mxu0 %v30719_v52 }
0x3c0c   :  { %30721 = vmatprep.subr.bf16.mxu0 %v31578_v45 }
0x3c0e   :  { %28876 = vmatmul.mubr.f32.vlgmr.msra.gmra.mrb[104].mxu0 %v25012_v29 }
0x3c0f   :  { %30723 = vmatpush3.bf16.msra.mxu0 %v36209_v22  ;;  %28894 = vmatprep.mubr.msk.f32.mxu0 %vm31579_vm6, %v36804_v34 }
0x3c10   :  { %30724 = vmatprep.subr.bf16.mxu0 %v31578_v45 }
0x3c13   :  { %30726 = vmatpush3.bf16.msra.mxu0 %v36219_v40 }
0x3c14   :  { %30727 = vmatprep.subr.bf16.mxu0 %v31578_v45 }
0x3c17   :  { %30729 = vmatpush3.bf16.msra.mxu0 %v36243_v30 }
0x3c18   :  { %30730 = vmatprep.subr.bf16.mxu0 %v31578_v45 }
0x3c1b   :  { %30732 = vmatpush3.bf16.msra.mxu0 %v36255_v20 }
0x3c1e   :  { %28895 = vmatmul.mubr.f32.vlgmr.msra.gmra.mrb[104].mxu0 %v25012_v29 }
0x3cf1   :  { %v25472_v36 = vpop.f32.mrb[104].mxu0 }
0x3cf2   :  { %25476 = vst [vmem:[#allocation2] sm:$0x3] %v25472_v36  ;;  %v28896_v22 = vpop.f32.mrb[105].mxu0 }
0x3cf3   :  { %31557 = shalt.err (!%p31554_p4)
}
0x3cf4   :  { %s31558_s20 = scalar_lea.hbm %s36357_s17, 32 }
0x3cf5   :  { %p31559_p5 = scmp.ne.s32.totalorder %s36357_s17, %s31558_s20  ;;  %p31562_p6 = scmp.lt.u32.totalorder %s31558_s20, %s36357_s17 }
0x3cf7   :  { %p31564_p7 = pnand %p31562_p6, %p31559_p5 }
0x3cf9   :  { %31567 = shalt.err (!%p31564_p7)
}
0x3cfa   :  { %25486 = dma.vmem_to_hbm [thread:$0]  %s25484_s14, 32, %s36357_s17, [#allocation3]  }
0x3cfb   :  { %31568 = dma.done.wait [#allocation3], 32  }
0x3cfc   :  { %31569 = vsyncadd [#allocation3], 4294967264 }
0x3cfd   :  { %25490 = vsyncpa [#allocation3], 1 }

</bundles_post_ra>
